<compile_context>
chip_gen: v7x
topology: tpu7x:2x2x1
jax: 0.10.0
libtpu: 0.0.40
codegen_flags: <defaults>
</compile_context>

<pallas_src>
import functools
import numpy as np

import jax
import jax.numpy as jnp
from jax.experimental import pallas as pl
from jax.experimental.pallas import tpu as pltpu


def _round_up(x, m):
    return (x + m - 1) // m * m


_VMEM_LIMIT = 48 * 1024 * 1024  # > per-kernel need, < v7x 64 MiB physical VMEM

# Set by a runtime smoke test in __main__; if the direct 3x3 kernel cannot be
# lowered / validated on this Mosaic version, fall back to the im2col path.
_USE_DIRECT_CONV = True


# ----------------------------------------------------------------------------
# Pallas kernel 1: tiled MXU matmul with fused affine / residual / ReLU
# (used for 7x7 / strided / 1x1 convs and as the 3x3 fallback path)
# ----------------------------------------------------------------------------
def _matmul_affine_kernel(a_ref, b_ref, scale_ref, shift_ref, *rest, relu, has_res):
    if has_res:
        res_ref, o_ref, acc_ref = rest
    else:
        res_ref = None
        o_ref, acc_ref = rest

    k = pl.program_id(2)
    prod = jnp.dot(a_ref[...], b_ref[...], preferred_element_type=jnp.float32)

    @pl.when(k == 0)
    def _():
        acc_ref[...] = prod           # direct write: no zero-init pass

    @pl.when(k > 0)
    def _():
        acc_ref[...] += prod

    @pl.when(k == pl.num_programs(2) - 1)
    def _():
        y = acc_ref[...] * scale_ref[...] + shift_ref[...]
        if has_res:
            y = y + res_ref[...].astype(jnp.float32)
        if relu:
            y = jnp.maximum(y, 0.0)
        o_ref[...] = y.astype(o_ref.dtype)


def _maybe_pad2(x, r, c):
    R, C = x.shape
    if (R, C) == (r, c):
        return x
    return jnp.pad(x, ((0, r - R), (0, c - C)))


def _pick_tk(kp):
    for cand in (512, 256, 128):       # 384 dropped (half-utilized MXU pass)
        if kp % cand == 0:
            return cand
    return 128


def _pick_tn(n):
    if n % 128 != 0:
        return n                       # full (possibly narrow) lane block
    for cand in (512, 256, 128):
        if n % cand == 0:
            return cand
    return 128


def _pick_tm(m):
    # Prefer a divisor of M (no pad copy) that still leaves >=2 tiles (megacore).
    for cand in (512, 256, 128, 64, 32, 16, 8):
        if m % cand == 0 and m // cand >= 2:
            return cand
    for cand in (512, 256, 128, 64, 32, 16, 8):
        if m % cand == 0:
            return cand
    return min(512, _round_up(m, 8))


def matmul_scale_shift(a, b, scale, shift, residual=None, *, relu,
                       out_dtype=jnp.bfloat16):
    """relu?((a @ b) * scale + shift [+ residual]); bf16 MXU, f32 accumulation."""
    M, K = a.shape
    _, N = b.shape
    Kp = _round_up(K, 128)
    tk = _pick_tk(Kp)
    tn = _pick_tn(N)
    tm = _pick_tm(M)
    Mp = _round_up(M, tm)

    a_p = _maybe_pad2(a.astype(jnp.bfloat16), Mp, Kp)
    b_p = _maybe_pad2(b.astype(jnp.bfloat16), Kp, N)
    sc = scale.astype(jnp.float32).reshape(1, N)
    sh = shift.astype(jnp.float32).reshape(1, N)

    has_res = residual is not None
    in_specs = [
        pl.BlockSpec((tm, tk), lambda i, j, k: (i, k)),
        pl.BlockSpec((tk, tn), lambda i, j, k: (k, j)),
        pl.BlockSpec((1, tn), lambda i, j, k: (0, j)),
        pl.BlockSpec((1, tn), lambda i, j, k: (0, j)),
    ]
    operands = [a_p, b_p, sc, sh]
    if has_res:
        in_specs.append(pl.BlockSpec((tm, tn), lambda i, j, k: (i, j)))
        operands.append(_maybe_pad2(residual.astype(jnp.bfloat16), Mp, N))

    grid = (Mp // tm, N // tn, Kp // tk)
    out = pl.pallas_call(
        functools.partial(_matmul_affine_kernel, relu=relu, has_res=has_res),
        out_shape=jax.ShapeDtypeStruct((Mp, N), out_dtype),
        grid=grid,
        in_specs=in_specs,
        out_specs=pl.BlockSpec((tm, tn), lambda i, j, k: (i, j)),
        scratch_shapes=[pltpu.VMEM((tm, tn), jnp.float32)],
        compiler_params=pltpu.CompilerParams(
            dimension_semantics=("parallel", "parallel", "arbitrary"),
            vmem_limit_bytes=_VMEM_LIMIT),
    )(*operands)
    return out[:M] if Mp != M else out


# ----------------------------------------------------------------------------
# Pallas kernel 2: direct 3x3 stride-1 conv (no im2col), fused BN/residual/ReLU
# ----------------------------------------------------------------------------
def _conv3x3_kernel(x_ref, w_ref, scale_ref, shift_ref, *rest, d, wp, relu, has_res):
    # x_ref : (1, Fin, Cin)   flattened (rows-major over padded H,W) input tile
    # w_ref : (9, Cin, tn)    per-tap weights
    # o_ref : (1, Mf, tn)     Mf = ty * Wp flattened output rows (bf16/f32)
    if has_res:
        res_ref, o_ref = rest
    else:
        res_ref = None
        (o_ref,) = rest
    mf = o_ref.shape[1]
    acc = None
    for i in range(3):
        for j in range(3):
            off = i * d * wp + j * d          # constant flat offset of tap (i, j)
            a = x_ref[0, pl.ds(off, mf), :]   # (Mf, Cin) bf16
            p = jnp.dot(a, w_ref[3 * i + j], preferred_element_type=jnp.float32)
            acc = p if acc is None else acc + p
    y = acc * scale_ref[...] + shift_ref[...]
    if has_res:
        y = y + res_ref[0].astype(jnp.float32)
    if relu:
        y = jnp.maximum(y, 0.0)
    o_ref[0] = y.astype(o_ref.dtype)


def conv3x3_direct(x, w, scale, shift, *, dilation, relu, residual=None,
                   out_dtype=jnp.bfloat16):
    """3x3 conv, stride 1, padding == dilation, NHWC, without im2col."""
    N, H, W, Cin = x.shape
    Cout = w.shape[0]
    d = int(dilation)
    Wp = W + 2 * d

    # Output rows per tile so the input tile is ~<=3 MiB (bounded VMEM on v7x).
    rows_budget = max(1, (3 << 20) // (Wp * Cin * 2))
    ty = max(1, min(H, rows_budget - 2 * d))
    nrt = -(-H // ty)
    Ht = nrt * ty
    Mf = ty * Wp
    flat_rows = (ty + 2 * d) * Wp
    Fin = _round_up(flat_rows + 2 * d, 8)

    xh = x.astype(jnp.bfloat16)
    xp = jnp.pad(xh, ((0, 0), (d, Ht - H + d), (d, d), (0, 0)))  # (N, Ht+2d, Wp, Cin)
    if nrt == 1:
        tiles = xp[:, None]                                       # no halo copy needed
    else:
        idx = np.arange(nrt)[:, None] * ty + np.arange(ty + 2 * d)[None, :]
        tiles = xp[:, idx]                                        # overlapping row tiles
    a = tiles.reshape(N * nrt, flat_rows, Cin)
    a = jnp.pad(a, ((0, 0), (0, Fin - flat_rows), (0, 0)))

    w9 = jnp.transpose(w, (2, 3, 1, 0)).reshape(9, Cin, Cout).astype(jnp.bfloat16)
    sc = scale.astype(jnp.float32).reshape(1, Cout)
    sh = shift.astype(jnp.float32).reshape(1, Cout)

    tn = Cout if Cout <= 256 else 256
    n_ct = Cout // tn

    has_res = residual is not None
    in_specs = [
        pl.BlockSpec((1, Fin, Cin), lambda t, j: (t, 0, 0)),
        pl.BlockSpec((9, Cin, tn), lambda t, j: (0, 0, j)),
        pl.BlockSpec((1, tn), lambda t, j: (0, j)),
        pl.BlockSpec((1, tn), lambda t, j: (0, j)),
    ]
    operands = [a, w9, sc, sh]
    if has_res:
        r = jnp.pad(residual.astype(jnp.bfloat16),
                    ((0, 0), (0, Ht - H), (0, Wp - W), (0, 0)))
        r = r.reshape(N * nrt, Mf, Cout)
        in_specs.append(pl.BlockSpec((1, Mf, tn), lambda t, j: (t, 0, j)))
        operands.append(r)

    out = pl.pallas_call(
        functools.partial(_conv3x3_kernel, d=d, wp=Wp, relu=relu, has_res=has_res),
        out_shape=jax.ShapeDtypeStruct((N * nrt, Mf, Cout), out_dtype),
        grid=(N * nrt, n_ct),
        in_specs=in_specs,
        out_specs=pl.BlockSpec((1, Mf, tn), lambda t, j: (t, 0, j)),
        compiler_params=pltpu.CompilerParams(
            dimension_semantics=("parallel", "parallel"),
            vmem_limit_bytes=_VMEM_LIMIT),
    )(*operands)

    out = out.reshape(N, Ht, Wp, Cout)[:, :H, :W, :]
    return out


# ----------------------------------------------------------------------------
# Pallas kernel 3: blocked elementwise add (branch fusion at H/8 resolution)
# ----------------------------------------------------------------------------
def _add_kernel(x_ref, y_ref, o_ref):
    o_ref[...] = x_ref[...] + y_ref[...]


def pallas_add(x, y):
    shape = x.shape
    total = int(np.prod(shape))
    lane = 1024
    rows = -(-total // lane)
    tr = min(512, _round_up(rows, 8))
    R = _round_up(rows, tr)
    padded = R * lane
    x2 = jnp.pad(x.reshape(-1), (0, padded - total)).reshape(R, lane)
    y2 = jnp.pad(y.reshape(-1), (0, padded - total)).reshape(R, lane)
    out = pl.pallas_call(
        _add_kernel,
        out_shape=jax.ShapeDtypeStruct((R, lane), x.dtype),
        grid=(R // tr,),
        in_specs=[pl.BlockSpec((tr, lane), lambda i: (i, 0)),
                  pl.BlockSpec((tr, lane), lambda i: (i, 0))],
        out_specs=pl.BlockSpec((tr, lane), lambda i: (i, 0)),
        compiler_params=pltpu.CompilerParams(
            dimension_semantics=("parallel",), vmem_limit_bytes=_VMEM_LIMIT),
    )(x2, y2)
    return out.reshape(-1)[:total].reshape(shape)


# ----------------------------------------------------------------------------
# Convolution wrappers
# ----------------------------------------------------------------------------
def _im2col(x, kh, kw, stride, dilation, padding):
    # TODO(synk): patch extraction for the few strided / 7x7 convs stays in XLA
    #             glue (bf16); all 3x3 stride-1 convs use the direct kernel.
    N, H, W, C = x.shape
    xp = jnp.pad(x, ((0, 0), (padding, padding), (padding, padding), (0, 0)))
    oh = (H + 2 * padding - (dilation * (kh - 1) + 1)) // stride + 1
    ow = (W + 2 * padding - (dilation * (kw - 1) + 1)) // stride + 1
    cols = []
    for i in range(kh):
        for j in range(kw):
            hs, ws = i * dilation, j * dilation
            patch = xp[:, hs:hs + (oh - 1) * stride + 1:stride,
                       ws:ws + (ow - 1) * stride + 1:stride, :]
            cols.append(patch)
    stacked = jnp.stack(cols, axis=-1)                 # (N, oh, ow, C, kh*kw)
    return stacked.reshape(N * oh * ow, C * kh * kw), oh, ow


def conv2d_nhwc(x, w, scale, shift, *, stride, dilation, padding, relu,
                residual=None, out_dtype=jnp.bfloat16):
    """General conv (im2col + Pallas matmul).  x NHWC, w (Cout,Cin,kh,kw)."""
    cout, cin, kh, kw = w.shape
    N, H, W, C = x.shape
    assert C == cin
    xh = x.astype(jnp.bfloat16)
    if kh == 1 and kw == 1 and padding == 0:
        xs = xh[:, ::stride, ::stride, :]
        oh, ow = xs.shape[1], xs.shape[2]
        patches = xs.reshape(N * oh * ow, cin)
    else:
        patches, oh, ow = _im2col(xh, kh, kw, stride, dilation, padding)
    w2 = jnp.transpose(w, (1, 2, 3, 0)).reshape(cin * kh * kw, cout).astype(jnp.bfloat16)
    res2 = None
    if residual is not None:
        res2 = residual.reshape(N * oh * ow, cout)
    out = matmul_scale_shift(patches, w2, scale, shift, res2, relu=relu,
                             out_dtype=out_dtype)
    return out.reshape(N, oh, ow, cout)


def conv3x3_s1(x, w, scale, shift, *, dilation, relu, residual=None):
    if _USE_DIRECT_CONV:
        return conv3x3_direct(x, w, scale, shift, dilation=dilation, relu=relu,
                              residual=residual)
    return conv2d_nhwc(x, w, scale, shift, stride=1, dilation=dilation,
                       padding=dilation, relu=relu, residual=residual)


def fold_affine(cout, bias=None, bn=None, eps=1e-5):
    """Fold (optional conv bias) + (optional eval-mode BN) into scale/shift."""
    scale = jnp.ones((cout,), jnp.float32)
    shift = bias.astype(jnp.float32) if bias is not None else jnp.zeros((cout,), jnp.float32)
    if bn is not None:
        gamma, beta, mean, var = bn
        s = gamma / jnp.sqrt(var + eps)
        shift = (shift - mean) * s + beta
        scale = scale * s
    return scale, shift


def maxpool_3x3_s2_p1(x):
    # TODO(synk): max-pool kept in plain JAX glue (tiny vs. the conv stack).
    return jax.lax.reduce_window(
        x, jnp.array(-jnp.inf, x.dtype), jax.lax.max,
        window_dimensions=(1, 3, 3, 1),
        window_strides=(1, 2, 2, 1),
        padding=((0, 0), (1, 1), (1, 1), (0, 0)))


# ----------------------------------------------------------------------------
# ResNet34-8s (fully convolutional, output_stride=8) forward
# ----------------------------------------------------------------------------
# (planes, num_blocks, stride, dilation) for output_stride = 8
LAYER_CFG = [(64, 3, 1, 1), (128, 4, 2, 1), (256, 6, 1, 2), (512, 3, 1, 4)]


def basic_block(x, blk, stride, dilation):
    planes = blk['conv1_w'].shape[0]
    if 'down_w' in blk:
        sd, shd = fold_affine(planes, bn=blk['down_bn'])
        identity = conv2d_nhwc(x, blk['down_w'], sd, shd, stride=stride,
                               dilation=1, padding=0, relu=False)
    else:
        identity = x
    s1, sh1 = fold_affine(planes, bn=blk['bn1'])
    if stride == 1:
        out = conv3x3_s1(x, blk['conv1_w'], s1, sh1, dilation=dilation, relu=True)
    else:
        out = conv2d_nhwc(x, blk['conv1_w'], s1, sh1, stride=stride,
                          dilation=dilation, padding=dilation, relu=True)
    s2, sh2 = fold_affine(planes, bn=blk['bn2'])
    # conv2 + BN2 + residual add + ReLU fused in a single Pallas kernel epilogue
    out = conv3x3_s1(out, blk['conv2_w'], s2, sh2, dilation=1, relu=True,
                     residual=identity)
    return out


def resnet34_8s_forward(x_nchw, p):
    x = jnp.transpose(x_nchw, (0, 2, 3, 1)).astype(jnp.bfloat16)   # NCHW -> NHWC
    s, sh = fold_affine(64, bias=p['conv1_b'], bn=p['bn1'])
    x = conv2d_nhwc(x, p['conv1_w'], s, sh, stride=2, dilation=1, padding=3, relu=True)
    x = maxpool_3x3_s2_p1(x)
    for (planes, blocks, stride, dilation), layer_params in zip(LAYER_CFG, p['layers']):
        for bi, blk in enumerate(layer_params):
            bstride = stride if bi == 0 else 1
            x = basic_block(x, blk, bstride, dilation)
    num_classes = p['fc_w'].shape[0]
    s, sh = fold_affine(num_classes, bias=p['fc_b'], bn=None)
    x = conv2d_nhwc(x, p['fc_w'], s, sh, stride=1, dilation=1, padding=0,
                    relu=False, out_dtype=jnp.float32)
    return jnp.transpose(x, (0, 3, 1, 2))                           # back to NCHW


# ----------------------------------------------------------------------------
# Bilinear upsampling (align_corners=True == torch upsample_bilinear)
# ----------------------------------------------------------------------------
def _bilinear_matrix(out_size, in_size):
    if in_size == 1:
        return jnp.ones((out_size, 1), jnp.float32)
    if out_size == 1:
        src = jnp.zeros((1,), jnp.float32)
    else:
        src = jnp.arange(out_size, dtype=jnp.float32) * ((in_size - 1) / (out_size - 1))
    i0 = jnp.clip(jnp.floor(src).astype(jnp.int32), 0, in_size - 1)
    i1 = jnp.clip(i0 + 1, 0, in_size - 1)
    w1 = src - i0.astype(jnp.float32)
    w0 = 1.0 - w1
    return (jax.nn.one_hot(i0, in_size, dtype=jnp.float32) * w0[:, None]
            + jax.nn.one_hot(i1, in_size, dtype=jnp.float32) * w1[:, None])


def bilinear_upsample_nchw(x, out_h, out_w):
    # TODO(synk): bilinear upsample kept as plain-JAX einsum glue (tiny vs. convs).
    Ah = _bilinear_matrix(out_h, x.shape[2])
    Aw = _bilinear_matrix(out_w, x.shape[3])
    y = jnp.einsum('Hh,nchw->ncHw', Ah, x)
    y = jnp.einsum('Ww,ncHw->ncHW', Aw, y)
    return y


# ----------------------------------------------------------------------------
# Resnet34_8s_fuse.forward
# ----------------------------------------------------------------------------
def resnet34_8s_fuse_forward(rgb, depth, params_rgb, params_depth,
                             feature_alignment=False):
    # TODO(synk): feature_alignment=True resize path not implemented; the
    #             default forward (feature_alignment=False) is matched.
    assert not feature_alignment
    H, W = rgb.shape[2], rgb.shape[3]
    rgb_pre = resnet34_8s_forward(rgb, params_rgb)       # (N, C, H/8, W/8)
    depth_pre = resnet34_8s_forward(depth, params_depth)
    # Bilinear interpolation is linear -> add at H/8 and upsample once
    # (identical result to upsample(rgb_pre) + upsample(depth_pre)).
    pre = pallas_add(rgb_pre, depth_pre)
    return bilinear_upsample_nchw(pre, H, W)


# ----------------------------------------------------------------------------
# Parameter construction (deterministic, synthetic — no checkpoint load)
# ----------------------------------------------------------------------------
class ParamGen:
    def __init__(self, seed=0):
        self.key = jax.random.PRNGKey(seed)
        self.count = 0

    def _next(self):
        self.count += 1
        return jax.random.fold_in(self.key, self.count)

    def conv(self, cout, cin, kh, kw):
        fan_in = cin * kh * kw
        return jax.random.normal(self._next(), (cout, cin, kh, kw), jnp.float32) / np.sqrt(fan_in)

    def bias(self, c):
        return 0.01 * jax.random.normal(self._next(), (c,), jnp.float32)

    def bn(self, c):
        gamma = 1.0 + 0.1 * jax.random.normal(self._next(), (c,), jnp.float32)
        beta = 0.05 * jax.random.normal(self._next(), (c,), jnp.float32)
        mean = 0.05 * jax.random.normal(self._next(), (c,), jnp.float32)
        var = 1.0 + 0.1 * jax.random.uniform(self._next(), (c,), jnp.float32)
        return gamma, beta, mean, var


def make_resnet34_8s_params(pg, in_ch, conv1_bias, num_classes):
    p = {
        'conv1_w': pg.conv(64, in_ch, 7, 7),
        'conv1_b': pg.bias(64) if conv1_bias else None,
        'bn1': pg.bn(64),
    }
    inplanes = 64
    layers = []
    for planes, blocks, stride, dilation in LAYER_CFG:
        blist = []
        for bi in range(blocks):
            bstride = stride if bi == 0 else 1
            blk = {
                'conv1_w': pg.conv(planes, inplanes, 3, 3),
                'bn1': pg.bn(planes),
                'conv2_w': pg.conv(planes, planes, 3, 3),
                'bn2': pg.bn(planes),
            }
            if bi == 0 and (bstride != 1 or inplanes != planes):
                blk['down_w'] = pg.conv(planes, inplanes, 1, 1)
                blk['down_bn'] = pg.bn(planes)
            blist.append(blk)
            inplanes = planes
        layers.append(blist)
    p['layers'] = layers
    # fc: _normal_initialization -> weight ~ N(0, 0.01), bias = 0
    p['fc_w'] = 0.01 * jax.random.normal(pg._next(), (num_classes, 512, 1, 1), jnp.float32)
    p['fc_b'] = jnp.zeros((num_classes,), jnp.float32)
    return p


# ----------------------------------------------------------------------------
# Direct-conv smoke test (validates the no-im2col kernel; else fall back)
# ----------------------------------------------------------------------------
def _direct_conv_smoke_test():
    try:
        for d, (h, w) in ((1, (10, 9)), (2, (9, 7))):
            k = jax.random.PRNGKey(100 + d)
            x = jax.random.normal(k, (1, h, w, 64), jnp.float32)
            wt = 0.05 * jax.random.normal(jax.random.fold_in(k, 1), (64, 64, 3, 3), jnp.float32)
            scale = jnp.full((64,), 1.5, jnp.float32)
            shift = jnp.full((64,), 0.25, jnp.float32)
            out = conv3x3_direct(x, wt, scale, shift, dilation=d, relu=True,
                                 out_dtype=jnp.float32)
            ref = jax.lax.conv_general_dilated(
                x, wt, window_strides=(1, 1), padding=((d, d), (d, d)),
                rhs_dilation=(d, d), dimension_numbers=('NHWC', 'OIHW', 'NHWC'))
            ref = jnp.maximum(ref * scale + shift, 0.0)
            out = jax.block_until_ready(out)
            if not bool(jnp.all(jnp.isfinite(out))):
                return False
            if float(jnp.max(jnp.abs(out - ref))) > 0.25:   # bf16 tolerance
                return False
        return True
    except Exception:
        return False


if __name__ == "__main__":
    _USE_DIRECT_CONV = _direct_conv_smoke_test()

    key = jax.random.PRNGKey(0)
    k_rgb, k_depth = jax.random.split(key)

    N, H, W = 2, 32, 32
    num_classes = 16  # small synthetic num_classes (ctor arg; default 1000)

    rgb = jax.random.normal(k_rgb, (N, 3, H, W), jnp.float32)
    depth = jax.random.normal(k_depth, (N, 1, H, W), jnp.float32)

    pg = ParamGen(0)
    params_rgb = make_resnet34_8s_params(pg, in_ch=3, conv1_bias=False,
                                         num_classes=num_classes)
    # depth branch: conv1 = nn.Conv2d(1, 64, 7, stride=2, padding=3) -> has bias
    params_depth = make_resnet34_8s_params(pg, in_ch=1, conv1_bias=True,
                                           num_classes=num_classes)

    fused = jax.jit(resnet34_8s_fuse_forward)
    out = fused(rgb, depth, params_rgb, params_depth)
    out = jax.block_until_ready(out)
    assert out.shape == (N, num_classes, H, W), out.shape
    assert out.dtype == jnp.float32
    assert bool(jnp.all(jnp.isfinite(out)))
    print("KERNEL_OK")
</pallas_src>

<mosaic_0001>
module attributes {stable_mosaic.version = 11 : i64} {
  func.func @_conv3x3_kernel(%arg0: i32, %arg1: i32, %arg2: memref<1x136x64xbf16, #tpu.memory_space<vmem>>, %arg3: memref<9x64x64xbf16, #tpu.memory_space<vmem>>, %arg4: memref<1x64xf32, #tpu.memory_space<vmem>>, %arg5: memref<1x64xf32, #tpu.memory_space<vmem>>, %arg6: memref<1x110x64xf32, #tpu.memory_space<vmem>>) attributes {dimension_semantics = [#tpu.dimension_semantics<parallel>, #tpu.dimension_semantics<parallel>], iteration_bounds = array<i64: 1, 1>, scalar_prefetch = 0 : i64, scratch_operands = 0 : i64, tpu.core_type = #tpu.core_type<tc>, window_params = [{transform_indices = @transform_0, window_bounds = array<i64: 1, 136, 64>}, {transform_indices = @transform_1, window_bounds = array<i64: 9, 64, 64>}, {transform_indices = @transform_2, window_bounds = array<i64: 1, 64>}, {transform_indices = @transform_3, window_bounds = array<i64: 1, 64>}, {transform_indices = @transform_4, window_bounds = array<i64: 1, 110, 64>}]} {
    %c0 = arith.constant 0 : index
    %c0_0 = arith.constant 0 : index
    %c0_1 = arith.constant 0 : index
    %0 = vector.load %arg2[%c0, %c0_0, %c0_1] : memref<1x136x64xbf16, #tpu.memory_space<vmem>>, vector<1x110x64xbf16>
    %1 = vector.shape_cast %0 : vector<1x110x64xbf16> to vector<110x64xbf16>
    %c0_2 = arith.constant 0 : index
    %c0_3 = arith.constant 0 : index
    %c0_4 = arith.constant 0 : index
    %2 = vector.load %arg3[%c0_2, %c0_3, %c0_4] : memref<9x64x64xbf16, #tpu.memory_space<vmem>>, vector<1x64x64xbf16>
    %3 = vector.shape_cast %2 : vector<1x64x64xbf16> to vector<64x64xbf16>
    %cst = arith.constant dense<0.000000e+00> : vector<110x64xf32>
    %4 = tpu.matmul %1, %3, %cst {dimension_numbers = #tpu.dot_dimension_numbers<[1], [0], [0], [1], [0, 0, 1, 1], [], []>} : vector<110x64xbf16>, vector<64x64xbf16>, vector<110x64xf32> -> vector<110x64xf32>
    %c0_5 = arith.constant 0 : index
    %c1 = arith.constant 1 : index
    %c0_6 = arith.constant 0 : index
    %5 = vector.load %arg2[%c0_5, %c1, %c0_6] : memref<1x136x64xbf16, #tpu.memory_space<vmem>>, vector<1x110x64xbf16>
    %6 = vector.shape_cast %5 : vector<1x110x64xbf16> to vector<110x64xbf16>
    %c1_7 = arith.constant 1 : index
    %c0_8 = arith.constant 0 : index
    %c0_9 = arith.constant 0 : index
    %7 = vector.load %arg3[%c1_7, %c0_8, %c0_9] : memref<9x64x64xbf16, #tpu.memory_space<vmem>>, vector<1x64x64xbf16>
    %8 = vector.shape_cast %7 : vector<1x64x64xbf16> to vector<64x64xbf16>
    %cst_10 = arith.constant dense<0.000000e+00> : vector<110x64xf32>
    %9 = tpu.matmul %6, %8, %cst_10 {dimension_numbers = #tpu.dot_dimension_numbers<[1], [0], [0], [1], [0, 0, 1, 1], [], []>} : vector<110x64xbf16>, vector<64x64xbf16>, vector<110x64xf32> -> vector<110x64xf32>
    %10 = arith.addf %4, %9 : vector<110x64xf32>
    %c0_11 = arith.constant 0 : index
    %c2 = arith.constant 2 : index
    %c0_12 = arith.constant 0 : index
    %11 = vector.load %arg2[%c0_11, %c2, %c0_12] : memref<1x136x64xbf16, #tpu.memory_space<vmem>>, vector<1x110x64xbf16>
    %12 = vector.shape_cast %11 : vector<1x110x64xbf16> to vector<110x64xbf16>
    %c2_13 = arith.constant 2 : index
    %c0_14 = arith.constant 0 : index
    %c0_15 = arith.constant 0 : index
    %13 = vector.load %arg3[%c2_13, %c0_14, %c0_15] : memref<9x64x64xbf16, #tpu.memory_space<vmem>>, vector<1x64x64xbf16>
    %14 = vector.shape_cast %13 : vector<1x64x64xbf16> to vector<64x64xbf16>
    %cst_16 = arith.constant dense<0.000000e+00> : vector<110x64xf32>
    %15 = tpu.matmul %12, %14, %cst_16 {dimension_numbers = #tpu.dot_dimension_numbers<[1], [0], [0], [1], [0, 0, 1, 1], [], []>} : vector<110x64xbf16>, vector<64x64xbf16>, vector<110x64xf32> -> vector<110x64xf32>
    %16 = arith.addf %10, %15 : vector<110x64xf32>
    %c0_17 = arith.constant 0 : index
    %c11 = arith.constant 11 : index
    %c0_18 = arith.constant 0 : index
    %17 = vector.load %arg2[%c0_17, %c11, %c0_18] : memref<1x136x64xbf16, #tpu.memory_space<vmem>>, vector<1x110x64xbf16>
    %18 = vector.shape_cast %17 : vector<1x110x64xbf16> to vector<110x64xbf16>
    %c3 = arith.constant 3 : index
    %c0_19 = arith.constant 0 : index
    %c0_20 = arith.constant 0 : index
    %19 = vector.load %arg3[%c3, %c0_19, %c0_20] : memref<9x64x64xbf16, #tpu.memory_space<vmem>>, vector<1x64x64xbf16>
    %20 = vector.shape_cast %19 : vector<1x64x64xbf16> to vector<64x64xbf16>
    %cst_21 = arith.constant dense<0.000000e+00> : vector<110x64xf32>
    %21 = tpu.matmul %18, %20, %cst_21 {dimension_numbers = #tpu.dot_dimension_numbers<[1], [0], [0], [1], [0, 0, 1, 1], [], []>} : vector<110x64xbf16>, vector<64x64xbf16>, vector<110x64xf32> -> vector<110x64xf32>
    %22 = arith.addf %16, %21 : vector<110x64xf32>
    %c0_22 = arith.constant 0 : index
    %c12 = arith.constant 12 : index
    %c0_23 = arith.constant 0 : index
    %23 = vector.load %arg2[%c0_22, %c12, %c0_23] : memref<1x136x64xbf16, #tpu.memory_space<vmem>>, vector<1x110x64xbf16>
    %24 = vector.shape_cast %23 : vector<1x110x64xbf16> to vector<110x64xbf16>
    %c4 = arith.constant 4 : index
    %c0_24 = arith.constant 0 : index
    %c0_25 = arith.constant 0 : index
    %25 = vector.load %arg3[%c4, %c0_24, %c0_25] : memref<9x64x64xbf16, #tpu.memory_space<vmem>>, vector<1x64x64xbf16>
    %26 = vector.shape_cast %25 : vector<1x64x64xbf16> to vector<64x64xbf16>
    %cst_26 = arith.constant dense<0.000000e+00> : vector<110x64xf32>
    %27 = tpu.matmul %24, %26, %cst_26 {dimension_numbers = #tpu.dot_dimension_numbers<[1], [0], [0], [1], [0, 0, 1, 1], [], []>} : vector<110x64xbf16>, vector<64x64xbf16>, vector<110x64xf32> -> vector<110x64xf32>
    %28 = arith.addf %22, %27 : vector<110x64xf32>
    %c0_27 = arith.constant 0 : index
    %c13 = arith.constant 13 : index
    %c0_28 = arith.constant 0 : index
    %29 = vector.load %arg2[%c0_27, %c13, %c0_28] : memref<1x136x64xbf16, #tpu.memory_space<vmem>>, vector<1x110x64xbf16>
    %30 = vector.shape_cast %29 : vector<1x110x64xbf16> to vector<110x64xbf16>
    %c5 = arith.constant 5 : index
    %c0_29 = arith.constant 0 : index
    %c0_30 = arith.constant 0 : index
    %31 = vector.load %arg3[%c5, %c0_29, %c0_30] : memref<9x64x64xbf16, #tpu.memory_space<vmem>>, vector<1x64x64xbf16>
    %32 = vector.shape_cast %31 : vector<1x64x64xbf16> to vector<64x64xbf16>
    %cst_31 = arith.constant dense<0.000000e+00> : vector<110x64xf32>
    %33 = tpu.matmul %30, %32, %cst_31 {dimension_numbers = #tpu.dot_dimension_numbers<[1], [0], [0], [1], [0, 0, 1, 1], [], []>} : vector<110x64xbf16>, vector<64x64xbf16>, vector<110x64xf32> -> vector<110x64xf32>
    %34 = arith.addf %28, %33 : vector<110x64xf32>
    %c0_32 = arith.constant 0 : index
    %c22 = arith.constant 22 : index
    %c0_33 = arith.constant 0 : index
    %35 = vector.load %arg2[%c0_32, %c22, %c0_33] : memref<1x136x64xbf16, #tpu.memory_space<vmem>>, vector<1x110x64xbf16>
    %36 = vector.shape_cast %35 : vector<1x110x64xbf16> to vector<110x64xbf16>
    %c6 = arith.constant 6 : index
    %c0_34 = arith.constant 0 : index
    %c0_35 = arith.constant 0 : index
    %37 = vector.load %arg3[%c6, %c0_34, %c0_35] : memref<9x64x64xbf16, #tpu.memory_space<vmem>>, vector<1x64x64xbf16>
    %38 = vector.shape_cast %37 : vector<1x64x64xbf16> to vector<64x64xbf16>
    %cst_36 = arith.constant dense<0.000000e+00> : vector<110x64xf32>
    %39 = tpu.matmul %36, %38, %cst_36 {dimension_numbers = #tpu.dot_dimension_numbers<[1], [0], [0], [1], [0, 0, 1, 1], [], []>} : vector<110x64xbf16>, vector<64x64xbf16>, vector<110x64xf32> -> vector<110x64xf32>
    %40 = arith.addf %34, %39 : vector<110x64xf32>
    %c0_37 = arith.constant 0 : index
    %c23 = arith.constant 23 : index
    %c0_38 = arith.constant 0 : index
    %41 = vector.load %arg2[%c0_37, %c23, %c0_38] : memref<1x136x64xbf16, #tpu.memory_space<vmem>>, vector<1x110x64xbf16>
    %42 = vector.shape_cast %41 : vector<1x110x64xbf16> to vector<110x64xbf16>
    %c7 = arith.constant 7 : index
    %c0_39 = arith.constant 0 : index
    %c0_40 = arith.constant 0 : index
    %43 = vector.load %arg3[%c7, %c0_39, %c0_40] : memref<9x64x64xbf16, #tpu.memory_space<vmem>>, vector<1x64x64xbf16>
    %44 = vector.shape_cast %43 : vector<1x64x64xbf16> to vector<64x64xbf16>
    %cst_41 = arith.constant dense<0.000000e+00> : vector<110x64xf32>
    %45 = tpu.matmul %42, %44, %cst_41 {dimension_numbers = #tpu.dot_dimension_numbers<[1], [0], [0], [1], [0, 0, 1, 1], [], []>} : vector<110x64xbf16>, vector<64x64xbf16>, vector<110x64xf32> -> vector<110x64xf32>
    %46 = arith.addf %40, %45 : vector<110x64xf32>
    %c0_42 = arith.constant 0 : index
    %c24 = arith.constant 24 : index
    %c0_43 = arith.constant 0 : index
    %47 = vector.load %arg2[%c0_42, %c24, %c0_43] : memref<1x136x64xbf16, #tpu.memory_space<vmem>>, vector<1x110x64xbf16>
    %48 = vector.shape_cast %47 : vector<1x110x64xbf16> to vector<110x64xbf16>
    %c8 = arith.constant 8 : index
    %c0_44 = arith.constant 0 : index
    %c0_45 = arith.constant 0 : index
    %49 = vector.load %arg3[%c8, %c0_44, %c0_45] : memref<9x64x64xbf16, #tpu.memory_space<vmem>>, vector<1x64x64xbf16>
    %50 = vector.shape_cast %49 : vector<1x64x64xbf16> to vector<64x64xbf16>
    %cst_46 = arith.constant dense<0.000000e+00> : vector<110x64xf32>
    %51 = tpu.matmul %48, %50, %cst_46 {dimension_numbers = #tpu.dot_dimension_numbers<[1], [0], [0], [1], [0, 0, 1, 1], [], []>} : vector<110x64xbf16>, vector<64x64xbf16>, vector<110x64xf32> -> vector<110x64xf32>
    %52 = arith.addf %46, %51 : vector<110x64xf32>
    %c0_47 = arith.constant 0 : index
    %c0_48 = arith.constant 0 : index
    %53 = vector.load %arg4[%c0_47, %c0_48] : memref<1x64xf32, #tpu.memory_space<vmem>>, vector<1x64xf32>
    %54 = vector.broadcast %53 : vector<1x64xf32> to vector<110x64xf32>
    %55 = arith.mulf %52, %54 : vector<110x64xf32>
    %c0_49 = arith.constant 0 : index
    %c0_50 = arith.constant 0 : index
    %56 = vector.load %arg5[%c0_49, %c0_50] : memref<1x64xf32, #tpu.memory_space<vmem>>, vector<1x64xf32>
    %57 = vector.broadcast %56 : vector<1x64xf32> to vector<110x64xf32>
    %58 = arith.addf %55, %57 : vector<110x64xf32>
    %cst_51 = arith.constant 0.000000e+00 : f32
    %59 = vector.broadcast %cst_51 : f32 to vector<110x64xf32>
    %60 = arith.maximumf %58, %59 : vector<110x64xf32>
    %c0_52 = arith.constant 0 : index
    %c0_53 = arith.constant 0 : index
    %c0_54 = arith.constant 0 : index
    %61 = vector.load %arg6[%c0_52, %c0_53, %c0_54] : memref<1x110x64xf32, #tpu.memory_space<vmem>>, vector<1x110x64xf32>
    %62 = vector.shape_cast %61 : vector<1x110x64xf32> to vector<110x64xf32>
    %63 = vector.shape_cast %60 : vector<110x64xf32> to vector<1x110x64xf32>
    tpu.vector_store %arg6[%c0_52, %c0_53, %c0_54], %63 {strides = array<i32>} : memref<1x110x64xf32, #tpu.memory_space<vmem>>, vector<1x110x64xf32>,
    return
  }
  func.func @transform_0(%arg0: i32, %arg1: i32) -> (i32, i32, i32) {
    %c0_i32 = arith.constant 0 : i32
    %c0_i32_0 = arith.constant 0 : i32
    %c0_i32_1 = arith.constant 0 : i32
    return %arg0, %c0_i32, %c0_i32_0 : i32, i32, i32
  }
  func.func @transform_1(%arg0: i32, %arg1: i32) -> (i32, i32, i32) {
    %c0_i32 = arith.constant 0 : i32
    %c0_i32_0 = arith.constant 0 : i32
    %c0_i32_1 = arith.constant 0 : i32
    return %c0_i32, %c0_i32_0, %arg1 : i32, i32, i32
  }
  func.func @transform_2(%arg0: i32, %arg1: i32) -> (i32, i32) {
    %c0_i32 = arith.constant 0 : i32
    %c0_i32_0 = arith.constant 0 : i32
    return %c0_i32, %arg1 : i32, i32
  }
  func.func @transform_3(%arg0: i32, %arg1: i32) -> (i32, i32) {
    %c0_i32 = arith.constant 0 : i32
    %c0_i32_0 = arith.constant 0 : i32
    return %c0_i32, %arg1 : i32, i32
  }
  func.func @transform_4(%arg0: i32, %arg1: i32) -> (i32, i32, i32) {
    %c0_i32 = arith.constant 0 : i32
    %c0_i32_0 = arith.constant 0 : i32
    return %arg0, %c0_i32, %arg1 : i32, i32, i32
  }
}

module attributes {stable_mosaic.version = 11 : i64} {
  func.func @_matmul_affine_kernel(%arg0: i32, %arg1: i32, %arg2: i32, %arg3: memref<256x256xbf16, #tpu.memory_space<vmem>>, %arg4: memref<256x64xbf16, #tpu.memory_space<vmem>>, %arg5: memref<1x64xf32, #tpu.memory_space<vmem>>, %arg6: memref<1x64xf32, #tpu.memory_space<vmem>>, %arg7: memref<256x64xbf16, #tpu.memory_space<vmem>>, %arg8: memref<256x64xf32, #tpu.memory_space<vmem>>) attributes {dimension_semantics = [#tpu.dimension_semantics<parallel>, #tpu.dimension_semantics<parallel>, #tpu.dimension_semantics<arbitrary>], iteration_bounds = array<i64: 2, 1, 1>, scalar_prefetch = 0 : i64, scratch_operands = 1 : i64, tpu.core_type = #tpu.core_type<tc>, window_params = [{transform_indices = @transform_0, window_bounds = array<i64: 256, 256>}, {transform_indices = @transform_1, window_bounds = array<i64: 256, 64>}, {transform_indices = @transform_2, window_bounds = array<i64: 1, 64>}, {transform_indices = @transform_3, window_bounds = array<i64: 1, 64>}, {transform_indices = @transform_4, window_bounds = array<i64: 256, 64>}]} {
    %c0 = arith.constant 0 : index
    %c0_0 = arith.constant 0 : index
    %0 = vector.load %arg3[%c0, %c0_0] : memref<256x256xbf16, #tpu.memory_space<vmem>>, vector<256x256xbf16>
    %c0_1 = arith.constant 0 : index
    %c0_2 = arith.constant 0 : index
    %1 = vector.load %arg4[%c0_1, %c0_2] : memref<256x64xbf16, #tpu.memory_space<vmem>>, vector<256x64xbf16>
    %cst = arith.constant dense<0.000000e+00> : vector<256x64xf32>
    %2 = tpu.matmul %0, %1, %cst {dimension_numbers = #tpu.dot_dimension_numbers<[1], [0], [0], [1], [0, 0, 1, 1], [], []>} : vector<256x256xbf16>, vector<256x64xbf16>, vector<256x64xf32> -> vector<256x64xf32>
    %c0_i32 = arith.constant 0 : i32
    %3 = arith.cmpi eq, %arg2, %c0_i32 : i32
    %4 = arith.extui %3 : i1 to i32
    %c0_i32_3 = arith.constant 0 : i32
    %5 = arith.cmpi ne, %4, %c0_i32_3 : i32
    scf.if %5 {
      %c0_8 = arith.constant 0 : index
      %c0_9 = arith.constant 0 : index
      %12 = vector.load %arg8[%c0_8, %c0_9] : memref<256x64xf32, #tpu.memory_space<vmem>>, vector<256x64xf32>
      tpu.vector_store %arg8[%c0_8, %c0_9], %2 {strides = array<i32>} : memref<256x64xf32, #tpu.memory_space<vmem>>, vector<256x64xf32>,
    } else {
    }
    %c0_i32_4 = arith.constant 0 : i32
    %6 = arith.cmpi sgt, %arg2, %c0_i32_4 : i32
    %7 = arith.extui %6 : i1 to i32
    %c0_i32_5 = arith.constant 0 : i32
    %8 = arith.cmpi ne, %7, %c0_i32_5 : i32
    scf.if %8 {
      %c0_8 = arith.constant 0 : index
      %c0_9 = arith.constant 0 : index
      %12 = vector.load %arg8[%c0_8, %c0_9] : memref<256x64xf32, #tpu.memory_space<vmem>>, vector<256x64xf32>
      %13 = arith.addf %12, %2 : vector<256x64xf32>
      %c0_10 = arith.constant 0 : index
      %c0_11 = arith.constant 0 : index
      %14 = vector.load %arg8[%c0_10, %c0_11] : memref<256x64xf32, #tpu.memory_space<vmem>>, vector<256x64xf32>
      tpu.vector_store %arg8[%c0_10, %c0_11], %13 {strides = array<i32>} : memref<256x64xf32, #tpu.memory_space<vmem>>, vector<256x64xf32>,
    } else {
    }
    %c0_i32_6 = arith.constant 0 : i32
    %9 = arith.cmpi eq, %arg2, %c0_i32_6 : i32
    %10 = arith.extui %9 : i1 to i32
    %c0_i32_7 = arith.constant 0 : i32
    %11 = arith.cmpi ne, %10, %c0_i32_7 : i32
    scf.if %11 {
      %c0_8 = arith.constant 0 : index
      %c0_9 = arith.constant 0 : index
      %12 = vector.load %arg8[%c0_8, %c0_9] : memref<256x64xf32, #tpu.memory_space<vmem>>, vector<256x64xf32>
      %c0_10 = arith.constant 0 : index
      %c0_11 = arith.constant 0 : index
      %13 = vector.load %arg5[%c0_10, %c0_11] : memref<1x64xf32, #tpu.memory_space<vmem>>, vector<1x64xf32>
      %14 = vector.broadcast %13 : vector<1x64xf32> to vector<256x64xf32>
      %15 = arith.mulf %12, %14 : vector<256x64xf32>
      %c0_12 = arith.constant 0 : index
      %c0_13 = arith.constant 0 : index
      %16 = vector.load %arg6[%c0_12, %c0_13] : memref<1x64xf32, #tpu.memory_space<vmem>>, vector<1x64xf32>
      %17 = vector.broadcast %16 : vector<1x64xf32> to vector<256x64xf32>
      %18 = arith.addf %15, %17 : vector<256x64xf32>
      %cst_14 = arith.constant 0.000000e+00 : f32
      %19 = vector.broadcast %cst_14 : f32 to vector<256x64xf32>
      %20 = arith.maximumf %18, %19 : vector<256x64xf32>
      %21 = arith.truncf %20 : vector<256x64xf32> to vector<256x64xbf16>
      %c0_15 = arith.constant 0 : index
      %c0_16 = arith.constant 0 : index
      %22 = vector.load %arg7[%c0_15, %c0_16] : memref<256x64xbf16, #tpu.memory_space<vmem>>, vector<256x64xbf16>
      tpu.vector_store %arg7[%c0_15, %c0_16], %21 {strides = array<i32>} : memref<256x64xbf16, #tpu.memory_space<vmem>>, vector<256x64xbf16>,
    } else {
    }
    return
  }
  func.func @transform_0(%arg0: i32, %arg1: i32, %arg2: i32) -> (i32, i32) {
    %c0_i32 = arith.constant 0 : i32
    return %arg0, %arg2 : i32, i32
  }
  func.func @transform_1(%arg0: i32, %arg1: i32, %arg2: i32) -> (i32, i32) {
    %c0_i32 = arith.constant 0 : i32
    return %arg2, %arg1 : i32, i32
  }
  func.func @transform_2(%arg0: i32, %arg1: i32, %arg2: i32) -> (i32, i32) {
    %c0_i32 = arith.constant 0 : i32
    %c0_i32_0 = arith.constant 0 : i32
    return %c0_i32, %arg1 : i32, i32
  }
  func.func @transform_3(%arg0: i32, %arg1: i32, %arg2: i32) -> (i32, i32) {
    %c0_i32 = arith.constant 0 : i32
    %c0_i32_0 = arith.constant 0 : i32
    return %c0_i32, %arg1 : i32, i32
  }
  func.func @transform_4(%arg0: i32, %arg1: i32, %arg2: i32) -> (i32, i32) {
    %c0_i32 = arith.constant 0 : i32
    return %arg0, %arg1 : i32, i32
  }
}

module attributes {stable_mosaic.version = 11 : i64} {
  func.func @_matmul_affine_kernel(%arg0: i32, %arg1: i32, %arg2: i32, %arg3: memref<64x128xbf16, #tpu.memory_space<vmem>>, %arg4: memref<128x64xbf16, #tpu.memory_space<vmem>>, %arg5: memref<1x64xf32, #tpu.memory_space<vmem>>, %arg6: memref<1x64xf32, #tpu.memory_space<vmem>>, %arg7: memref<64x64xbf16, #tpu.memory_space<vmem>>, %arg8: memref<64x64xf32, #tpu.memory_space<vmem>>) attributes {dimension_semantics = [#tpu.dimension_semantics<parallel>, #tpu.dimension_semantics<parallel>, #tpu.dimension_semantics<arbitrary>], iteration_bounds = array<i64: 2, 1, 5>, scalar_prefetch = 0 : i64, scratch_operands = 1 : i64, tpu.core_type = #tpu.core_type<tc>, window_params = [{transform_indices = @transform_0, window_bounds = array<i64: 64, 128>}, {transform_indices = @transform_1, window_bounds = array<i64: 128, 64>}, {transform_indices = @transform_2, window_bounds = array<i64: 1, 64>}, {transform_indices = @transform_3, window_bounds = array<i64: 1, 64>}, {transform_indices = @transform_4, window_bounds = array<i64: 64, 64>}]} {
    %c0 = arith.constant 0 : index
    %c0_0 = arith.constant 0 : index
    %0 = vector.load %arg3[%c0, %c0_0] : memref<64x128xbf16, #tpu.memory_space<vmem>>, vector<64x128xbf16>
    %c0_1 = arith.constant 0 : index
    %c0_2 = arith.constant 0 : index
    %1 = vector.load %arg4[%c0_1, %c0_2] : memref<128x64xbf16, #tpu.memory_space<vmem>>, vector<128x64xbf16>
    %cst = arith.constant dense<0.000000e+00> : vector<64x64xf32>
    %2 = tpu.matmul %0, %1, %cst {dimension_numbers = #tpu.dot_dimension_numbers<[1], [0], [0], [1], [0, 0, 1, 1], [], []>} : vector<64x128xbf16>, vector<128x64xbf16>, vector<64x64xf32> -> vector<64x64xf32>
    %c0_i32 = arith.constant 0 : i32
    %3 = arith.cmpi eq, %arg2, %c0_i32 : i32
    %4 = arith.extui %3 : i1 to i32
    %c0_i32_3 = arith.constant 0 : i32
    %5 = arith.cmpi ne, %4, %c0_i32_3 : i32
    scf.if %5 {
      %c0_7 = arith.constant 0 : index
      %c0_8 = arith.constant 0 : index
      %12 = vector.load %arg8[%c0_7, %c0_8] : memref<64x64xf32, #tpu.memory_space<vmem>>, vector<64x64xf32>
      tpu.vector_store %arg8[%c0_7, %c0_8], %2 {strides = array<i32>} : memref<64x64xf32, #tpu.memory_space<vmem>>, vector<64x64xf32>,
    } else {
    }
    %c0_i32_4 = arith.constant 0 : i32
    %6 = arith.cmpi sgt, %arg2, %c0_i32_4 : i32
    %7 = arith.extui %6 : i1 to i32
    %c0_i32_5 = arith.constant 0 : i32
    %8 = arith.cmpi ne, %7, %c0_i32_5 : i32
    scf.if %8 {
      %c0_7 = arith.constant 0 : index
      %c0_8 = arith.constant 0 : index
      %12 = vector.load %arg8[%c0_7, %c0_8] : memref<64x64xf32, #tpu.memory_space<vmem>>, vector<64x64xf32>
      %13 = arith.addf %12, %2 : vector<64x64xf32>
      %c0_9 = arith.constant 0 : index
      %c0_10 = arith.constant 0 : index
      %14 = vector.load %arg8[%c0_9, %c0_10] : memref<64x64xf32, #tpu.memory_space<vmem>>, vector<64x64xf32>
      tpu.vector_store %arg8[%c0_9, %c0_10], %13 {strides = array<i32>} : memref<64x64xf32, #tpu.memory_space<vmem>>, vector<64x64xf32>,
    } else {
    }
    %c4_i32 = arith.constant 4 : i32
    %9 = arith.cmpi eq, %arg2, %c4_i32 : i32
    %10 = arith.extui %9 : i1 to i32
    %c0_i32_6 = arith.constant 0 : i32
    %11 = arith.cmpi ne, %10, %c0_i32_6 : i32
    scf.if %11 {
      %c0_7 = arith.constant 0 : index
      %c0_8 = arith.constant 0 : index
      %12 = vector.load %arg8[%c0_7, %c0_8] : memref<64x64xf32, #tpu.memory_space<vmem>>, vector<64x64xf32>
      %c0_9 = arith.constant 0 : index
      %c0_10 = arith.constant 0 : index
      %13 = vector.load %arg5[%c0_9, %c0_10] : memref<1x64xf32, #tpu.memory_space<vmem>>, vector<1x64xf32>
      %14 = vector.broadcast %13 : vector<1x64xf32> to vector<64x64xf32>
      %15 = arith.mulf %12, %14 : vector<64x64xf32>
      %c0_11 = arith.constant 0 : index
      %c0_12 = arith.constant 0 : index
      %16 = vector.load %arg6[%c0_11, %c0_12] : memref<1x64xf32, #tpu.memory_space<vmem>>, vector<1x64xf32>
      %17 = vector.broadcast %16 : vector<1x64xf32> to vector<64x64xf32>
      %18 = arith.addf %15, %17 : vector<64x64xf32>
      %cst_13 = arith.constant 0.000000e+00 : f32
      %19 = vector.broadcast %cst_13 : f32 to vector<64x64xf32>
      %20 = arith.maximumf %18, %19 : vector<64x64xf32>
      %21 = arith.truncf %20 : vector<64x64xf32> to vector<64x64xbf16>
      %c0_14 = arith.constant 0 : index
      %c0_15 = arith.constant 0 : index
      %22 = vector.load %arg7[%c0_14, %c0_15] : memref<64x64xbf16, #tpu.memory_space<vmem>>, vector<64x64xbf16>
      tpu.vector_store %arg7[%c0_14, %c0_15], %21 {strides = array<i32>} : memref<64x64xbf16, #tpu.memory_space<vmem>>, vector<64x64xbf16>,
    } else {
    }
    return
  }
  func.func @transform_0(%arg0: i32, %arg1: i32, %arg2: i32) -> (i32, i32) {
    %c0_i32 = arith.constant 0 : i32
    return %arg0, %arg2 : i32, i32
  }
  func.func @transform_1(%arg0: i32, %arg1: i32, %arg2: i32) -> (i32, i32) {
    %c0_i32 = arith.constant 0 : i32
    return %arg2, %arg1 : i32, i32
  }
  func.func @transform_2(%arg0: i32, %arg1: i32, %arg2: i32) -> (i32, i32) {
    %c0_i32 = arith.constant 0 : i32
    %c0_i32_0 = arith.constant 0 : i32
    return %c0_i32, %arg1 : i32, i32
  }
  func.func @transform_3(%arg0: i32, %arg1: i32, %arg2: i32) -> (i32, i32) {
    %c0_i32 = arith.constant 0 : i32
    %c0_i32_0 = arith.constant 0 : i32
    return %c0_i32, %arg1 : i32, i32
  }
  func.func @transform_4(%arg0: i32, %arg1: i32, %arg2: i32) -> (i32, i32) {
    %c0_i32 = arith.constant 0 : i32
    return %arg0, %arg1 : i32, i32
  }
}

module attributes {stable_mosaic.version = 11 : i64} {
  func.func @_matmul_affine_kernel(%arg0: i32, %arg1: i32, %arg2: i32, %arg3: memref<64x128xbf16, #tpu.memory_space<vmem>>, %arg4: memref<128x64xbf16, #tpu.memory_space<vmem>>, %arg5: memref<1x64xf32, #tpu.memory_space<vmem>>, %arg6: memref<1x64xf32, #tpu.memory_space<vmem>>, %arg7: memref<64x64xbf16, #tpu.memory_space<vmem>>, %arg8: memref<64x64xbf16, #tpu.memory_space<vmem>>, %arg9: memref<64x64xf32, #tpu.memory_space<vmem>>) attributes {dimension_semantics = [#tpu.dimension_semantics<parallel>, #tpu.dimension_semantics<parallel>, #tpu.dimension_semantics<arbitrary>], iteration_bounds = array<i64: 2, 1, 5>, scalar_prefetch = 0 : i64, scratch_operands = 1 : i64, tpu.core_type = #tpu.core_type<tc>, window_params = [{transform_indices = @transform_0, window_bounds = array<i64: 64, 128>}, {transform_indices = @transform_1, window_bounds = array<i64: 128, 64>}, {transform_indices = @transform_2, window_bounds = array<i64: 1, 64>}, {transform_indices = @transform_3, window_bounds = array<i64: 1, 64>}, {transform_indices = @transform_4, window_bounds = array<i64: 64, 64>}, {transform_indices = @transform_5, window_bounds = array<i64: 64, 64>}]} {
    %c0 = arith.constant 0 : index
    %c0_0 = arith.constant 0 : index
    %0 = vector.load %arg3[%c0, %c0_0] : memref<64x128xbf16, #tpu.memory_space<vmem>>, vector<64x128xbf16>
    %c0_1 = arith.constant 0 : index
    %c0_2 = arith.constant 0 : index
    %1 = vector.load %arg4[%c0_1, %c0_2] : memref<128x64xbf16, #tpu.memory_space<vmem>>, vector<128x64xbf16>
    %cst = arith.constant dense<0.000000e+00> : vector<64x64xf32>
    %2 = tpu.matmul %0, %1, %cst {dimension_numbers = #tpu.dot_dimension_numbers<[1], [0], [0], [1], [0, 0, 1, 1], [], []>} : vector<64x128xbf16>, vector<128x64xbf16>, vector<64x64xf32> -> vector<64x64xf32>
    %c0_i32 = arith.constant 0 : i32
    %3 = arith.cmpi eq, %arg2, %c0_i32 : i32
    %4 = arith.extui %3 : i1 to i32
    %c0_i32_3 = arith.constant 0 : i32
    %5 = arith.cmpi ne, %4, %c0_i32_3 : i32
    scf.if %5 {
      %c0_7 = arith.constant 0 : index
      %c0_8 = arith.constant 0 : index
      %12 = vector.load %arg9[%c0_7, %c0_8] : memref<64x64xf32, #tpu.memory_space<vmem>>, vector<64x64xf32>
      tpu.vector_store %arg9[%c0_7, %c0_8], %2 {strides = array<i32>} : memref<64x64xf32, #tpu.memory_space<vmem>>, vector<64x64xf32>,
    } else {
    }
    %c0_i32_4 = arith.constant 0 : i32
    %6 = arith.cmpi sgt, %arg2, %c0_i32_4 : i32
    %7 = arith.extui %6 : i1 to i32
    %c0_i32_5 = arith.constant 0 : i32
    %8 = arith.cmpi ne, %7, %c0_i32_5 : i32
    scf.if %8 {
      %c0_7 = arith.constant 0 : index
      %c0_8 = arith.constant 0 : index
      %12 = vector.load %arg9[%c0_7, %c0_8] : memref<64x64xf32, #tpu.memory_space<vmem>>, vector<64x64xf32>
      %13 = arith.addf %12, %2 : vector<64x64xf32>
      %c0_9 = arith.constant 0 : index
      %c0_10 = arith.constant 0 : index
      %14 = vector.load %arg9[%c0_9, %c0_10] : memref<64x64xf32, #tpu.memory_space<vmem>>, vector<64x64xf32>
      tpu.vector_store %arg9[%c0_9, %c0_10], %13 {strides = array<i32>} : memref<64x64xf32, #tpu.memory_space<vmem>>, vector<64x64xf32>,
    } else {
    }
    %c4_i32 = arith.constant 4 : i32
    %9 = arith.cmpi eq, %arg2, %c4_i32 : i32
    %10 = arith.extui %9 : i1 to i32
    %c0_i32_6 = arith.constant 0 : i32
    %11 = arith.cmpi ne, %10, %c0_i32_6 : i32
    scf.if %11 {
      %c0_7 = arith.constant 0 : index
      %c0_8 = arith.constant 0 : index
      %12 = vector.load %arg9[%c0_7, %c0_8] : memref<64x64xf32, #tpu.memory_space<vmem>>, vector<64x64xf32>
      %c0_9 = arith.constant 0 : index
      %c0_10 = arith.constant 0 : index
      %13 = vector.load %arg5[%c0_9, %c0_10] : memref<1x64xf32, #tpu.memory_space<vmem>>, vector<1x64xf32>
      %14 = vector.broadcast %13 : vector<1x64xf32> to vector<64x64xf32>
      %15 = arith.mulf %12, %14 : vector<64x64xf32>
      %c0_11 = arith.constant 0 : index
      %c0_12 = arith.constant 0 : index
      %16 = vector.load %arg6[%c0_11, %c0_12] : memref<1x64xf32, #tpu.memory_space<vmem>>, vector<1x64xf32>
      %17 = vector.broadcast %16 : vector<1x64xf32> to vector<64x64xf32>
      %18 = arith.addf %15, %17 : vector<64x64xf32>
      %c0_13 = arith.constant 0 : index
      %c0_14 = arith.constant 0 : index
      %19 = vector.load %arg7[%c0_13, %c0_14] : memref<64x64xbf16, #tpu.memory_space<vmem>>, vector<64x64xbf16>
      %20 = arith.extf %19 : vector<64x64xbf16> to vector<64x64xf32>
      %21 = arith.addf %18, %20 : vector<64x64xf32>
      %cst_15 = arith.constant 0.000000e+00 : f32
      %22 = vector.broadcast %cst_15 : f32 to vector<64x64xf32>
      %23 = arith.maximumf %21, %22 : vector<64x64xf32>
      %24 = arith.truncf %23 : vector<64x64xf32> to vector<64x64xbf16>
      %c0_16 = arith.constant 0 : index
      %c0_17 = arith.constant 0 : index
      %25 = vector.load %arg8[%c0_16, %c0_17] : memref<64x64xbf16, #tpu.memory_space<vmem>>, vector<64x64xbf16>
      tpu.vector_store %arg8[%c0_16, %c0_17], %24 {strides = array<i32>} : memref<64x64xbf16, #tpu.memory_space<vmem>>, vector<64x64xbf16>,
    } else {
    }
    return
  }
  func.func @transform_0(%arg0: i32, %arg1: i32, %arg2: i32) -> (i32, i32) {
    %c0_i32 = arith.constant 0 : i32
    return %arg0, %arg2 : i32, i32
  }
  func.func @transform_1(%arg0: i32, %arg1: i32, %arg2: i32) -> (i32, i32) {
    %c0_i32 = arith.constant 0 : i32
    return %arg2, %arg1 : i32, i32
  }
  func.func @transform_2(%arg0: i32, %arg1: i32, %arg2: i32) -> (i32, i32) {
    %c0_i32 = arith.constant 0 : i32
    %c0_i32_0 = arith.constant 0 : i32
    return %c0_i32, %arg1 : i32, i32
  }
  func.func @transform_3(%arg0: i32, %arg1: i32, %arg2: i32) -> (i32, i32) {
    %c0_i32 = arith.constant 0 : i32
    %c0_i32_0 = arith.constant 0 : i32
    return %c0_i32, %arg1 : i32, i32
  }
  func.func @transform_4(%arg0: i32, %arg1: i32, %arg2: i32) -> (i32, i32) {
    %c0_i32 = arith.constant 0 : i32
    return %arg0, %arg1 : i32, i32
  }
  func.func @transform_5(%arg0: i32, %arg1: i32, %arg2: i32) -> (i32, i32) {
    %c0_i32 = arith.constant 0 : i32
    return %arg0, %arg1 : i32, i32
  }
}

module attributes {stable_mosaic.version = 11 : i64} {
  func.func @_matmul_affine_kernel(%arg0: i32, %arg1: i32, %arg2: i32, %arg3: memref<16x128xbf16, #tpu.memory_space<vmem>>, %arg4: memref<128x128xbf16, #tpu.memory_space<vmem>>, %arg5: memref<1x128xf32, #tpu.memory_space<vmem>>, %arg6: memref<1x128xf32, #tpu.memory_space<vmem>>, %arg7: memref<16x128xbf16, #tpu.memory_space<vmem>>, %arg8: memref<16x128xf32, #tpu.memory_space<vmem>>) attributes {dimension_semantics = [#tpu.dimension_semantics<parallel>, #tpu.dimension_semantics<parallel>, #tpu.dimension_semantics<arbitrary>], iteration_bounds = array<i64: 2, 1, 5>, scalar_prefetch = 0 : i64, scratch_operands = 1 : i64, tpu.core_type = #tpu.core_type<tc>, window_params = [{transform_indices = @transform_0, window_bounds = array<i64: 16, 128>}, {transform_indices = @transform_1, window_bounds = array<i64: 128, 128>}, {transform_indices = @transform_2, window_bounds = array<i64: 1, 128>}, {transform_indices = @transform_3, window_bounds = array<i64: 1, 128>}, {transform_indices = @transform_4, window_bounds = array<i64: 16, 128>}]} {
    %c0 = arith.constant 0 : index
    %c0_0 = arith.constant 0 : index
    %0 = vector.load %arg3[%c0, %c0_0] : memref<16x128xbf16, #tpu.memory_space<vmem>>, vector<16x128xbf16>
    %c0_1 = arith.constant 0 : index
    %c0_2 = arith.constant 0 : index
    %1 = vector.load %arg4[%c0_1, %c0_2] : memref<128x128xbf16, #tpu.memory_space<vmem>>, vector<128x128xbf16>
    %cst = arith.constant dense<0.000000e+00> : vector<16x128xf32>
    %2 = tpu.matmul %0, %1, %cst {dimension_numbers = #tpu.dot_dimension_numbers<[1], [0], [0], [1], [0, 0, 1, 1], [], []>} : vector<16x128xbf16>, vector<128x128xbf16>, vector<16x128xf32> -> vector<16x128xf32>
    %c0_i32 = arith.constant 0 : i32
    %3 = arith.cmpi eq, %arg2, %c0_i32 : i32
    %4 = arith.extui %3 : i1 to i32
    %c0_i32_3 = arith.constant 0 : i32
    %5 = arith.cmpi ne, %4, %c0_i32_3 : i32
    scf.if %5 {
      %c0_7 = arith.constant 0 : index
      %c0_8 = arith.constant 0 : index
      %12 = vector.load %arg8[%c0_7, %c0_8] : memref<16x128xf32, #tpu.memory_space<vmem>>, vector<16x128xf32>
      tpu.vector_store %arg8[%c0_7, %c0_8], %2 {strides = array<i32>} : memref<16x128xf32, #tpu.memory_space<vmem>>, vector<16x128xf32>,
    } else {
    }
    %c0_i32_4 = arith.constant 0 : i32
    %6 = arith.cmpi sgt, %arg2, %c0_i32_4 : i32
    %7 = arith.extui %6 : i1 to i32
    %c0_i32_5 = arith.constant 0 : i32
    %8 = arith.cmpi ne, %7, %c0_i32_5 : i32
    scf.if %8 {
      %c0_7 = arith.constant 0 : index
      %c0_8 = arith.constant 0 : index
      %12 = vector.load %arg8[%c0_7, %c0_8] : memref<16x128xf32, #tpu.memory_space<vmem>>, vector<16x128xf32>
      %13 = arith.addf %12, %2 : vector<16x128xf32>
      %c0_9 = arith.constant 0 : index
      %c0_10 = arith.constant 0 : index
      %14 = vector.load %arg8[%c0_9, %c0_10] : memref<16x128xf32, #tpu.memory_space<vmem>>, vector<16x128xf32>
      tpu.vector_store %arg8[%c0_9, %c0_10], %13 {strides = array<i32>} : memref<16x128xf32, #tpu.memory_space<vmem>>, vector<16x128xf32>,
    } else {
    }
    %c4_i32 = arith.constant 4 : i32
    %9 = arith.cmpi eq, %arg2, %c4_i32 : i32
    %10 = arith.extui %9 : i1 to i32
    %c0_i32_6 = arith.constant 0 : i32
    %11 = arith.cmpi ne, %10, %c0_i32_6 : i32
    scf.if %11 {
      %c0_7 = arith.constant 0 : index
      %c0_8 = arith.constant 0 : index
      %12 = vector.load %arg8[%c0_7, %c0_8] : memref<16x128xf32, #tpu.memory_space<vmem>>, vector<16x128xf32>
      %c0_9 = arith.constant 0 : index
      %c0_10 = arith.constant 0 : index
      %13 = vector.load %arg5[%c0_9, %c0_10] : memref<1x128xf32, #tpu.memory_space<vmem>>, vector<1x128xf32>
      %14 = vector.broadcast %13 : vector<1x128xf32> to vector<16x128xf32>
      %15 = arith.mulf %12, %14 : vector<16x128xf32>
      %c0_11 = arith.constant 0 : index
      %c0_12 = arith.constant 0 : index
      %16 = vector.load %arg6[%c0_11, %c0_12] : memref<1x128xf32, #tpu.memory_space<vmem>>, vector<1x128xf32>
      %17 = vector.broadcast %16 : vector<1x128xf32> to vector<16x128xf32>
      %18 = arith.addf %15, %17 : vector<16x128xf32>
      %cst_13 = arith.constant 0.000000e+00 : f32
      %19 = vector.broadcast %cst_13 : f32 to vector<16x128xf32>
      %20 = arith.maximumf %18, %19 : vector<16x128xf32>
      %21 = arith.truncf %20 : vector<16x128xf32> to vector<16x128xbf16>
      %c0_14 = arith.constant 0 : index
      %c0_15 = arith.constant 0 : index
      %22 = vector.load %arg7[%c0_14, %c0_15] : memref<16x128xbf16, #tpu.memory_space<vmem>>, vector<16x128xbf16>
      tpu.vector_store %arg7[%c0_14, %c0_15], %21 {strides = array<i32>} : memref<16x128xbf16, #tpu.memory_space<vmem>>, vector<16x128xbf16>,
    } else {
    }
    return
  }
  func.func @transform_0(%arg0: i32, %arg1: i32, %arg2: i32) -> (i32, i32) {
    %c0_i32 = arith.constant 0 : i32
    return %arg0, %arg2 : i32, i32
  }
  func.func @transform_1(%arg0: i32, %arg1: i32, %arg2: i32) -> (i32, i32) {
    %c0_i32 = arith.constant 0 : i32
    return %arg2, %arg1 : i32, i32
  }
  func.func @transform_2(%arg0: i32, %arg1: i32, %arg2: i32) -> (i32, i32) {
    %c0_i32 = arith.constant 0 : i32
    %c0_i32_0 = arith.constant 0 : i32
    return %c0_i32, %arg1 : i32, i32
  }
  func.func @transform_3(%arg0: i32, %arg1: i32, %arg2: i32) -> (i32, i32) {
    %c0_i32 = arith.constant 0 : i32
    %c0_i32_0 = arith.constant 0 : i32
    return %c0_i32, %arg1 : i32, i32
  }
  func.func @transform_4(%arg0: i32, %arg1: i32, %arg2: i32) -> (i32, i32) {
    %c0_i32 = arith.constant 0 : i32
    return %arg0, %arg1 : i32, i32
  }
}

module attributes {stable_mosaic.version = 11 : i64} {
  func.func @_matmul_affine_kernel(%arg0: i32, %arg1: i32, %arg2: i32, %arg3: memref<16x128xbf16, #tpu.memory_space<vmem>>, %arg4: memref<128x128xbf16, #tpu.memory_space<vmem>>, %arg5: memref<1x128xf32, #tpu.memory_space<vmem>>, %arg6: memref<1x128xf32, #tpu.memory_space<vmem>>, %arg7: memref<16x128xbf16, #tpu.memory_space<vmem>>, %arg8: memref<16x128xf32, #tpu.memory_space<vmem>>) attributes {dimension_semantics = [#tpu.dimension_semantics<parallel>, #tpu.dimension_semantics<parallel>, #tpu.dimension_semantics<arbitrary>], iteration_bounds = array<i64: 2, 1, 1>, scalar_prefetch = 0 : i64, scratch_operands = 1 : i64, tpu.core_type = #tpu.core_type<tc>, window_params = [{transform_indices = @transform_0, window_bounds = array<i64: 16, 128>}, {transform_indices = @transform_1, window_bounds = array<i64: 128, 128>}, {transform_indices = @transform_2, window_bounds = array<i64: 1, 128>}, {transform_indices = @transform_3, window_bounds = array<i64: 1, 128>}, {transform_indices = @transform_4, window_bounds = array<i64: 16, 128>}]} {
    %c0 = arith.constant 0 : index
    %c0_0 = arith.constant 0 : index
    %0 = vector.load %arg3[%c0, %c0_0] : memref<16x128xbf16, #tpu.memory_space<vmem>>, vector<16x128xbf16>
    %c0_1 = arith.constant 0 : index
    %c0_2 = arith.constant 0 : index
    %1 = vector.load %arg4[%c0_1, %c0_2] : memref<128x128xbf16, #tpu.memory_space<vmem>>, vector<128x128xbf16>
    %cst = arith.constant dense<0.000000e+00> : vector<16x128xf32>
    %2 = tpu.matmul %0, %1, %cst {dimension_numbers = #tpu.dot_dimension_numbers<[1], [0], [0], [1], [0, 0, 1, 1], [], []>} : vector<16x128xbf16>, vector<128x128xbf16>, vector<16x128xf32> -> vector<16x128xf32>
    %c0_i32 = arith.constant 0 : i32
    %3 = arith.cmpi eq, %arg2, %c0_i32 : i32
    %4 = arith.extui %3 : i1 to i32
    %c0_i32_3 = arith.constant 0 : i32
    %5 = arith.cmpi ne, %4, %c0_i32_3 : i32
    scf.if %5 {
      %c0_8 = arith.constant 0 : index
      %c0_9 = arith.constant 0 : index
      %12 = vector.load %arg8[%c0_8, %c0_9] : memref<16x128xf32, #tpu.memory_space<vmem>>, vector<16x128xf32>
      tpu.vector_store %arg8[%c0_8, %c0_9], %2 {strides = array<i32>} : memref<16x128xf32, #tpu.memory_space<vmem>>, vector<16x128xf32>,
    } else {
    }
    %c0_i32_4 = arith.constant 0 : i32
    %6 = arith.cmpi sgt, %arg2, %c0_i32_4 : i32
    %7 = arith.extui %6 : i1 to i32
    %c0_i32_5 = arith.constant 0 : i32
    %8 = arith.cmpi ne, %7, %c0_i32_5 : i32
    scf.if %8 {
      %c0_8 = arith.constant 0 : index
      %c0_9 = arith.constant 0 : index
      %12 = vector.load %arg8[%c0_8, %c0_9] : memref<16x128xf32, #tpu.memory_space<vmem>>, vector<16x128xf32>
      %13 = arith.addf %12, %2 : vector<16x128xf32>
      %c0_10 = arith.constant 0 : index
      %c0_11 = arith.constant 0 : index
      %14 = vector.load %arg8[%c0_10, %c0_11] : memref<16x128xf32, #tpu.memory_space<vmem>>, vector<16x128xf32>
      tpu.vector_store %arg8[%c0_10, %c0_11], %13 {strides = array<i32>} : memref<16x128xf32, #tpu.memory_space<vmem>>, vector<16x128xf32>,
    } else {
    }
    %c0_i32_6 = arith.constant 0 : i32
    %9 = arith.cmpi eq, %arg2, %c0_i32_6 : i32
    %10 = arith.extui %9 : i1 to i32
    %c0_i32_7 = arith.constant 0 : i32
    %11 = arith.cmpi ne, %10, %c0_i32_7 : i32
    scf.if %11 {
      %c0_8 = arith.constant 0 : index
      %c0_9 = arith.constant 0 : index
      %12 = vector.load %arg8[%c0_8, %c0_9] : memref<16x128xf32, #tpu.memory_space<vmem>>, vector<16x128xf32>
      %c0_10 = arith.constant 0 : index
      %c0_11 = arith.constant 0 : index
      %13 = vector.load %arg5[%c0_10, %c0_11] : memref<1x128xf32, #tpu.memory_space<vmem>>, vector<1x128xf32>
      %14 = vector.broadcast %13 : vector<1x128xf32> to vector<16x128xf32>
      %15 = arith.mulf %12, %14 : vector<16x128xf32>
      %c0_12 = arith.constant 0 : index
      %c0_13 = arith.constant 0 : index
      %16 = vector.load %arg6[%c0_12, %c0_13] : memref<1x128xf32, #tpu.memory_space<vmem>>, vector<1x128xf32>
      %17 = vector.broadcast %16 : vector<1x128xf32> to vector<16x128xf32>
      %18 = arith.addf %15, %17 : vector<16x128xf32>
      %19 = arith.truncf %18 : vector<16x128xf32> to vector<16x128xbf16>
      %c0_14 = arith.constant 0 : index
      %c0_15 = arith.constant 0 : index
      %20 = vector.load %arg7[%c0_14, %c0_15] : memref<16x128xbf16, #tpu.memory_space<vmem>>, vector<16x128xbf16>
      tpu.vector_store %arg7[%c0_14, %c0_15], %19 {strides = array<i32>} : memref<16x128xbf16, #tpu.memory_space<vmem>>, vector<16x128xbf16>,
    } else {
    }
    return
  }
  func.func @transform_0(%arg0: i32, %arg1: i32, %arg2: i32) -> (i32, i32) {
    %c0_i32 = arith.constant 0 : i32
    return %arg0, %arg2 : i32, i32
  }
  func.func @transform_1(%arg0: i32, %arg1: i32, %arg2: i32) -> (i32, i32) {
    %c0_i32 = arith.constant 0 : i32
    return %arg2, %arg1 : i32, i32
  }
  func.func @transform_2(%arg0: i32, %arg1: i32, %arg2: i32) -> (i32, i32) {
    %c0_i32 = arith.constant 0 : i32
    %c0_i32_0 = arith.constant 0 : i32
    return %c0_i32, %arg1 : i32, i32
  }
  func.func @transform_3(%arg0: i32, %arg1: i32, %arg2: i32) -> (i32, i32) {
    %c0_i32 = arith.constant 0 : i32
    %c0_i32_0 = arith.constant 0 : i32
    return %c0_i32, %arg1 : i32, i32
  }
  func.func @transform_4(%arg0: i32, %arg1: i32, %arg2: i32) -> (i32, i32) {
    %c0_i32 = arith.constant 0 : i32
    return %arg0, %arg1 : i32, i32
  }
}

module attributes {stable_mosaic.version = 11 : i64} {
  func.func @_matmul_affine_kernel(%arg0: i32, %arg1: i32, %arg2: i32, %arg3: memref<16x128xbf16, #tpu.memory_space<vmem>>, %arg4: memref<128x128xbf16, #tpu.memory_space<vmem>>, %arg5: memref<1x128xf32, #tpu.memory_space<vmem>>, %arg6: memref<1x128xf32, #tpu.memory_space<vmem>>, %arg7: memref<16x128xbf16, #tpu.memory_space<vmem>>, %arg8: memref<16x128xbf16, #tpu.memory_space<vmem>>, %arg9: memref<16x128xf32, #tpu.memory_space<vmem>>) attributes {dimension_semantics = [#tpu.dimension_semantics<parallel>, #tpu.dimension_semantics<parallel>, #tpu.dimension_semantics<arbitrary>], iteration_bounds = array<i64: 2, 1, 9>, scalar_prefetch = 0 : i64, scratch_operands = 1 : i64, tpu.core_type = #tpu.core_type<tc>, window_params = [{transform_indices = @transform_0, window_bounds = array<i64: 16, 128>}, {transform_indices = @transform_1, window_bounds = array<i64: 128, 128>}, {transform_indices = @transform_2, window_bounds = array<i64: 1, 128>}, {transform_indices = @transform_3, window_bounds = array<i64: 1, 128>}, {transform_indices = @transform_4, window_bounds = array<i64: 16, 128>}, {transform_indices = @transform_5, window_bounds = array<i64: 16, 128>}]} {
    %c0 = arith.constant 0 : index
    %c0_0 = arith.constant 0 : index
    %0 = vector.load %arg3[%c0, %c0_0] : memref<16x128xbf16, #tpu.memory_space<vmem>>, vector<16x128xbf16>
    %c0_1 = arith.constant 0 : index
    %c0_2 = arith.constant 0 : index
    %1 = vector.load %arg4[%c0_1, %c0_2] : memref<128x128xbf16, #tpu.memory_space<vmem>>, vector<128x128xbf16>
    %cst = arith.constant dense<0.000000e+00> : vector<16x128xf32>
    %2 = tpu.matmul %0, %1, %cst {dimension_numbers = #tpu.dot_dimension_numbers<[1], [0], [0], [1], [0, 0, 1, 1], [], []>} : vector<16x128xbf16>, vector<128x128xbf16>, vector<16x128xf32> -> vector<16x128xf32>
    %c0_i32 = arith.constant 0 : i32
    %3 = arith.cmpi eq, %arg2, %c0_i32 : i32
    %4 = arith.extui %3 : i1 to i32
    %c0_i32_3 = arith.constant 0 : i32
    %5 = arith.cmpi ne, %4, %c0_i32_3 : i32
    scf.if %5 {
      %c0_7 = arith.constant 0 : index
      %c0_8 = arith.constant 0 : index
      %12 = vector.load %arg9[%c0_7, %c0_8] : memref<16x128xf32, #tpu.memory_space<vmem>>, vector<16x128xf32>
      tpu.vector_store %arg9[%c0_7, %c0_8], %2 {strides = array<i32>} : memref<16x128xf32, #tpu.memory_space<vmem>>, vector<16x128xf32>,
    } else {
    }
    %c0_i32_4 = arith.constant 0 : i32
    %6 = arith.cmpi sgt, %arg2, %c0_i32_4 : i32
    %7 = arith.extui %6 : i1 to i32
    %c0_i32_5 = arith.constant 0 : i32
    %8 = arith.cmpi ne, %7, %c0_i32_5 : i32
    scf.if %8 {
      %c0_7 = arith.constant 0 : index
      %c0_8 = arith.constant 0 : index
      %12 = vector.load %arg9[%c0_7, %c0_8] : memref<16x128xf32, #tpu.memory_space<vmem>>, vector<16x128xf32>
      %13 = arith.addf %12, %2 : vector<16x128xf32>
      %c0_9 = arith.constant 0 : index
      %c0_10 = arith.constant 0 : index
      %14 = vector.load %arg9[%c0_9, %c0_10] : memref<16x128xf32, #tpu.memory_space<vmem>>, vector<16x128xf32>
      tpu.vector_store %arg9[%c0_9, %c0_10], %13 {strides = array<i32>} : memref<16x128xf32, #tpu.memory_space<vmem>>, vector<16x128xf32>,
    } else {
    }
    %c8_i32 = arith.constant 8 : i32
    %9 = arith.cmpi eq, %arg2, %c8_i32 : i32
    %10 = arith.extui %9 : i1 to i32
    %c0_i32_6 = arith.constant 0 : i32
    %11 = arith.cmpi ne, %10, %c0_i32_6 : i32
    scf.if %11 {
      %c0_7 = arith.constant 0 : index
      %c0_8 = arith.constant 0 : index
      %12 = vector.load %arg9[%c0_7, %c0_8] : memref<16x128xf32, #tpu.memory_space<vmem>>, vector<16x128xf32>
      %c0_9 = arith.constant 0 : index
      %c0_10 = arith.constant 0 : index
      %13 = vector.load %arg5[%c0_9, %c0_10] : memref<1x128xf32, #tpu.memory_space<vmem>>, vector<1x128xf32>
      %14 = vector.broadcast %13 : vector<1x128xf32> to vector<16x128xf32>
      %15 = arith.mulf %12, %14 : vector<16x128xf32>
      %c0_11 = arith.constant 0 : index
      %c0_12 = arith.constant 0 : index
      %16 = vector.load %arg6[%c0_11, %c0_12] : memref<1x128xf32, #tpu.memory_space<vmem>>, vector<1x128xf32>
      %17 = vector.broadcast %16 : vector<1x128xf32> to vector<16x128xf32>
      %18 = arith.addf %15, %17 : vector<16x128xf32>
      %c0_13 = arith.constant 0 : index
      %c0_14 = arith.constant 0 : index
      %19 = vector.load %arg7[%c0_13, %c0_14] : memref<16x128xbf16, #tpu.memory_space<vmem>>, vector<16x128xbf16>
      %20 = arith.extf %19 : vector<16x128xbf16> to vector<16x128xf32>
      %21 = arith.addf %18, %20 : vector<16x128xf32>
      %cst_15 = arith.constant 0.000000e+00 : f32
      %22 = vector.broadcast %cst_15 : f32 to vector<16x128xf32>
      %23 = arith.maximumf %21, %22 : vector<16x128xf32>
      %24 = arith.truncf %23 : vector<16x128xf32> to vector<16x128xbf16>
      %c0_16 = arith.constant 0 : index
      %c0_17 = arith.constant 0 : index
      %25 = vector.load %arg8[%c0_16, %c0_17] : memref<16x128xbf16, #tpu.memory_space<vmem>>, vector<16x128xbf16>
      tpu.vector_store %arg8[%c0_16, %c0_17], %24 {strides = array<i32>} : memref<16x128xbf16, #tpu.memory_space<vmem>>, vector<16x128xbf16>,
    } else {
    }
    return
  }
  func.func @transform_0(%arg0: i32, %arg1: i32, %arg2: i32) -> (i32, i32) {
    %c0_i32 = arith.constant 0 : i32
    return %arg0, %arg2 : i32, i32
  }
  func.func @transform_1(%arg0: i32, %arg1: i32, %arg2: i32) -> (i32, i32) {
    %c0_i32 = arith.constant 0 : i32
    return %arg2, %arg1 : i32, i32
  }
  func.func @transform_2(%arg0: i32, %arg1: i32, %arg2: i32) -> (i32, i32) {
    %c0_i32 = arith.constant 0 : i32
    %c0_i32_0 = arith.constant 0 : i32
    return %c0_i32, %arg1 : i32, i32
  }
  func.func @transform_3(%arg0: i32, %arg1: i32, %arg2: i32) -> (i32, i32) {
    %c0_i32 = arith.constant 0 : i32
    %c0_i32_0 = arith.constant 0 : i32
    return %c0_i32, %arg1 : i32, i32
  }
  func.func @transform_4(%arg0: i32, %arg1: i32, %arg2: i32) -> (i32, i32) {
    %c0_i32 = arith.constant 0 : i32
    return %arg0, %arg1 : i32, i32
  }
  func.func @transform_5(%arg0: i32, %arg1: i32, %arg2: i32) -> (i32, i32) {
    %c0_i32 = arith.constant 0 : i32
    return %arg0, %arg1 : i32, i32
  }
}

module attributes {stable_mosaic.version = 11 : i64} {
  func.func @_matmul_affine_kernel(%arg0: i32, %arg1: i32, %arg2: i32, %arg3: memref<16x128xbf16, #tpu.memory_space<vmem>>, %arg4: memref<128x128xbf16, #tpu.memory_space<vmem>>, %arg5: memref<1x128xf32, #tpu.memory_space<vmem>>, %arg6: memref<1x128xf32, #tpu.memory_space<vmem>>, %arg7: memref<16x128xbf16, #tpu.memory_space<vmem>>, %arg8: memref<16x128xf32, #tpu.memory_space<vmem>>) attributes {dimension_semantics = [#tpu.dimension_semantics<parallel>, #tpu.dimension_semantics<parallel>, #tpu.dimension_semantics<arbitrary>], iteration_bounds = array<i64: 2, 1, 9>, scalar_prefetch = 0 : i64, scratch_operands = 1 : i64, tpu.core_type = #tpu.core_type<tc>, window_params = [{transform_indices = @transform_0, window_bounds = array<i64: 16, 128>}, {transform_indices = @transform_1, window_bounds = array<i64: 128, 128>}, {transform_indices = @transform_2, window_bounds = array<i64: 1, 128>}, {transform_indices = @transform_3, window_bounds = array<i64: 1, 128>}, {transform_indices = @transform_4, window_bounds = array<i64: 16, 128>}]} {
    %c0 = arith.constant 0 : index
    %c0_0 = arith.constant 0 : index
    %0 = vector.load %arg3[%c0, %c0_0] : memref<16x128xbf16, #tpu.memory_space<vmem>>, vector<16x128xbf16>
    %c0_1 = arith.constant 0 : index
    %c0_2 = arith.constant 0 : index
    %1 = vector.load %arg4[%c0_1, %c0_2] : memref<128x128xbf16, #tpu.memory_space<vmem>>, vector<128x128xbf16>
    %cst = arith.constant dense<0.000000e+00> : vector<16x128xf32>
    %2 = tpu.matmul %0, %1, %cst {dimension_numbers = #tpu.dot_dimension_numbers<[1], [0], [0], [1], [0, 0, 1, 1], [], []>} : vector<16x128xbf16>, vector<128x128xbf16>, vector<16x128xf32> -> vector<16x128xf32>
    %c0_i32 = arith.constant 0 : i32
    %3 = arith.cmpi eq, %arg2, %c0_i32 : i32
    %4 = arith.extui %3 : i1 to i32
    %c0_i32_3 = arith.constant 0 : i32
    %5 = arith.cmpi ne, %4, %c0_i32_3 : i32
    scf.if %5 {
      %c0_7 = arith.constant 0 : index
      %c0_8 = arith.constant 0 : index
      %12 = vector.load %arg8[%c0_7, %c0_8] : memref<16x128xf32, #tpu.memory_space<vmem>>, vector<16x128xf32>
      tpu.vector_store %arg8[%c0_7, %c0_8], %2 {strides = array<i32>} : memref<16x128xf32, #tpu.memory_space<vmem>>, vector<16x128xf32>,
    } else {
    }
    %c0_i32_4 = arith.constant 0 : i32
    %6 = arith.cmpi sgt, %arg2, %c0_i32_4 : i32
    %7 = arith.extui %6 : i1 to i32
    %c0_i32_5 = arith.constant 0 : i32
    %8 = arith.cmpi ne, %7, %c0_i32_5 : i32
    scf.if %8 {
      %c0_7 = arith.constant 0 : index
      %c0_8 = arith.constant 0 : index
      %12 = vector.load %arg8[%c0_7, %c0_8] : memref<16x128xf32, #tpu.memory_space<vmem>>, vector<16x128xf32>
      %13 = arith.addf %12, %2 : vector<16x128xf32>
      %c0_9 = arith.constant 0 : index
      %c0_10 = arith.constant 0 : index
      %14 = vector.load %arg8[%c0_9, %c0_10] : memref<16x128xf32, #tpu.memory_space<vmem>>, vector<16x128xf32>
      tpu.vector_store %arg8[%c0_9, %c0_10], %13 {strides = array<i32>} : memref<16x128xf32, #tpu.memory_space<vmem>>, vector<16x128xf32>,
    } else {
    }
    %c8_i32 = arith.constant 8 : i32
    %9 = arith.cmpi eq, %arg2, %c8_i32 : i32
    %10 = arith.extui %9 : i1 to i32
    %c0_i32_6 = arith.constant 0 : i32
    %11 = arith.cmpi ne, %10, %c0_i32_6 : i32
    scf.if %11 {
      %c0_7 = arith.constant 0 : index
      %c0_8 = arith.constant 0 : index
      %12 = vector.load %arg8[%c0_7, %c0_8] : memref<16x128xf32, #tpu.memory_space<vmem>>, vector<16x128xf32>
      %c0_9 = arith.constant 0 : index
      %c0_10 = arith.constant 0 : index
      %13 = vector.load %arg5[%c0_9, %c0_10] : memref<1x128xf32, #tpu.memory_space<vmem>>, vector<1x128xf32>
      %14 = vector.broadcast %13 : vector<1x128xf32> to vector<16x128xf32>
      %15 = arith.mulf %12, %14 : vector<16x128xf32>
      %c0_11 = arith.constant 0 : index
      %c0_12 = arith.constant 0 : index
      %16 = vector.load %arg6[%c0_11, %c0_12] : memref<1x128xf32, #tpu.memory_space<vmem>>, vector<1x128xf32>
      %17 = vector.broadcast %16 : vector<1x128xf32> to vector<16x128xf32>
      %18 = arith.addf %15, %17 : vector<16x128xf32>
      %cst_13 = arith.constant 0.000000e+00 : f32
      %19 = vector.broadcast %cst_13 : f32 to vector<16x128xf32>
      %20 = arith.maximumf %18, %19 : vector<16x128xf32>
      %21 = arith.truncf %20 : vector<16x128xf32> to vector<16x128xbf16>
      %c0_14 = arith.constant 0 : index
      %c0_15 = arith.constant 0 : index
      %22 = vector.load %arg7[%c0_14, %c0_15] : memref<16x128xbf16, #tpu.memory_space<vmem>>, vector<16x128xbf16>
      tpu.vector_store %arg7[%c0_14, %c0_15], %21 {strides = array<i32>} : memref<16x128xbf16, #tpu.memory_space<vmem>>, vector<16x128xbf16>,
    } else {
    }
    return
  }
  func.func @transform_0(%arg0: i32, %arg1: i32, %arg2: i32) -> (i32, i32) {
    %c0_i32 = arith.constant 0 : i32
    return %arg0, %arg2 : i32, i32
  }
  func.func @transform_1(%arg0: i32, %arg1: i32, %arg2: i32) -> (i32, i32) {
    %c0_i32 = arith.constant 0 : i32
    return %arg2, %arg1 : i32, i32
  }
  func.func @transform_2(%arg0: i32, %arg1: i32, %arg2: i32) -> (i32, i32) {
    %c0_i32 = arith.constant 0 : i32
    %c0_i32_0 = arith.constant 0 : i32
    return %c0_i32, %arg1 : i32, i32
  }
  func.func @transform_3(%arg0: i32, %arg1: i32, %arg2: i32) -> (i32, i32) {
    %c0_i32 = arith.constant 0 : i32
    %c0_i32_0 = arith.constant 0 : i32
    return %c0_i32, %arg1 : i32, i32
  }
  func.func @transform_4(%arg0: i32, %arg1: i32, %arg2: i32) -> (i32, i32) {
    %c0_i32 = arith.constant 0 : i32
    return %arg0, %arg1 : i32, i32
  }
}

module attributes {stable_mosaic.version = 11 : i64} {
  func.func @_matmul_affine_kernel(%arg0: i32, %arg1: i32, %arg2: i32, %arg3: memref<16x128xbf16, #tpu.memory_space<vmem>>, %arg4: memref<128x256xbf16, #tpu.memory_space<vmem>>, %arg5: memref<1x256xf32, #tpu.memory_space<vmem>>, %arg6: memref<1x256xf32, #tpu.memory_space<vmem>>, %arg7: memref<16x256xbf16, #tpu.memory_space<vmem>>, %arg8: memref<16x256xf32, #tpu.memory_space<vmem>>) attributes {dimension_semantics = [#tpu.dimension_semantics<parallel>, #tpu.dimension_semantics<parallel>, #tpu.dimension_semantics<arbitrary>], iteration_bounds = array<i64: 2, 1, 9>, scalar_prefetch = 0 : i64, scratch_operands = 1 : i64, tpu.core_type = #tpu.core_type<tc>, window_params = [{transform_indices = @transform_0, window_bounds = array<i64: 16, 128>}, {transform_indices = @transform_1, window_bounds = array<i64: 128, 256>}, {transform_indices = @transform_2, window_bounds = array<i64: 1, 256>}, {transform_indices = @transform_3, window_bounds = array<i64: 1, 256>}, {transform_indices = @transform_4, window_bounds = array<i64: 16, 256>}]} {
    %c0 = arith.constant 0 : index
    %c0_0 = arith.constant 0 : index
    %0 = vector.load %arg3[%c0, %c0_0] : memref<16x128xbf16, #tpu.memory_space<vmem>>, vector<16x128xbf16>
    %c0_1 = arith.constant 0 : index
    %c0_2 = arith.constant 0 : index
    %1 = vector.load %arg4[%c0_1, %c0_2] : memref<128x256xbf16, #tpu.memory_space<vmem>>, vector<128x256xbf16>
    %cst = arith.constant dense<0.000000e+00> : vector<16x256xf32>
    %2 = tpu.matmul %0, %1, %cst {dimension_numbers = #tpu.dot_dimension_numbers<[1], [0], [0], [1], [0, 0, 1, 1], [], []>} : vector<16x128xbf16>, vector<128x256xbf16>, vector<16x256xf32> -> vector<16x256xf32>
    %c0_i32 = arith.constant 0 : i32
    %3 = arith.cmpi eq, %arg2, %c0_i32 : i32
    %4 = arith.extui %3 : i1 to i32
    %c0_i32_3 = arith.constant 0 : i32
    %5 = arith.cmpi ne, %4, %c0_i32_3 : i32
    scf.if %5 {
      %c0_7 = arith.constant 0 : index
      %c0_8 = arith.constant 0 : index
      %12 = vector.load %arg8[%c0_7, %c0_8] : memref<16x256xf32, #tpu.memory_space<vmem>>, vector<16x256xf32>
      tpu.vector_store %arg8[%c0_7, %c0_8], %2 {strides = array<i32>} : memref<16x256xf32, #tpu.memory_space<vmem>>, vector<16x256xf32>,
    } else {
    }
    %c0_i32_4 = arith.constant 0 : i32
    %6 = arith.cmpi sgt, %arg2, %c0_i32_4 : i32
    %7 = arith.extui %6 : i1 to i32
    %c0_i32_5 = arith.constant 0 : i32
    %8 = arith.cmpi ne, %7, %c0_i32_5 : i32
    scf.if %8 {
      %c0_7 = arith.constant 0 : index
      %c0_8 = arith.constant 0 : index
      %12 = vector.load %arg8[%c0_7, %c0_8] : memref<16x256xf32, #tpu.memory_space<vmem>>, vector<16x256xf32>
      %13 = arith.addf %12, %2 : vector<16x256xf32>
      %c0_9 = arith.constant 0 : index
      %c0_10 = arith.constant 0 : index
      %14 = vector.load %arg8[%c0_9, %c0_10] : memref<16x256xf32, #tpu.memory_space<vmem>>, vector<16x256xf32>
      tpu.vector_store %arg8[%c0_9, %c0_10], %13 {strides = array<i32>} : memref<16x256xf32, #tpu.memory_space<vmem>>, vector<16x256xf32>,
    } else {
    }
    %c8_i32 = arith.constant 8 : i32
    %9 = arith.cmpi eq, %arg2, %c8_i32 : i32
    %10 = arith.extui %9 : i1 to i32
    %c0_i32_6 = arith.constant 0 : i32
    %11 = arith.cmpi ne, %10, %c0_i32_6 : i32
    scf.if %11 {
      %c0_7 = arith.constant 0 : index
      %c0_8 = arith.constant 0 : index
      %12 = vector.load %arg8[%c0_7, %c0_8] : memref<16x256xf32, #tpu.memory_space<vmem>>, vector<16x256xf32>
      %c0_9 = arith.constant 0 : index
      %c0_10 = arith.constant 0 : index
      %13 = vector.load %arg5[%c0_9, %c0_10] : memref<1x256xf32, #tpu.memory_space<vmem>>, vector<1x256xf32>
      %14 = vector.broadcast %13 : vector<1x256xf32> to vector<16x256xf32>
      %15 = arith.mulf %12, %14 : vector<16x256xf32>
      %c0_11 = arith.constant 0 : index
      %c0_12 = arith.constant 0 : index
      %16 = vector.load %arg6[%c0_11, %c0_12] : memref<1x256xf32, #tpu.memory_space<vmem>>, vector<1x256xf32>
      %17 = vector.broadcast %16 : vector<1x256xf32> to vector<16x256xf32>
      %18 = arith.addf %15, %17 : vector<16x256xf32>
      %cst_13 = arith.constant 0.000000e+00 : f32
      %19 = vector.broadcast %cst_13 : f32 to vector<16x256xf32>
      %20 = arith.maximumf %18, %19 : vector<16x256xf32>
      %21 = arith.truncf %20 : vector<16x256xf32> to vector<16x256xbf16>
      %c0_14 = arith.constant 0 : index
      %c0_15 = arith.constant 0 : index
      %22 = vector.load %arg7[%c0_14, %c0_15] : memref<16x256xbf16, #tpu.memory_space<vmem>>, vector<16x256xbf16>
      tpu.vector_store %arg7[%c0_14, %c0_15], %21 {strides = array<i32>} : memref<16x256xbf16, #tpu.memory_space<vmem>>, vector<16x256xbf16>,
    } else {
    }
    return
  }
  func.func @transform_0(%arg0: i32, %arg1: i32, %arg2: i32) -> (i32, i32) {
    %c0_i32 = arith.constant 0 : i32
    return %arg0, %arg2 : i32, i32
  }
  func.func @transform_1(%arg0: i32, %arg1: i32, %arg2: i32) -> (i32, i32) {
    %c0_i32 = arith.constant 0 : i32
    return %arg2, %arg1 : i32, i32
  }
  func.func @transform_2(%arg0: i32, %arg1: i32, %arg2: i32) -> (i32, i32) {
    %c0_i32 = arith.constant 0 : i32
    %c0_i32_0 = arith.constant 0 : i32
    return %c0_i32, %arg1 : i32, i32
  }
  func.func @transform_3(%arg0: i32, %arg1: i32, %arg2: i32) -> (i32, i32) {
    %c0_i32 = arith.constant 0 : i32
    %c0_i32_0 = arith.constant 0 : i32
    return %c0_i32, %arg1 : i32, i32
  }
  func.func @transform_4(%arg0: i32, %arg1: i32, %arg2: i32) -> (i32, i32) {
    %c0_i32 = arith.constant 0 : i32
    return %arg0, %arg1 : i32, i32
  }
}

module attributes {stable_mosaic.version = 11 : i64} {
  func.func @_matmul_affine_kernel(%arg0: i32, %arg1: i32, %arg2: i32, %arg3: memref<16x128xbf16, #tpu.memory_space<vmem>>, %arg4: memref<128x256xbf16, #tpu.memory_space<vmem>>, %arg5: memref<1x256xf32, #tpu.memory_space<vmem>>, %arg6: memref<1x256xf32, #tpu.memory_space<vmem>>, %arg7: memref<16x256xbf16, #tpu.memory_space<vmem>>, %arg8: memref<16x256xf32, #tpu.memory_space<vmem>>) attributes {dimension_semantics = [#tpu.dimension_semantics<parallel>, #tpu.dimension_semantics<parallel>, #tpu.dimension_semantics<arbitrary>], iteration_bounds = array<i64: 2, 1, 1>, scalar_prefetch = 0 : i64, scratch_operands = 1 : i64, tpu.core_type = #tpu.core_type<tc>, window_params = [{transform_indices = @transform_0, window_bounds = array<i64: 16, 128>}, {transform_indices = @transform_1, window_bounds = array<i64: 128, 256>}, {transform_indices = @transform_2, window_bounds = array<i64: 1, 256>}, {transform_indices = @transform_3, window_bounds = array<i64: 1, 256>}, {transform_indices = @transform_4, window_bounds = array<i64: 16, 256>}]} {
    %c0 = arith.constant 0 : index
    %c0_0 = arith.constant 0 : index
    %0 = vector.load %arg3[%c0, %c0_0] : memref<16x128xbf16, #tpu.memory_space<vmem>>, vector<16x128xbf16>
    %c0_1 = arith.constant 0 : index
    %c0_2 = arith.constant 0 : index
    %1 = vector.load %arg4[%c0_1, %c0_2] : memref<128x256xbf16, #tpu.memory_space<vmem>>, vector<128x256xbf16>
    %cst = arith.constant dense<0.000000e+00> : vector<16x256xf32>
    %2 = tpu.matmul %0, %1, %cst {dimension_numbers = #tpu.dot_dimension_numbers<[1], [0], [0], [1], [0, 0, 1, 1], [], []>} : vector<16x128xbf16>, vector<128x256xbf16>, vector<16x256xf32> -> vector<16x256xf32>
    %c0_i32 = arith.constant 0 : i32
    %3 = arith.cmpi eq, %arg2, %c0_i32 : i32
    %4 = arith.extui %3 : i1 to i32
    %c0_i32_3 = arith.constant 0 : i32
    %5 = arith.cmpi ne, %4, %c0_i32_3 : i32
    scf.if %5 {
      %c0_8 = arith.constant 0 : index
      %c0_9 = arith.constant 0 : index
      %12 = vector.load %arg8[%c0_8, %c0_9] : memref<16x256xf32, #tpu.memory_space<vmem>>, vector<16x256xf32>
      tpu.vector_store %arg8[%c0_8, %c0_9], %2 {strides = array<i32>} : memref<16x256xf32, #tpu.memory_space<vmem>>, vector<16x256xf32>,
    } else {
    }
    %c0_i32_4 = arith.constant 0 : i32
    %6 = arith.cmpi sgt, %arg2, %c0_i32_4 : i32
    %7 = arith.extui %6 : i1 to i32
    %c0_i32_5 = arith.constant 0 : i32
    %8 = arith.cmpi ne, %7, %c0_i32_5 : i32
    scf.if %8 {
      %c0_8 = arith.constant 0 : index
      %c0_9 = arith.constant 0 : index
      %12 = vector.load %arg8[%c0_8, %c0_9] : memref<16x256xf32, #tpu.memory_space<vmem>>, vector<16x256xf32>
      %13 = arith.addf %12, %2 : vector<16x256xf32>
      %c0_10 = arith.constant 0 : index
      %c0_11 = arith.constant 0 : index
      %14 = vector.load %arg8[%c0_10, %c0_11] : memref<16x256xf32, #tpu.memory_space<vmem>>, vector<16x256xf32>
      tpu.vector_store %arg8[%c0_10, %c0_11], %13 {strides = array<i32>} : memref<16x256xf32, #tpu.memory_space<vmem>>, vector<16x256xf32>,
    } else {
    }
    %c0_i32_6 = arith.constant 0 : i32
    %9 = arith.cmpi eq, %arg2, %c0_i32_6 : i32
    %10 = arith.extui %9 : i1 to i32
    %c0_i32_7 = arith.constant 0 : i32
    %11 = arith.cmpi ne, %10, %c0_i32_7 : i32
    scf.if %11 {
      %c0_8 = arith.constant 0 : index
      %c0_9 = arith.constant 0 : index
      %12 = vector.load %arg8[%c0_8, %c0_9] : memref<16x256xf32, #tpu.memory_space<vmem>>, vector<16x256xf32>
      %c0_10 = arith.constant 0 : index
      %c0_11 = arith.constant 0 : index
      %13 = vector.load %arg5[%c0_10, %c0_11] : memref<1x256xf32, #tpu.memory_space<vmem>>, vector<1x256xf32>
      %14 = vector.broadcast %13 : vector<1x256xf32> to vector<16x256xf32>
      %15 = arith.mulf %12, %14 : vector<16x256xf32>
      %c0_12 = arith.constant 0 : index
      %c0_13 = arith.constant 0 : index
      %16 = vector.load %arg6[%c0_12, %c0_13] : memref<1x256xf32, #tpu.memory_space<vmem>>, vector<1x256xf32>
      %17 = vector.broadcast %16 : vector<1x256xf32> to vector<16x256xf32>
      %18 = arith.addf %15, %17 : vector<16x256xf32>
      %19 = arith.truncf %18 : vector<16x256xf32> to vector<16x256xbf16>
      %c0_14 = arith.constant 0 : index
      %c0_15 = arith.constant 0 : index
      %20 = vector.load %arg7[%c0_14, %c0_15] : memref<16x256xbf16, #tpu.memory_space<vmem>>, vector<16x256xbf16>
      tpu.vector_store %arg7[%c0_14, %c0_15], %19 {strides = array<i32>} : memref<16x256xbf16, #tpu.memory_space<vmem>>, vector<16x256xbf16>,
    } else {
    }
    return
  }
  func.func @transform_0(%arg0: i32, %arg1: i32, %arg2: i32) -> (i32, i32) {
    %c0_i32 = arith.constant 0 : i32
    return %arg0, %arg2 : i32, i32
  }
  func.func @transform_1(%arg0: i32, %arg1: i32, %arg2: i32) -> (i32, i32) {
    %c0_i32 = arith.constant 0 : i32
    return %arg2, %arg1 : i32, i32
  }
  func.func @transform_2(%arg0: i32, %arg1: i32, %arg2: i32) -> (i32, i32) {
    %c0_i32 = arith.constant 0 : i32
    %c0_i32_0 = arith.constant 0 : i32
    return %c0_i32, %arg1 : i32, i32
  }
  func.func @transform_3(%arg0: i32, %arg1: i32, %arg2: i32) -> (i32, i32) {
    %c0_i32 = arith.constant 0 : i32
    %c0_i32_0 = arith.constant 0 : i32
    return %c0_i32, %arg1 : i32, i32
  }
  func.func @transform_4(%arg0: i32, %arg1: i32, %arg2: i32) -> (i32, i32) {
    %c0_i32 = arith.constant 0 : i32
    return %arg0, %arg1 : i32, i32
  }
}

module attributes {stable_mosaic.version = 11 : i64} {
  func.func @_matmul_affine_kernel(%arg0: i32, %arg1: i32, %arg2: i32, %arg3: memref<16x256xbf16, #tpu.memory_space<vmem>>, %arg4: memref<256x256xbf16, #tpu.memory_space<vmem>>, %arg5: memref<1x256xf32, #tpu.memory_space<vmem>>, %arg6: memref<1x256xf32, #tpu.memory_space<vmem>>, %arg7: memref<16x256xbf16, #tpu.memory_space<vmem>>, %arg8: memref<16x256xbf16, #tpu.memory_space<vmem>>, %arg9: memref<16x256xf32, #tpu.memory_space<vmem>>) attributes {dimension_semantics = [#tpu.dimension_semantics<parallel>, #tpu.dimension_semantics<parallel>, #tpu.dimension_semantics<arbitrary>], iteration_bounds = array<i64: 2, 1, 9>, scalar_prefetch = 0 : i64, scratch_operands = 1 : i64, tpu.core_type = #tpu.core_type<tc>, window_params = [{transform_indices = @transform_0, window_bounds = array<i64: 16, 256>}, {transform_indices = @transform_1, window_bounds = array<i64: 256, 256>}, {transform_indices = @transform_2, window_bounds = array<i64: 1, 256>}, {transform_indices = @transform_3, window_bounds = array<i64: 1, 256>}, {transform_indices = @transform_4, window_bounds = array<i64: 16, 256>}, {transform_indices = @transform_5, window_bounds = array<i64: 16, 256>}]} {
    %c0 = arith.constant 0 : index
    %c0_0 = arith.constant 0 : index
    %0 = vector.load %arg3[%c0, %c0_0] : memref<16x256xbf16, #tpu.memory_space<vmem>>, vector<16x256xbf16>
    %c0_1 = arith.constant 0 : index
    %c0_2 = arith.constant 0 : index
    %1 = vector.load %arg4[%c0_1, %c0_2] : memref<256x256xbf16, #tpu.memory_space<vmem>>, vector<256x256xbf16>
    %cst = arith.constant dense<0.000000e+00> : vector<16x256xf32>
    %2 = tpu.matmul %0, %1, %cst {dimension_numbers = #tpu.dot_dimension_numbers<[1], [0], [0], [1], [0, 0, 1, 1], [], []>} : vector<16x256xbf16>, vector<256x256xbf16>, vector<16x256xf32> -> vector<16x256xf32>
    %c0_i32 = arith.constant 0 : i32
    %3 = arith.cmpi eq, %arg2, %c0_i32 : i32
    %4 = arith.extui %3 : i1 to i32
    %c0_i32_3 = arith.constant 0 : i32
    %5 = arith.cmpi ne, %4, %c0_i32_3 : i32
    scf.if %5 {
      %c0_7 = arith.constant 0 : index
      %c0_8 = arith.constant 0 : index
      %12 = vector.load %arg9[%c0_7, %c0_8] : memref<16x256xf32, #tpu.memory_space<vmem>>, vector<16x256xf32>
      tpu.vector_store %arg9[%c0_7, %c0_8], %2 {strides = array<i32>} : memref<16x256xf32, #tpu.memory_space<vmem>>, vector<16x256xf32>,
    } else {
    }
    %c0_i32_4 = arith.constant 0 : i32
    %6 = arith.cmpi sgt, %arg2, %c0_i32_4 : i32
    %7 = arith.extui %6 : i1 to i32
    %c0_i32_5 = arith.constant 0 : i32
    %8 = arith.cmpi ne, %7, %c0_i32_5 : i32
    scf.if %8 {
      %c0_7 = arith.constant 0 : index
      %c0_8 = arith.constant 0 : index
      %12 = vector.load %arg9[%c0_7, %c0_8] : memref<16x256xf32, #tpu.memory_space<vmem>>, vector<16x256xf32>
      %13 = arith.addf %12, %2 : vector<16x256xf32>
      %c0_9 = arith.constant 0 : index
      %c0_10 = arith.constant 0 : index
      %14 = vector.load %arg9[%c0_9, %c0_10] : memref<16x256xf32, #tpu.memory_space<vmem>>, vector<16x256xf32>
      tpu.vector_store %arg9[%c0_9, %c0_10], %13 {strides = array<i32>} : memref<16x256xf32, #tpu.memory_space<vmem>>, vector<16x256xf32>,
    } else {
    }
    %c8_i32 = arith.constant 8 : i32
    %9 = arith.cmpi eq, %arg2, %c8_i32 : i32
    %10 = arith.extui %9 : i1 to i32
    %c0_i32_6 = arith.constant 0 : i32
    %11 = arith.cmpi ne, %10, %c0_i32_6 : i32
    scf.if %11 {
      %c0_7 = arith.constant 0 : index
      %c0_8 = arith.constant 0 : index
      %12 = vector.load %arg9[%c0_7, %c0_8] : memref<16x256xf32, #tpu.memory_space<vmem>>, vector<16x256xf32>
      %c0_9 = arith.constant 0 : index
      %c0_10 = arith.constant 0 : index
      %13 = vector.load %arg5[%c0_9, %c0_10] : memref<1x256xf32, #tpu.memory_space<vmem>>, vector<1x256xf32>
      %14 = vector.broadcast %13 : vector<1x256xf32> to vector<16x256xf32>
      %15 = arith.mulf %12, %14 : vector<16x256xf32>
      %c0_11 = arith.constant 0 : index
      %c0_12 = arith.constant 0 : index
      %16 = vector.load %arg6[%c0_11, %c0_12] : memref<1x256xf32, #tpu.memory_space<vmem>>, vector<1x256xf32>
      %17 = vector.broadcast %16 : vector<1x256xf32> to vector<16x256xf32>
      %18 = arith.addf %15, %17 : vector<16x256xf32>
      %c0_13 = arith.constant 0 : index
      %c0_14 = arith.constant 0 : index
      %19 = vector.load %arg7[%c0_13, %c0_14] : memref<16x256xbf16, #tpu.memory_space<vmem>>, vector<16x256xbf16>
      %20 = arith.extf %19 : vector<16x256xbf16> to vector<16x256xf32>
      %21 = arith.addf %18, %20 : vector<16x256xf32>
      %cst_15 = arith.constant 0.000000e+00 : f32
      %22 = vector.broadcast %cst_15 : f32 to vector<16x256xf32>
      %23 = arith.maximumf %21, %22 : vector<16x256xf32>
      %24 = arith.truncf %23 : vector<16x256xf32> to vector<16x256xbf16>
      %c0_16 = arith.constant 0 : index
      %c0_17 = arith.constant 0 : index
      %25 = vector.load %arg8[%c0_16, %c0_17] : memref<16x256xbf16, #tpu.memory_space<vmem>>, vector<16x256xbf16>
      tpu.vector_store %arg8[%c0_16, %c0_17], %24 {strides = array<i32>} : memref<16x256xbf16, #tpu.memory_space<vmem>>, vector<16x256xbf16>,
    } else {
    }
    return
  }
  func.func @transform_0(%arg0: i32, %arg1: i32, %arg2: i32) -> (i32, i32) {
    %c0_i32 = arith.constant 0 : i32
    return %arg0, %arg2 : i32, i32
  }
  func.func @transform_1(%arg0: i32, %arg1: i32, %arg2: i32) -> (i32, i32) {
    %c0_i32 = arith.constant 0 : i32
    return %arg2, %arg1 : i32, i32
  }
  func.func @transform_2(%arg0: i32, %arg1: i32, %arg2: i32) -> (i32, i32) {
    %c0_i32 = arith.constant 0 : i32
    %c0_i32_0 = arith.constant 0 : i32
    return %c0_i32, %arg1 : i32, i32
  }
  func.func @transform_3(%arg0: i32, %arg1: i32, %arg2: i32) -> (i32, i32) {
    %c0_i32 = arith.constant 0 : i32
    %c0_i32_0 = arith.constant 0 : i32
    return %c0_i32, %arg1 : i32, i32
  }
  func.func @transform_4(%arg0: i32, %arg1: i32, %arg2: i32) -> (i32, i32) {
    %c0_i32 = arith.constant 0 : i32
    return %arg0, %arg1 : i32, i32
  }
  func.func @transform_5(%arg0: i32, %arg1: i32, %arg2: i32) -> (i32, i32) {
    %c0_i32 = arith.constant 0 : i32
    return %arg0, %arg1 : i32, i32
  }
}

module attributes {stable_mosaic.version = 11 : i64} {
  func.func @_matmul_affine_kernel(%arg0: i32, %arg1: i32, %arg2: i32, %arg3: memref<16x256xbf16, #tpu.memory_space<vmem>>, %arg4: memref<256x256xbf16, #tpu.memory_space<vmem>>, %arg5: memref<1x256xf32, #tpu.memory_space<vmem>>, %arg6: memref<1x256xf32, #tpu.memory_space<vmem>>, %arg7: memref<16x256xbf16, #tpu.memory_space<vmem>>, %arg8: memref<16x256xf32, #tpu.memory_space<vmem>>) attributes {dimension_semantics = [#tpu.dimension_semantics<parallel>, #tpu.dimension_semantics<parallel>, #tpu.dimension_semantics<arbitrary>], iteration_bounds = array<i64: 2, 1, 9>, scalar_prefetch = 0 : i64, scratch_operands = 1 : i64, tpu.core_type = #tpu.core_type<tc>, window_params = [{transform_indices = @transform_0, window_bounds = array<i64: 16, 256>}, {transform_indices = @transform_1, window_bounds = array<i64: 256, 256>}, {transform_indices = @transform_2, window_bounds = array<i64: 1, 256>}, {transform_indices = @transform_3, window_bounds = array<i64: 1, 256>}, {transform_indices = @transform_4, window_bounds = array<i64: 16, 256>}]} {
    %c0 = arith.constant 0 : index
    %c0_0 = arith.constant 0 : index
    %0 = vector.load %arg3[%c0, %c0_0] : memref<16x256xbf16, #tpu.memory_space<vmem>>, vector<16x256xbf16>
    %c0_1 = arith.constant 0 : index
    %c0_2 = arith.constant 0 : index
    %1 = vector.load %arg4[%c0_1, %c0_2] : memref<256x256xbf16, #tpu.memory_space<vmem>>, vector<256x256xbf16>
    %cst = arith.constant dense<0.000000e+00> : vector<16x256xf32>
    %2 = tpu.matmul %0, %1, %cst {dimension_numbers = #tpu.dot_dimension_numbers<[1], [0], [0], [1], [0, 0, 1, 1], [], []>} : vector<16x256xbf16>, vector<256x256xbf16>, vector<16x256xf32> -> vector<16x256xf32>
    %c0_i32 = arith.constant 0 : i32
    %3 = arith.cmpi eq, %arg2, %c0_i32 : i32
    %4 = arith.extui %3 : i1 to i32
    %c0_i32_3 = arith.constant 0 : i32
    %5 = arith.cmpi ne, %4, %c0_i32_3 : i32
    scf.if %5 {
      %c0_7 = arith.constant 0 : index
      %c0_8 = arith.constant 0 : index
      %12 = vector.load %arg8[%c0_7, %c0_8] : memref<16x256xf32, #tpu.memory_space<vmem>>, vector<16x256xf32>
      tpu.vector_store %arg8[%c0_7, %c0_8], %2 {strides = array<i32>} : memref<16x256xf32, #tpu.memory_space<vmem>>, vector<16x256xf32>,
    } else {
    }
    %c0_i32_4 = arith.constant 0 : i32
    %6 = arith.cmpi sgt, %arg2, %c0_i32_4 : i32
    %7 = arith.extui %6 : i1 to i32
    %c0_i32_5 = arith.constant 0 : i32
    %8 = arith.cmpi ne, %7, %c0_i32_5 : i32
    scf.if %8 {
      %c0_7 = arith.constant 0 : index
      %c0_8 = arith.constant 0 : index
      %12 = vector.load %arg8[%c0_7, %c0_8] : memref<16x256xf32, #tpu.memory_space<vmem>>, vector<16x256xf32>
      %13 = arith.addf %12, %2 : vector<16x256xf32>
      %c0_9 = arith.constant 0 : index
      %c0_10 = arith.constant 0 : index
      %14 = vector.load %arg8[%c0_9, %c0_10] : memref<16x256xf32, #tpu.memory_space<vmem>>, vector<16x256xf32>
      tpu.vector_store %arg8[%c0_9, %c0_10], %13 {strides = array<i32>} : memref<16x256xf32, #tpu.memory_space<vmem>>, vector<16x256xf32>,
    } else {
    }
    %c8_i32 = arith.constant 8 : i32
    %9 = arith.cmpi eq, %arg2, %c8_i32 : i32
    %10 = arith.extui %9 : i1 to i32
    %c0_i32_6 = arith.constant 0 : i32
    %11 = arith.cmpi ne, %10, %c0_i32_6 : i32
    scf.if %11 {
      %c0_7 = arith.constant 0 : index
      %c0_8 = arith.constant 0 : index
      %12 = vector.load %arg8[%c0_7, %c0_8] : memref<16x256xf32, #tpu.memory_space<vmem>>, vector<16x256xf32>
      %c0_9 = arith.constant 0 : index
      %c0_10 = arith.constant 0 : index
      %13 = vector.load %arg5[%c0_9, %c0_10] : memref<1x256xf32, #tpu.memory_space<vmem>>, vector<1x256xf32>
      %14 = vector.broadcast %13 : vector<1x256xf32> to vector<16x256xf32>
      %15 = arith.mulf %12, %14 : vector<16x256xf32>
      %c0_11 = arith.constant 0 : index
      %c0_12 = arith.constant 0 : index
      %16 = vector.load %arg6[%c0_11, %c0_12] : memref<1x256xf32, #tpu.memory_space<vmem>>, vector<1x256xf32>
      %17 = vector.broadcast %16 : vector<1x256xf32> to vector<16x256xf32>
      %18 = arith.addf %15, %17 : vector<16x256xf32>
      %cst_13 = arith.constant 0.000000e+00 : f32
      %19 = vector.broadcast %cst_13 : f32 to vector<16x256xf32>
      %20 = arith.maximumf %18, %19 : vector<16x256xf32>
      %21 = arith.truncf %20 : vector<16x256xf32> to vector<16x256xbf16>
      %c0_14 = arith.constant 0 : index
      %c0_15 = arith.constant 0 : index
      %22 = vector.load %arg7[%c0_14, %c0_15] : memref<16x256xbf16, #tpu.memory_space<vmem>>, vector<16x256xbf16>
      tpu.vector_store %arg7[%c0_14, %c0_15], %21 {strides = array<i32>} : memref<16x256xbf16, #tpu.memory_space<vmem>>, vector<16x256xbf16>,
    } else {
    }
    return
  }
  func.func @transform_0(%arg0: i32, %arg1: i32, %arg2: i32) -> (i32, i32) {
    %c0_i32 = arith.constant 0 : i32
    return %arg0, %arg2 : i32, i32
  }
  func.func @transform_1(%arg0: i32, %arg1: i32, %arg2: i32) -> (i32, i32) {
    %c0_i32 = arith.constant 0 : i32
    return %arg2, %arg1 : i32, i32
  }
  func.func @transform_2(%arg0: i32, %arg1: i32, %arg2: i32) -> (i32, i32) {
    %c0_i32 = arith.constant 0 : i32
    %c0_i32_0 = arith.constant 0 : i32
    return %c0_i32, %arg1 : i32, i32
  }
  func.func @transform_3(%arg0: i32, %arg1: i32, %arg2: i32) -> (i32, i32) {
    %c0_i32 = arith.constant 0 : i32
    %c0_i32_0 = arith.constant 0 : i32
    return %c0_i32, %arg1 : i32, i32
  }
  func.func @transform_4(%arg0: i32, %arg1: i32, %arg2: i32) -> (i32, i32) {
    %c0_i32 = arith.constant 0 : i32
    return %arg0, %arg1 : i32, i32
  }
}

module attributes {stable_mosaic.version = 11 : i64} {
  func.func @_matmul_affine_kernel(%arg0: i32, %arg1: i32, %arg2: i32, %arg3: memref<16x256xbf16, #tpu.memory_space<vmem>>, %arg4: memref<256x512xbf16, #tpu.memory_space<vmem>>, %arg5: memref<1x512xf32, #tpu.memory_space<vmem>>, %arg6: memref<1x512xf32, #tpu.memory_space<vmem>>, %arg7: memref<16x512xbf16, #tpu.memory_space<vmem>>, %arg8: memref<16x512xf32, #tpu.memory_space<vmem>>) attributes {dimension_semantics = [#tpu.dimension_semantics<parallel>, #tpu.dimension_semantics<parallel>, #tpu.dimension_semantics<arbitrary>], iteration_bounds = array<i64: 2, 1, 9>, scalar_prefetch = 0 : i64, scratch_operands = 1 : i64, tpu.core_type = #tpu.core_type<tc>, window_params = [{transform_indices = @transform_0, window_bounds = array<i64: 16, 256>}, {transform_indices = @transform_1, window_bounds = array<i64: 256, 512>}, {transform_indices = @transform_2, window_bounds = array<i64: 1, 512>}, {transform_indices = @transform_3, window_bounds = array<i64: 1, 512>}, {transform_indices = @transform_4, window_bounds = array<i64: 16, 512>}]} {
    %c0 = arith.constant 0 : index
    %c0_0 = arith.constant 0 : index
    %0 = vector.load %arg3[%c0, %c0_0] : memref<16x256xbf16, #tpu.memory_space<vmem>>, vector<16x256xbf16>
    %c0_1 = arith.constant 0 : index
    %c0_2 = arith.constant 0 : index
    %1 = vector.load %arg4[%c0_1, %c0_2] : memref<256x512xbf16, #tpu.memory_space<vmem>>, vector<256x512xbf16>
    %cst = arith.constant dense<0.000000e+00> : vector<16x512xf32>
    %2 = tpu.matmul %0, %1, %cst {dimension_numbers = #tpu.dot_dimension_numbers<[1], [0], [0], [1], [0, 0, 1, 1], [], []>} : vector<16x256xbf16>, vector<256x512xbf16>, vector<16x512xf32> -> vector<16x512xf32>
    %c0_i32 = arith.constant 0 : i32
    %3 = arith.cmpi eq, %arg2, %c0_i32 : i32
    %4 = arith.extui %3 : i1 to i32
    %c0_i32_3 = arith.constant 0 : i32
    %5 = arith.cmpi ne, %4, %c0_i32_3 : i32
    scf.if %5 {
      %c0_7 = arith.constant 0 : index
      %c0_8 = arith.constant 0 : index
      %12 = vector.load %arg8[%c0_7, %c0_8] : memref<16x512xf32, #tpu.memory_space<vmem>>, vector<16x512xf32>
      tpu.vector_store %arg8[%c0_7, %c0_8], %2 {strides = array<i32>} : memref<16x512xf32, #tpu.memory_space<vmem>>, vector<16x512xf32>,
    } else {
    }
    %c0_i32_4 = arith.constant 0 : i32
    %6 = arith.cmpi sgt, %arg2, %c0_i32_4 : i32
    %7 = arith.extui %6 : i1 to i32
    %c0_i32_5 = arith.constant 0 : i32
    %8 = arith.cmpi ne, %7, %c0_i32_5 : i32
    scf.if %8 {
      %c0_7 = arith.constant 0 : index
      %c0_8 = arith.constant 0 : index
      %12 = vector.load %arg8[%c0_7, %c0_8] : memref<16x512xf32, #tpu.memory_space<vmem>>, vector<16x512xf32>
      %13 = arith.addf %12, %2 : vector<16x512xf32>
      %c0_9 = arith.constant 0 : index
      %c0_10 = arith.constant 0 : index
      %14 = vector.load %arg8[%c0_9, %c0_10] : memref<16x512xf32, #tpu.memory_space<vmem>>, vector<16x512xf32>
      tpu.vector_store %arg8[%c0_9, %c0_10], %13 {strides = array<i32>} : memref<16x512xf32, #tpu.memory_space<vmem>>, vector<16x512xf32>,
    } else {
    }
    %c8_i32 = arith.constant 8 : i32
    %9 = arith.cmpi eq, %arg2, %c8_i32 : i32
    %10 = arith.extui %9 : i1 to i32
    %c0_i32_6 = arith.constant 0 : i32
    %11 = arith.cmpi ne, %10, %c0_i32_6 : i32
    scf.if %11 {
      %c0_7 = arith.constant 0 : index
      %c0_8 = arith.constant 0 : index
      %12 = vector.load %arg8[%c0_7, %c0_8] : memref<16x512xf32, #tpu.memory_space<vmem>>, vector<16x512xf32>
      %c0_9 = arith.constant 0 : index
      %c0_10 = arith.constant 0 : index
      %13 = vector.load %arg5[%c0_9, %c0_10] : memref<1x512xf32, #tpu.memory_space<vmem>>, vector<1x512xf32>
      %14 = vector.broadcast %13 : vector<1x512xf32> to vector<16x512xf32>
      %15 = arith.mulf %12, %14 : vector<16x512xf32>
      %c0_11 = arith.constant 0 : index
      %c0_12 = arith.constant 0 : index
      %16 = vector.load %arg6[%c0_11, %c0_12] : memref<1x512xf32, #tpu.memory_space<vmem>>, vector<1x512xf32>
      %17 = vector.broadcast %16 : vector<1x512xf32> to vector<16x512xf32>
      %18 = arith.addf %15, %17 : vector<16x512xf32>
      %cst_13 = arith.constant 0.000000e+00 : f32
      %19 = vector.broadcast %cst_13 : f32 to vector<16x512xf32>
      %20 = arith.maximumf %18, %19 : vector<16x512xf32>
      %21 = arith.truncf %20 : vector<16x512xf32> to vector<16x512xbf16>
      %c0_14 = arith.constant 0 : index
      %c0_15 = arith.constant 0 : index
      %22 = vector.load %arg7[%c0_14, %c0_15] : memref<16x512xbf16, #tpu.memory_space<vmem>>, vector<16x512xbf16>
      tpu.vector_store %arg7[%c0_14, %c0_15], %21 {strides = array<i32>} : memref<16x512xbf16, #tpu.memory_space<vmem>>, vector<16x512xbf16>,
    } else {
    }
    return
  }
  func.func @transform_0(%arg0: i32, %arg1: i32, %arg2: i32) -> (i32, i32) {
    %c0_i32 = arith.constant 0 : i32
    return %arg0, %arg2 : i32, i32
  }
  func.func @transform_1(%arg0: i32, %arg1: i32, %arg2: i32) -> (i32, i32) {
    %c0_i32 = arith.constant 0 : i32
    return %arg2, %arg1 : i32, i32
  }
  func.func @transform_2(%arg0: i32, %arg1: i32, %arg2: i32) -> (i32, i32) {
    %c0_i32 = arith.constant 0 : i32
    %c0_i32_0 = arith.constant 0 : i32
    return %c0_i32, %arg1 : i32, i32
  }
  func.func @transform_3(%arg0: i32, %arg1: i32, %arg2: i32) -> (i32, i32) {
    %c0_i32 = arith.constant 0 : i32
    %c0_i32_0 = arith.constant 0 : i32
    return %c0_i32, %arg1 : i32, i32
  }
  func.func @transform_4(%arg0: i32, %arg1: i32, %arg2: i32) -> (i32, i32) {
    %c0_i32 = arith.constant 0 : i32
    return %arg0, %arg1 : i32, i32
  }
}

module attributes {stable_mosaic.version = 11 : i64} {
  func.func @_matmul_affine_kernel(%arg0: i32, %arg1: i32, %arg2: i32, %arg3: memref<16x256xbf16, #tpu.memory_space<vmem>>, %arg4: memref<256x512xbf16, #tpu.memory_space<vmem>>, %arg5: memref<1x512xf32, #tpu.memory_space<vmem>>, %arg6: memref<1x512xf32, #tpu.memory_space<vmem>>, %arg7: memref<16x512xbf16, #tpu.memory_space<vmem>>, %arg8: memref<16x512xf32, #tpu.memory_space<vmem>>) attributes {dimension_semantics = [#tpu.dimension_semantics<parallel>, #tpu.dimension_semantics<parallel>, #tpu.dimension_semantics<arbitrary>], iteration_bounds = array<i64: 2, 1, 1>, scalar_prefetch = 0 : i64, scratch_operands = 1 : i64, tpu.core_type = #tpu.core_type<tc>, window_params = [{transform_indices = @transform_0, window_bounds = array<i64: 16, 256>}, {transform_indices = @transform_1, window_bounds = array<i64: 256, 512>}, {transform_indices = @transform_2, window_bounds = array<i64: 1, 512>}, {transform_indices = @transform_3, window_bounds = array<i64: 1, 512>}, {transform_indices = @transform_4, window_bounds = array<i64: 16, 512>}]} {
    %c0 = arith.constant 0 : index
    %c0_0 = arith.constant 0 : index
    %0 = vector.load %arg3[%c0, %c0_0] : memref<16x256xbf16, #tpu.memory_space<vmem>>, vector<16x256xbf16>
    %c0_1 = arith.constant 0 : index
    %c0_2 = arith.constant 0 : index
    %1 = vector.load %arg4[%c0_1, %c0_2] : memref<256x512xbf16, #tpu.memory_space<vmem>>, vector<256x512xbf16>
    %cst = arith.constant dense<0.000000e+00> : vector<16x512xf32>
    %2 = tpu.matmul %0, %1, %cst {dimension_numbers = #tpu.dot_dimension_numbers<[1], [0], [0], [1], [0, 0, 1, 1], [], []>} : vector<16x256xbf16>, vector<256x512xbf16>, vector<16x512xf32> -> vector<16x512xf32>
    %c0_i32 = arith.constant 0 : i32
    %3 = arith.cmpi eq, %arg2, %c0_i32 : i32
    %4 = arith.extui %3 : i1 to i32
    %c0_i32_3 = arith.constant 0 : i32
    %5 = arith.cmpi ne, %4, %c0_i32_3 : i32
    scf.if %5 {
      %c0_8 = arith.constant 0 : index
      %c0_9 = arith.constant 0 : index
      %12 = vector.load %arg8[%c0_8, %c0_9] : memref<16x512xf32, #tpu.memory_space<vmem>>, vector<16x512xf32>
      tpu.vector_store %arg8[%c0_8, %c0_9], %2 {strides = array<i32>} : memref<16x512xf32, #tpu.memory_space<vmem>>, vector<16x512xf32>,
    } else {
    }
    %c0_i32_4 = arith.constant 0 : i32
    %6 = arith.cmpi sgt, %arg2, %c0_i32_4 : i32
    %7 = arith.extui %6 : i1 to i32
    %c0_i32_5 = arith.constant 0 : i32
    %8 = arith.cmpi ne, %7, %c0_i32_5 : i32
    scf.if %8 {
      %c0_8 = arith.constant 0 : index
      %c0_9 = arith.constant 0 : index
      %12 = vector.load %arg8[%c0_8, %c0_9] : memref<16x512xf32, #tpu.memory_space<vmem>>, vector<16x512xf32>
      %13 = arith.addf %12, %2 : vector<16x512xf32>
      %c0_10 = arith.constant 0 : index
      %c0_11 = arith.constant 0 : index
      %14 = vector.load %arg8[%c0_10, %c0_11] : memref<16x512xf32, #tpu.memory_space<vmem>>, vector<16x512xf32>
      tpu.vector_store %arg8[%c0_10, %c0_11], %13 {strides = array<i32>} : memref<16x512xf32, #tpu.memory_space<vmem>>, vector<16x512xf32>,
    } else {
    }
    %c0_i32_6 = arith.constant 0 : i32
    %9 = arith.cmpi eq, %arg2, %c0_i32_6 : i32
    %10 = arith.extui %9 : i1 to i32
    %c0_i32_7 = arith.constant 0 : i32
    %11 = arith.cmpi ne, %10, %c0_i32_7 : i32
    scf.if %11 {
      %c0_8 = arith.constant 0 : index
      %c0_9 = arith.constant 0 : index
      %12 = vector.load %arg8[%c0_8, %c0_9] : memref<16x512xf32, #tpu.memory_space<vmem>>, vector<16x512xf32>
      %c0_10 = arith.constant 0 : index
      %c0_11 = arith.constant 0 : index
      %13 = vector.load %arg5[%c0_10, %c0_11] : memref<1x512xf32, #tpu.memory_space<vmem>>, vector<1x512xf32>
      %14 = vector.broadcast %13 : vector<1x512xf32> to vector<16x512xf32>
      %15 = arith.mulf %12, %14 : vector<16x512xf32>
      %c0_12 = arith.constant 0 : index
      %c0_13 = arith.constant 0 : index
      %16 = vector.load %arg6[%c0_12, %c0_13] : memref<1x512xf32, #tpu.memory_space<vmem>>, vector<1x512xf32>
      %17 = vector.broadcast %16 : vector<1x512xf32> to vector<16x512xf32>
      %18 = arith.addf %15, %17 : vector<16x512xf32>
      %19 = arith.truncf %18 : vector<16x512xf32> to vector<16x512xbf16>
      %c0_14 = arith.constant 0 : index
      %c0_15 = arith.constant 0 : index
      %20 = vector.load %arg7[%c0_14, %c0_15] : memref<16x512xbf16, #tpu.memory_space<vmem>>, vector<16x512xbf16>
      tpu.vector_store %arg7[%c0_14, %c0_15], %19 {strides = array<i32>} : memref<16x512xbf16, #tpu.memory_space<vmem>>, vector<16x512xbf16>,
    } else {
    }
    return
  }
  func.func @transform_0(%arg0: i32, %arg1: i32, %arg2: i32) -> (i32, i32) {
    %c0_i32 = arith.constant 0 : i32
    return %arg0, %arg2 : i32, i32
  }
  func.func @transform_1(%arg0: i32, %arg1: i32, %arg2: i32) -> (i32, i32) {
    %c0_i32 = arith.constant 0 : i32
    return %arg2, %arg1 : i32, i32
  }
  func.func @transform_2(%arg0: i32, %arg1: i32, %arg2: i32) -> (i32, i32) {
    %c0_i32 = arith.constant 0 : i32
    %c0_i32_0 = arith.constant 0 : i32
    return %c0_i32, %arg1 : i32, i32
  }
  func.func @transform_3(%arg0: i32, %arg1: i32, %arg2: i32) -> (i32, i32) {
    %c0_i32 = arith.constant 0 : i32
    %c0_i32_0 = arith.constant 0 : i32
    return %c0_i32, %arg1 : i32, i32
  }
  func.func @transform_4(%arg0: i32, %arg1: i32, %arg2: i32) -> (i32, i32) {
    %c0_i32 = arith.constant 0 : i32
    return %arg0, %arg1 : i32, i32
  }
}

module attributes {stable_mosaic.version = 11 : i64} {
  func.func @_matmul_affine_kernel(%arg0: i32, %arg1: i32, %arg2: i32, %arg3: memref<16x512xbf16, #tpu.memory_space<vmem>>, %arg4: memref<512x512xbf16, #tpu.memory_space<vmem>>, %arg5: memref<1x512xf32, #tpu.memory_space<vmem>>, %arg6: memref<1x512xf32, #tpu.memory_space<vmem>>, %arg7: memref<16x512xbf16, #tpu.memory_space<vmem>>, %arg8: memref<16x512xbf16, #tpu.memory_space<vmem>>, %arg9: memref<16x512xf32, #tpu.memory_space<vmem>>) attributes {dimension_semantics = [#tpu.dimension_semantics<parallel>, #tpu.dimension_semantics<parallel>, #tpu.dimension_semantics<arbitrary>], iteration_bounds = array<i64: 2, 1, 9>, scalar_prefetch = 0 : i64, scratch_operands = 1 : i64, tpu.core_type = #tpu.core_type<tc>, window_params = [{transform_indices = @transform_0, window_bounds = array<i64: 16, 512>}, {transform_indices = @transform_1, window_bounds = array<i64: 512, 512>}, {transform_indices = @transform_2, window_bounds = array<i64: 1, 512>}, {transform_indices = @transform_3, window_bounds = array<i64: 1, 512>}, {transform_indices = @transform_4, window_bounds = array<i64: 16, 512>}, {transform_indices = @transform_5, window_bounds = array<i64: 16, 512>}]} {
    %c0 = arith.constant 0 : index
    %c0_0 = arith.constant 0 : index
    %0 = vector.load %arg3[%c0, %c0_0] : memref<16x512xbf16, #tpu.memory_space<vmem>>, vector<16x512xbf16>
    %c0_1 = arith.constant 0 : index
    %c0_2 = arith.constant 0 : index
    %1 = vector.load %arg4[%c0_1, %c0_2] : memref<512x512xbf16, #tpu.memory_space<vmem>>, vector<512x512xbf16>
    %cst = arith.constant dense<0.000000e+00> : vector<16x512xf32>
    %2 = tpu.matmul %0, %1, %cst {dimension_numbers = #tpu.dot_dimension_numbers<[1], [0], [0], [1], [0, 0, 1, 1], [], []>} : vector<16x512xbf16>, vector<512x512xbf16>, vector<16x512xf32> -> vector<16x512xf32>
    %c0_i32 = arith.constant 0 : i32
    %3 = arith.cmpi eq, %arg2, %c0_i32 : i32
    %4 = arith.extui %3 : i1 to i32
    %c0_i32_3 = arith.constant 0 : i32
    %5 = arith.cmpi ne, %4, %c0_i32_3 : i32
    scf.if %5 {
      %c0_7 = arith.constant 0 : index
      %c0_8 = arith.constant 0 : index
      %12 = vector.load %arg9[%c0_7, %c0_8] : memref<16x512xf32, #tpu.memory_space<vmem>>, vector<16x512xf32>
      tpu.vector_store %arg9[%c0_7, %c0_8], %2 {strides = array<i32>} : memref<16x512xf32, #tpu.memory_space<vmem>>, vector<16x512xf32>,
    } else {
    }
    %c0_i32_4 = arith.constant 0 : i32
    %6 = arith.cmpi sgt, %arg2, %c0_i32_4 : i32
    %7 = arith.extui %6 : i1 to i32
    %c0_i32_5 = arith.constant 0 : i32
    %8 = arith.cmpi ne, %7, %c0_i32_5 : i32
    scf.if %8 {
      %c0_7 = arith.constant 0 : index
      %c0_8 = arith.constant 0 : index
      %12 = vector.load %arg9[%c0_7, %c0_8] : memref<16x512xf32, #tpu.memory_space<vmem>>, vector<16x512xf32>
      %13 = arith.addf %12, %2 : vector<16x512xf32>
      %c0_9 = arith.constant 0 : index
      %c0_10 = arith.constant 0 : index
      %14 = vector.load %arg9[%c0_9, %c0_10] : memref<16x512xf32, #tpu.memory_space<vmem>>, vector<16x512xf32>
      tpu.vector_store %arg9[%c0_9, %c0_10], %13 {strides = array<i32>} : memref<16x512xf32, #tpu.memory_space<vmem>>, vector<16x512xf32>,
    } else {
    }
    %c8_i32 = arith.constant 8 : i32
    %9 = arith.cmpi eq, %arg2, %c8_i32 : i32
    %10 = arith.extui %9 : i1 to i32
    %c0_i32_6 = arith.constant 0 : i32
    %11 = arith.cmpi ne, %10, %c0_i32_6 : i32
    scf.if %11 {
      %c0_7 = arith.constant 0 : index
      %c0_8 = arith.constant 0 : index
      %12 = vector.load %arg9[%c0_7, %c0_8] : memref<16x512xf32, #tpu.memory_space<vmem>>, vector<16x512xf32>
      %c0_9 = arith.constant 0 : index
      %c0_10 = arith.constant 0 : index
      %13 = vector.load %arg5[%c0_9, %c0_10] : memref<1x512xf32, #tpu.memory_space<vmem>>, vector<1x512xf32>
      %14 = vector.broadcast %13 : vector<1x512xf32> to vector<16x512xf32>
      %15 = arith.mulf %12, %14 : vector<16x512xf32>
      %c0_11 = arith.constant 0 : index
      %c0_12 = arith.constant 0 : index
      %16 = vector.load %arg6[%c0_11, %c0_12] : memref<1x512xf32, #tpu.memory_space<vmem>>, vector<1x512xf32>
      %17 = vector.broadcast %16 : vector<1x512xf32> to vector<16x512xf32>
      %18 = arith.addf %15, %17 : vector<16x512xf32>
      %c0_13 = arith.constant 0 : index
      %c0_14 = arith.constant 0 : index
      %19 = vector.load %arg7[%c0_13, %c0_14] : memref<16x512xbf16, #tpu.memory_space<vmem>>, vector<16x512xbf16>
      %20 = arith.extf %19 : vector<16x512xbf16> to vector<16x512xf32>
      %21 = arith.addf %18, %20 : vector<16x512xf32>
      %cst_15 = arith.constant 0.000000e+00 : f32
      %22 = vector.broadcast %cst_15 : f32 to vector<16x512xf32>
      %23 = arith.maximumf %21, %22 : vector<16x512xf32>
      %24 = arith.truncf %23 : vector<16x512xf32> to vector<16x512xbf16>
      %c0_16 = arith.constant 0 : index
      %c0_17 = arith.constant 0 : index
      %25 = vector.load %arg8[%c0_16, %c0_17] : memref<16x512xbf16, #tpu.memory_space<vmem>>, vector<16x512xbf16>
      tpu.vector_store %arg8[%c0_16, %c0_17], %24 {strides = array<i32>} : memref<16x512xbf16, #tpu.memory_space<vmem>>, vector<16x512xbf16>,
    } else {
    }
    return
  }
  func.func @transform_0(%arg0: i32, %arg1: i32, %arg2: i32) -> (i32, i32) {
    %c0_i32 = arith.constant 0 : i32
    return %arg0, %arg2 : i32, i32
  }
  func.func @transform_1(%arg0: i32, %arg1: i32, %arg2: i32) -> (i32, i32) {
    %c0_i32 = arith.constant 0 : i32
    return %arg2, %arg1 : i32, i32
  }
  func.func @transform_2(%arg0: i32, %arg1: i32, %arg2: i32) -> (i32, i32) {
    %c0_i32 = arith.constant 0 : i32
    %c0_i32_0 = arith.constant 0 : i32
    return %c0_i32, %arg1 : i32, i32
  }
  func.func @transform_3(%arg0: i32, %arg1: i32, %arg2: i32) -> (i32, i32) {
    %c0_i32 = arith.constant 0 : i32
    %c0_i32_0 = arith.constant 0 : i32
    return %c0_i32, %arg1 : i32, i32
  }
  func.func @transform_4(%arg0: i32, %arg1: i32, %arg2: i32) -> (i32, i32) {
    %c0_i32 = arith.constant 0 : i32
    return %arg0, %arg1 : i32, i32
  }
  func.func @transform_5(%arg0: i32, %arg1: i32, %arg2: i32) -> (i32, i32) {
    %c0_i32 = arith.constant 0 : i32
    return %arg0, %arg1 : i32, i32
  }
}

module attributes {stable_mosaic.version = 11 : i64} {
  func.func @_matmul_affine_kernel(%arg0: i32, %arg1: i32, %arg2: i32, %arg3: memref<16x512xbf16, #tpu.memory_space<vmem>>, %arg4: memref<512x512xbf16, #tpu.memory_space<vmem>>, %arg5: memref<1x512xf32, #tpu.memory_space<vmem>>, %arg6: memref<1x512xf32, #tpu.memory_space<vmem>>, %arg7: memref<16x512xbf16, #tpu.memory_space<vmem>>, %arg8: memref<16x512xf32, #tpu.memory_space<vmem>>) attributes {dimension_semantics = [#tpu.dimension_semantics<parallel>, #tpu.dimension_semantics<parallel>, #tpu.dimension_semantics<arbitrary>], iteration_bounds = array<i64: 2, 1, 9>, scalar_prefetch = 0 : i64, scratch_operands = 1 : i64, tpu.core_type = #tpu.core_type<tc>, window_params = [{transform_indices = @transform_0, window_bounds = array<i64: 16, 512>}, {transform_indices = @transform_1, window_bounds = array<i64: 512, 512>}, {transform_indices = @transform_2, window_bounds = array<i64: 1, 512>}, {transform_indices = @transform_3, window_bounds = array<i64: 1, 512>}, {transform_indices = @transform_4, window_bounds = array<i64: 16, 512>}]} {
    %c0 = arith.constant 0 : index
    %c0_0 = arith.constant 0 : index
    %0 = vector.load %arg3[%c0, %c0_0] : memref<16x512xbf16, #tpu.memory_space<vmem>>, vector<16x512xbf16>
    %c0_1 = arith.constant 0 : index
    %c0_2 = arith.constant 0 : index
    %1 = vector.load %arg4[%c0_1, %c0_2] : memref<512x512xbf16, #tpu.memory_space<vmem>>, vector<512x512xbf16>
    %cst = arith.constant dense<0.000000e+00> : vector<16x512xf32>
    %2 = tpu.matmul %0, %1, %cst {dimension_numbers = #tpu.dot_dimension_numbers<[1], [0], [0], [1], [0, 0, 1, 1], [], []>} : vector<16x512xbf16>, vector<512x512xbf16>, vector<16x512xf32> -> vector<16x512xf32>
    %c0_i32 = arith.constant 0 : i32
    %3 = arith.cmpi eq, %arg2, %c0_i32 : i32
    %4 = arith.extui %3 : i1 to i32
    %c0_i32_3 = arith.constant 0 : i32
    %5 = arith.cmpi ne, %4, %c0_i32_3 : i32
    scf.if %5 {
      %c0_7 = arith.constant 0 : index
      %c0_8 = arith.constant 0 : index
      %12 = vector.load %arg8[%c0_7, %c0_8] : memref<16x512xf32, #tpu.memory_space<vmem>>, vector<16x512xf32>
      tpu.vector_store %arg8[%c0_7, %c0_8], %2 {strides = array<i32>} : memref<16x512xf32, #tpu.memory_space<vmem>>, vector<16x512xf32>,
    } else {
    }
    %c0_i32_4 = arith.constant 0 : i32
    %6 = arith.cmpi sgt, %arg2, %c0_i32_4 : i32
    %7 = arith.extui %6 : i1 to i32
    %c0_i32_5 = arith.constant 0 : i32
    %8 = arith.cmpi ne, %7, %c0_i32_5 : i32
    scf.if %8 {
      %c0_7 = arith.constant 0 : index
      %c0_8 = arith.constant 0 : index
      %12 = vector.load %arg8[%c0_7, %c0_8] : memref<16x512xf32, #tpu.memory_space<vmem>>, vector<16x512xf32>
      %13 = arith.addf %12, %2 : vector<16x512xf32>
      %c0_9 = arith.constant 0 : index
      %c0_10 = arith.constant 0 : index
      %14 = vector.load %arg8[%c0_9, %c0_10] : memref<16x512xf32, #tpu.memory_space<vmem>>, vector<16x512xf32>
      tpu.vector_store %arg8[%c0_9, %c0_10], %13 {strides = array<i32>} : memref<16x512xf32, #tpu.memory_space<vmem>>, vector<16x512xf32>,
    } else {
    }
    %c8_i32 = arith.constant 8 : i32
    %9 = arith.cmpi eq, %arg2, %c8_i32 : i32
    %10 = arith.extui %9 : i1 to i32
    %c0_i32_6 = arith.constant 0 : i32
    %11 = arith.cmpi ne, %10, %c0_i32_6 : i32
    scf.if %11 {
      %c0_7 = arith.constant 0 : index
      %c0_8 = arith.constant 0 : index
      %12 = vector.load %arg8[%c0_7, %c0_8] : memref<16x512xf32, #tpu.memory_space<vmem>>, vector<16x512xf32>
      %c0_9 = arith.constant 0 : index
      %c0_10 = arith.constant 0 : index
      %13 = vector.load %arg5[%c0_9, %c0_10] : memref<1x512xf32, #tpu.memory_space<vmem>>, vector<1x512xf32>
      %14 = vector.broadcast %13 : vector<1x512xf32> to vector<16x512xf32>
      %15 = arith.mulf %12, %14 : vector<16x512xf32>
      %c0_11 = arith.constant 0 : index
      %c0_12 = arith.constant 0 : index
      %16 = vector.load %arg6[%c0_11, %c0_12] : memref<1x512xf32, #tpu.memory_space<vmem>>, vector<1x512xf32>
      %17 = vector.broadcast %16 : vector<1x512xf32> to vector<16x512xf32>
      %18 = arith.addf %15, %17 : vector<16x512xf32>
      %cst_13 = arith.constant 0.000000e+00 : f32
      %19 = vector.broadcast %cst_13 : f32 to vector<16x512xf32>
      %20 = arith.maximumf %18, %19 : vector<16x512xf32>
      %21 = arith.truncf %20 : vector<16x512xf32> to vector<16x512xbf16>
      %c0_14 = arith.constant 0 : index
      %c0_15 = arith.constant 0 : index
      %22 = vector.load %arg7[%c0_14, %c0_15] : memref<16x512xbf16, #tpu.memory_space<vmem>>, vector<16x512xbf16>
      tpu.vector_store %arg7[%c0_14, %c0_15], %21 {strides = array<i32>} : memref<16x512xbf16, #tpu.memory_space<vmem>>, vector<16x512xbf16>,
    } else {
    }
    return
  }
  func.func @transform_0(%arg0: i32, %arg1: i32, %arg2: i32) -> (i32, i32) {
    %c0_i32 = arith.constant 0 : i32
    return %arg0, %arg2 : i32, i32
  }
  func.func @transform_1(%arg0: i32, %arg1: i32, %arg2: i32) -> (i32, i32) {
    %c0_i32 = arith.constant 0 : i32
    return %arg2, %arg1 : i32, i32
  }
  func.func @transform_2(%arg0: i32, %arg1: i32, %arg2: i32) -> (i32, i32) {
    %c0_i32 = arith.constant 0 : i32
    %c0_i32_0 = arith.constant 0 : i32
    return %c0_i32, %arg1 : i32, i32
  }
  func.func @transform_3(%arg0: i32, %arg1: i32, %arg2: i32) -> (i32, i32) {
    %c0_i32 = arith.constant 0 : i32
    %c0_i32_0 = arith.constant 0 : i32
    return %c0_i32, %arg1 : i32, i32
  }
  func.func @transform_4(%arg0: i32, %arg1: i32, %arg2: i32) -> (i32, i32) {
    %c0_i32 = arith.constant 0 : i32
    return %arg0, %arg1 : i32, i32
  }
}

module attributes {stable_mosaic.version = 11 : i64} {
  func.func @_matmul_affine_kernel(%arg0: i32, %arg1: i32, %arg2: i32, %arg3: memref<16x512xbf16, #tpu.memory_space<vmem>>, %arg4: memref<512x16xbf16, #tpu.memory_space<vmem>>, %arg5: memref<1x16xf32, #tpu.memory_space<vmem>>, %arg6: memref<1x16xf32, #tpu.memory_space<vmem>>, %arg7: memref<16x16xf32, #tpu.memory_space<vmem>>, %arg8: memref<16x16xf32, #tpu.memory_space<vmem>>) attributes {dimension_semantics = [#tpu.dimension_semantics<parallel>, #tpu.dimension_semantics<parallel>, #tpu.dimension_semantics<arbitrary>], iteration_bounds = array<i64: 2, 1, 1>, scalar_prefetch = 0 : i64, scratch_operands = 1 : i64, tpu.core_type = #tpu.core_type<tc>, window_params = [{transform_indices = @transform_0, window_bounds = array<i64: 16, 512>}, {transform_indices = @transform_1, window_bounds = array<i64: 512, 16>}, {transform_indices = @transform_2, window_bounds = array<i64: 1, 16>}, {transform_indices = @transform_3, window_bounds = array<i64: 1, 16>}, {transform_indices = @transform_4, window_bounds = array<i64: 16, 16>}]} {
    %c0 = arith.constant 0 : index
    %c0_0 = arith.constant 0 : index
    %0 = vector.load %arg3[%c0, %c0_0] : memref<16x512xbf16, #tpu.memory_space<vmem>>, vector<16x512xbf16>
    %c0_1 = arith.constant 0 : index
    %c0_2 = arith.constant 0 : index
    %1 = vector.load %arg4[%c0_1, %c0_2] : memref<512x16xbf16, #tpu.memory_space<vmem>>, vector<512x16xbf16>
    %cst = arith.constant dense<0.000000e+00> : vector<16x16xf32>
    %2 = tpu.matmul %0, %1, %cst {dimension_numbers = #tpu.dot_dimension_numbers<[1], [0], [0], [1], [0, 0, 1, 1], [], []>} : vector<16x512xbf16>, vector<512x16xbf16>, vector<16x16xf32> -> vector<16x16xf32>
    %c0_i32 = arith.constant 0 : i32
    %3 = arith.cmpi eq, %arg2, %c0_i32 : i32
    %4 = arith.extui %3 : i1 to i32
    %c0_i32_3 = arith.constant 0 : i32
    %5 = arith.cmpi ne, %4, %c0_i32_3 : i32
    scf.if %5 {
      %c0_8 = arith.constant 0 : index
      %c0_9 = arith.constant 0 : index
      %12 = vector.load %arg8[%c0_8, %c0_9] : memref<16x16xf32, #tpu.memory_space<vmem>>, vector<16x16xf32>
      tpu.vector_store %arg8[%c0_8, %c0_9], %2 {strides = array<i32>} : memref<16x16xf32, #tpu.memory_space<vmem>>, vector<16x16xf32>,
    } else {
    }
    %c0_i32_4 = arith.constant 0 : i32
    %6 = arith.cmpi sgt, %arg2, %c0_i32_4 : i32
    %7 = arith.extui %6 : i1 to i32
    %c0_i32_5 = arith.constant 0 : i32
    %8 = arith.cmpi ne, %7, %c0_i32_5 : i32
    scf.if %8 {
      %c0_8 = arith.constant 0 : index
      %c0_9 = arith.constant 0 : index
      %12 = vector.load %arg8[%c0_8, %c0_9] : memref<16x16xf32, #tpu.memory_space<vmem>>, vector<16x16xf32>
      %13 = arith.addf %12, %2 : vector<16x16xf32>
      %c0_10 = arith.constant 0 : index
      %c0_11 = arith.constant 0 : index
      %14 = vector.load %arg8[%c0_10, %c0_11] : memref<16x16xf32, #tpu.memory_space<vmem>>, vector<16x16xf32>
      tpu.vector_store %arg8[%c0_10, %c0_11], %13 {strides = array<i32>} : memref<16x16xf32, #tpu.memory_space<vmem>>, vector<16x16xf32>,
    } else {
    }
    %c0_i32_6 = arith.constant 0 : i32
    %9 = arith.cmpi eq, %arg2, %c0_i32_6 : i32
    %10 = arith.extui %9 : i1 to i32
    %c0_i32_7 = arith.constant 0 : i32
    %11 = arith.cmpi ne, %10, %c0_i32_7 : i32
    scf.if %11 {
      %c0_8 = arith.constant 0 : index
      %c0_9 = arith.constant 0 : index
      %12 = vector.load %arg8[%c0_8, %c0_9] : memref<16x16xf32, #tpu.memory_space<vmem>>, vector<16x16xf32>
      %c0_10 = arith.constant 0 : index
      %c0_11 = arith.constant 0 : index
      %13 = vector.load %arg5[%c0_10, %c0_11] : memref<1x16xf32, #tpu.memory_space<vmem>>, vector<1x16xf32>
      %14 = vector.broadcast %13 : vector<1x16xf32> to vector<16x16xf32>
      %15 = arith.mulf %12, %14 : vector<16x16xf32>
      %c0_12 = arith.constant 0 : index
      %c0_13 = arith.constant 0 : index
      %16 = vector.load %arg6[%c0_12, %c0_13] : memref<1x16xf32, #tpu.memory_space<vmem>>, vector<1x16xf32>
      %17 = vector.broadcast %16 : vector<1x16xf32> to vector<16x16xf32>
      %18 = arith.addf %15, %17 : vector<16x16xf32>
      %c0_14 = arith.constant 0 : index
      %c0_15 = arith.constant 0 : index
      %19 = vector.load %arg7[%c0_14, %c0_15] : memref<16x16xf32, #tpu.memory_space<vmem>>, vector<16x16xf32>
      tpu.vector_store %arg7[%c0_14, %c0_15], %18 {strides = array<i32>} : memref<16x16xf32, #tpu.memory_space<vmem>>, vector<16x16xf32>,
    } else {
    }
    return
  }
  func.func @transform_0(%arg0: i32, %arg1: i32, %arg2: i32) -> (i32, i32) {
    %c0_i32 = arith.constant 0 : i32
    return %arg0, %arg2 : i32, i32
  }
  func.func @transform_1(%arg0: i32, %arg1: i32, %arg2: i32) -> (i32, i32) {
    %c0_i32 = arith.constant 0 : i32
    return %arg2, %arg1 : i32, i32
  }
  func.func @transform_2(%arg0: i32, %arg1: i32, %arg2: i32) -> (i32, i32) {
    %c0_i32 = arith.constant 0 : i32
    %c0_i32_0 = arith.constant 0 : i32
    return %c0_i32, %arg1 : i32, i32
  }
  func.func @transform_3(%arg0: i32, %arg1: i32, %arg2: i32) -> (i32, i32) {
    %c0_i32 = arith.constant 0 : i32
    %c0_i32_0 = arith.constant 0 : i32
    return %c0_i32, %arg1 : i32, i32
  }
  func.func @transform_4(%arg0: i32, %arg1: i32, %arg2: i32) -> (i32, i32) {
    %c0_i32 = arith.constant 0 : i32
    return %arg0, %arg1 : i32, i32
  }
}

module attributes {stable_mosaic.version = 11 : i64} {
  func.func @_matmul_affine_kernel(%arg0: i32, %arg1: i32, %arg2: i32, %arg3: memref<256x128xbf16, #tpu.memory_space<vmem>>, %arg4: memref<128x64xbf16, #tpu.memory_space<vmem>>, %arg5: memref<1x64xf32, #tpu.memory_space<vmem>>, %arg6: memref<1x64xf32, #tpu.memory_space<vmem>>, %arg7: memref<256x64xbf16, #tpu.memory_space<vmem>>, %arg8: memref<256x64xf32, #tpu.memory_space<vmem>>) attributes {dimension_semantics = [#tpu.dimension_semantics<parallel>, #tpu.dimension_semantics<parallel>, #tpu.dimension_semantics<arbitrary>], iteration_bounds = array<i64: 2, 1, 1>, scalar_prefetch = 0 : i64, scratch_operands = 1 : i64, tpu.core_type = #tpu.core_type<tc>, window_params = [{transform_indices = @transform_0, window_bounds = array<i64: 256, 128>}, {transform_indices = @transform_1, window_bounds = array<i64: 128, 64>}, {transform_indices = @transform_2, window_bounds = array<i64: 1, 64>}, {transform_indices = @transform_3, window_bounds = array<i64: 1, 64>}, {transform_indices = @transform_4, window_bounds = array<i64: 256, 64>}]} {
    %c0 = arith.constant 0 : index
    %c0_0 = arith.constant 0 : index
    %0 = vector.load %arg3[%c0, %c0_0] : memref<256x128xbf16, #tpu.memory_space<vmem>>, vector<256x128xbf16>
    %c0_1 = arith.constant 0 : index
    %c0_2 = arith.constant 0 : index
    %1 = vector.load %arg4[%c0_1, %c0_2] : memref<128x64xbf16, #tpu.memory_space<vmem>>, vector<128x64xbf16>
    %cst = arith.constant dense<0.000000e+00> : vector<256x64xf32>
    %2 = tpu.matmul %0, %1, %cst {dimension_numbers = #tpu.dot_dimension_numbers<[1], [0], [0], [1], [0, 0, 1, 1], [], []>} : vector<256x128xbf16>, vector<128x64xbf16>, vector<256x64xf32> -> vector<256x64xf32>
    %c0_i32 = arith.constant 0 : i32
    %3 = arith.cmpi eq, %arg2, %c0_i32 : i32
    %4 = arith.extui %3 : i1 to i32
    %c0_i32_3 = arith.constant 0 : i32
    %5 = arith.cmpi ne, %4, %c0_i32_3 : i32
    scf.if %5 {
      %c0_8 = arith.constant 0 : index
      %c0_9 = arith.constant 0 : index
      %12 = vector.load %arg8[%c0_8, %c0_9] : memref<256x64xf32, #tpu.memory_space<vmem>>, vector<256x64xf32>
      tpu.vector_store %arg8[%c0_8, %c0_9], %2 {strides = array<i32>} : memref<256x64xf32, #tpu.memory_space<vmem>>, vector<256x64xf32>,
    } else {
    }
    %c0_i32_4 = arith.constant 0 : i32
    %6 = arith.cmpi sgt, %arg2, %c0_i32_4 : i32
    %7 = arith.extui %6 : i1 to i32
    %c0_i32_5 = arith.constant 0 : i32
    %8 = arith.cmpi ne, %7, %c0_i32_5 : i32
    scf.if %8 {
      %c0_8 = arith.constant 0 : index
      %c0_9 = arith.constant 0 : index
      %12 = vector.load %arg8[%c0_8, %c0_9] : memref<256x64xf32, #tpu.memory_space<vmem>>, vector<256x64xf32>
      %13 = arith.addf %12, %2 : vector<256x64xf32>
      %c0_10 = arith.constant 0 : index
      %c0_11 = arith.constant 0 : index
      %14 = vector.load %arg8[%c0_10, %c0_11] : memref<256x64xf32, #tpu.memory_space<vmem>>, vector<256x64xf32>
      tpu.vector_store %arg8[%c0_10, %c0_11], %13 {strides = array<i32>} : memref<256x64xf32, #tpu.memory_space<vmem>>, vector<256x64xf32>,
    } else {
    }
    %c0_i32_6 = arith.constant 0 : i32
    %9 = arith.cmpi eq, %arg2, %c0_i32_6 : i32
    %10 = arith.extui %9 : i1 to i32
    %c0_i32_7 = arith.constant 0 : i32
    %11 = arith.cmpi ne, %10, %c0_i32_7 : i32
    scf.if %11 {
      %c0_8 = arith.constant 0 : index
      %c0_9 = arith.constant 0 : index
      %12 = vector.load %arg8[%c0_8, %c0_9] : memref<256x64xf32, #tpu.memory_space<vmem>>, vector<256x64xf32>
      %c0_10 = arith.constant 0 : index
      %c0_11 = arith.constant 0 : index
      %13 = vector.load %arg5[%c0_10, %c0_11] : memref<1x64xf32, #tpu.memory_space<vmem>>, vector<1x64xf32>
      %14 = vector.broadcast %13 : vector<1x64xf32> to vector<256x64xf32>
      %15 = arith.mulf %12, %14 : vector<256x64xf32>
      %c0_12 = arith.constant 0 : index
      %c0_13 = arith.constant 0 : index
      %16 = vector.load %arg6[%c0_12, %c0_13] : memref<1x64xf32, #tpu.memory_space<vmem>>, vector<1x64xf32>
      %17 = vector.broadcast %16 : vector<1x64xf32> to vector<256x64xf32>
      %18 = arith.addf %15, %17 : vector<256x64xf32>
      %cst_14 = arith.constant 0.000000e+00 : f32
      %19 = vector.broadcast %cst_14 : f32 to vector<256x64xf32>
      %20 = arith.maximumf %18, %19 : vector<256x64xf32>
      %21 = arith.truncf %20 : vector<256x64xf32> to vector<256x64xbf16>
      %c0_15 = arith.constant 0 : index
      %c0_16 = arith.constant 0 : index
      %22 = vector.load %arg7[%c0_15, %c0_16] : memref<256x64xbf16, #tpu.memory_space<vmem>>, vector<256x64xbf16>
      tpu.vector_store %arg7[%c0_15, %c0_16], %21 {strides = array<i32>} : memref<256x64xbf16, #tpu.memory_space<vmem>>, vector<256x64xbf16>,
    } else {
    }
    return
  }
  func.func @transform_0(%arg0: i32, %arg1: i32, %arg2: i32) -> (i32, i32) {
    %c0_i32 = arith.constant 0 : i32
    return %arg0, %arg2 : i32, i32
  }
  func.func @transform_1(%arg0: i32, %arg1: i32, %arg2: i32) -> (i32, i32) {
    %c0_i32 = arith.constant 0 : i32
    return %arg2, %arg1 : i32, i32
  }
  func.func @transform_2(%arg0: i32, %arg1: i32, %arg2: i32) -> (i32, i32) {
    %c0_i32 = arith.constant 0 : i32
    %c0_i32_0 = arith.constant 0 : i32
    return %c0_i32, %arg1 : i32, i32
  }
  func.func @transform_3(%arg0: i32, %arg1: i32, %arg2: i32) -> (i32, i32) {
    %c0_i32 = arith.constant 0 : i32
    %c0_i32_0 = arith.constant 0 : i32
    return %c0_i32, %arg1 : i32, i32
  }
  func.func @transform_4(%arg0: i32, %arg1: i32, %arg2: i32) -> (i32, i32) {
    %c0_i32 = arith.constant 0 : i32
    return %arg0, %arg1 : i32, i32
  }
}

module attributes {stable_mosaic.version = 11 : i64} {
  func.func @_add_kernel(%arg0: i32, %arg1: memref<8x1024xf32, #tpu.memory_space<vmem>>, %arg2: memref<8x1024xf32, #tpu.memory_space<vmem>>, %arg3: memref<8x1024xf32, #tpu.memory_space<vmem>>) attributes {dimension_semantics = [#tpu.dimension_semantics<parallel>], iteration_bounds = array<i64: 1>, scalar_prefetch = 0 : i64, scratch_operands = 0 : i64, tpu.core_type = #tpu.core_type<tc>, window_params = [{transform_indices = @transform_0, window_bounds = array<i64: 8, 1024>}, {transform_indices = @transform_1, window_bounds = array<i64: 8, 1024>}, {transform_indices = @transform_2, window_bounds = array<i64: 8, 1024>}]} {
    %c0 = arith.constant 0 : index
    %c0_0 = arith.constant 0 : index
    %0 = vector.load %arg1[%c0, %c0_0] : memref<8x1024xf32, #tpu.memory_space<vmem>>, vector<8x1024xf32>
    %c0_1 = arith.constant 0 : index
    %c0_2 = arith.constant 0 : index
    %1 = vector.load %arg2[%c0_1, %c0_2] : memref<8x1024xf32, #tpu.memory_space<vmem>>, vector<8x1024xf32>
    %2 = arith.addf %0, %1 : vector<8x1024xf32>
    %c0_3 = arith.constant 0 : index
    %c0_4 = arith.constant 0 : index
    %3 = vector.load %arg3[%c0_3, %c0_4] : memref<8x1024xf32, #tpu.memory_space<vmem>>, vector<8x1024xf32>
    tpu.vector_store %arg3[%c0_3, %c0_4], %2 {strides = array<i32>} : memref<8x1024xf32, #tpu.memory_space<vmem>>, vector<8x1024xf32>,
    return
  }
  func.func @transform_0(%arg0: i32) -> (i32, i32) {
    %c0_i32 = arith.constant 0 : i32
    %c0_i32_0 = arith.constant 0 : i32
    return %arg0, %c0_i32 : i32, i32
  }
  func.func @transform_1(%arg0: i32) -> (i32, i32) {
    %c0_i32 = arith.constant 0 : i32
    %c0_i32_0 = arith.constant 0 : i32
    return %arg0, %c0_i32 : i32, i32
  }
  func.func @transform_2(%arg0: i32) -> (i32, i32) {
    %c0_i32 = arith.constant 0 : i32
    %c0_i32_0 = arith.constant 0 : i32
    return %arg0, %c0_i32 : i32, i32
  }
}

</mosaic_0001>

<bundles_post_ra>
// kernel: tpu_custom_call.1
= control target key start
LH: loop header
LB: loop body
LE: loop exit
PB: predicated region body
PF: predicated region fallthrough
CT: control target
= control target key end

     0   :  { %9 = vsyncpa [#allocation3], 0  ;;  %s2834_s15 = smov [#allocation2]   ;;  %s3592_s0 = inlined_call_operand.vmem [shape: bf16[1,136,64], index: 0, kind: input, shape index: {}]   ;;  %s3593_s1 = inlined_call_operand.hbm [shape: bf16[9,64,64], index: 1, kind: input, shape index: {}]   ;;  %s3594_s2 = inlined_call_operand.vmem [shape: f32[1,64], index: 2, kind: input, shape index: {}]   ;;  %s3595_s3 = inlined_call_operand.vmem [shape: f32[1,64], index: 3, kind: input, shape index: {}]   ;;  %s3596_s4 = inlined_call_operand.vmem [shape: f32[1,110,64], index: 4, kind: output, shape index: {}]  }
   0x1   :  { %s17_s16 = sshll.u32 %s2834_s15, 4  ;;  %s2810_s19 = scalar_lea.hbm %s3593_s1, 4608  ;;  %s18_s16 = int_to_ptr.vmem [resolvable:$true] %s17_s16 }
   0x2   :  { %p2811_p0 = scmp.ne.s32.totalorder %s3593_s1, %s2810_s19  ;;  %p2814_p1 = scmp.lt.u32.totalorder %s2810_s19, %s3593_s1 }
   0x4   :  { %p2816_p2 = pnand %p2814_p1, %p2811_p0 }
   0x6   :  { %2819 = shalt.err (!%p2816_p2)
}
   0x7   :  { %s2820_s24 = scalar_lea.vmem %s18_s16, 4608  ;;  %p2825_p4 = scmp.lt.s32.totalorder %s18_s16, %s18_s16 }
   0x8   :  { %p2821_p3 = scmp.ne.s32.totalorder %s18_s16, %s2820_s24  ;;  %p2826_p5 = scmp.lt.s32.totalorder %s2820_s24, %s2820_s24 }
   0xa   :  { %p2827_p6 = por %p2826_p5, %p2825_p4 }
   0xc   :  { %p2828_p7 = pnand %p2827_p6, %p2821_p3 }
   0xe   :  { %2831 = shalt.err (!%p2828_p7)
}
   0xf   :  { %s2835_s25 = smov 64   ;;  %s2836_s26 = smov 4  }
  0x10   :  { %23 = dma.hbm_to_vmem [thread:$0]  %s3593_s1, 4608, %s18_s16, [#allocation3], %s2835_s25, %s2835_s25, %s2836_s26  }
  0x11   :  { %2832 = dma.done.wait [#allocation3], 4608  }
  0x12   :  { %2833 = vsyncadd [#allocation3], 4294962688  ;;  %v2837_v0 = vmov 0.0   ;;  %vm2838_vm0 = vmmov 0   ;;  %v2735_v1 = vld [vmem:[#allocation2 + $0x20] sm:$0xff]   ;;  %v2737_v3 = vld [vmem:[#allocation2 + $0x28] sm:$0xff]  }
  0x13   :  { %2188 = vmatprep.subr.bf16.mxu1 %v2837_v0  ;;  %2332 = vmatprep.subr.bf16.mxu0 %v2837_v0  ;;  %v2736_v2 = vld [vmem:[#allocation2 + $0x80] sm:$0xff]   ;;  %v2738_v4 = vld [vmem:[#allocation2 + $0x88] sm:$0xff]   ;;  %v2739_v5 = vld [vmem:[#allocation2 + $0x30] sm:$0xff]   ;;  %vm99_vm1 = vsmask.f32 7424  ;;  %vm179_vm2 = vcmask 523264  }
  0x14   :  { %2196 = vmatprep.mubr.msk.bf16.mxu1 %vm2838_vm0, %v2837_v0  ;;  %2340 = vmatprep.mubr.msk.bf16.mxu0 %vm2838_vm0, %v2837_v0  ;;  %v2740_v6 = vld [vmem:[#allocation2 + $0x90] sm:$0xff]   ;;  %v2741_v7 = vld [vmem:[#allocation2 + $0x38] sm:$0xff]   ;;  %v32_v8 = vld [vmem:[%s3592_s0] sm:$0xf]  ;;  %vm887_vm3 = vcmask 1045504   ;;  %vm1316_vm6 = vcmask 1044480  }
  0x15   :  { %2189 = vmatpush3.bf16.msra.mxu1 %v2735_v1  ;;  %2333 = vmatpush3.bf16.msra.mxu0 %v2736_v2  ;;  %v2892_v9 = vld [vmem:[%s3592_s0 + $0x4] sm:$0xf]  ;;  %v2742_v10 = vld [vmem:[#allocation2 + $0x98] sm:$0xff]   ;;  %v2900_v12 = vld [vmem:[%s3592_s0 + $0x8] sm:$0xff]   ;;  %vm1064_vm4 = vsmask.f32 5376 }
  0x16   :  { %2190 = vmatprep.subr.bf16.mxu1 %v2837_v0  ;;  %2334 = vmatprep.subr.bf16.mxu0 %v2837_v0  ;;  %v2895_v11 = vcombine.low %v32_v8, %v2892_v9  ;;  %v2905_v13 = vld [vmem:[%s3592_s0 + $0x8] sm:$0xf]  ;;  %v108_v16 = vshll.u32 %v2900_v12, 16  ;;  %v2914_v17 = vld [vmem:[%s3592_s0 + $0xc] sm:$0xff]   ;;  %v874_v18 = vld [vmem:[%s3592_s0 + $0x4] sm:$0xc] }
  0x17   :  { %v2921_v19 = vcombine.low %v874_v18, %v2905_v13  ;;  %v889_v22 = vrot.slane %v2914_v17, 2  ;;  %v2748_v23 = vld [vmem:[#allocation2 + $0xa0] sm:$0xff]   ;;  %v2927_v24 = vld [vmem:[%s3592_s0 + $0x10] sm:$0xff]   ;;  %v112_v28 = vshrl.u32 %v2900_v12, 16  ;;  %v2752_v34 = vld [vmem:[#allocation2 + $0xa8] sm:$0xff]   ;;  %v668_v61 = vshrl.u32 %v2914_v17, 16 }
  0x18   :  { %v101_v14 = vshrl.u32 %v2895_v11, 16  ;;  %v103_v15 = vshll.u32 %v2895_v11, 16  ;;  %v110_v21 = vrot.slane %v108_v16, 1  ;;  %v2933_v26 = vld [vmem:[%s3592_s0 + $0x14] sm:$0xff]   ;;  %v116_v29 = vshll.u32 %v2927_v24, 16  ;;  %v2751_v32 = vld [vmem:[#allocation2] sm:$0xff]  }
  0x19   :  { %2191 = vmatpush3.bf16.msra.mxu1 %v2737_v3  ;;  %2335 = vmatpush3.bf16.msra.mxu0 %v2738_v4  ;;  %v888_v25 = vrot.slane %v2921_v19, 2  ;;  %v891_v33 = vrot.slane %v2933_v26, 2  ;;  %v2949_v37 = vld [vmem:[%s3592_s0 + $0x18] sm:$0xff]   ;;  %v2756_v38 = vld [vmem:[#allocation2 + $0x8] sm:$0xff]   ;;  %v120_v39 = vshrl.u32 %v2927_v24, 16  ;;  %v2755_v44 = vld [vmem:[#allocation2 + $0xb0] sm:$0xff]  }
  0x1a   :  { %2192 = vmatprep.subr.bf16.mxu1 %v2837_v0  ;;  %2336 = vmatprep.subr.bf16.mxu0 %v2837_v0  ;;  %v105_v20 = vrot.slane %v103_v15, 1  ;;  %v114_v35 = vor.u32 %v112_v28, %v110_v21  ;;  %v118_v36 = vrot.slane %v116_v29, 1  ;;  %v124_v42 = vshll.u32 %v2949_v37, 16  ;;  %v2962_v43 = vld [vmem:[%s3592_s0 + $0x1c] sm:$0xff]   ;;  %v2762_v50 = vld [vmem:[#allocation2 + $0x10] sm:$0xff]   ;;  %v2982_v52 = vld [vmem:[%s3592_s0 + $0x24] sm:$0xff]  }
  0x1b   :  { %v890_v30 = vsel %vm887_vm3, %v888_v25, %v889_v22  ;;  %v892_v41 = vsel %vm887_vm3, %v889_v22, %v891_v33  ;;  %v2968_v45 = vld [vmem:[%s3592_s0 + $0x20] sm:$0xff]   ;;  %v893_v48 = vrot.slane %v2962_v43, 2  ;;  %v2759_v49 = vld [vmem:[#allocation2 + $0xb8] sm:$0xff]   ;;  %v128_v53 = vshrl.u32 %v2949_v37, 16  ;;  %v2993_v59 = vld [vmem:[%s3592_s0 + $0x28] sm:$0xff]  }
  0x1c   :  { %v106_v27 = vor.u32 %v105_v20, %v101_v14  ;;  %v119_v40 = vsel %vm99_vm1, %v114_v35, %v118_v36  ;;  %v122_v46 = vor.u32 %v120_v39, %v118_v36  ;;  %v126_v47 = vrot.slane %v124_v42, 1  ;;  %v2765_v56 = vld [vmem:[#allocation2 + $0x18] sm:$0xff]   ;;  %v3020_v14 = vld [vmem:[%s3592_s0 + $0x30] sm:$0xf]  ;;  %v54_v15 = vld [vmem:[%s3592_s0 + $0x34] sm:$0xf] }
  0x1d   :  { %2193 = vmatpush3.bf16.msra.mxu1 %v2739_v5  ;;  %2337 = vmatpush3.bf16.msra.mxu0 %v2740_v6  ;;  %v132_v51 = vshll.u32 %v2968_v45, 16  ;;  %v894_v55 = vsel %vm887_vm3, %v891_v33, %v893_v48  ;;  %v895_v58 = vrot.slane %v2982_v52, 2  ;;  %v671_v62 = vshll.u32 %v2914_v17, 16  ;;  %v2761_v29 = vld [vmem:[#allocation2 + $0xc0] sm:$0xff]   ;;  %v2764_v39 = vld [vmem:[#allocation2 + $0xc8] sm:$0xff]  }
  0x1e   :  { %2194 = vmatprep.subr.bf16.mxu1 %v2837_v0  ;;  %2338 = vmatprep.subr.bf16.mxu0 %v2837_v0  ;;  %v111_v31 = vsel %vm99_vm1, %v106_v27, %v110_v21  ;;  %v127_v54 = vsel %vm99_vm1, %v122_v46, %v126_v47  ;;  %v130_v60 = vor.u32 %v128_v53, %v126_v47  ;;  %v1066_v63 = vshrl.u32 %v2921_v19, 16  ;;  %v2766_v46 = vld [vmem:[#allocation2 + $0xd0] sm:$0xff]   ;;  %v2770_v53 = vld [vmem:[#allocation2 + $0xd8] sm:$0xff]  }
  0x1f   :  { %v134_v57 = vrot.slane %v132_v51, 1  ;;  %v1069_v1 = vshll.u32 %v2921_v19, 16  ;;  %v896_v3 = vsel %vm887_vm3, %v893_v48, %v895_v58  ;;  %v136_v4 = vshrl.u32 %v2968_v45, 16 }
  0x20   :  { %v140_v5 = vshll.u32 %v2993_v59, 16  ;;  %v1068_v6 = vrot.slane %v1066_v63, 2  ;;  %v1073_v8 = vrot.slane %v668_v61, 2  ;;  %v677_v19 = vshrl.u32 %v2933_v26, 16 }
  0x21   :  { %2195 = vmatpush3.bf16.msra.mxu1 %v2741_v7  ;;  %2339 = vmatpush3.bf16.msra.mxu0 %v2742_v10  ;;  %v135_v2 = vsel %vm99_vm1, %v130_v60, %v134_v57  ;;  %v1071_v7 = vrot.slane %v1069_v1, 3  ;;  %v1074_v10 = vrot.slane %v671_v62, 3  ;;  %v138_v16 = vor.u32 %v136_v4, %v134_v57 }
  0x22   :  { %2224 = vmatprep.subr.bf16.mxu1 %v2837_v0  ;;  %2368 = vmatprep.subr.bf16.mxu0 %v2837_v0  ;;  %v142_v18 = vrot.slane %v140_v5, 1  ;;  %v680_v20 = vshll.u32 %v2933_v26, 16  ;;  %v144_v27 = vshrl.u32 %v2993_v59, 16  ;;  %v686_v33 = vshrl.u32 %v2962_v43, 16 }
  0x23   :  { %v1072_v21 = vor.u32 %v1071_v7, %v1068_v6  ;;  %v1075_v22 = vor.u32 %v1074_v10, %v1073_v8  ;;  %v695_v48 = vshrl.u32 %v2982_v52, 16  ;;  %v670_v1 = vrot.slane %v668_v61, 1 }
  0x24   :  { %2197 = vmatmul.mubr.msk.bf16.vlgmr.msra.gmra.mrb[0].mxu1 %vm179_vm2, %v111_v31  ;;  %2341 = vmatmul.mubr.msk.bf16.vlgmr.msra.gmra.mrb[0].mxu0 %vm179_vm2, %v890_v30  ;;  %v143_v25 = vsel %vm99_vm1, %v138_v16, %v142_v18  ;;  %v1077_v31 = vrot.slane %v677_v19, 2  ;;  %v146_v35 = vor.u32 %v144_v27, %v142_v18  ;;  %v679_v7 = vrot.slane %v677_v19, 1  ;;  %v3096_v19 = vld [vmem:[%s3592_s0 + $0x34] sm:$0xff]  }
  0x25   :  { %2369 = vmatpush3.bf16.msra.mxu0 %v2748_v23  ;;  %2200 = vmatprep.mubr.msk.bf16.mxu1 %vm2838_vm0, %v2837_v0  ;;  %v3034_v23 = vcombine.low %v3020_v14, %v54_v15  ;;  %v1076_v28 = vsel %vm1064_vm4, %v1072_v21, %v1075_v22  ;;  %vm658_vm5 = vsmask.f32 6400  ;;  %v688_v15 = vrot.slane %v686_v33, 1 }
  0x26   :  { %2344 = vmatprep.mubr.msk.bf16.mxu0 %vm2838_vm0, %v2837_v0  ;;  %2370 = vmatprep.subr.bf16.mxu0 %v2837_v0  ;;  %vm434_vm7 = vcmask 1046528   ;;  %vm1493_vm8 = vsmask.f32 4352  ;;  %vm1946_vm9 = vcmask 521216  }
  0x27   :  { %2225 = vmatpush3.bf16.msra.mxu1 %v2751_v32  ;;  %v148_v30 = vshll.u32 %v3034_v23, 16  ;;  %v1078_v32 = vrot.slane %v680_v20, 3  ;;  %v152_v47 = vshrl.u32 %v3034_v23, 16 }
  0x28   :  { %2226 = vmatprep.subr.bf16.mxu1 %v2837_v0 }
  0x29   :  { %2371 = vmatpush3.bf16.msra.mxu0 %v2752_v34  ;;  %v689_v34 = vshll.u32 %v2962_v43, 16  ;;  %v150_v36 = vrot.slane %v148_v30, 1  ;;  %v596_v43 = vld [vmem:[%s3592_s0 + $0x4] sm:$0xe] }
  0x2a   :  { %2372 = vmatprep.subr.bf16.mxu0 %v2837_v0 }
  0x2b   :  { %2227 = vmatpush3.bf16.msra.mxu1 %v2756_v38  ;;  %v1079_v38 = vor.u32 %v1078_v32, %v1077_v31  ;;  %v151_v42 = vsel %vm99_vm1, %v146_v35, %v150_v36  ;;  %v691_v16 = vrot.slane %v689_v34, 2  ;;  %v716_v31 = vshll.u32 %v3096_v19, 16  ;;  %v2772_v35 = vld [vmem:[%s3592_s0 + $0x3c] ss:$0 sps:$4 sm:$0x33]  }
  0x2c   :  { %2201 = vmatmul.mubr.msk.bf16.gmra.mrb[4].mxu1 %vm179_vm2, %v119_v40  ;;  %2345 = vmatmul.mubr.msk.bf16.gmra.mrb[4].mxu0 %vm179_vm2, %v892_v41  ;;  %v1081_v40 = vrot.slane %v686_v33, 2  ;;  %v1082_v41 = vrot.slane %v689_v34, 3  ;;  %v697_v32 = vrot.slane %v695_v48, 1  ;;  %v2771_v34 = vld [vmem:[#allocation2 + $0x48] sm:$0xff]  }
  0x2d   :  { %2204 = vmatprep.mubr.msk.bf16.mxu1 %vm2838_vm0, %v2837_v0  ;;  %2348 = vmatprep.mubr.msk.bf16.mxu0 %vm2838_vm0, %v2837_v0  ;;  %v692_v26 = vor.u32 %v691_v16, %v688_v15  ;;  %v3199_v15 = vld [vmem:[%s3592_s0 + $0x1c] sm:$0xf] }
  0x2e   :  { %2373 = vmatpush3.bf16.msra.mxu0 %v2755_v44  ;;  %2228 = vmatprep.subr.bf16.mxu1 %v2837_v0  ;;  %v1080_v44 = vsel %vm1064_vm4, %v1075_v22, %v1079_v38  ;;  %v1083_v51 = vor.u32 %v1082_v41, %v1081_v40  ;;  %v2776_v41 = vld [vmem:[#allocation2 + $0x50] sm:$0xff]  }
  0x2f   :  { %2374 = vmatprep.subr.bf16.mxu0 %v2837_v0  ;;  %2229 = vmatpush3.bf16.msra.mxu1 %v2762_v50  ;;  %v1995_v50 = vcombine.low %v596_v43, %v2905_v13  ;;  %v1101_v43 = vshll.u32 %v2772_v35, 16 }
  0x30   :  { %2230 = vmatprep.subr.bf16.mxu1 %v2837_v0  ;;  %v1084_v13 = vsel %vm1064_vm4, %v1079_v38, %v1083_v51 }
  0x31   :  { %v660_v60 = vshrl.u32 %v1995_v50, 16  ;;  %v663_v63 = vshll.u32 %v1995_v50, 16 }
  0x32   :  { %2375 = vmatpush3.bf16.msra.mxu0 %v2759_v49  ;;  %v698_v49 = vshll.u32 %v2982_v52, 16 }
  0x33   :  { %2404 = vmatprep.subr.bf16.mxu0 %v2837_v0  ;;  %2231 = vmatpush3.bf16.msra.mxu1 %v2765_v56  ;;  %v1085_v56 = vrot.slane %v695_v48, 2  ;;  %v665_v6 = vrot.slane %v663_v63, 2  ;;  %v2781_v48 = vld [vmem:[#allocation2 + $0x58] sm:$0xff]  }
  0x34   :  { %2205 = vmatmul.mubr.msk.bf16.gmra.mrb[8].mxu1 %vm179_vm2, %v127_v54  ;;  %2349 = vmatmul.mubr.msk.bf16.gmra.mrb[8].mxu0 %vm179_vm2, %v894_v55  ;;  %v3072_v54 = vld [vmem:[%s3592_s0 + $0x2c] sm:$0xff]   ;;  %v154_v55 = vor.u32 %v152_v47, %v150_v36  ;;  %v1086_v57 = vrot.slane %v698_v49, 3  ;;  %v700_v33 = vrot.slane %v698_v49, 2 }
  0x35   :  { %2208 = vmatprep.mubr.msk.bf16.mxu1 %vm2838_vm0, %v2837_v0  ;;  %2352 = vmatprep.mubr.msk.bf16.mxu0 %vm2838_vm0, %v2837_v0  ;;  %v704_v5 = vshrl.u32 %v3072_v54, 16  ;;  %v707_v17 = vshll.u32 %v3072_v54, 16 }
  0x36   :  { %2260 = vmatprep.subr.bf16.mxu1 %v2837_v0  ;;  %v1087_v4 = vor.u32 %v1086_v57, %v1085_v56  ;;  %v3143_v56 = vld [vmem:[%s3592_s0 + $0x10] sm:$0xf] }
  0x37   :  { %v1089_v18 = vrot.slane %v704_v5, 2  ;;  %v709_v47 = vrot.slane %v707_v17, 2 }
  0x38   :  { %v1088_v22 = vsel %vm1064_vm4, %v1083_v51, %v1087_v4 }
  0x3c   :  { %2209 = vmatmul.mubr.msk.bf16.gmra.mrb[12].mxu1 %vm179_vm2, %v135_v2  ;;  %2353 = vmatmul.mubr.msk.bf16.gmra.mrb[12].mxu0 %vm179_vm2, %v896_v3  ;;  %v662_v2 = vrot.slane %v660_v60, 1  ;;  %v673_v3 = vrot.slane %v671_v62, 2  ;;  %v682_v62 = vrot.slane %v680_v20, 2  ;;  %v2768_v20 = vld [vmem:[#allocation2 + $0x40] sm:$0xff]  }
  0x3d   :  { %2212 = vmatprep.mubr.msk.bf16.mxu1 %vm2838_vm0, %v2837_v0  ;;  %2376 = vmatprep.mubr.msk.bf16.mxu0 %vm2838_vm0, %v2837_v0 }
  0x3e   :  { %v674_v61 = vor.u32 %v673_v3, %v670_v1  ;;  %v666_v8 = vor.u32 %v665_v6, %v662_v2  ;;  %v683_v10 = vor.u32 %v682_v62, %v679_v7  ;;  %v718_v1 = vrot.slane %v716_v31, 2  ;;  %v1254_v2 = vld [vmem:[%s3592_s0 + $0x8] sm:$0x8]  ;;  %v3164_v3 = vld [vmem:[%s3592_s0 + $0x14] sm:$0xf] }
  0x3f   :  { %v3174_v7 = vcombine.low %v3143_v56, %v3164_v3 }
  0x40   :  { %v3099_v21 = vsel %vm658_vm5, %v666_v8, %v674_v61  ;;  %v3103_v27 = vsel %vm658_vm5, %v674_v61, %v683_v10 }
  0x44   :  { %2213 = vmatmul.mubr.msk.bf16.gmra.mrb[16].mxu1 %vm179_vm2, %v143_v25  ;;  %2377 = vmatmul.mubr.msk.bf16.vlgmr.msra.gmra.mrb[0].mxu0 %vm179_vm2, %v1076_v28  ;;  %v1090_v25 = vrot.slane %v707_v17, 3  ;;  %v3106_v28 = vsel %vm658_vm5, %v683_v10, %v692_v26  ;;  %v3179_v17 = vld [vmem:[%s3592_s0 + $0x18] sm:$0xf]  ;;  %v1318_v10 = vrot.slane %v3174_v7, 3 }
  0x45   :  { %2405 = vmatpush3.bf16.msra.mxu0 %v2761_v29  ;;  %2216 = vmatprep.mubr.msk.bf16.mxu1 %vm2838_vm0, %v2837_v0  ;;  %v713_v29 = vshrl.u32 %v3096_v19, 16  ;;  %v2070_v62 = vcombine.low %v3164_v3, %v3179_v17  ;;  %v899_v3 = vrot.slane %v3096_v19, 2 }
  0x46   :  { %2380 = vmatprep.mubr.msk.bf16.mxu0 %vm2838_vm0, %v2837_v0  ;;  %2406 = vmatprep.subr.bf16.mxu0 %v2837_v0  ;;  %v1091_v30 = vor.u32 %v1090_v25, %v1089_v18  ;;  %v2775_v18 = vld [vmem:[#allocation2 + $0xe0] sm:$0xff]  }
  0x47   :  { %v1093_v38 = vrot.slane %v713_v29, 2  ;;  %v715_v63 = vrot.slane %v713_v29, 1  ;;  %v3209_v25 = vld [vmem:[%s3592_s0 + $0x20] sm:$0xf]  ;;  %v2778_v29 = vld [vmem:[#allocation2 + $0xe8] sm:$0xff]  }
  0x48   :  { %v1092_v36 = vsel %vm1064_vm4, %v1087_v4, %v1091_v30 }
  0x49   :  { %2407 = vmatpush3.bf16.msra.mxu0 %v2764_v39  ;;  %v1094_v39 = vrot.slane %v716_v31, 3  ;;  %v3166_v4 = vor.u32 %v718_v1, %v715_v63  ;;  %v3303_v1 = vld [vmem:[%s3592_s0 + $0x38] sm:$0xf] }
  0x4a   :  { %2408 = vmatprep.subr.bf16.mxu0 %v2837_v0 }
  0x4c   :  { %2217 = vmatmul.mubr.msk.bf16.gmra.mrb[20].mxu1 %vm179_vm2, %v151_v42  ;;  %2381 = vmatmul.mubr.msk.bf16.gmra.mrb[4].mxu0 %vm179_vm2, %v1080_v44  ;;  %v1098_v42 = vshrl.u32 %v2772_v35, 16  ;;  %v1095_v44 = vor.u32 %v1094_v39, %v1093_v38  ;;  %v45_v35 = vld [vmem:[%s3592_s0 + $0x34] sm:$0x7]  ;;  %v421_v38 = vld [vmem:[%s3592_s0] sm:$0xe] }
  0x4d   :  { %2220 = vmatprep.mubr.msk.bf16.mxu1 %vm2838_vm0, %v2837_v0  ;;  %2384 = vmatprep.mubr.msk.bf16.mxu0 %vm2838_vm0, %v2837_v0  ;;  %v3257_v39 = vld [vmem:[%s3592_s0 + $0x2c] sm:$0xf] }
  0x4e   :  { %2409 = vmatpush3.bf16.msra.mxu0 %v2766_v46  ;;  %v706_v46 = vrot.slane %v704_v5, 1  ;;  %v1096_v50 = vsel %vm1064_vm4, %v1091_v30, %v1095_v44  ;;  %v1100_v51 = vrot.slane %v1098_v42, 2  ;;  %v3225_v30 = vld [vmem:[%s3592_s0 + $0x24] sm:$0xf]  ;;  %v1971_v42 = vcombine.low %v3020_v14, %v45_v35 }
  0x4f   :  { %2410 = vmatprep.subr.bf16.mxu0 %v2837_v0  ;;  %v2790_v35 = vld [vmem:[%s3592_s0 + $0x40] ss:$0 sps:$4 sm:$0x33]  }
  0x50   :  { %v710_v49 = vor.u32 %v709_v47, %v706_v46 }
  0x52   :  { %2411 = vmatpush3.bf16.msra.mxu0 %v2770_v53  ;;  %v1103_v53 = vrot.slane %v1101_v43, 3  ;;  %v3183_v61 = vsel %vm658_vm5, %v710_v49, %v3166_v4  ;;  %v1983_v43 = vcombine.low %v421_v38, %v2892_v9  ;;  %v436_v9 = vrot.slane %v2900_v12, 1 }
  0x53   :  { %2440 = vmatprep.subr.bf16.mxu0 %v2837_v0  ;;  %v1330_v38 = vrot.slane %v2790_v35, 3 }
  0x54   :  { %2221 = vmatmul.mubr.msk.bf16.gmra.mrb[24].mxu1 %vm179_vm2, %v154_v55  ;;  %2385 = vmatmul.mubr.msk.bf16.gmra.mrb[8].mxu0 %vm179_vm2, %v1084_v13  ;;  %v3138_v55 = vld [vmem:[%s3592_s0 + $0xc] sm:$0xf]  ;;  %v1104_v60 = vor.u32 %v1103_v53, %v1100_v51  ;;  %v435_v14 = vrot.slane %v1983_v43, 1  ;;  %v2786_v53 = vld [vmem:[#allocation2 + $0x60] sm:$0xff]  }
  0x55   :  { %2232 = vmatprep.mubr.msk.bf16.mxu1 %vm2838_vm0, %v2837_v0  ;;  %2388 = vmatprep.mubr.msk.bf16.mxu0 %vm2838_vm0, %v2837_v0  ;;  %v2069_v13 = vcombine.low %v3138_v55, %v3143_v56  ;;  %v3170_v6 = vcombine.low %v1254_v2, %v3138_v55  ;;  %v3308_v2 = vld [vmem:[%s3592_s0 + $0x3c] sm:$0xf] }
  0x56   :  { %v1105_v5 = vsel %vm1064_vm4, %v1095_v44, %v1104_v60  ;;  %v438_v60 = vrot.slane %v2927_v24, 1 }
  0x57   :  { %v1317_v8 = vrot.slane %v3170_v6, 3 }
  0x59   :  { %v1319_v16 = vsel %vm1316_vm6, %v1317_v8, %v1318_v10  ;;  %v439_v8 = vsel %vm434_vm7, %v436_v9, %v438_v60 }
  0x5c   :  { %2233 = vmatmul.mubr.msk.bf16.vlgmr.msra.gmra.mrb[0].mxu1 %vm179_vm2, %v2895_v11  ;;  %2389 = vmatmul.mubr.msk.bf16.gmra.mrb[12].mxu0 %vm179_vm2, %v1088_v22  ;;  %v701_v11 = vor.u32 %v700_v33, %v697_v32  ;;  %v3204_v22 = vcombine.low %v3179_v17, %v3199_v15  ;;  %v3230_v32 = vcombine.low %v3209_v25, %v3225_v30  ;;  %v3235_v33 = vld [vmem:[%s3592_s0 + $0x28] sm:$0xf] }
  0x5d   :  { %2236 = vmatprep.mubr.msk.bf16.mxu1 %vm2838_vm0, %v2837_v0  ;;  %2392 = vmatprep.mubr.msk.bf16.mxu0 %vm2838_vm0, %v2837_v0  ;;  %v3265_v46 = vcombine.low %v3235_v33, %v3257_v39 }
  0x5e   :  { %2261 = vmatpush3.bf16.msra.mxu1 %v2768_v20  ;;  %v3123_v40 = vsel %vm658_vm5, %v692_v26, %v701_v11  ;;  %v3146_v57 = vsel %vm658_vm5, %v701_v11, %v710_v49  ;;  %v2071_v26 = vcombine.low %v3199_v15, %v3209_v25  ;;  %v1320_v20 = vrot.slane %v3204_v22, 3  ;;  %v3284_v49 = vld [vmem:[%s3592_s0 + $0x34] sm:$0xf] }
  0x5f   :  { %2262 = vmatprep.subr.bf16.mxu1 %v2837_v0  ;;  %v2072_v11 = vcombine.low %v3225_v30, %v3235_v33  ;;  %v1324_v47 = vrot.slane %v3265_v46, 3 }
  0x60   :  { %v1321_v31 = vsel %vm1316_vm6, %v1318_v10, %v1320_v20  ;;  %v3315_v10 = vcombine.low %v3303_v1, %v3308_v2 }
  0x62   :  { %2263 = vmatpush3.bf16.msra.mxu1 %v2771_v34  ;;  %v2784_v34 = vld [vmem:[#allocation2 + $0xf0] sm:$0xff]  }
  0x63   :  { %2264 = vmatprep.subr.bf16.mxu1 %v2837_v0 }
  0x64   :  { %2237 = vmatmul.mubr.msk.bf16.gmra.mrb[4].mxu1 %vm179_vm2, %v2900_v12  ;;  %2393 = vmatmul.mubr.msk.bf16.gmra.mrb[16].mxu0 %vm179_vm2, %v1092_v36  ;;  %v1322_v36 = vrot.slane %v3230_v32, 3 }
  0x65   :  { %2240 = vmatprep.mubr.msk.bf16.mxu1 %vm2838_vm0, %v2837_v0  ;;  %2396 = vmatprep.mubr.msk.bf16.mxu0 %vm2838_vm0, %v2837_v0 }
  0x66   :  { %2265 = vmatpush3.bf16.msra.mxu1 %v2776_v41  ;;  %v2788_v41 = vld [vmem:[#allocation2 + $0xf8] sm:$0xff]   ;;  %v1323_v44 = vsel %vm1316_vm6, %v1320_v20, %v1322_v36  ;;  %v1325_v51 = vsel %vm1316_vm6, %v1322_v36, %v1324_v47  ;;  %v1328_v20 = vrot.slane %v3315_v10, 3  ;;  %v1495_v36 = vshrl.u32 %v3170_v6, 16 }
  0x67   :  { %2266 = vmatprep.subr.bf16.mxu1 %v2837_v0 }
  0x6a   :  { %2267 = vmatpush3.bf16.msra.mxu1 %v2781_v48  ;;  %v3279_v48 = vld [vmem:[%s3592_s0 + $0x30] sm:$0xf] }
  0x6b   :  { %2296 = vmatprep.subr.bf16.mxu1 %v2837_v0  ;;  %v3290_v12 = vcombine.low %v3279_v48, %v3284_v49  ;;  %v2073_v52 = vcombine.low %v3257_v39, %v3279_v48 }
  0x6c   :  { %2241 = vmatmul.mubr.msk.bf16.gmra.mrb[8].mxu1 %vm179_vm2, %v2927_v24  ;;  %2397 = vmatmul.mubr.msk.bf16.gmra.mrb[20].mxu0 %vm179_vm2, %v1096_v50  ;;  %v437_v50 = vsel %vm434_vm7, %v435_v14, %v436_v9  ;;  %v1497_v14 = vrot.slane %v1495_v36, 3  ;;  %v1530_v36 = vshrl.u32 %v3265_v46, 16 }
  0x6d   :  { %2244 = vmatprep.mubr.msk.bf16.mxu1 %vm2838_vm0, %v2837_v0  ;;  %2400 = vmatprep.mubr.msk.bf16.mxu0 %vm2838_vm0, %v2837_v0  ;;  %v1326_v63 = vrot.slane %v3290_v12, 3 }
  0x6f   :  { %v1327_v24 = vsel %vm1316_vm6, %v1324_v47, %v1326_v63 }
  0x74   :  { %2245 = vmatmul.mubr.msk.bf16.gmra.mrb[12].mxu1 %vm179_vm2, %v2949_v37  ;;  %2401 = vmatmul.mubr.msk.bf16.gmra.mrb[24].mxu0 %vm179_vm2, %v1105_v5  ;;  %v2789_v5 = vld [vmem:[#allocation2 + $0x68] sm:$0xff]  }
  0x75   :  { %2248 = vmatprep.mubr.msk.bf16.mxu1 %vm2838_vm0, %v2837_v0  ;;  %2412 = vmatprep.mubr.msk.bf16.mxu0 %vm2838_vm0, %v2837_v0 }
  0x7c   :  { %2249 = vmatmul.mubr.msk.bf16.gmra.mrb[16].mxu1 %vm179_vm2, %v2968_v45  ;;  %2413 = vmatmul.mubr.msk.bf16.vlgmr.msra.gmra.mrb[0].mxu0 %vm179_vm2, %v1319_v16  ;;  %v2792_v16 = vld [vmem:[#allocation2 + $0x70] sm:$0xff]  }
  0x7d   :  { %2441 = vmatpush3.bf16.msra.mxu0 %v2775_v18  ;;  %2252 = vmatprep.mubr.msk.bf16.mxu1 %vm2838_vm0, %v2837_v0  ;;  %v440_v18 = vrot.slane %v2949_v37, 1  ;;  %v442_v37 = vrot.slane %v2968_v45, 1  ;;  %v1331_v45 = vsel %vm1316_vm6, %v1328_v20, %v1330_v38  ;;  %v1533_v38 = vshll.u32 %v3265_v46, 16 }
  0x7e   :  { %2416 = vmatprep.mubr.msk.bf16.mxu0 %vm2838_vm0, %v2837_v0  ;;  %2442 = vmatprep.subr.bf16.mxu0 %v2837_v0 }
  0x7f   :  { %v443_v43 = vsel %vm434_vm7, %v440_v18, %v442_v37 }
  0x81   :  { %2443 = vmatpush3.bf16.msra.mxu0 %v2778_v29  ;;  %v2794_v29 = vld [vmem:[#allocation2 + $0x78] sm:$0xff]  }
  0x82   :  { %2444 = vmatprep.subr.bf16.mxu0 %v2837_v0 }
  0x84   :  { %2253 = vmatmul.mubr.msk.bf16.gmra.mrb[20].mxu1 %vm179_vm2, %v2993_v59  ;;  %2417 = vmatmul.mubr.msk.bf16.gmra.mrb[4].mxu0 %vm179_vm2, %v1321_v31  ;;  %v441_v31 = vsel %vm434_vm7, %v438_v60, %v440_v18  ;;  %v1515_v60 = vshll.u32 %v3204_v22, 16 }
  0x85   :  { %2256 = vmatprep.mubr.msk.bf16.mxu1 %vm2838_vm0, %v2837_v0  ;;  %2420 = vmatprep.mubr.msk.bf16.mxu0 %vm2838_vm0, %v2837_v0 }
  0x86   :  { %2445 = vmatpush3.bf16.msra.mxu0 %v2784_v34  ;;  %v1329_v34 = vsel %vm1316_vm6, %v1326_v63, %v1328_v20  ;;  %v1521_v20 = vshrl.u32 %v3230_v32, 16 }
  0x87   :  { %2446 = vmatprep.subr.bf16.mxu0 %v2837_v0 }
  0x88   :  { %v1523_v35 = vrot.slane %v1521_v20, 3 }
  0x8a   :  { %2447 = vmatpush3.bf16.msra.mxu0 %v2788_v41  ;;  %v1498_v41 = vshll.u32 %v3170_v6, 16 }
  0x8b   :  { %2476 = vmatprep.subr.bf16.mxu0 %v2837_v0 }
  0x8c   :  { %2257 = vmatmul.mubr.msk.bf16.gmra.mrb[24].mxu1 %vm179_vm2, %v1971_v42  ;;  %2421 = vmatmul.mubr.msk.bf16.gmra.mrb[8].mxu0 %vm179_vm2, %v1323_v44  ;;  %v1503_v42 = vshrl.u32 %v3174_v7, 16  ;;  %v1506_v44 = vshll.u32 %v3174_v7, 16  ;;  %v1500_v9 = vrot.slane %v1498_v41, 4  ;;  %v2796_v41 = vld [vmem:[#allocation2 + $0x118] sm:$0xff]  }
  0x8d   :  { %2268 = vmatprep.mubr.msk.bf16.mxu1 %vm2838_vm0, %v2837_v0  ;;  %2424 = vmatprep.mubr.msk.bf16.mxu0 %vm2838_vm0, %v2837_v0 }
  0x8e   :  { %v1505_v47 = vrot.slane %v1503_v42, 3  ;;  %v1501_v6 = vor.u32 %v1500_v9, %v1497_v14  ;;  %v1539_v14 = vshrl.u32 %v3290_v12, 16 }
  0x94   :  { %2269 = vmatmul.mubr.msk.bf16.vlgmr.msra.gmra.mrb[0].mxu1 %vm179_vm2, %v437_v50  ;;  %2425 = vmatmul.mubr.msk.bf16.gmra.mrb[12].mxu0 %vm179_vm2, %v1325_v51  ;;  %v1508_v50 = vrot.slane %v1506_v44, 4  ;;  %v444_v51 = vrot.slane %v2993_v59, 1  ;;  %v1517_v59 = vrot.slane %v1515_v60, 4  ;;  %v1532_v44 = vrot.slane %v1530_v36, 3 }
  0x95   :  { %2272 = vmatprep.mubr.msk.bf16.mxu1 %vm2838_vm0, %v2837_v0  ;;  %2428 = vmatprep.mubr.msk.bf16.mxu0 %vm2838_vm0, %v2837_v0 }
  0x96   :  { %2297 = vmatpush3.bf16.msra.mxu1 %v2786_v53  ;;  %v1509_v7 = vor.u32 %v1508_v50, %v1505_v47  ;;  %v1512_v53 = vshrl.u32 %v3204_v22, 16  ;;  %v445_v63 = vsel %vm434_vm7, %v442_v37, %v444_v51  ;;  %v2793_v22 = vld [vmem:[#allocation2 + $0x108] sm:$0xff]   ;;  %v1541_v47 = vrot.slane %v1539_v14, 3 }
  0x97   :  { %2298 = vmatprep.subr.bf16.mxu1 %v2837_v0 }
  0x9a   :  { %2299 = vmatpush3.bf16.msra.mxu1 %v2789_v5  ;;  %v1510_v5 = vsel %vm1493_vm8, %v1501_v6, %v1509_v7  ;;  %v1548_v6 = vshrl.u32 %v3315_v10, 16 }
  0x9b   :  { %2300 = vmatprep.subr.bf16.mxu1 %v2837_v0 }
  0x9c   :  { %2273 = vmatmul.mubr.msk.bf16.gmra.mrb[4].mxu1 %vm179_vm2, %v439_v8  ;;  %2429 = vmatmul.mubr.msk.bf16.gmra.mrb[16].mxu0 %vm179_vm2, %v1327_v24  ;;  %v2791_v8 = vld [vmem:[#allocation2 + $0x100] sm:$0xff]   ;;  %v1514_v24 = vrot.slane %v1512_v53, 3  ;;  %v1550_v60 = vrot.slane %v1548_v6, 3 }
  0x9d   :  { %2276 = vmatprep.mubr.msk.bf16.mxu1 %vm2838_vm0, %v2837_v0  ;;  %2432 = vmatprep.mubr.msk.bf16.mxu0 %vm2838_vm0, %v2837_v0  ;;  %v3401_v53 = vld [vmem:[%s3592_s0 + $0x40] sm:$0x7] }
  0x9e   :  { %2301 = vmatpush3.bf16.msra.mxu1 %v2792_v16  ;;  %v446_v16 = vrot.slane %v3034_v23, 1  ;;  %v1518_v18 = vor.u32 %v1517_v59, %v1514_v24  ;;  %v2795_v23 = vld [vmem:[#allocation2 + $0x110] sm:$0xff]   ;;  %v2075_v17 = vcombine.low %v3308_v2, %v3401_v53  ;;  %v3502_v2 = vld [vmem:[%s3594_s2] ss:$0 sm:$0xff] }
  0x9f   :  { %2302 = vmatprep.subr.bf16.mxu1 %v2837_v0 }
  0xa2   :  { %2303 = vmatpush3.bf16.msra.mxu1 %v2794_v29  ;;  %v1524_v29 = vshll.u32 %v3230_v32, 16 }
  0xa3   :  { %2512 = vmatprep.subr.bf16.mxu1 %v2837_v0 }
  0xa4   :  { %2277 = vmatmul.mubr.msk.bf16.gmra.mrb[8].mxu1 %vm179_vm2, %v441_v31  ;;  %2433 = vmatmul.mubr.msk.bf16.gmra.mrb[20].mxu0 %vm179_vm2, %v1329_v34  ;;  %v447_v31 = vsel %vm434_vm7, %v444_v51, %v446_v16  ;;  %v1519_v34 = vsel %vm1493_vm8, %v1509_v7, %v1518_v18  ;;  %v1526_v37 = vrot.slane %v1524_v29, 4  ;;  %v2806_v7 = vld [vmem:[#allocation2 + $0x80] sm:$0xff]  }
  0xa5   :  { %2280 = vmatprep.mubr.msk.bf16.mxu1 %vm2838_vm0, %v2837_v0  ;;  %2436 = vmatprep.mubr.msk.bf16.mxu0 %vm2838_vm0, %v2837_v0 }
  0xa6   :  { %v1527_v32 = vor.u32 %v1526_v37, %v1523_v35 }
  0xa8   :  { %v1528_v42 = vsel %vm1493_vm8, %v1518_v18, %v1527_v32 }
  0xac   :  { %2281 = vmatmul.mubr.msk.bf16.gmra.mrb[12].mxu1 %vm179_vm2, %v443_v43  ;;  %2437 = vmatmul.mubr.msk.bf16.gmra.mrb[24].mxu0 %vm179_vm2, %v1331_v45  ;;  %v1535_v43 = vrot.slane %v1533_v38, 4  ;;  %v1542_v45 = vshll.u32 %v3290_v12, 16  ;;  %v1551_v12 = vshll.u32 %v3315_v10, 16  ;;  %v3507_v38 = vld [vmem:[%s3595_s3] ss:$0 sm:$0xff] }
  0xad   :  { %2284 = vmatprep.mubr.msk.bf16.mxu1 %vm2838_vm0, %v2837_v0  ;;  %2448 = vmatprep.mubr.msk.bf16.mxu0 %vm2838_vm0, %v2837_v0 }
  0xae   :  { %v1536_v46 = vor.u32 %v1535_v43, %v1532_v44  ;;  %v1544_v50 = vrot.slane %v1542_v45, 4 }
  0xb0   :  { %v1537_v9 = vsel %vm1493_vm8, %v1527_v32, %v1536_v46  ;;  %v1545_v51 = vor.u32 %v1544_v50, %v1541_v47 }
  0xb4   :  { %2285 = vmatmul.mubr.msk.bf16.gmra.mrb[16].mxu1 %vm179_vm2, %v445_v63  ;;  %2449 = vmatmul.mubr.msk.bf16.vlgmr.msra.gmra.mrb[0].mxu0 %vm179_vm2, %v1510_v5  ;;  %v1553_v63 = vrot.slane %v1551_v12, 4  ;;  %v2057_v5 = vcombine.low %v3401_v53, %v3401_v53 }
  0xb5   :  { %2477 = vmatpush3.bf16.msra.mxu0 %v2791_v8  ;;  %2288 = vmatprep.mubr.msk.bf16.mxu1 %vm2838_vm0, %v2837_v0  ;;  %v2807_v8 = vld [vmem:[#allocation2 + $0x88] sm:$0xff]  }
  0xb6   :  { %2452 = vmatprep.mubr.msk.bf16.mxu0 %vm2838_vm0, %v2837_v0  ;;  %2478 = vmatprep.subr.bf16.mxu0 %v2837_v0  ;;  %v1554_v10 = vor.u32 %v1553_v63, %v1550_v60  ;;  %v1557_v24 = vshrl.u32 %v2057_v5, 16  ;;  %v1560_v59 = vshll.u32 %v2057_v5, 16 }
  0xb8   :  { %v1555_v18 = vsel %vm1493_vm8, %v1545_v51, %v1554_v10  ;;  %v1562_v20 = vrot.slane %v1560_v59, 4 }
  0xb9   :  { %2479 = vmatpush3.bf16.msra.mxu0 %v2793_v22  ;;  %v1559_v22 = vrot.slane %v1557_v24, 3 }
  0xba   :  { %2480 = vmatprep.subr.bf16.mxu0 %v2837_v0 }
  0xbb   :  { %v1563_v29 = vor.u32 %v1562_v20, %v1559_v22 }
  0xbc   :  { %2289 = vmatmul.mubr.msk.bf16.gmra.mrb[20].mxu1 %vm179_vm2, %v447_v31  ;;  %2453 = vmatmul.mubr.msk.bf16.gmra.mrb[4].mxu0 %vm179_vm2, %v1519_v34 }
  0xbd   :  { %2292 = vmatprep.mubr.msk.bf16.mxu1 %vm2838_vm0, %v2837_v0  ;;  %2456 = vmatprep.mubr.msk.bf16.mxu0 %vm2838_vm0, %v2837_v0  ;;  %v1564_v31 = vsel %vm1493_vm8, %v1554_v10, %v1563_v29 }
  0xbe   :  { %2481 = vmatpush3.bf16.msra.mxu0 %v2795_v23 }
  0xbf   :  { %2482 = vmatprep.subr.bf16.mxu0 %v2837_v0 }
  0xc2   :  { %2483 = vmatpush3.bf16.msra.mxu0 %v2796_v41 }
  0xc4   :  { %2293 = vmatmul.mubr.msk.bf16.gmra.mrb[24].mxu1 %vm179_vm2, %v446_v16  ;;  %2457 = vmatmul.mubr.msk.bf16.gmra.mrb[8].mxu0 %vm179_vm2, %v1528_v42  ;;  %v2808_v16 = vld [vmem:[#allocation2 + $0x90] sm:$0xff]  }
  0xc5   :  { %2304 = vmatprep.mubr.msk.bf16.mxu1 %vm2838_vm0, %v2837_v0  ;;  %2460 = vmatprep.mubr.msk.bf16.mxu0 %vm2838_vm0, %v2837_v0 }
  0xcc   :  { %2305 = vmatmul.mubr.msk.bf16.vlgmr.msra.gmra.mrb[0].mxu1 %vm179_vm2, %v3099_v21  ;;  %2461 = vmatmul.mubr.msk.bf16.gmra.mrb[12].mxu0 %vm179_vm2, %v1537_v9  ;;  %v1546_v21 = vsel %vm1493_vm8, %v1536_v46, %v1545_v51 }
  0xcd   :  { %2308 = vmatprep.mubr.msk.bf16.mxu1 %vm2838_vm0, %v2837_v0  ;;  %2464 = vmatprep.mubr.msk.bf16.mxu0 %vm2838_vm0, %v2837_v0 }
  0xce   :  { %2516 = vmatpush3.bf16.msra.mxu1 %v2806_v7 }
  0xcf   :  { %2513 = vmatprep.subr.bf16.mxu1 %v2837_v0 }
  0xd2   :  { %2517 = vmatpush3.bf16.msra.mxu1 %v2807_v8 }
  0xd3   :  { %2514 = vmatprep.subr.bf16.mxu1 %v2837_v0 }
  0xd4   :  { %2309 = vmatmul.mubr.msk.bf16.gmra.mrb[4].mxu1 %vm179_vm2, %v3103_v27  ;;  %2465 = vmatmul.mubr.msk.bf16.gmra.mrb[16].mxu0 %vm179_vm2, %v1546_v21  ;;  %v2809_v27 = vld [vmem:[#allocation2 + $0x98] sm:$0xff]  }
  0xd5   :  { %2312 = vmatprep.mubr.msk.bf16.mxu1 %vm2838_vm0, %v2837_v0  ;;  %2468 = vmatprep.mubr.msk.bf16.mxu0 %vm2838_vm0, %v2837_v0 }
  0xd6   :  { %2518 = vmatpush3.bf16.msra.mxu1 %v2808_v16 }
  0xd7   :  { %2515 = vmatprep.subr.bf16.mxu1 %v2837_v0 }
  0xda   :  { %2519 = vmatpush3.bf16.msra.mxu1 %v2809_v27 }
  0xdc   :  { %2313 = vmatmul.mubr.msk.bf16.gmra.mrb[8].mxu1 %vm179_vm2, %v3106_v28  ;;  %2469 = vmatmul.mubr.msk.bf16.gmra.mrb[20].mxu0 %vm179_vm2, %v1555_v18  ;;  %v2800_v28 = vld [vmem:[%s3592_s0 + $0x3c] ss:$0 sps:$4 sm:$0x11]  }
  0xdd   :  { %2316 = vmatprep.mubr.msk.bf16.mxu1 %vm2838_vm0, %v2837_v0  ;;  %2472 = vmatprep.mubr.msk.bf16.mxu0 %vm2838_vm0, %v2837_v0 }
  0xe4   :  { %2317 = vmatmul.mubr.msk.bf16.gmra.mrb[12].mxu1 %vm179_vm2, %v3123_v40  ;;  %2473 = vmatmul.mubr.msk.bf16.gmra.mrb[24].mxu0 %vm179_vm2, %v1564_v31  ;;  %v722_v40 = vshll.u32 %v2800_v28, 16 }
  0xe5   :  { %2320 = vmatprep.mubr.msk.bf16.mxu1 %vm2838_vm0, %v2837_v0  ;;  %2484 = vmatprep.mubr.msk.bf16.mxu0 %vm2838_vm0, %v2837_v0 }
  0xe6   :  { %v724_v55 = vrot.slane %v722_v40, 2 }
  0xe8   :  { %v725_v56 = vsel %vm658_vm5, %v3166_v4, %v724_v55  ;;  %v2074_v4 = vcombine.low %v3284_v49, %v3303_v1 }
  0xec   :  { %2321 = vmatmul.mubr.msk.bf16.gmra.mrb[16].mxu1 %vm179_vm2, %v3146_v57  ;;  %2485 = vmatmul.mubr.msk.bf16.vlgmr.msra.gmra.mrb[0].mxu0 %vm179_vm2, %v2069_v13  ;;  %v897_v57 = vrot.slane %v3072_v54, 2  ;;  %v901_v54 = vrot.slane %v2800_v28, 2 }
  0xed   :  { %2324 = vmatprep.mubr.msk.bf16.mxu1 %vm2838_vm0, %v2837_v0  ;;  %2488 = vmatprep.mubr.msk.bf16.mxu0 %vm2838_vm0, %v2837_v0 }
  0xee   :  { %v898_v13 = vsel %vm887_vm3, %v895_v58, %v897_v57  ;;  %v900_v58 = vsel %vm887_vm3, %v897_v57, %v899_v3  ;;  %v902_v19 = vsel %vm887_vm3, %v899_v3, %v901_v54 }
  0xf4   :  { %2325 = vmatmul.mubr.msk.bf16.gmra.mrb[20].mxu1 %vm179_vm2, %v3183_v61  ;;  %2489 = vmatmul.mubr.msk.bf16.gmra.mrb[4].mxu0 %vm179_vm2, %v2070_v62 }
  0xf5   :  { %2328 = vmatprep.mubr.msk.bf16.mxu1 %vm2838_vm0, %v2837_v0  ;;  %2492 = vmatprep.mubr.msk.bf16.mxu0 %vm2838_vm0, %v2837_v0 }
  0xfc   :  { %2329 = vmatmul.mubr.msk.bf16.gmra.mrb[24].mxu1 %vm179_vm2, %v725_v56  ;;  %2493 = vmatmul.mubr.msk.bf16.gmra.mrb[8].mxu0 %vm179_vm2, %v2071_v26 }
  0xfd   :  { %2356 = vmatprep.mubr.msk.bf16.mxu1 %vm2838_vm0, %v2837_v0  ;;  %2496 = vmatprep.mubr.msk.bf16.mxu0 %vm2838_vm0, %v2837_v0 }
 0x104   :  { %2357 = vmatmul.mubr.msk.bf16.vlgmr.msra.gmra.mrb[16].mxu1 %vm179_vm2, %v898_v13  ;;  %2497 = vmatmul.mubr.msk.bf16.gmra.mrb[12].mxu0 %vm179_vm2, %v2072_v11 }
 0x105   :  { %2360 = vmatprep.mubr.msk.bf16.mxu1 %vm2838_vm0, %v2837_v0  ;;  %2500 = vmatprep.mubr.msk.bf16.mxu0 %vm2838_vm0, %v2837_v0 }
 0x10c   :  { %2361 = vmatmul.mubr.msk.bf16.gmra.mrb[20].mxu1 %vm179_vm2, %v900_v58  ;;  %2501 = vmatmul.mubr.msk.bf16.gmra.mrb[16].mxu0 %vm179_vm2, %v2073_v52 }
 0x10d   :  { %2364 = vmatprep.mubr.msk.bf16.mxu1 %vm2838_vm0, %v2837_v0  ;;  %2504 = vmatprep.mubr.msk.bf16.mxu0 %vm2838_vm0, %v2837_v0 }
 0x114   :  { %2365 = vmatmul.mubr.msk.bf16.gmra.mrb[24].mxu1 %vm179_vm2, %v902_v19  ;;  %2505 = vmatmul.mubr.msk.bf16.gmra.mrb[20].mxu0 %vm179_vm2, %v2074_v4 }
 0x115   :  { %2508 = vmatprep.mubr.msk.bf16.mxu0 %vm2838_vm0, %v2837_v0 }
 0x11c   :  { %2509 = vmatmul.mubr.msk.bf16.gmra.mrb[24].mxu0 %vm179_vm2, %v2075_v17 }
 0x19f   :  { %v805_v61 = vpop.f32.mrb[0].mxu1 }
 0x1a0   :  { %v2306_v62 = vpop.f32.mrb[1].mxu1 }
 0x1a1   :  { %v808_v15 = vpop.f32.mrb[2].mxu1 }
 0x1a2   :  { %v2307_v25 = vpop.f32.mrb[3].mxu1 }
 0x1a7   :  { %v813_v26 = vpop.f32.mrb[4].mxu1 }
 0x1a8   :  { %v2310_v30 = vpop.f32.mrb[5].mxu1 }
 0x1a9   :  { %v816_v33 = vpop.f32.mrb[6].mxu1 }
 0x1aa   :  { %v2311_v11 = vpop.f32.mrb[7].mxu1 }
 0x1af   :  { %v821_v39 = vpop.f32.mrb[8].mxu1 }
 0x1b0   :  { %v2314_v48 = vpop.f32.mrb[9].mxu1 }
 0x1b1   :  { %v824_v49 = vpop.f32.mrb[10].mxu1 }
 0x1b2   :  { %v2315_v1 = vpop.f32.mrb[11].mxu1 }
 0x1b7   :  { %v829_v34 = vpop.f32.mrb[12].mxu1 }
 0x1b8   :  { %v2318_v35 = vpop.f32.mrb[13].mxu1 }
 0x1b9   :  { %v832_v0 = vpop.f32.mrb[14].mxu1 }
 0x1ba   :  { %v2319_v37 = vpop.f32.mrb[15].mxu1 }
 0x1bf   :  { %v1808_v23 = vpop.f32.mrb[0].mxu0 }
 0x1c0   :  { %v2520_v32 = vadd.f32 %v1808_v23, %v805_v61  ;;  %v2486_v36 = vpop.f32.mrb[1].mxu0 }
 0x1c1   :  { %v1811_v41 = vpop.f32.mrb[2].mxu0 }
 0x1c2   :  { %v1884_v42 = vmul.f32 %v2520_v32, %v3502_v2  ;;  %v2521_v44 = vadd.f32 %v1811_v41, %v808_v15  ;;  %v2487_v43 = vpop.f32.mrb[3].mxu0 }
 0x1c4   :  { %v1905_v46 = vadd.f32 %v3507_v38, %v1884_v42  ;;  %v1885_v14 = vmul.f32 %v2521_v44, %v3502_v2 }
 0x1c6   :  { %v1919_v45 = vmax.f32 %v1905_v46, 0.0  ;;  %v1906_v9 = vadd.f32 %v3507_v38, %v1885_v14 }
 0x1c7   :  { %v1816_v47 = vpop.f32.mrb[4].mxu0 }
 0x1c8   :  { %1933 = vst.msk [vmem:[%s3596_s4] sm:$0xff] %vm179_vm2, %v1919_v45  ;;  %v1920_v50 = vmax.f32 %v1906_v9, 0.0  ;;  %v2522_v51 = vadd.f32 %v1816_v47, %v813_v26  ;;  %v2490_v6 = vpop.f32.mrb[5].mxu0 }
 0x1c9   :  { %v1819_v12 = vpop.f32.mrb[6].mxu0 }
 0x1ca   :  { %1934 = vst.msk [vmem:[%s3596_s4 + $0x8] sm:$0xff] %vm179_vm2, %v1920_v50  ;;  %v1886_v7 = vmul.f32 %v2522_v51, %v3502_v2  ;;  %v2523_v53 = vadd.f32 %v1819_v12, %v816_v33  ;;  %v2491_v21 = vpop.f32.mrb[7].mxu0 }
 0x1cc   :  { %v1907_v60 = vadd.f32 %v3507_v38, %v1886_v7  ;;  %v1887_v63 = vmul.f32 %v2523_v53, %v3502_v2 }
 0x1ce   :  { %v1921_v5 = vmax.f32 %v1907_v60, 0.0  ;;  %v1908_v8 = vadd.f32 %v3507_v38, %v1887_v63 }
 0x1cf   :  { %v1824_v10 = vpop.f32.mrb[8].mxu0 }
 0x1d0   :  { %1935 = vst.msk [vmem:[%s3596_s4 + $0x10] sm:$0xff] %vm179_vm2, %v1921_v5  ;;  %v1922_v24 = vmax.f32 %v1908_v8, 0.0  ;;  %v2524_v59 = vadd.f32 %v1824_v10, %v821_v39  ;;  %v2494_v16 = vpop.f32.mrb[9].mxu0 }
 0x1d1   :  { %v1827_v18 = vpop.f32.mrb[10].mxu0 }
 0x1d2   :  { %1936 = vst.msk [vmem:[%s3596_s4 + $0x18] sm:$0xff] %vm179_vm2, %v1922_v24  ;;  %v1888_v22 = vmul.f32 %v2524_v59, %v3502_v2  ;;  %v2525_v20 = vadd.f32 %v1827_v18, %v824_v49  ;;  %v2495_v27 = vpop.f32.mrb[11].mxu0 }
 0x1d4   :  { %v1909_v29 = vadd.f32 %v3507_v38, %v1888_v22  ;;  %v1889_v31 = vmul.f32 %v2525_v20, %v3502_v2 }
 0x1d6   :  { %v1923_v28 = vmax.f32 %v1909_v29, 0.0  ;;  %v1910_v40 = vadd.f32 %v3507_v38, %v1889_v31 }
 0x1d7   :  { %v1014_v55 = vpop.f32.mrb[16].mxu1  ;;  %v1832_v56 = vpop.f32.mrb[12].mxu0 }
 0x1d8   :  { %1937 = vst.msk [vmem:[%s3596_s4 + $0x20] sm:$0xff] %vm179_vm2, %v1923_v28  ;;  %v1924_v57 = vmax.f32 %v1910_v40, 0.0  ;;  %v2526_v13 = vadd.f32 %v1832_v56, %v829_v34  ;;  %v2358_v3 = vpop.f32.mrb[17].mxu1  ;;  %v2498_v52 = vpop.f32.mrb[13].mxu0 }
 0x1d9   :  { %v1017_v58 = vpop.f32.mrb[18].mxu1  ;;  %v1835_v54 = vpop.f32.mrb[14].mxu0 }
 0x1da   :  { %1938 = vst.msk [vmem:[%s3596_s4 + $0x28] sm:$0xff] %vm179_vm2, %v1924_v57  ;;  %v1890_v4 = vmul.f32 %v2526_v13, %v3502_v2  ;;  %v2527_v19 = vadd.f32 %v1835_v54, %v832_v0  ;;  %v2359_v17 = vpop.f32.mrb[19].mxu1  ;;  %v2499_v61 = vpop.f32.mrb[15].mxu0 }
 0x1dc   :  { %v1911_v62 = vadd.f32 %v3507_v38, %v1890_v4  ;;  %v1891_v15 = vmul.f32 %v2527_v19, %v3502_v2 }
 0x1de   :  { %v1925_v25 = vmax.f32 %v1911_v62, 0.0  ;;  %v1912_v26 = vadd.f32 %v3507_v38, %v1891_v15 }
 0x1df   :  { %v1022_v30 = vpop.f32.mrb[20].mxu1  ;;  %v1840_v33 = vpop.f32.mrb[16].mxu0 }
 0x1e0   :  { %1939 = vst.msk [vmem:[%s3596_s4 + $0x30] sm:$0xff] %vm179_vm2, %v1925_v25  ;;  %v1926_v11 = vmax.f32 %v1912_v26, 0.0  ;;  %v2528_v39 = vadd.f32 %v1840_v33, %v1014_v55  ;;  %v2362_v48 = vpop.f32.mrb[21].mxu1  ;;  %v2502_v49 = vpop.f32.mrb[17].mxu0 }
 0x1e1   :  { %v1025_v1 = vpop.f32.mrb[22].mxu1  ;;  %v1843_v34 = vpop.f32.mrb[18].mxu0 }
 0x1e2   :  { %1940 = vst.msk [vmem:[%s3596_s4 + $0x38] sm:$0xff] %vm179_vm2, %v1926_v11  ;;  %v1892_v35 = vmul.f32 %v2528_v39, %v3502_v2  ;;  %v2529_v0 = vadd.f32 %v1843_v34, %v1017_v58  ;;  %v2363_v37 = vpop.f32.mrb[23].mxu1  ;;  %v2503_v23 = vpop.f32.mrb[19].mxu0 }
 0x1e4   :  { %v1913_v32 = vadd.f32 %v3507_v38, %v1892_v35  ;;  %v1893_v36 = vmul.f32 %v2529_v0, %v3502_v2 }
 0x1e6   :  { %v1927_v41 = vmax.f32 %v1913_v32, 0.0  ;;  %v1914_v42 = vadd.f32 %v3507_v38, %v1893_v36 }
 0x1e7   :  { %v1030_v44 = vpop.f32.mrb[24].mxu1  ;;  %v1848_v43 = vpop.f32.mrb[20].mxu0 }
 0x1e8   :  { %1941 = vst.msk [vmem:[%s3596_s4 + $0x40] sm:$0xff] %vm179_vm2, %v1927_v41  ;;  %v1928_v46 = vmax.f32 %v1914_v42, 0.0  ;;  %v2530_v14 = vadd.f32 %v1848_v43, %v1022_v30  ;;  %v2366_v45 = vpop.f32.mrb[25].mxu1  ;;  %v2506_v9 = vpop.f32.mrb[21].mxu0 }
 0x1e9   :  { %v1033_v47 = vpop.f32.mrb[26].mxu1  ;;  %v1851_v50 = vpop.f32.mrb[22].mxu0 }
 0x1ea   :  { %1942 = vst.msk [vmem:[%s3596_s4 + $0x48] sm:$0xff] %vm179_vm2, %v1928_v46  ;;  %v1894_v51 = vmul.f32 %v2530_v14, %v3502_v2  ;;  %v2531_v6 = vadd.f32 %v1851_v50, %v1025_v1  ;;  %v2367_v12 = vpop.f32.mrb[27].mxu1  ;;  %v2507_v7 = vpop.f32.mrb[23].mxu0 }
 0x1ec   :  { %v1915_v53 = vadd.f32 %v3507_v38, %v1894_v51  ;;  %v1895_v21 = vmul.f32 %v2531_v6, %v3502_v2 }
 0x1ee   :  { %v1929_v60 = vmax.f32 %v1915_v53, 0.0  ;;  %v1916_v63 = vadd.f32 %v3507_v38, %v1895_v21 }
 0x1ef   :  { %v1856_v5 = vpop.f32.mrb[24].mxu0 }
 0x1f0   :  { %1943 = vst.msk [vmem:[%s3596_s4 + $0x50] sm:$0xff] %vm179_vm2, %v1929_v60  ;;  %v1930_v8 = vmax.f32 %v1916_v63, 0.0  ;;  %v2532_v10 = vadd.f32 %v1856_v5, %v1030_v44  ;;  %v2510_v24 = vpop.f32.mrb[25].mxu0 }
 0x1f1   :  { %v1859_v59 = vpop.f32.mrb[26].mxu0 }
 0x1f2   :  { %1944 = vst.msk [vmem:[%s3596_s4 + $0x58] sm:$0xff] %vm179_vm2, %v1930_v8  ;;  %v1896_v16 = vmul.f32 %v2532_v10, %v3502_v2  ;;  %v2533_v18 = vadd.f32 %v1859_v59, %v1033_v47  ;;  %v2511_v22 = vpop.f32.mrb[27].mxu0 }
 0x1f4   :  { %v1917_v20 = vadd.f32 %v3507_v38, %v1896_v16  ;;  %v1897_v27 = vmul.f32 %v2533_v18, %v3502_v2 }
 0x1f6   :  { %v1931_v29 = vmax.f32 %v1917_v20, 0.0  ;;  %v1918_v31 = vadd.f32 %v3507_v38, %v1897_v27 }
 0x1f8   :  { %1945 = vst.msk [vmem:[%s3596_s4 + $0x60] sm:$0xff] %vm179_vm2, %v1931_v29  ;;  %v1932_v28 = vmax.f32 %v1918_v31, 0.0 }
 0x1fa   :  { %1947 = vst.msk [vmem:[%s3596_s4 + $0x68] sm:$0x3f] %vm1946_vm9, %v1932_v28 }
 0x1fb   :  { %1952 = vsyncpa [#allocation3], 1 }

// kernel: resnet34_8s_fuse_forward.75
= control target key start
LH: loop header
LB: loop body
LE: loop exit
PB: predicated region body
PF: predicated region fallthrough
CT: control target
= control target key end

     0   :  { %s1755_s15 = smov 0   ;;  %s1757_s16 = smov 0   ;;  %s2046_s0 = inlined_call_operand.vmem [shape: bf16[512,256], index: 0, kind: input, shape index: {}]   ;;  %s2047_s1 = inlined_call_operand.vmem [shape: bf16[256,64], index: 1, kind: input, shape index: {}]   ;;  %s2048_s2 = inlined_call_operand.vmem [shape: f32[1,64], index: 2, kind: input, shape index: {}]   ;;  %s2049_s3 = inlined_call_operand.vmem [shape: f32[1,64], index: 3, kind: input, shape index: {}]   ;;  %s2050_s4 = inlined_call_operand.vmem [shape: bf16[512,64], index: 4, kind: output, shape index: {}]  }
   0x1   :  { %s1759_s17 = smov 0  }
   0x2 LB: > { %s33_s18 = sadd.s32 1, %s1724_s16  ;;  %p1367_p0 = scmp.ge.s32.totalorder %s1728_s17, 1  ;;  %s1728_s17 = sphi %s1759_s17, %s14_s17   ;;  %s1724_s16 = sphi %s1757_s16, %s2052_s16   ;;  %s1720_s15 = sphi %s1755_s15, %s2051_s15  }
   0x3   : > { %p35_p1 = scmp.ge.s32.totalorder %s33_s18, 2  ;;  %p224_p2 = scmp.lt.s32.totalorder %s1728_s17, 3 }
   0x5   : > { %s2054_s18 = smov (%p35_p1, %s33_s18), 0  ;;  %p225_p3 = pnand %p1367_p0, %p224_p2 }
   0x6   : > { %v1642_v0 = vld [vmem:[%s2047_s1 + $0x40] sm:$0xff] (!%p225_p3)   ;;  %s1368_s21 = sshll.u32 (!%p225_p3), %s1720_s15, 5  ;;  %v1644_v2 = vld [vmem:[%s2047_s1 + $0x48] sm:$0xff] (!%p225_p3)   ;;  %v1646_v4 = vld [vmem:[%s2047_s1 + $0x50] sm:$0xff] (!%p225_p3)   ;;  %vm794_vm0 = vcmask (!%p225_p3), 523264   ;;  %vm1201_vm1 = vcmask (!%p225_p3), 519168  }
   0x7   : > { %228 = sbr.rel (%p225_p3) target bundleno = 331 (0x14b), region = 36  ;;  %v1643_v1 = vld [vmem:[%s2047_s1] sm:$0xff] (!%p225_p3)   ;;  %1490 = vmatprep.subr.bf16.mxu0 (!%p225_p3), %v1642_v0  ;;  %1602 = vmatprep.subr.bf16.mxu1 (!%p225_p3), %v1642_v0  ;;  %v1645_v3 = vld [vmem:[%s2047_s1 + $0x8] sm:$0xff] (!%p225_p3)   ;;  %p274_p4 = scmp.lt.s32.totalorder (!%p225_p3), %s1368_s21, 63  ;;  %v1647_v5 = vld [vmem:[%s2047_s1 + $0x10] sm:$0xff] (!%p225_p3)  }
   0x8   : > { %1491 = vmatpush3.bf16.msra.mxu0 (!%p225_p3), %v1643_v1  ;;  %1610 = vmatpush3.bf16.msra.mxu1 (!%p225_p3), %v1643_v1  ;;  %v1648_v6 = vld [vmem:[%s2047_s1 + $0x58] sm:$0xff] (!%p225_p3)   ;;  %v1650_v8 = vld [vmem:[%s2047_s1 + $0x60] sm:$0xff] (!%p225_p3)   ;;  %v1652_v10 = vld [vmem:[%s2047_s1 + $0x68] sm:$0xff] (!%p225_p3)  }
   0x9   : > { %1492 = vmatprep.subr.bf16.mxu0 (!%p225_p3), %v1644_v2  ;;  %1603 = vmatprep.subr.bf16.mxu1 (!%p225_p3), %v1644_v2  ;;  %v1649_v7 = vld [vmem:[%s2047_s1 + $0x18] sm:$0xff] (!%p225_p3)   ;;  %v1651_v9 = vld [vmem:[%s2047_s1 + $0x20] sm:$0xff] (!%p225_p3)   ;;  %v1653_v13 = vld [vmem:[%s2047_s1 + $0x28] sm:$0xff] (!%p225_p3)  }
   0xa   : > { %v1654_v14 = vld [vmem:[%s2047_s1 + $0x70] sm:$0xff] (!%p225_p3)   ;;  %v1656_v16 = vld [vmem:[%s2047_s1 + $0x78] sm:$0xff] (!%p225_p3)   ;;  %v1868_v62 = vld [vmem:[%s2048_s2] ss:$0 sm:$0xff] (!%p225_p3) }
   0xb   : > { %v1655_v15 = vld [vmem:[%s2047_s1 + $0x30] sm:$0xff] (!%p225_p3)   ;;  %v1657_v17 = vld [vmem:[%s2047_s1 + $0x38] sm:$0xff] (!%p225_p3)  }
   0xc   : > { %1493 = vmatpush3.bf16.msra.mxu0 (!%p225_p3), %v1645_v3  ;;  %1611 = vmatpush3.bf16.msra.mxu1 (!%p225_p3), %v1645_v3 }
   0xd   : > { %1494 = vmatprep.subr.bf16.mxu0 (!%p225_p3), %v1646_v4  ;;  %1604 = vmatprep.subr.bf16.mxu1 (!%p225_p3), %v1646_v4 }
   0xe   : > { %s2056_s21 = smov (!%p274_p4, %s1368_s21), 63 }
   0xf   : > { %s1457_s10 = sshll.u32 %s2056_s21, 3  ;;  %s1372_s12 = sshll.u32 %s2056_s21, 2 }
  0x10   : > { %1495 = vmatpush3.bf16.msra.mxu0 %v1647_v5  ;;  %1612 = vmatpush3.bf16.msra.mxu1 %v1647_v5  ;;  %s1806_s15 = scalar_lea.vmem %s2046_s0, %s1457_s10  ;;  %s1891_s14 = scalar_lea.vmem %s2050_s4, %s1372_s12 }
  0x11   : > { %1496 = vmatprep.subr.bf16.mxu0 %v1648_v6  ;;  %1605 = vmatprep.subr.bf16.mxu1 %v1648_v6  ;;  %v1660_v11 = vld [vmem:[%s1806_s15 + $0x4] ss:$8 sps:$4 sm:$0xff]   ;;  %v1658_v18 = vld [vmem:[%s1806_s15] ss:$8 sps:$4 sm:$0xff]   ;;  %v1664_v20 = vld [vmem:[%s1806_s15 + $0x14] ss:$8 sps:$4 sm:$0xff]  }
  0x12   : > { %v1663_v12 = vld [vmem:[%s1806_s15 + $0x84] ss:$8 sps:$4 sm:$0xff]   ;;  %661 = vmatprep.mubr.bf16.mxu0 %v1660_v11  ;;  %v1661_v19 = vld [vmem:[%s1806_s15 + $0x80] ss:$8 sps:$4 sm:$0xff]   ;;  %v1666_v21 = vld [vmem:[%s1806_s15 + $0x94] ss:$8 sps:$4 sm:$0xff]  }
  0x13   : > { %725 = vmatprep.mubr.bf16.mxu1 %v1663_v12  ;;  %v1668_v22 = vld [vmem:[%s1806_s15 + $0x10] ss:$8 sps:$4 sm:$0xff]   ;;  %v1670_v24 = vld [vmem:[%s1806_s15 + $0x24] ss:$8 sps:$4 sm:$0xff]   ;;  %v1674_v26 = vld [vmem:[%s1806_s15 + $0x20] ss:$8 sps:$4 sm:$0xff]  }
  0x14   : > { %1497 = vmatpush3.bf16.msra.mxu0 %v1649_v7  ;;  %1613 = vmatpush3.bf16.msra.mxu1 %v1649_v7  ;;  %v1669_v23 = vld [vmem:[%s1806_s15 + $0x90] ss:$8 sps:$4 sm:$0xff]   ;;  %v1672_v25 = vld [vmem:[%s1806_s15 + $0xa4] ss:$8 sps:$4 sm:$0xff]   ;;  %v1675_v27 = vld [vmem:[%s1806_s15 + $0xa0] ss:$8 sps:$4 sm:$0xff]  }
  0x15   : > { %1498 = vmatprep.subr.bf16.mxu0 %v1650_v8  ;;  %1606 = vmatprep.subr.bf16.mxu1 %v1650_v8  ;;  %v1676_v28 = vld [vmem:[%s1806_s15 + $0x34] ss:$8 sps:$4 sm:$0xff]   ;;  %v1680_v30 = vld [vmem:[%s1806_s15 + $0x30] ss:$8 sps:$4 sm:$0xff]   ;;  %v1682_v32 = vld [vmem:[%s1806_s15 + $0x44] ss:$8 sps:$4 sm:$0xff]  }
  0x16   : > { %v1678_v29 = vld [vmem:[%s1806_s15 + $0xb4] ss:$8 sps:$4 sm:$0xff]   ;;  %v1681_v31 = vld [vmem:[%s1806_s15 + $0xb0] ss:$8 sps:$4 sm:$0xff]   ;;  %v1684_v33 = vld [vmem:[%s1806_s15 + $0xc4] ss:$8 sps:$4 sm:$0xff]  }
  0x17   : > { %v1686_v34 = vld [vmem:[%s1806_s15 + $0x40] ss:$8 sps:$4 sm:$0xff]   ;;  %v1688_v36 = vld [vmem:[%s1806_s15 + $0x54] ss:$8 sps:$4 sm:$0xff]   ;;  %v1692_v38 = vld [vmem:[%s1806_s15 + $0x50] ss:$8 sps:$4 sm:$0xff]  }
  0x18   : > { %1499 = vmatpush3.bf16.msra.mxu0 %v1651_v9  ;;  %1614 = vmatpush3.bf16.msra.mxu1 %v1651_v9  ;;  %v1687_v35 = vld [vmem:[%s1806_s15 + $0xc0] ss:$8 sps:$4 sm:$0xff]   ;;  %v1690_v37 = vld [vmem:[%s1806_s15 + $0xd4] ss:$8 sps:$4 sm:$0xff]   ;;  %v1693_v39 = vld [vmem:[%s1806_s15 + $0xd0] ss:$8 sps:$4 sm:$0xff]  }
  0x19   : > { %1500 = vmatprep.subr.bf16.mxu0 %v1652_v10  ;;  %1607 = vmatprep.subr.bf16.mxu1 %v1652_v10  ;;  %v1694_v40 = vld [vmem:[%s1806_s15 + $0x64] ss:$8 sps:$4 sm:$0xff]   ;;  %v1698_v42 = vld [vmem:[%s1806_s15 + $0x60] ss:$8 sps:$4 sm:$0xff]   ;;  %v1700_v44 = vld [vmem:[%s1806_s15 + $0x74] ss:$8 sps:$4 sm:$0xff]  }
  0x1a   : > { %v1696_v41 = vld [vmem:[%s1806_s15 + $0xe4] ss:$8 sps:$4 sm:$0xff]   ;;  %v1699_v43 = vld [vmem:[%s1806_s15 + $0xe0] ss:$8 sps:$4 sm:$0xff]   ;;  %v1702_v45 = vld [vmem:[%s1806_s15 + $0xf4] ss:$8 sps:$4 sm:$0xff]  }
  0x1b   : > { %v1704_v46 = vld [vmem:[%s1806_s15 + $0x70] ss:$8 sps:$4 sm:$0xff]   ;;  %v1873_v6 = vld [vmem:[%s2049_s3] ss:$0 sm:$0xff] }
  0x1c   : > { %1501 = vmatpush3.bf16.msra.mxu0 %v1653_v13  ;;  %1615 = vmatpush3.bf16.msra.mxu1 %v1653_v13  ;;  %v1705_v47 = vld [vmem:[%s1806_s15 + $0xf0] ss:$8 sps:$4 sm:$0xff]  }
  0x1d   : > { %1502 = vmatprep.subr.bf16.mxu0 %v1654_v14  ;;  %1608 = vmatprep.subr.bf16.mxu1 %v1654_v14 }
  0x20   : > { %1503 = vmatpush3.bf16.msra.mxu0 %v1655_v15  ;;  %1616 = vmatpush3.bf16.msra.mxu1 %v1655_v15 }
  0x21   : > { %1504 = vmatprep.subr.bf16.mxu0 %v1656_v16  ;;  %1609 = vmatprep.subr.bf16.mxu1 %v1656_v16 }
  0x24   : > { %1505 = vmatpush3.bf16.msra.mxu0 %v1657_v17  ;;  %1617 = vmatpush3.bf16.msra.mxu1 %v1657_v17 }
  0x27   : > { %662 = vmatmul.mubr.bf16.vlgmr.msra.gmra.mrb[0].mxu0 %v1658_v18  ;;  %726 = vmatmul.mubr.bf16.vlgmr.msra.gmra.mrb[0].mxu1 %v1661_v19 }
  0x28   : > { %669 = vmatprep.mubr.bf16.mxu0 %v1664_v20  ;;  %733 = vmatprep.mubr.bf16.mxu1 %v1666_v21 }
  0x2f   : > { %670 = vmatmul.mubr.bf16.gmra.mrb[4].mxu0 %v1668_v22  ;;  %734 = vmatmul.mubr.bf16.gmra.mrb[4].mxu1 %v1669_v23 }
  0x30   : > { %677 = vmatprep.mubr.bf16.mxu0 %v1670_v24  ;;  %741 = vmatprep.mubr.bf16.mxu1 %v1672_v25 }
  0x37   : > { %678 = vmatmul.mubr.bf16.gmra.mrb[8].mxu0 %v1674_v26  ;;  %742 = vmatmul.mubr.bf16.gmra.mrb[8].mxu1 %v1675_v27 }
  0x38   : > { %685 = vmatprep.mubr.bf16.mxu0 %v1676_v28  ;;  %749 = vmatprep.mubr.bf16.mxu1 %v1678_v29 }
  0x3f   : > { %686 = vmatmul.mubr.bf16.gmra.mrb[12].mxu0 %v1680_v30  ;;  %750 = vmatmul.mubr.bf16.gmra.mrb[12].mxu1 %v1681_v31 }
  0x40   : > { %693 = vmatprep.mubr.bf16.mxu0 %v1682_v32  ;;  %757 = vmatprep.mubr.bf16.mxu1 %v1684_v33 }
  0x47   : > { %694 = vmatmul.mubr.bf16.gmra.mrb[16].mxu0 %v1686_v34  ;;  %758 = vmatmul.mubr.bf16.gmra.mrb[16].mxu1 %v1687_v35 }
  0x48   : > { %701 = vmatprep.mubr.bf16.mxu0 %v1688_v36  ;;  %765 = vmatprep.mubr.bf16.mxu1 %v1690_v37 }
  0x4f   : > { %702 = vmatmul.mubr.bf16.gmra.mrb[20].mxu0 %v1692_v38  ;;  %766 = vmatmul.mubr.bf16.gmra.mrb[20].mxu1 %v1693_v39 }
  0x50   : > { %709 = vmatprep.mubr.bf16.mxu0 %v1694_v40  ;;  %773 = vmatprep.mubr.bf16.mxu1 %v1696_v41 }
  0x57   : > { %710 = vmatmul.mubr.bf16.gmra.mrb[24].mxu0 %v1698_v42  ;;  %774 = vmatmul.mubr.bf16.gmra.mrb[24].mxu1 %v1699_v43 }
  0x58   : > { %717 = vmatprep.mubr.bf16.mxu0 %v1700_v44  ;;  %781 = vmatprep.mubr.bf16.mxu1 %v1702_v45 }
  0x5f   : > { %718 = vmatmul.mubr.bf16.gmra.mrb[28].mxu0 %v1704_v46  ;;  %782 = vmatmul.mubr.bf16.gmra.mrb[28].mxu1 %v1705_v47 }
  0xfa   : > { %v1506_v48 = vpop.f32.mrb[0].mxu0  ;;  %v1554_v49 = vpop.f32.mrb[0].mxu1 }
  0xfb   : > { %v1507_v50 = vpop.f32.mrb[1].mxu0  ;;  %v1555_v51 = vpop.f32.mrb[1].mxu1 }
  0xfc   : > { %v1508_v52 = vadd.f32 %v1507_v50, %v1506_v48  ;;  %v1556_v53 = vadd.f32 %v1555_v51, %v1554_v49  ;;  %v1509_v54 = vpop.f32.mrb[2].mxu0  ;;  %v1557_v55 = vpop.f32.mrb[2].mxu1 }
  0xfd   : > { %v1510_v56 = vpop.f32.mrb[3].mxu0  ;;  %v1558_v57 = vpop.f32.mrb[3].mxu1 }
  0xfe   : > { %795 = vst.msk [vmem:[#allocation2] sm:$0xff] %vm794_vm0, %v1508_v52  ;;  %811 = vst.msk [vmem:[#allocation2 + $0x80] sm:$0xff] %vm794_vm0, %v1556_v53  ;;  %v1511_v58 = vadd.f32 %v1510_v56, %v1509_v54  ;;  %v1559_v59 = vadd.f32 %v1558_v57, %v1557_v55 }
 0x100   : > { %796 = vst.msk [vmem:[#allocation2 + $0x8] sm:$0xff] %vm794_vm0, %v1511_v58  ;;  %812 = vst.msk [vmem:[#allocation2 + $0x88] sm:$0xff] %vm794_vm0, %v1559_v59 }
 0x102   : > { %v1512_v60 = vpop.f32.mrb[4].mxu0  ;;  %v1560_v61 = vpop.f32.mrb[4].mxu1 }
 0x103   : > { %v1513_v63 = vpop.f32.mrb[5].mxu0  ;;  %v1561_v0 = vpop.f32.mrb[5].mxu1 }
 0x104   : > { %v1514_v1 = vadd.f32 %v1513_v63, %v1512_v60  ;;  %v1562_v2 = vadd.f32 %v1561_v0, %v1560_v61  ;;  %v1515_v3 = vpop.f32.mrb[6].mxu0  ;;  %v1563_v4 = vpop.f32.mrb[6].mxu1 }
 0x105   : > { %v931_v5 = vld [vmem:[#allocation2] sm:$0xff]  ;;  %v1516_v8 = vpop.f32.mrb[7].mxu0  ;;  %v1564_v9 = vpop.f32.mrb[7].mxu1 }
 0x106   : > { %v947_v7 = vld [vmem:[#allocation2 + $0x80] sm:$0xff]  ;;  %v970_v10 = vmul.f32 %v1868_v62, %v931_v5  ;;  %797 = vst.msk [vmem:[#allocation2 + $0x10] sm:$0xff] %vm794_vm0, %v1514_v1  ;;  %813 = vst.msk [vmem:[#allocation2 + $0x90] sm:$0xff] %vm794_vm0, %v1562_v2  ;;  %v1517_v12 = vadd.f32 %v1516_v8, %v1515_v3  ;;  %v1565_v13 = vadd.f32 %v1564_v9, %v1563_v4 }
 0x107   : > { %v986_v11 = vmul.f32 %v1868_v62, %v947_v7  ;;  %v932_v14 = vld [vmem:[#allocation2 + $0x8] sm:$0xff] }
 0x108   : > { %v948_v15 = vld [vmem:[#allocation2 + $0x88] sm:$0xff]  ;;  %v1009_v16 = vadd.f32 %v1873_v6, %v970_v10  ;;  %v971_v18 = vmul.f32 %v1868_v62, %v932_v14  ;;  %798 = vst.msk [vmem:[#allocation2 + $0x18] sm:$0xff] %vm794_vm0, %v1517_v12  ;;  %814 = vst.msk [vmem:[#allocation2 + $0x98] sm:$0xff] %vm794_vm0, %v1565_v13 }
 0x109   : > { %v1025_v17 = vadd.f32 %v1873_v6, %v986_v11  ;;  %v987_v19 = vmul.f32 %v1868_v62, %v948_v15 }
 0x10a   : > { %v1041_v20 = vmax.f32 %v1009_v16, 0.0  ;;  %v1010_v22 = vadd.f32 %v1873_v6, %v971_v18  ;;  %v1518_v24 = vpop.f32.mrb[8].mxu0  ;;  %v1566_v25 = vpop.f32.mrb[8].mxu1 }
 0x10b   : > { %v1057_v21 = vmax.f32 %v1025_v17, 0.0  ;;  %v1026_v23 = vadd.f32 %v1873_v6, %v987_v19  ;;  %v1519_v26 = vpop.f32.mrb[9].mxu0  ;;  %v1567_v27 = vpop.f32.mrb[9].mxu1 }
 0x10c   : > { %v1458_v28 = vpack.c.bf16 %v1041_v20, %v1041_v20  ;;  %v1042_v30 = vmax.f32 %v1010_v22, 0.0  ;;  %v1521_v32 = vpop.f32.mrb[10].mxu0  ;;  %v1569_v33 = vpop.f32.mrb[10].mxu1  ;;  %v1520_v36 = vadd.f32 %v1519_v26, %v1518_v24  ;;  %v1568_v37 = vadd.f32 %v1567_v27, %v1566_v25 }
 0x10d   : > { %v1474_v29 = vpack.c.bf16 %v1057_v21, %v1057_v21  ;;  %v1058_v31 = vmax.f32 %v1026_v23, 0.0  ;;  %v933_v34 = vld [vmem:[#allocation2 + $0x10] sm:$0xff]  ;;  %v1522_v38 = vpop.f32.mrb[11].mxu0  ;;  %v1570_v39 = vpop.f32.mrb[11].mxu1 }
 0x10e   : > { %v949_v35 = vld [vmem:[#allocation2 + $0x90] sm:$0xff]  ;;  %1202 = vst.msk [vmem:[%s1891_s14] sm:$0xf] %vm1201_vm1, %v1458_v28  ;;  %v1459_v40 = vpack.c.bf16 %v1042_v30, %v1042_v30  ;;  %v972_v42 = vmul.f32 %v1868_v62, %v933_v34  ;;  %v1523_v46 = vadd.f32 %v1522_v38, %v1521_v32  ;;  %v1571_v47 = vadd.f32 %v1570_v39, %v1569_v33 }
 0x10f   : > { %1218 = vst.msk [vmem:[%s1891_s14 + $0x40] sm:$0xf] %vm1201_vm1, %v1474_v29  ;;  %v1475_v41 = vpack.c.bf16 %v1058_v31, %v1058_v31  ;;  %v988_v43 = vmul.f32 %v1868_v62, %v949_v35  ;;  %v934_v44 = vld [vmem:[#allocation2 + $0x18] sm:$0xff] }
 0x110   : > { %v950_v45 = vld [vmem:[#allocation2 + $0x98] sm:$0xff]  ;;  %799 = vst.msk [vmem:[#allocation2 + $0x20] sm:$0xff] %vm794_vm0, %v1520_v36  ;;  %815 = vst.msk [vmem:[#allocation2 + $0xa0] sm:$0xff] %vm794_vm0, %v1568_v37  ;;  %v1011_v48 = vadd.f32 %v1873_v6, %v972_v42  ;;  %v973_v50 = vmul.f32 %v1868_v62, %v934_v44 }
 0x111   : > { %1203 = vst.msk [vmem:[%s1891_s14 + $0x4] sm:$0xf] %vm1201_vm1, %v1459_v40  ;;  %1219 = vst.msk [vmem:[%s1891_s14 + $0x44] sm:$0xf] %vm1201_vm1, %v1475_v41  ;;  %v1027_v49 = vadd.f32 %v1873_v6, %v988_v43  ;;  %v989_v51 = vmul.f32 %v1868_v62, %v950_v45 }
 0x112   : > { %800 = vst.msk [vmem:[#allocation2 + $0x28] sm:$0xff] %vm794_vm0, %v1523_v46  ;;  %816 = vst.msk [vmem:[#allocation2 + $0xa8] sm:$0xff] %vm794_vm0, %v1571_v47  ;;  %v1043_v52 = vmax.f32 %v1011_v48, 0.0  ;;  %v1012_v54 = vadd.f32 %v1873_v6, %v973_v50  ;;  %v1524_v56 = vpop.f32.mrb[12].mxu0  ;;  %v1572_v57 = vpop.f32.mrb[12].mxu1 }
 0x113   : > { %v1059_v53 = vmax.f32 %v1027_v49, 0.0  ;;  %v1028_v55 = vadd.f32 %v1873_v6, %v989_v51  ;;  %v1525_v58 = vpop.f32.mrb[13].mxu0  ;;  %v1573_v59 = vpop.f32.mrb[13].mxu1 }
 0x114   : > { %v1460_v60 = vpack.c.bf16 %v1043_v52, %v1043_v52  ;;  %v1044_v63 = vmax.f32 %v1012_v54, 0.0  ;;  %v1527_v1 = vpop.f32.mrb[14].mxu0  ;;  %v1575_v2 = vpop.f32.mrb[14].mxu1  ;;  %v1526_v3 = vadd.f32 %v1525_v58, %v1524_v56  ;;  %v1574_v4 = vadd.f32 %v1573_v59, %v1572_v57 }
 0x115   : > { %v1476_v61 = vpack.c.bf16 %v1059_v53, %v1059_v53  ;;  %v1060_v0 = vmax.f32 %v1028_v55, 0.0  ;;  %v1528_v5 = vpop.f32.mrb[15].mxu0  ;;  %v1576_v7 = vpop.f32.mrb[15].mxu1 }
 0x116   : > { %1204 = vst.msk [vmem:[%s1891_s14 + $0x8] sm:$0xf] %vm1201_vm1, %v1460_v60  ;;  %v1461_v8 = vpack.c.bf16 %v1044_v63, %v1044_v63  ;;  %v1529_v12 = vadd.f32 %v1528_v5, %v1527_v1  ;;  %v1577_v13 = vadd.f32 %v1576_v7, %v1575_v2 }
 0x117   : > { %1220 = vst.msk [vmem:[%s1891_s14 + $0x48] sm:$0xf] %vm1201_vm1, %v1476_v61  ;;  %v1477_v9 = vpack.c.bf16 %v1060_v0, %v1060_v0  ;;  %v935_v10 = vld [vmem:[#allocation2 + $0x20] sm:$0xff] }
 0x118   : > { %v951_v11 = vld [vmem:[#allocation2 + $0xa0] sm:$0xff]  ;;  %v974_v14 = vmul.f32 %v1868_v62, %v935_v10  ;;  %801 = vst.msk [vmem:[#allocation2 + $0x30] sm:$0xff] %vm794_vm0, %v1526_v3  ;;  %817 = vst.msk [vmem:[#allocation2 + $0xb0] sm:$0xff] %vm794_vm0, %v1574_v4 }
 0x119   : > { %v990_v15 = vmul.f32 %v1868_v62, %v951_v11  ;;  %1205 = vst.msk [vmem:[%s1891_s14 + $0xc] sm:$0xf] %vm1201_vm1, %v1461_v8  ;;  %1221 = vst.msk [vmem:[%s1891_s14 + $0x4c] sm:$0xf] %vm1201_vm1, %v1477_v9  ;;  %v936_v16 = vld [vmem:[#allocation2 + $0x28] sm:$0xff] }
 0x11a   : > { %v952_v17 = vld [vmem:[#allocation2 + $0xa8] sm:$0xff]  ;;  %802 = vst.msk [vmem:[#allocation2 + $0x38] sm:$0xff] %vm794_vm0, %v1529_v12  ;;  %818 = vst.msk [vmem:[#allocation2 + $0xb8] sm:$0xff] %vm794_vm0, %v1577_v13  ;;  %v1013_v18 = vadd.f32 %v1873_v6, %v974_v14  ;;  %v975_v20 = vmul.f32 %v1868_v62, %v936_v16  ;;  %v1530_v22 = vpop.f32.mrb[16].mxu0  ;;  %v1578_v23 = vpop.f32.mrb[16].mxu1 }
 0x11b   : > { %v1029_v19 = vadd.f32 %v1873_v6, %v990_v15  ;;  %v991_v21 = vmul.f32 %v1868_v62, %v952_v17  ;;  %v1531_v28 = vpop.f32.mrb[17].mxu0  ;;  %v1579_v29 = vpop.f32.mrb[17].mxu1 }
 0x11c   : > { %v1045_v24 = vmax.f32 %v1013_v18, 0.0  ;;  %v1014_v26 = vadd.f32 %v1873_v6, %v975_v20  ;;  %v1532_v30 = vadd.f32 %v1531_v28, %v1530_v22  ;;  %v1580_v31 = vadd.f32 %v1579_v29, %v1578_v23  ;;  %v1533_v32 = vpop.f32.mrb[18].mxu0  ;;  %v1581_v33 = vpop.f32.mrb[18].mxu1 }
 0x11d   : > { %v1061_v25 = vmax.f32 %v1029_v19, 0.0  ;;  %v1030_v27 = vadd.f32 %v1873_v6, %v991_v21  ;;  %v1534_v38 = vpop.f32.mrb[19].mxu0  ;;  %v1582_v39 = vpop.f32.mrb[19].mxu1 }
 0x11e   : > { %v1462_v34 = vpack.c.bf16 %v1045_v24, %v1045_v24  ;;  %v1046_v36 = vmax.f32 %v1014_v26, 0.0  ;;  %803 = vst.msk [vmem:[#allocation2 + $0x40] sm:$0xff] %vm794_vm0, %v1532_v30  ;;  %819 = vst.msk [vmem:[#allocation2 + $0xc0] sm:$0xff] %vm794_vm0, %v1580_v31  ;;  %v1535_v42 = vadd.f32 %v1534_v38, %v1533_v32  ;;  %v1583_v43 = vadd.f32 %v1582_v39, %v1581_v33 }
 0x11f   : > { %v1478_v35 = vpack.c.bf16 %v1061_v25, %v1061_v25  ;;  %v1062_v37 = vmax.f32 %v1030_v27, 0.0  ;;  %v937_v40 = vld [vmem:[#allocation2 + $0x30] sm:$0xff] }
 0x120   : > { %v953_v41 = vld [vmem:[#allocation2 + $0xb0] sm:$0xff]  ;;  %1206 = vst.msk [vmem:[%s1891_s14 + $0x10] sm:$0xf] %vm1201_vm1, %v1462_v34  ;;  %v1463_v44 = vpack.c.bf16 %v1046_v36, %v1046_v36  ;;  %v976_v46 = vmul.f32 %v1868_v62, %v937_v40 }
 0x121   : > { %1222 = vst.msk [vmem:[%s1891_s14 + $0x50] sm:$0xf] %vm1201_vm1, %v1478_v35  ;;  %v1479_v45 = vpack.c.bf16 %v1062_v37, %v1062_v37  ;;  %v992_v47 = vmul.f32 %v1868_v62, %v953_v41  ;;  %v938_v48 = vld [vmem:[#allocation2 + $0x38] sm:$0xff] }
 0x122   : > { %v954_v49 = vld [vmem:[#allocation2 + $0xb8] sm:$0xff]  ;;  %v977_v50 = vmul.f32 %v1868_v62, %v938_v48  ;;  %804 = vst.msk [vmem:[#allocation2 + $0x48] sm:$0xff] %vm794_vm0, %v1535_v42  ;;  %820 = vst.msk [vmem:[#allocation2 + $0xc8] sm:$0xff] %vm794_vm0, %v1583_v43  ;;  %v1015_v52 = vadd.f32 %v1873_v6, %v976_v46  ;;  %v1536_v56 = vpop.f32.mrb[20].mxu0  ;;  %v1584_v57 = vpop.f32.mrb[20].mxu1 }
 0x123   : > { %v993_v51 = vmul.f32 %v1868_v62, %v954_v49  ;;  %1207 = vst.msk [vmem:[%s1891_s14 + $0x14] sm:$0xf] %vm1201_vm1, %v1463_v44  ;;  %1223 = vst.msk [vmem:[%s1891_s14 + $0x54] sm:$0xf] %vm1201_vm1, %v1479_v45  ;;  %v1031_v53 = vadd.f32 %v1873_v6, %v992_v47  ;;  %v1537_v60 = vpop.f32.mrb[21].mxu0  ;;  %v1585_v61 = vpop.f32.mrb[21].mxu1 }
 0x124   : > { %v1016_v54 = vadd.f32 %v1873_v6, %v977_v50  ;;  %v1047_v58 = vmax.f32 %v1015_v52, 0.0  ;;  %v1538_v1 = vadd.f32 %v1537_v60, %v1536_v56  ;;  %v1586_v2 = vadd.f32 %v1585_v61, %v1584_v57  ;;  %v1539_v3 = vpop.f32.mrb[22].mxu0  ;;  %v1587_v4 = vpop.f32.mrb[22].mxu1 }
 0x125   : > { %v1032_v55 = vadd.f32 %v1873_v6, %v993_v51  ;;  %v1063_v59 = vmax.f32 %v1031_v53, 0.0  ;;  %v939_v8 = vld [vmem:[#allocation2 + $0x40] sm:$0xff]  ;;  %v1540_v10 = vpop.f32.mrb[23].mxu0  ;;  %v1588_v11 = vpop.f32.mrb[23].mxu1 }
 0x126   : > { %v1048_v63 = vmax.f32 %v1016_v54, 0.0  ;;  %v1464_v5 = vpack.c.bf16 %v1047_v58, %v1047_v58  ;;  %v955_v9 = vld [vmem:[#allocation2 + $0xc0] sm:$0xff]  ;;  %v978_v14 = vmul.f32 %v1868_v62, %v939_v8  ;;  %805 = vst.msk [vmem:[#allocation2 + $0x50] sm:$0xff] %vm794_vm0, %v1538_v1  ;;  %821 = vst.msk [vmem:[#allocation2 + $0xd0] sm:$0xff] %vm794_vm0, %v1586_v2  ;;  %v1541_v18 = vadd.f32 %v1540_v10, %v1539_v3 }
 0x127   : > { %v1064_v0 = vmax.f32 %v1032_v55, 0.0  ;;  %v1480_v7 = vpack.c.bf16 %v1063_v59, %v1063_v59  ;;  %v994_v15 = vmul.f32 %v1868_v62, %v955_v9  ;;  %v1589_v19 = vadd.f32 %v1588_v11, %v1587_v4 }
 0x128   : > { %v1465_v12 = vpack.c.bf16 %v1048_v63, %v1048_v63  ;;  %1208 = vst.msk [vmem:[%s1891_s14 + $0x18] sm:$0xf] %vm1201_vm1, %v1464_v5  ;;  %v1017_v20 = vadd.f32 %v1873_v6, %v978_v14 }
 0x129   : > { %v1481_v13 = vpack.c.bf16 %v1064_v0, %v1064_v0  ;;  %1224 = vst.msk [vmem:[%s1891_s14 + $0x58] sm:$0xf] %vm1201_vm1, %v1480_v7  ;;  %v940_v16 = vld [vmem:[#allocation2 + $0x48] sm:$0xff]  ;;  %v1033_v21 = vadd.f32 %v1873_v6, %v994_v15 }
 0x12a   : > { %v956_v17 = vld [vmem:[#allocation2 + $0xc8] sm:$0xff]  ;;  %1209 = vst.msk [vmem:[%s1891_s14 + $0x1c] sm:$0xf] %vm1201_vm1, %v1465_v12  ;;  %v979_v22 = vmul.f32 %v1868_v62, %v940_v16  ;;  %v1049_v24 = vmax.f32 %v1017_v20, 0.0  ;;  %v1542_v28 = vpop.f32.mrb[24].mxu0  ;;  %v1590_v29 = vpop.f32.mrb[24].mxu1 }
 0x12b   : > { %1225 = vst.msk [vmem:[%s1891_s14 + $0x5c] sm:$0xf] %vm1201_vm1, %v1481_v13  ;;  %v995_v23 = vmul.f32 %v1868_v62, %v956_v17  ;;  %v1065_v25 = vmax.f32 %v1033_v21, 0.0  ;;  %v1543_v30 = vpop.f32.mrb[25].mxu0  ;;  %v1591_v31 = vpop.f32.mrb[25].mxu1 }
 0x12c   : > { %806 = vst.msk [vmem:[#allocation2 + $0x58] sm:$0xff] %vm794_vm0, %v1541_v18  ;;  %822 = vst.msk [vmem:[#allocation2 + $0xd8] sm:$0xff] %vm794_vm0, %v1589_v19  ;;  %v1018_v26 = vadd.f32 %v1873_v6, %v979_v22  ;;  %v1466_v32 = vpack.c.bf16 %v1049_v24, %v1049_v24  ;;  %v1545_v36 = vpop.f32.mrb[26].mxu0  ;;  %v1593_v37 = vpop.f32.mrb[26].mxu1  ;;  %v1544_v40 = vadd.f32 %v1543_v30, %v1542_v28 }
 0x12d   : > { %v1034_v27 = vadd.f32 %v1873_v6, %v995_v23  ;;  %v1482_v33 = vpack.c.bf16 %v1065_v25, %v1065_v25  ;;  %v941_v38 = vld [vmem:[#allocation2 + $0x50] sm:$0xff]  ;;  %v1592_v41 = vadd.f32 %v1591_v31, %v1590_v29  ;;  %v1546_v42 = vpop.f32.mrb[27].mxu0  ;;  %v1594_v43 = vpop.f32.mrb[27].mxu1 }
 0x12e   : > { %v1050_v34 = vmax.f32 %v1018_v26, 0.0  ;;  %v957_v39 = vld [vmem:[#allocation2 + $0xd0] sm:$0xff]  ;;  %1210 = vst.msk [vmem:[%s1891_s14 + $0x20] sm:$0xf] %vm1201_vm1, %v1466_v32  ;;  %v980_v46 = vmul.f32 %v1868_v62, %v941_v38  ;;  %v1547_v48 = vadd.f32 %v1546_v42, %v1545_v36  ;;  %v1595_v49 = vadd.f32 %v1594_v43, %v1593_v37 }
 0x12f   : > { %v1066_v35 = vmax.f32 %v1034_v27, 0.0  ;;  %1226 = vst.msk [vmem:[%s1891_s14 + $0x60] sm:$0xf] %vm1201_vm1, %v1482_v33  ;;  %v996_v47 = vmul.f32 %v1868_v62, %v957_v39 }
 0x130   : > { %v1467_v44 = vpack.c.bf16 %v1050_v34, %v1050_v34  ;;  %807 = vst.msk [vmem:[#allocation2 + $0x60] sm:$0xff] %vm794_vm0, %v1544_v40  ;;  %823 = vst.msk [vmem:[#allocation2 + $0xe0] sm:$0xff] %vm794_vm0, %v1592_v41  ;;  %v1019_v50 = vadd.f32 %v1873_v6, %v980_v46 }
 0x131   : > { %v1483_v45 = vpack.c.bf16 %v1066_v35, %v1066_v35  ;;  %v1035_v51 = vadd.f32 %v1873_v6, %v996_v47  ;;  %808 = vst.msk [vmem:[#allocation2 + $0x68] sm:$0xff] %vm794_vm0, %v1547_v48  ;;  %824 = vst.msk [vmem:[#allocation2 + $0xe8] sm:$0xff] %vm794_vm0, %v1595_v49 }
 0x132   : > { %1211 = vst.msk [vmem:[%s1891_s14 + $0x24] sm:$0xf] %vm1201_vm1, %v1467_v44  ;;  %v1051_v56 = vmax.f32 %v1019_v50, 0.0  ;;  %v1548_v58 = vpop.f32.mrb[28].mxu0  ;;  %v1596_v59 = vpop.f32.mrb[28].mxu1 }
 0x133   : > { %1227 = vst.msk [vmem:[%s1891_s14 + $0x64] sm:$0xf] %vm1201_vm1, %v1483_v45  ;;  %v942_v52 = vld [vmem:[#allocation2 + $0x58] sm:$0xff]  ;;  %v1067_v57 = vmax.f32 %v1035_v51, 0.0  ;;  %v1549_v63 = vpop.f32.mrb[29].mxu0  ;;  %v1597_v0 = vpop.f32.mrb[29].mxu1 }
 0x134   : > { %v958_v53 = vld [vmem:[#allocation2 + $0xd8] sm:$0xff]  ;;  %v981_v54 = vmul.f32 %v1868_v62, %v942_v52  ;;  %v1468_v1 = vpack.c.bf16 %v1051_v56, %v1051_v56  ;;  %v1550_v3 = vadd.f32 %v1549_v63, %v1548_v58  ;;  %v1598_v4 = vadd.f32 %v1597_v0, %v1596_v59  ;;  %v1551_v5 = vpop.f32.mrb[30].mxu0  ;;  %v1599_v7 = vpop.f32.mrb[30].mxu1 }
 0x135   : > { %v997_v55 = vmul.f32 %v1868_v62, %v958_v53  ;;  %v1484_v2 = vpack.c.bf16 %v1067_v57, %v1067_v57  ;;  %v1552_v10 = vpop.f32.mrb[31].mxu0  ;;  %v1600_v11 = vpop.f32.mrb[31].mxu1 }
 0x136   : > { %v1020_v60 = vadd.f32 %v1873_v6, %v981_v54  ;;  %1212 = vst.msk [vmem:[%s1891_s14 + $0x28] sm:$0xf] %vm1201_vm1, %v1468_v1  ;;  %v1553_v14 = vadd.f32 %v1552_v10, %v1551_v5  ;;  %v1601_v15 = vadd.f32 %v1600_v11, %v1599_v7 }
 0x137   : > { %v1036_v61 = vadd.f32 %v1873_v6, %v997_v55  ;;  %1228 = vst.msk [vmem:[%s1891_s14 + $0x68] sm:$0xf] %vm1201_vm1, %v1484_v2  ;;  %v943_v12 = vld [vmem:[#allocation2 + $0x60] sm:$0xff] }
 0x138   : > { %v1052_v8 = vmax.f32 %v1020_v60, 0.0  ;;  %v959_v13 = vld [vmem:[#allocation2 + $0xe0] sm:$0xff]  ;;  %809 = vst.msk [vmem:[#allocation2 + $0x70] sm:$0xff] %vm794_vm0, %v1550_v3  ;;  %825 = vst.msk [vmem:[#allocation2 + $0xf0] sm:$0xff] %vm794_vm0, %v1598_v4  ;;  %v982_v18 = vmul.f32 %v1868_v62, %v943_v12  ;;  %v944_v20 = vld [vmem:[#allocation2 + $0x68] sm:$0xff] }
 0x139   : > { %v1068_v9 = vmax.f32 %v1036_v61, 0.0  ;;  %v998_v19 = vmul.f32 %v1868_v62, %v959_v13  ;;  %v960_v21 = vld [vmem:[#allocation2 + $0xe8] sm:$0xff]  ;;  %810 = vst.msk [vmem:[#allocation2 + $0x78] sm:$0xff] %vm794_vm0, %v1553_v14  ;;  %826 = vst.msk [vmem:[#allocation2 + $0xf8] sm:$0xff] %vm794_vm0, %v1601_v15  ;;  %v983_v24 = vmul.f32 %v1868_v62, %v944_v20 }
 0x13a   : > { %v1469_v16 = vpack.c.bf16 %v1052_v8, %v1052_v8  ;;  %v1021_v22 = vadd.f32 %v1873_v6, %v982_v18  ;;  %v999_v25 = vmul.f32 %v1868_v62, %v960_v21 }
 0x13b   : > { %v1485_v17 = vpack.c.bf16 %v1068_v9, %v1068_v9  ;;  %v1037_v23 = vadd.f32 %v1873_v6, %v998_v19  ;;  %v1022_v28 = vadd.f32 %v1873_v6, %v983_v24 }
 0x13c   : > { %1213 = vst.msk [vmem:[%s1891_s14 + $0x2c] sm:$0xf] %vm1201_vm1, %v1469_v16  ;;  %v1053_v26 = vmax.f32 %v1021_v22, 0.0  ;;  %v1038_v29 = vadd.f32 %v1873_v6, %v999_v25 }
 0x13d   : > { %1229 = vst.msk [vmem:[%s1891_s14 + $0x6c] sm:$0xf] %vm1201_vm1, %v1485_v17  ;;  %v1069_v27 = vmax.f32 %v1037_v23, 0.0  ;;  %v1054_v32 = vmax.f32 %v1022_v28, 0.0 }
 0x13e   : > { %v1470_v30 = vpack.c.bf16 %v1053_v26, %v1053_v26  ;;  %v1070_v33 = vmax.f32 %v1038_v29, 0.0 }
 0x13f   : > { %v1486_v31 = vpack.c.bf16 %v1069_v27, %v1069_v27  ;;  %v945_v34 = vld [vmem:[#allocation2 + $0x70] sm:$0xff]  ;;  %v1471_v38 = vpack.c.bf16 %v1054_v32, %v1054_v32 }
 0x140   : > { %v961_v35 = vld [vmem:[#allocation2 + $0xf0] sm:$0xff]  ;;  %v984_v36 = vmul.f32 %v1868_v62, %v945_v34  ;;  %1214 = vst.msk [vmem:[%s1891_s14 + $0x30] sm:$0xf] %vm1201_vm1, %v1470_v30  ;;  %v1487_v39 = vpack.c.bf16 %v1070_v33, %v1070_v33  ;;  %v946_v40 = vld [vmem:[#allocation2 + $0x78] sm:$0xff] }
 0x141   : > { %v1000_v37 = vmul.f32 %v1868_v62, %v961_v35  ;;  %1230 = vst.msk [vmem:[%s1891_s14 + $0x70] sm:$0xf] %vm1201_vm1, %v1486_v31  ;;  %v962_v41 = vld [vmem:[#allocation2 + $0xf8] sm:$0xff]  ;;  %v985_v44 = vmul.f32 %v1868_v62, %v946_v40  ;;  %1215 = vst.msk [vmem:[%s1891_s14 + $0x34] sm:$0xf] %vm1201_vm1, %v1471_v38 }
 0x142   : > { %v1023_v42 = vadd.f32 %v1873_v6, %v984_v36  ;;  %v1001_v45 = vmul.f32 %v1868_v62, %v962_v41  ;;  %1231 = vst.msk [vmem:[%s1891_s14 + $0x74] sm:$0xf] %vm1201_vm1, %v1487_v39 }
 0x143   : > { %v1039_v43 = vadd.f32 %v1873_v6, %v1000_v37  ;;  %v1024_v48 = vadd.f32 %v1873_v6, %v985_v44 }
 0x144   : > { %v1055_v46 = vmax.f32 %v1023_v42, 0.0  ;;  %v1040_v49 = vadd.f32 %v1873_v6, %v1001_v45 }
 0x145   : > { %v1071_v47 = vmax.f32 %v1039_v43, 0.0  ;;  %v1056_v52 = vmax.f32 %v1024_v48, 0.0 }
 0x146   : > { %v1472_v50 = vpack.c.bf16 %v1055_v46, %v1055_v46  ;;  %v1072_v53 = vmax.f32 %v1040_v49, 0.0 }
 0x147   : > { %v1488_v51 = vpack.c.bf16 %v1071_v47, %v1071_v47  ;;  %v1473_v62 = vpack.c.bf16 %v1056_v52, %v1056_v52 }
 0x148   : > { %1216 = vst.msk [vmem:[%s1891_s14 + $0x38] sm:$0xf] %vm1201_vm1, %v1472_v50  ;;  %v1489_v54 = vpack.c.bf16 %v1072_v53, %v1072_v53 }
 0x149   : > { %1232 = vst.msk [vmem:[%s1891_s14 + $0x78] sm:$0xf] %vm1201_vm1, %v1488_v51  ;;  %1217 = vst.msk [vmem:[%s1891_s14 + $0x3c] sm:$0xf] %vm1201_vm1, %v1473_v62 }
 0x14a   : > { %1233 = vst.msk [vmem:[%s1891_s14 + $0x7c] sm:$0xf] %vm1201_vm1, %v1489_v54 }
 0x14b PF: > { %s14_s17 = sadd.s32 1, %s1728_s17   ;;  %s2051_s15 = smov %s1724_s16 }
 0x14c   : > { %p11_p5 = scmp.ge.s32.totalorder %s14_s17, 4   ;;  %s2052_s16 = smov %s2054_s18 }
 0x14e   :  { %13 = sbr.rel (!%p11_p5) target bundleno = 2 (0x2), region = 87 }

// kernel: resnet34_8s_fuse_forward.76
= control target key start
LH: loop header
LB: loop body
LE: loop exit
PB: predicated region body
PF: predicated region fallthrough
CT: control target
= control target key end

     0   :  { %s1038_s15 = smov 0   ;;  %s1040_s16 = smov 0   ;;  %s1175_s0 = inlined_call_operand.vmem [shape: bf16[128,640], index: 0, kind: input, shape index: {}]   ;;  %s1176_s1 = inlined_call_operand.vmem [shape: bf16[640,64], index: 1, kind: input, shape index: {}]   ;;  %s1177_s2 = inlined_call_operand.vmem [shape: f32[1,64], index: 2, kind: input, shape index: {}]   ;;  %s1178_s3 = inlined_call_operand.vmem [shape: f32[1,64], index: 3, kind: input, shape index: {}]   ;;  %s1179_s4 = inlined_call_operand.vmem [shape: bf16[128,64], index: 4, kind: output, shape index: {}]  }
   0x1   :  { %s1042_s17 = smov 0   ;;  %s1044_s18 = smov 0  }
   0x2   :  { %s1046_s19 = smov 0   ;;  %s1048_s20 = smov 0  }
   0x3   :  { %s1050_s21 = smov 0  }
   0x4 LB: > { %s26_s22 = sadd.s32 1, %s1003_s19  ;;  %s33_s23 = sadd.s32 1, %s1007_s20  ;;  %s1011_s21 = sphi %s1050_s21, %s14_s21   ;;  %s1007_s20 = sphi %s1048_s20, %s1185_s20   ;;  %s1003_s19 = sphi %s1046_s19, %s1184_s19   ;;  %s999_s18 = sphi %s1044_s18, %s1183_s18   ;;  %s995_s17 = sphi %s1042_s17, %s1182_s17   ;;  %s991_s16 = sphi %s1040_s16, %s1181_s16   ;;  %s987_s15 = sphi %s1038_s15, %s1180_s15  }
   0x5   : > { %p27_p0 = scmp.ge.s32.totalorder %s26_s22, 5  ;;  %p49_p1 = scmp.ne.s32.totalorder %s991_s16, %s987_s15 }
   0x6   : > { %p50_p2 = scmp.eq.s32.totalorder %s1011_s21, 0  ;;  %s42_s27 = sadd.s32 1, %s991_s16 }
   0x7   : > { %s1187_s22 = smov (%p27_p0, %s26_s22), 0  ;;  %s1189_s23 = smov (!%p27_p0, %s33_s23), %s1007_s20 }
   0x8   : > { %p51_p3 = por %p50_p2, %p49_p1  ;;  %p35_p4 = scmp.ge.s32.totalorder %s1189_s23, 2 }
   0x9   : > { %s38_s24 = ssub.s32 %s1003_s19, %s1187_s22  ;;  %p790_p6 = scmp.ge.s32.totalorder %s1011_s21, 10 }
   0xa   : > { %s1191_s23 = smov (%p35_p4, %s1189_s23), 0 }
   0xb   : > { %s37_s25 = ssub.s32 %s1007_s20, %s1191_s23  ;;  %195 = sbr.rel (%p790_p6) target bundleno = 30 (0x1e), region = 24 }
   0xc   : > { %s39_s26 = sor.u32 %s38_s24, %s37_s25 }
   0xd   : > { %p40_p5 = scmp.eq.s32.totalorder %s39_s26, 0 }
   0xf   : > { %s1089_s28 = scalar_select %p40_p5, %s991_s16, %s42_s27  }
  0x12   : > { %198 = sbr.rel (!%p51_p3) target bundleno = 30 (0x1e), region = 28  ;;  %s200_s29 = sand.u32 (%p51_p3), 1, %s991_s16  }
  0x13   : > { %s888_s30 = smul.u32 (%p51_p3), 40, %s1007_s20  ;;  %s791_s5 = sshll.u32 (%p51_p3), %s200_s29, 5 }
  0x14   : > { %s202_s11 = scalar_lea.vmem (%p51_p3), [#allocation3], %s791_s5 }
  0x15   : > { %s205_s6 = sadd.s32 (%p51_p3), %s1003_s19, %s888_s30 }
  0x16   : > { %s794_s7 = sshll.u32 (%p51_p3), %s205_s6, 2 }
  0x17   : > { %s207_s10 = scalar_lea.vmem (%p51_p3), %s1175_s0, %s794_s7 }
  0x18   : > { %v223_v0 = vld [vmem:[%s207_s10] sm:$0xf] (%p51_p3)  ;;  %v225_v1 = vld [vmem:[%s207_s10 + $0x14] sm:$0xf] (%p51_p3)  ;;  %v227_v2 = vld [vmem:[%s207_s10 + $0x28] sm:$0xf] (%p51_p3) }
  0x19   : > { %224 = vst [vmem:[%s202_s11] sm:$0xf] %v223_v0  ;;  %226 = vst [vmem:[%s202_s11 + $0x4] sm:$0xf] %v225_v1  ;;  %v229_v3 = vld [vmem:[%s207_s10 + $0x3c] sm:$0xf] }
  0x1a   : > { %228 = vst [vmem:[%s202_s11 + $0x8] sm:$0xf] %v227_v2  ;;  %v231_v4 = vld [vmem:[%s207_s10 + $0x50] sm:$0xf]  ;;  %v233_v5 = vld [vmem:[%s207_s10 + $0x64] sm:$0xf] }
  0x1b   : > { %230 = vst [vmem:[%s202_s11 + $0xc] sm:$0xf] %v229_v3  ;;  %232 = vst [vmem:[%s202_s11 + $0x10] sm:$0xf] %v231_v4  ;;  %v235_v6 = vld [vmem:[%s207_s10 + $0x78] sm:$0xf] }
  0x1c   : > { %234 = vst [vmem:[%s202_s11 + $0x14] sm:$0xf] %v233_v5  ;;  %v237_v7 = vld [vmem:[%s207_s10 + $0x8c] sm:$0xf]  ;;  %236 = vst [vmem:[%s202_s11 + $0x18] sm:$0xf] %v235_v6 }
  0x1d   : > { %238 = vst [vmem:[%s202_s11 + $0x1c] sm:$0xf] %v237_v7 }
  0x1e PF: > { %p795_p7 = scmp.ge.s32.totalorder %s1011_s21, 1  ;;  %p288_p8 = scmp.lt.s32.totalorder %s1011_s21, 11 }
  0x20   : > { %p289_p9 = pnand %p795_p7, %p288_p8 }
  0x21   : > { %s797_s12 = sshll.u32 (!%p289_p9), %s995_s17, 4  ;;  %s799_s13 = sshll.u32 (!%p289_p9), %s999_s18, 3 }
  0x22   : > { %292 = sbr.rel (%p289_p9) target bundleno = 323 (0x143), region = 73  ;;  %p339_p10 = scmp.lt.s32.totalorder (!%p289_p9), %s797_s12, 79 }
  0x23   : > { %p354_p11 = scmp.lt.s32.totalorder (!%p289_p9), %s799_s13, 15  ;;  %s295_s24 = sand.u32 (!%p289_p9), 1, %s987_s15  }
  0x24   : > { %s796_s15 = sshll.u32 (!%p289_p9), %s295_s24, 5  ;;  %p813_p12 = scmp.ne.s32.totalorder (!%p289_p9), %s995_s17, 0 }
  0x25   : > { %s297_s6 = scalar_lea.vmem (!%p289_p9), [#allocation3], %s796_s15 }
  0x26   : > { %v953_v12 = vld [vmem:[%s297_s6] sm:$0xff] (!%p289_p9)   ;;  %v954_v13 = vld [vmem:[%s297_s6 + $0x10] sm:$0xff] (!%p289_p9)   ;;  %v955_v18 = vld [vmem:[%s297_s6 + $0x8] sm:$0xff] (!%p289_p9)  }
  0x27   : > { %864 = vmatprep.mubr.bf16.mxu0 (!%p289_p9), %v953_v12  ;;  %868 = vmatprep.mubr.bf16.mxu1 (!%p289_p9), %v954_v13  ;;  %v956_v19 = vld [vmem:[%s297_s6 + $0x18] sm:$0xff] (!%p289_p9)  }
  0x29   : > { %s1193_s12 = smov (!%p339_p10, %s797_s12), 79  ;;  %s1195_s13 = smov (!%p354_p11, %s799_s13), 15 }
  0x2a   : > { %s798_s14 = sshll.u32 %s1193_s12, 2  ;;  %s800_s29 = sshll.u32 %s1195_s13, 2  ;;  %vm528_vm0 = vcmask (!%p813_p12), 523264  }
  0x2b   : > { %s1106_s27 = scalar_lea.vmem %s1176_s1, %s798_s14  ;;  %s1111_s18 = scalar_lea.vmem %s1179_s4, %s800_s29 }
  0x2c   : > { %v945_v8 = vld [vmem:[%s1106_s27] sm:$0xff]   ;;  %v946_v9 = vld [vmem:[%s1106_s27 + $0x8] sm:$0xff]   ;;  %v947_v10 = vld [vmem:[%s1106_s27 + $0x10] sm:$0xff]  }
  0x2d   : > { %848 = vmatprep.subr.bf16.mxu0 %v945_v8  ;;  %872 = vmatprep.subr.bf16.mxu1 %v945_v8  ;;  %v948_v11 = vld [vmem:[%s1106_s27 + $0x18] sm:$0xff]   ;;  %v949_v14 = vld [vmem:[%s1106_s27 + $0x20] sm:$0xff]   ;;  %v950_v15 = vld [vmem:[%s1106_s27 + $0x28] sm:$0xff]  }
  0x2e   : > { %849 = vmatpush3.bf16.msra.mxu0 %v945_v8  ;;  %880 = vmatpush3.bf16.msra.mxu1 %v945_v8  ;;  %v951_v16 = vld [vmem:[%s1106_s27 + $0x30] sm:$0xff]   ;;  %v952_v17 = vld [vmem:[%s1106_s27 + $0x38] sm:$0xff]  }
  0x2f   : > { %850 = vmatprep.subr.bf16.mxu0 %v946_v9  ;;  %873 = vmatprep.subr.bf16.mxu1 %v946_v9 }
  0x32   : > { %851 = vmatpush3.bf16.msra.mxu0 %v946_v9  ;;  %881 = vmatpush3.bf16.msra.mxu1 %v946_v9 }
  0x33   : > { %852 = vmatprep.subr.bf16.mxu0 %v947_v10  ;;  %874 = vmatprep.subr.bf16.mxu1 %v947_v10 }
  0x36   : > { %853 = vmatpush3.bf16.msra.mxu0 %v947_v10  ;;  %882 = vmatpush3.bf16.msra.mxu1 %v947_v10 }
  0x37   : > { %854 = vmatprep.subr.bf16.mxu0 %v948_v11  ;;  %875 = vmatprep.subr.bf16.mxu1 %v948_v11 }
  0x3a   : > { %855 = vmatpush3.bf16.msra.mxu0 %v948_v11  ;;  %883 = vmatpush3.bf16.msra.mxu1 %v948_v11 }
  0x3b   : > { %856 = vmatprep.subr.bf16.mxu0 %v949_v14  ;;  %876 = vmatprep.subr.bf16.mxu1 %v949_v14 }
  0x3e   : > { %857 = vmatpush3.bf16.msra.mxu0 %v949_v14  ;;  %884 = vmatpush3.bf16.msra.mxu1 %v949_v14 }
  0x3f   : > { %858 = vmatprep.subr.bf16.mxu0 %v950_v15  ;;  %877 = vmatprep.subr.bf16.mxu1 %v950_v15 }
  0x42   : > { %859 = vmatpush3.bf16.msra.mxu0 %v950_v15  ;;  %885 = vmatpush3.bf16.msra.mxu1 %v950_v15 }
  0x43   : > { %860 = vmatprep.subr.bf16.mxu0 %v951_v16  ;;  %878 = vmatprep.subr.bf16.mxu1 %v951_v16 }
  0x46   : > { %861 = vmatpush3.bf16.msra.mxu0 %v951_v16  ;;  %886 = vmatpush3.bf16.msra.mxu1 %v951_v16 }
  0x47   : > { %862 = vmatprep.subr.bf16.mxu0 %v952_v17  ;;  %879 = vmatprep.subr.bf16.mxu1 %v952_v17 }
  0x4a   : > { %863 = vmatpush3.bf16.msra.mxu0 %v952_v17  ;;  %887 = vmatpush3.bf16.msra.mxu1 %v952_v17 }
  0x4d   : > { %865 = vmatmul.mubr.bf16.vlgmr.msra.gmra.mrb[0].mxu0 %v955_v18  ;;  %869 = vmatmul.mubr.bf16.vlgmr.msra.gmra.mrb[0].mxu1 %v956_v19 }
 0x11d   : > { %527 = sbr.rel (%p813_p12) target bundleno = 293 (0x125), region = 81 }
 0x120   : > { %v866_v20 = vpop.f32.mrb[0].mxu0  ;;  %v870_v21 = vpop.f32.mrb[0].mxu1 }
 0x121   : > { %v493_v22 = vpop.f32.mrb[1].mxu0  ;;  %v509_v23 = vpop.f32.mrb[1].mxu1  ;;  %531 = vst.msk [vmem:[#allocation2 + $0x10] sm:$0xff] (!%p813_p12), %vm528_vm0, %v866_v20  ;;  %535 = vst.msk [vmem:[#allocation2 + $0x30] sm:$0xff] (!%p813_p12), %vm528_vm0, %v870_v21 }
 0x122   : > { %v867_v24 = vpop.f32.mrb[2].mxu0  ;;  %v871_v25 = vpop.f32.mrb[2].mxu1  ;;  %529 = vst.msk [vmem:[#allocation2] sm:$0xff] (!%p813_p12), %vm528_vm0, %v493_v22  ;;  %533 = vst.msk [vmem:[#allocation2 + $0x20] sm:$0xff] (!%p813_p12), %vm528_vm0, %v509_v23 }
 0x123   : > { %v496_v26 = vpop.f32.mrb[3].mxu0  ;;  %v512_v27 = vpop.f32.mrb[3].mxu1  ;;  %532 = vst.msk [vmem:[#allocation2 + $0x18] sm:$0xff] (!%p813_p12), %vm528_vm0, %v867_v24  ;;  %536 = vst.msk [vmem:[#allocation2 + $0x38] sm:$0xff] (!%p813_p12), %vm528_vm0, %v871_v25 }
 0x124   : > { %530 = vst.msk [vmem:[#allocation2 + $0x8] sm:$0xff] %vm528_vm0, %v496_v26  ;;  %534 = vst.msk [vmem:[#allocation2 + $0x28] sm:$0xff] %vm528_vm0, %v512_v27 }
 0x125 PF: > { %p814_p13 = scmp.le.s32.totalorder %s995_s17, 0 }
 0x126   : > { %vm557_vm1 = vcmask (!%p814_p13), 523264  }
 0x127   : > { %540 = sbr.rel (%p814_p13) target bundleno = 305 (0x131), region = 85 }
 0x129   : > { %v543_v30 = vld [vmem:[#allocation2 + $0x10] sm:$0xff] (!%p814_p13) }
 0x12a   : > { %v541_v28 = vld [vmem:[#allocation2] sm:$0xff] (!%p814_p13)  ;;  %v551_v33 = vadd.f32 (!%p814_p13), %v866_v20, %v543_v30  ;;  %v547_v40 = vld [vmem:[#allocation2 + $0x30] sm:$0xff] (!%p814_p13) }
 0x12b   : > { %v542_v29 = vld [vmem:[#allocation2 + $0x8] sm:$0xff] (!%p814_p13)  ;;  %v549_v31 = vadd.f32 (!%p814_p13), %v541_v28, %v493_v22  ;;  %v544_v34 = vld [vmem:[#allocation2 + $0x18] sm:$0xff] (!%p814_p13)  ;;  %v545_v35 = vld [vmem:[#allocation2 + $0x20] sm:$0xff] (!%p814_p13)  ;;  %v555_v42 = vadd.f32 (!%p814_p13), %v870_v21, %v547_v40 }
 0x12c   : > { %v550_v32 = vadd.f32 (!%p814_p13), %v542_v29, %v496_v26  ;;  %v546_v36 = vld [vmem:[#allocation2 + $0x28] sm:$0xff] (!%p814_p13)  ;;  %v552_v37 = vadd.f32 (!%p814_p13), %v867_v24, %v544_v34  ;;  %v553_v38 = vadd.f32 (!%p814_p13), %v545_v35, %v509_v23  ;;  %v548_v41 = vld [vmem:[#allocation2 + $0x38] sm:$0xff] (!%p814_p13)  ;;  %560 = vst.msk [vmem:[#allocation2 + $0x10] sm:$0xff] (!%p814_p13), %vm557_vm1, %v551_v33 }
 0x12d   : > { %v554_v39 = vadd.f32 (!%p814_p13), %v546_v36, %v512_v27  ;;  %558 = vst.msk [vmem:[#allocation2] sm:$0xff] (!%p814_p13), %vm557_vm1, %v549_v31  ;;  %v556_v43 = vadd.f32 (!%p814_p13), %v871_v25, %v548_v41  ;;  %564 = vst.msk [vmem:[#allocation2 + $0x30] sm:$0xff] (!%p814_p13), %vm557_vm1, %v555_v42 }
 0x12e   : > { %559 = vst.msk [vmem:[#allocation2 + $0x8] sm:$0xff] %vm557_vm1, %v550_v32  ;;  %561 = vst.msk [vmem:[#allocation2 + $0x18] sm:$0xff] %vm557_vm1, %v552_v37 }
 0x12f   : > { %562 = vst.msk [vmem:[#allocation2 + $0x20] sm:$0xff] %vm557_vm1, %v553_v38  ;;  %563 = vst.msk [vmem:[#allocation2 + $0x28] sm:$0xff] %vm557_vm1, %v554_v39 }
 0x130   : > { %565 = vst.msk [vmem:[#allocation2 + $0x38] sm:$0xff] %vm557_vm1, %v556_v43 }
 0x131 PF: > { %p815_p0 = scmp.ne.s32.totalorder %s995_s17, 4 }
 0x132   : > { %v816_v45 = vld [vmem:[%s1177_s2] ss:$0 sm:$0xff] (!%p815_p0)  ;;  %vm648_vm2 = vcmask (!%p815_p0), 519168  }
 0x133   : > { %569 = sbr.rel (%p815_p0) target bundleno = 323 (0x143), region = 89  ;;  %v817_v46 = vld [vmem:[%s1178_s3] ss:$0 sm:$0xff] (!%p815_p0) }
 0x136   : > { %v572_v49 = vld [vmem:[#allocation2 + $0x10] sm:$0xff] (!%p815_p0)  ;;  %v574_v54 = vld [vmem:[#allocation2 + $0x20] sm:$0xff] (!%p815_p0)  ;;  %v575_v55 = vld [vmem:[#allocation2 + $0x28] sm:$0xff] (!%p815_p0) }
 0x137   : > { %v570_v44 = vld [vmem:[#allocation2] sm:$0xff] (!%p815_p0)  ;;  %v587_v52 = vmul.f32 (!%p815_p0), %v816_v45, %v572_v49  ;;  %v576_v56 = vld [vmem:[#allocation2 + $0x30] sm:$0xff] (!%p815_p0)  ;;  %v589_v58 = vmul.f32 (!%p815_p0), %v816_v45, %v574_v54  ;;  %v590_v59 = vmul.f32 (!%p815_p0), %v816_v45, %v575_v55  ;;  %v577_v61 = vld [vmem:[#allocation2 + $0x38] sm:$0xff] (!%p815_p0) }
 0x138   : > { %v585_v47 = vmul.f32 (!%p815_p0), %v816_v45, %v570_v44  ;;  %v571_v48 = vld [vmem:[#allocation2 + $0x8] sm:$0xff] (!%p815_p0)  ;;  %v573_v50 = vld [vmem:[#allocation2 + $0x18] sm:$0xff] (!%p815_p0)  ;;  %v591_v60 = vmul.f32 (!%p815_p0), %v816_v45, %v576_v56  ;;  %v592_v1 = vmul.f32 (!%p815_p0), %v816_v45, %v577_v61 }
 0x139   : > { %v586_v51 = vmul.f32 (!%p815_p0), %v816_v45, %v571_v48  ;;  %v588_v53 = vmul.f32 (!%p815_p0), %v816_v45, %v573_v50  ;;  %v602_v63 = vadd.f32 (!%p815_p0), %v817_v46, %v587_v52  ;;  %v604_v3 = vadd.f32 (!%p815_p0), %v817_v46, %v589_v58 }
 0x13a   : > { %v600_v57 = vadd.f32 %v817_v46, %v585_v47  ;;  %v605_v4 = vadd.f32 %v817_v46, %v590_v59  ;;  %v606_v5 = vadd.f32 %v817_v46, %v591_v60  ;;  %v607_v9 = vadd.f32 %v817_v46, %v592_v1 }
 0x13b   : > { %v601_v62 = vadd.f32 %v817_v46, %v586_v51  ;;  %v603_v0 = vadd.f32 %v817_v46, %v588_v53  ;;  %v610_v7 = vmax.f32 %v602_v63, 0.0  ;;  %v612_v11 = vmax.f32 %v604_v3, 0.0 }
 0x13c   : > { %v608_v2 = vmax.f32 %v600_v57, 0.0  ;;  %v613_v12 = vmax.f32 %v605_v4, 0.0  ;;  %v614_v13 = vmax.f32 %v606_v5, 0.0  ;;  %v615_v17 = vmax.f32 %v607_v9, 0.0 }
 0x13d   : > { %v609_v6 = vmax.f32 %v601_v62, 0.0  ;;  %v611_v8 = vmax.f32 %v603_v0, 0.0  ;;  %v830_v15 = vpack.c.bf16 %v610_v7, %v610_v7  ;;  %v832_v18 = vpack.c.bf16 %v612_v11, %v612_v11 }
 0x13e   : > { %v828_v10 = vpack.c.bf16 %v608_v2, %v608_v2  ;;  %v833_v19 = vpack.c.bf16 %v613_v12, %v613_v12  ;;  %v834_v20 = vpack.c.bf16 %v614_v13, %v614_v13  ;;  %v835_v21 = vpack.c.bf16 %v615_v17, %v615_v17 }
 0x13f   : > { %v829_v14 = vpack.c.bf16 %v609_v6, %v609_v6  ;;  %v831_v16 = vpack.c.bf16 %v611_v8, %v611_v8  ;;  %651 = vst.msk [vmem:[%s1111_s18 + $0x8] sm:$0xf] %vm648_vm2, %v830_v15  ;;  %653 = vst.msk [vmem:[%s1111_s18 + $0x10] sm:$0xf] %vm648_vm2, %v832_v18 }
 0x140   : > { %649 = vst.msk [vmem:[%s1111_s18] sm:$0xf] %vm648_vm2, %v828_v10  ;;  %654 = vst.msk [vmem:[%s1111_s18 + $0x14] sm:$0xf] %vm648_vm2, %v833_v19 }
 0x141   : > { %650 = vst.msk [vmem:[%s1111_s18 + $0x4] sm:$0xf] %vm648_vm2, %v829_v14  ;;  %652 = vst.msk [vmem:[%s1111_s18 + $0xc] sm:$0xf] %vm648_vm2, %v831_v16 }
 0x142   : > { %655 = vst.msk [vmem:[%s1111_s18 + $0x18] sm:$0xf] %vm648_vm2, %v834_v20  ;;  %656 = vst.msk [vmem:[%s1111_s18 + $0x1c] sm:$0xf] %vm648_vm2, %v835_v21 }
 0x143 PF: > { %s14_s21 = sadd.s32 1, %s1011_s21   ;;  %s1180_s15 = smov %s991_s16 }
 0x144   : > { %p11_p1 = scmp.ge.s32.totalorder %s14_s21, 12   ;;  %s1181_s16 = smov %s1089_s28 }
 0x145   : > { %s1182_s17 = smov %s1003_s19  ;;  %s1183_s18 = smov %s1007_s20 }
 0x146   : > { %s1184_s19 = smov %s1187_s22  ;;  %s1185_s20 = smov %s1191_s23 }
 0x147   :  { %13 = sbr.rel (!%p11_p1) target bundleno = 4 (0x4), region = 133 }

// kernel: resnet34_8s_fuse_forward.77
= control target key start
LH: loop header
LB: loop body
LE: loop exit
PB: predicated region body
PF: predicated region fallthrough
CT: control target
= control target key end

     0   :  { %s1163_s18 = smov 0   ;;  %s1165_s19 = smov 0   ;;  %s1309_s0 = inlined_call_operand.vmem [shape: bf16[128,640], index: 0, kind: input, shape index: {}]   ;;  %s1310_s1 = inlined_call_operand.vmem [shape: bf16[640,64], index: 1, kind: input, shape index: {}]   ;;  %s1311_s2 = inlined_call_operand.vmem [shape: f32[1,64], index: 2, kind: input, shape index: {}]   ;;  %s1312_s3 = inlined_call_operand.vmem [shape: f32[1,64], index: 3, kind: input, shape index: {}]   ;;  %s1313_s4 = inlined_call_operand.vmem [shape: bf16[128,64], index: 4, kind: input, shape index: {}]   ;;  %s1314_s5 = inlined_call_operand.vmem [shape: bf16[128,64], index: 5, kind: output, shape index: {}]  }
   0x1   :  { %s1167_s20 = smov 0   ;;  %s1169_s21 = smov 0  }
   0x2   :  { %s1171_s22 = smov 0   ;;  %s1173_s23 = smov 0  }
   0x3   :  { %s1175_s24 = smov 0  }
   0x4 LB: > { %s27_s25 = sadd.s32 1, %s1123_s22  ;;  %s34_s26 = sadd.s32 1, %s1127_s23  ;;  %s1131_s24 = sphi %s1175_s24, %s15_s24   ;;  %s1127_s23 = sphi %s1173_s23, %s1320_s23   ;;  %s1123_s22 = sphi %s1171_s22, %s1319_s22   ;;  %s1119_s21 = sphi %s1169_s21, %s1318_s21   ;;  %s1115_s20 = sphi %s1167_s20, %s1317_s20   ;;  %s1111_s19 = sphi %s1165_s19, %s1316_s19   ;;  %s1107_s18 = sphi %s1163_s18, %s1315_s18  }
   0x5   : > { %p28_p0 = scmp.ge.s32.totalorder %s27_s25, 5  ;;  %p50_p1 = scmp.ne.s32.totalorder %s1111_s19, %s1107_s18 }
   0x6   : > { %p51_p2 = scmp.eq.s32.totalorder %s1131_s24, 0  ;;  %s43_s30 = sadd.s32 1, %s1111_s19 }
   0x7   : > { %s1322_s25 = smov (%p28_p0, %s27_s25), 0  ;;  %s1324_s26 = smov (!%p28_p0, %s34_s26), %s1127_s23 }
   0x8   : > { %p52_p3 = por %p51_p2, %p50_p1  ;;  %p36_p4 = scmp.ge.s32.totalorder %s1324_s26, 2 }
   0x9   : > { %s39_s27 = ssub.s32 %s1123_s22, %s1322_s25  ;;  %p889_p6 = scmp.ge.s32.totalorder %s1131_s24, 10 }
   0xa   : > { %s1326_s26 = smov (%p36_p4, %s1324_s26), 0 }
   0xb   : > { %s38_s28 = ssub.s32 %s1127_s23, %s1326_s26  ;;  %224 = sbr.rel (%p889_p6) target bundleno = 30 (0x1e), region = 24 }
   0xc   : > { %s40_s29 = sor.u32 %s39_s27, %s38_s28 }
   0xd   : > { %p41_p5 = scmp.eq.s32.totalorder %s40_s29, 0 }
   0xf   : > { %s1214_s6 = scalar_select %p41_p5, %s1111_s19, %s43_s30  }
  0x12   : > { %227 = sbr.rel (!%p52_p3) target bundleno = 30 (0x1e), region = 28  ;;  %s229_s7 = sand.u32 (%p52_p3), 1, %s1111_s19  }
  0x13   : > { %s1008_s8 = smul.u32 (%p52_p3), 40, %s1127_s23  ;;  %s890_s9 = sshll.u32 (%p52_p3), %s229_s7, 5 }
  0x14   : > { %s231_s15 = scalar_lea.vmem (%p52_p3), [#allocation3], %s890_s9 }
  0x15   : > { %s234_s10 = sadd.s32 (%p52_p3), %s1123_s22, %s1008_s8 }
  0x16   : > { %s893_s11 = sshll.u32 (%p52_p3), %s234_s10, 2 }
  0x17   : > { %s236_s14 = scalar_lea.vmem (%p52_p3), %s1309_s0, %s893_s11 }
  0x18   : > { %v252_v0 = vld [vmem:[%s236_s14] sm:$0xf] (%p52_p3)  ;;  %v254_v1 = vld [vmem:[%s236_s14 + $0x14] sm:$0xf] (%p52_p3)  ;;  %v256_v2 = vld [vmem:[%s236_s14 + $0x28] sm:$0xf] (%p52_p3) }
  0x19   : > { %253 = vst [vmem:[%s231_s15] sm:$0xf] %v252_v0  ;;  %255 = vst [vmem:[%s231_s15 + $0x4] sm:$0xf] %v254_v1  ;;  %v258_v3 = vld [vmem:[%s236_s14 + $0x3c] sm:$0xf] }
  0x1a   : > { %257 = vst [vmem:[%s231_s15 + $0x8] sm:$0xf] %v256_v2  ;;  %v260_v4 = vld [vmem:[%s236_s14 + $0x50] sm:$0xf]  ;;  %v262_v5 = vld [vmem:[%s236_s14 + $0x64] sm:$0xf] }
  0x1b   : > { %259 = vst [vmem:[%s231_s15 + $0xc] sm:$0xf] %v258_v3  ;;  %261 = vst [vmem:[%s231_s15 + $0x10] sm:$0xf] %v260_v4  ;;  %v264_v6 = vld [vmem:[%s236_s14 + $0x78] sm:$0xf] }
  0x1c   : > { %263 = vst [vmem:[%s231_s15 + $0x14] sm:$0xf] %v262_v5  ;;  %v266_v7 = vld [vmem:[%s236_s14 + $0x8c] sm:$0xf]  ;;  %265 = vst [vmem:[%s231_s15 + $0x18] sm:$0xf] %v264_v6 }
  0x1d   : > { %267 = vst [vmem:[%s231_s15 + $0x1c] sm:$0xf] %v266_v7 }
  0x1e PF: > { %p894_p7 = scmp.ge.s32.totalorder %s1131_s24, 1  ;;  %p329_p8 = scmp.lt.s32.totalorder %s1131_s24, 11 }
  0x20   : > { %p330_p9 = pnand %p894_p7, %p329_p8 }
  0x21   : > { %s896_s16 = sshll.u32 (!%p330_p9), %s1115_s20, 4  ;;  %s898_s17 = sshll.u32 (!%p330_p9), %s1119_s21, 3 }
  0x22   : > { %333 = sbr.rel (%p330_p9) target bundleno = 325 (0x145), region = 77  ;;  %p390_p10 = scmp.lt.s32.totalorder (!%p330_p9), %s896_s16, 79 }
  0x23   : > { %p405_p11 = scmp.lt.s32.totalorder (!%p330_p9), %s898_s17, 15  ;;  %s336_s28 = sand.u32 (!%p330_p9), 1, %s1107_s18  }
  0x24   : > { %s895_s18 = sshll.u32 (!%p330_p9), %s336_s28, 5  ;;  %p914_p12 = scmp.ne.s32.totalorder (!%p330_p9), %s1115_s20, 0 }
  0x25   : > { %s338_s14 = scalar_lea.vmem (!%p330_p9), [#allocation3], %s895_s18 }
  0x26   : > { %v1073_v12 = vld [vmem:[%s338_s14] sm:$0xff] (!%p330_p9)   ;;  %v1074_v13 = vld [vmem:[%s338_s14 + $0x10] sm:$0xff] (!%p330_p9)   ;;  %v1075_v18 = vld [vmem:[%s338_s14 + $0x8] sm:$0xff] (!%p330_p9)  }
  0x27   : > { %984 = vmatprep.mubr.bf16.mxu0 (!%p330_p9), %v1073_v12  ;;  %988 = vmatprep.mubr.bf16.mxu1 (!%p330_p9), %v1074_v13  ;;  %v1076_v19 = vld [vmem:[%s338_s14 + $0x18] sm:$0xff] (!%p330_p9)  }
  0x29   : > { %s1328_s16 = smov (!%p390_p10, %s896_s16), 79  ;;  %s1330_s17 = smov (!%p405_p11, %s898_s17), 15 }
  0x2a   : > { %s897_s27 = sshll.u32 %s1328_s16, 2  ;;  %s899_s8 = sshll.u32 %s1330_s17, 2  ;;  %vm588_vm0 = vcmask (!%p914_p12), 523264  }
  0x2b   : > { %s1231_s7 = scalar_lea.vmem %s1310_s1, %s897_s27  ;;  %s1236_s21 = scalar_lea.vmem %s1313_s4, %s899_s8 }
  0x2c   : > { %s1241_s13 = scalar_lea.vmem %s1314_s5, %s899_s8  ;;  %v1065_v8 = vld [vmem:[%s1231_s7] sm:$0xff]   ;;  %v1066_v9 = vld [vmem:[%s1231_s7 + $0x8] sm:$0xff]   ;;  %v1067_v10 = vld [vmem:[%s1231_s7 + $0x10] sm:$0xff]  }
  0x2d   : > { %968 = vmatprep.subr.bf16.mxu0 %v1065_v8  ;;  %992 = vmatprep.subr.bf16.mxu1 %v1065_v8  ;;  %v1068_v11 = vld [vmem:[%s1231_s7 + $0x18] sm:$0xff]   ;;  %v1069_v14 = vld [vmem:[%s1231_s7 + $0x20] sm:$0xff]   ;;  %v1070_v15 = vld [vmem:[%s1231_s7 + $0x28] sm:$0xff]  }
  0x2e   : > { %969 = vmatpush3.bf16.msra.mxu0 %v1065_v8  ;;  %1000 = vmatpush3.bf16.msra.mxu1 %v1065_v8  ;;  %v1071_v16 = vld [vmem:[%s1231_s7 + $0x30] sm:$0xff]   ;;  %v1072_v17 = vld [vmem:[%s1231_s7 + $0x38] sm:$0xff]  }
  0x2f   : > { %970 = vmatprep.subr.bf16.mxu0 %v1066_v9  ;;  %993 = vmatprep.subr.bf16.mxu1 %v1066_v9 }
  0x32   : > { %971 = vmatpush3.bf16.msra.mxu0 %v1066_v9  ;;  %1001 = vmatpush3.bf16.msra.mxu1 %v1066_v9 }
  0x33   : > { %972 = vmatprep.subr.bf16.mxu0 %v1067_v10  ;;  %994 = vmatprep.subr.bf16.mxu1 %v1067_v10 }
  0x36   : > { %973 = vmatpush3.bf16.msra.mxu0 %v1067_v10  ;;  %1002 = vmatpush3.bf16.msra.mxu1 %v1067_v10 }
  0x37   : > { %974 = vmatprep.subr.bf16.mxu0 %v1068_v11  ;;  %995 = vmatprep.subr.bf16.mxu1 %v1068_v11 }
  0x3a   : > { %975 = vmatpush3.bf16.msra.mxu0 %v1068_v11  ;;  %1003 = vmatpush3.bf16.msra.mxu1 %v1068_v11 }
  0x3b   : > { %976 = vmatprep.subr.bf16.mxu0 %v1069_v14  ;;  %996 = vmatprep.subr.bf16.mxu1 %v1069_v14 }
  0x3e   : > { %977 = vmatpush3.bf16.msra.mxu0 %v1069_v14  ;;  %1004 = vmatpush3.bf16.msra.mxu1 %v1069_v14 }
  0x3f   : > { %978 = vmatprep.subr.bf16.mxu0 %v1070_v15  ;;  %997 = vmatprep.subr.bf16.mxu1 %v1070_v15 }
  0x42   : > { %979 = vmatpush3.bf16.msra.mxu0 %v1070_v15  ;;  %1005 = vmatpush3.bf16.msra.mxu1 %v1070_v15 }
  0x43   : > { %980 = vmatprep.subr.bf16.mxu0 %v1071_v16  ;;  %998 = vmatprep.subr.bf16.mxu1 %v1071_v16 }
  0x46   : > { %981 = vmatpush3.bf16.msra.mxu0 %v1071_v16  ;;  %1006 = vmatpush3.bf16.msra.mxu1 %v1071_v16 }
  0x47   : > { %982 = vmatprep.subr.bf16.mxu0 %v1072_v17  ;;  %999 = vmatprep.subr.bf16.mxu1 %v1072_v17 }
  0x4a   : > { %983 = vmatpush3.bf16.msra.mxu0 %v1072_v17  ;;  %1007 = vmatpush3.bf16.msra.mxu1 %v1072_v17 }
  0x4d   : > { %985 = vmatmul.mubr.bf16.vlgmr.msra.gmra.mrb[0].mxu0 %v1075_v18  ;;  %989 = vmatmul.mubr.bf16.vlgmr.msra.gmra.mrb[0].mxu1 %v1076_v19 }
 0x11d   : > { %587 = sbr.rel (%p914_p12) target bundleno = 293 (0x125), region = 85 }
 0x120   : > { %v986_v20 = vpop.f32.mrb[0].mxu0  ;;  %v990_v21 = vpop.f32.mrb[0].mxu1 }
 0x121   : > { %v553_v22 = vpop.f32.mrb[1].mxu0  ;;  %v569_v23 = vpop.f32.mrb[1].mxu1  ;;  %591 = vst.msk [vmem:[#allocation2 + $0x10] sm:$0xff] (!%p914_p12), %vm588_vm0, %v986_v20  ;;  %595 = vst.msk [vmem:[#allocation2 + $0x30] sm:$0xff] (!%p914_p12), %vm588_vm0, %v990_v21 }
 0x122   : > { %v987_v24 = vpop.f32.mrb[2].mxu0  ;;  %v991_v25 = vpop.f32.mrb[2].mxu1  ;;  %589 = vst.msk [vmem:[#allocation2] sm:$0xff] (!%p914_p12), %vm588_vm0, %v553_v22  ;;  %593 = vst.msk [vmem:[#allocation2 + $0x20] sm:$0xff] (!%p914_p12), %vm588_vm0, %v569_v23 }
 0x123   : > { %v556_v26 = vpop.f32.mrb[3].mxu0  ;;  %v572_v27 = vpop.f32.mrb[3].mxu1  ;;  %592 = vst.msk [vmem:[#allocation2 + $0x18] sm:$0xff] (!%p914_p12), %vm588_vm0, %v987_v24  ;;  %596 = vst.msk [vmem:[#allocation2 + $0x38] sm:$0xff] (!%p914_p12), %vm588_vm0, %v991_v25 }
 0x124   : > { %590 = vst.msk [vmem:[#allocation2 + $0x8] sm:$0xff] %vm588_vm0, %v556_v26  ;;  %594 = vst.msk [vmem:[#allocation2 + $0x28] sm:$0xff] %vm588_vm0, %v572_v27 }
 0x125 PF: > { %p915_p13 = scmp.le.s32.totalorder %s1115_s20, 0 }
 0x126   : > { %vm617_vm1 = vcmask (!%p915_p13), 523264  }
 0x127   : > { %600 = sbr.rel (%p915_p13) target bundleno = 305 (0x131), region = 89 }
 0x129   : > { %v603_v30 = vld [vmem:[#allocation2 + $0x10] sm:$0xff] (!%p915_p13) }
 0x12a   : > { %v601_v28 = vld [vmem:[#allocation2] sm:$0xff] (!%p915_p13)  ;;  %v611_v33 = vadd.f32 (!%p915_p13), %v986_v20, %v603_v30  ;;  %v607_v40 = vld [vmem:[#allocation2 + $0x30] sm:$0xff] (!%p915_p13) }
 0x12b   : > { %v602_v29 = vld [vmem:[#allocation2 + $0x8] sm:$0xff] (!%p915_p13)  ;;  %v609_v31 = vadd.f32 (!%p915_p13), %v601_v28, %v553_v22  ;;  %v604_v34 = vld [vmem:[#allocation2 + $0x18] sm:$0xff] (!%p915_p13)  ;;  %v605_v35 = vld [vmem:[#allocation2 + $0x20] sm:$0xff] (!%p915_p13)  ;;  %v615_v42 = vadd.f32 (!%p915_p13), %v990_v21, %v607_v40 }
 0x12c   : > { %v610_v32 = vadd.f32 (!%p915_p13), %v602_v29, %v556_v26  ;;  %v606_v36 = vld [vmem:[#allocation2 + $0x28] sm:$0xff] (!%p915_p13)  ;;  %v612_v37 = vadd.f32 (!%p915_p13), %v987_v24, %v604_v34  ;;  %v613_v38 = vadd.f32 (!%p915_p13), %v605_v35, %v569_v23  ;;  %v608_v41 = vld [vmem:[#allocation2 + $0x38] sm:$0xff] (!%p915_p13)  ;;  %620 = vst.msk [vmem:[#allocation2 + $0x10] sm:$0xff] (!%p915_p13), %vm617_vm1, %v611_v33 }
 0x12d   : > { %v614_v39 = vadd.f32 (!%p915_p13), %v606_v36, %v572_v27  ;;  %618 = vst.msk [vmem:[#allocation2] sm:$0xff] (!%p915_p13), %vm617_vm1, %v609_v31  ;;  %v616_v43 = vadd.f32 (!%p915_p13), %v991_v25, %v608_v41  ;;  %624 = vst.msk [vmem:[#allocation2 + $0x30] sm:$0xff] (!%p915_p13), %vm617_vm1, %v615_v42 }
 0x12e   : > { %619 = vst.msk [vmem:[#allocation2 + $0x8] sm:$0xff] %vm617_vm1, %v610_v32  ;;  %621 = vst.msk [vmem:[#allocation2 + $0x18] sm:$0xff] %vm617_vm1, %v612_v37 }
 0x12f   : > { %622 = vst.msk [vmem:[#allocation2 + $0x20] sm:$0xff] %vm617_vm1, %v613_v38  ;;  %623 = vst.msk [vmem:[#allocation2 + $0x28] sm:$0xff] %vm617_vm1, %v614_v39 }
 0x130   : > { %625 = vst.msk [vmem:[#allocation2 + $0x38] sm:$0xff] %vm617_vm1, %v616_v43 }
 0x131 PF: > { %p916_p0 = scmp.ne.s32.totalorder %s1115_s20, 4 }
 0x132   : > { %v917_v45 = vld [vmem:[%s1311_s2] ss:$0 sm:$0xff] (!%p916_p0)  ;;  %vm732_vm2 = vcmask (!%p916_p0), 519168   ;;  %v953_v55 = vld [vmem:[%s1236_s21 + $0x8] sm:$0xff] (!%p916_p0)   ;;  %v954_v62 = vld [vmem:[%s1236_s21 + $0x10] sm:$0xff] (!%p916_p0)  }
 0x133   : > { %629 = sbr.rel (%p916_p0) target bundleno = 325 (0x145), region = 93  ;;  %v918_v46 = vld [vmem:[%s1312_s3] ss:$0 sm:$0xff] (!%p916_p0)  ;;  %v943_v59 = vunpack.c.l.bf16 (!%p916_p0), %v953_v55  ;;  %v944_v61 = vunpack.c.h.bf16 (!%p916_p0), %v953_v55  ;;  %v947_v4 = vunpack.c.l.bf16 (!%p916_p0), %v954_v62  ;;  %v955_v5 = vld [vmem:[%s1236_s21 + $0x18] sm:$0xff] (!%p916_p0)   ;;  %v948_v9 = vunpack.c.h.bf16 (!%p916_p0), %v954_v62 }
 0x134   : > { %v938_v48 = vld [vmem:[%s1236_s21] sm:$0xff] (!%p916_p0)   ;;  %v951_v18 = vunpack.c.l.bf16 (!%p916_p0), %v955_v5  ;;  %v952_v34 = vunpack.c.h.bf16 (!%p916_p0), %v955_v5 }
 0x135   : > { %v939_v51 = vunpack.c.l.bf16 (!%p916_p0), %v938_v48  ;;  %v940_v53 = vunpack.c.h.bf16 (!%p916_p0), %v938_v48 }
 0x136   : > { %v632_v50 = vld [vmem:[#allocation2 + $0x10] sm:$0xff] (!%p916_p0)  ;;  %v634_v57 = vld [vmem:[#allocation2 + $0x20] sm:$0xff] (!%p916_p0)  ;;  %v635_v63 = vld [vmem:[#allocation2 + $0x28] sm:$0xff] (!%p916_p0) }
 0x137   : > { %v630_v44 = vld [vmem:[#allocation2] sm:$0xff] (!%p916_p0)  ;;  %v647_v54 = vmul.f32 (!%p916_p0), %v917_v45, %v632_v50  ;;  %v636_v0 = vld [vmem:[#allocation2 + $0x30] sm:$0xff] (!%p916_p0)  ;;  %v649_v3 = vmul.f32 (!%p916_p0), %v917_v45, %v634_v57  ;;  %v650_v8 = vmul.f32 (!%p916_p0), %v917_v45, %v635_v63  ;;  %v637_v14 = vld [vmem:[#allocation2 + $0x38] sm:$0xff] (!%p916_p0) }
 0x138   : > { %v645_v47 = vmul.f32 (!%p916_p0), %v917_v45, %v630_v44  ;;  %v631_v49 = vld [vmem:[#allocation2 + $0x8] sm:$0xff] (!%p916_p0)  ;;  %v633_v56 = vld [vmem:[#allocation2 + $0x18] sm:$0xff] (!%p916_p0)  ;;  %v651_v13 = vmul.f32 (!%p916_p0), %v917_v45, %v636_v0  ;;  %v652_v26 = vmul.f32 (!%p916_p0), %v917_v45, %v637_v14 }
 0x139   : > { %v646_v52 = vmul.f32 (!%p916_p0), %v917_v45, %v631_v49  ;;  %v648_v60 = vmul.f32 (!%p916_p0), %v917_v45, %v633_v56  ;;  %v662_v2 = vadd.f32 (!%p916_p0), %v918_v46, %v647_v54  ;;  %v664_v12 = vadd.f32 (!%p916_p0), %v918_v46, %v649_v3 }
 0x13a   : > { %v660_v58 = vadd.f32 %v918_v46, %v645_v47  ;;  %v665_v17 = vadd.f32 %v918_v46, %v650_v8  ;;  %v666_v22 = vadd.f32 %v918_v46, %v651_v13  ;;  %v667_v33 = vadd.f32 %v918_v46, %v652_v26 }
 0x13b   : > { %v661_v1 = vadd.f32 %v918_v46, %v646_v52  ;;  %v663_v7 = vadd.f32 %v918_v46, %v648_v60  ;;  %v686_v11 = vadd.f32 %v943_v59, %v662_v2  ;;  %v688_v21 = vadd.f32 %v947_v4, %v664_v12 }
 0x13c   : > { %v684_v6 = vadd.f32 %v939_v51, %v660_v58  ;;  %v689_v25 = vadd.f32 %v948_v9, %v665_v17  ;;  %v690_v30 = vadd.f32 %v951_v18, %v666_v22  ;;  %v691_v38 = vadd.f32 %v952_v34, %v667_v33 }
 0x13d   : > { %v685_v10 = vadd.f32 %v940_v53, %v661_v1  ;;  %v687_v16 = vadd.f32 %v944_v61, %v663_v7  ;;  %v694_v20 = vmax.f32 %v686_v11, 0.0  ;;  %v696_v29 = vmax.f32 %v688_v21, 0.0 }
 0x13e   : > { %v692_v15 = vmax.f32 %v684_v6, 0.0  ;;  %v697_v32 = vmax.f32 %v689_v25, 0.0  ;;  %v698_v36 = vmax.f32 %v690_v30, 0.0  ;;  %v699_v40 = vmax.f32 %v691_v38, 0.0 }
 0x13f   : > { %v693_v19 = vmax.f32 %v685_v10, 0.0  ;;  %v695_v24 = vmax.f32 %v687_v16, 0.0  ;;  %v931_v28 = vpack.c.bf16 %v694_v20, %v694_v20  ;;  %v933_v35 = vpack.c.bf16 %v696_v29, %v696_v29 }
 0x140   : > { %v929_v23 = vpack.c.bf16 %v692_v15, %v692_v15  ;;  %v934_v37 = vpack.c.bf16 %v697_v32, %v697_v32  ;;  %v935_v39 = vpack.c.bf16 %v698_v36, %v698_v36  ;;  %v936_v41 = vpack.c.bf16 %v699_v40, %v699_v40 }
 0x141   : > { %v930_v27 = vpack.c.bf16 %v693_v19, %v693_v19  ;;  %v932_v31 = vpack.c.bf16 %v695_v24, %v695_v24  ;;  %735 = vst.msk [vmem:[%s1241_s13 + $0x8] sm:$0xf] %vm732_vm2, %v931_v28  ;;  %737 = vst.msk [vmem:[%s1241_s13 + $0x10] sm:$0xf] %vm732_vm2, %v933_v35 }
 0x142   : > { %733 = vst.msk [vmem:[%s1241_s13] sm:$0xf] %vm732_vm2, %v929_v23  ;;  %738 = vst.msk [vmem:[%s1241_s13 + $0x14] sm:$0xf] %vm732_vm2, %v934_v37 }
 0x143   : > { %734 = vst.msk [vmem:[%s1241_s13 + $0x4] sm:$0xf] %vm732_vm2, %v930_v27  ;;  %736 = vst.msk [vmem:[%s1241_s13 + $0xc] sm:$0xf] %vm732_vm2, %v932_v31 }
 0x144   : > { %739 = vst.msk [vmem:[%s1241_s13 + $0x18] sm:$0xf] %vm732_vm2, %v935_v39  ;;  %740 = vst.msk [vmem:[%s1241_s13 + $0x1c] sm:$0xf] %vm732_vm2, %v936_v41 }
 0x145 PF: > { %s15_s24 = sadd.s32 1, %s1131_s24   ;;  %s1315_s18 = smov %s1111_s19 }
 0x146   : > { %p12_p1 = scmp.ge.s32.totalorder %s15_s24, 12   ;;  %s1316_s19 = smov %s1214_s6 }
 0x147   : > { %s1317_s20 = smov %s1123_s22  ;;  %s1318_s21 = smov %s1127_s23 }
 0x148   : > { %s1319_s22 = smov %s1322_s25  ;;  %s1320_s23 = smov %s1326_s26 }
 0x149   :  { %14 = sbr.rel (!%p12_p1) target bundleno = 4 (0x4), region = 140 }

// kernel: resnet34_8s_fuse_forward.83
= control target key start
LH: loop header
LB: loop body
LE: loop exit
PB: predicated region body
PF: predicated region fallthrough
CT: control target
= control target key end

     0   :  { %s853_s15 = smov 0   ;;  %s855_s16 = smov 0   ;;  %s957_s0 = inlined_call_operand.vmem [shape: bf16[32,640], index: 0, kind: input, shape index: {}]   ;;  %s958_s1 = inlined_call_operand.vmem [shape: bf16[640,128], index: 1, kind: input, shape index: {}]   ;;  %s959_s2 = inlined_call_operand.vmem [shape: f32[1,128], index: 2, kind: input, shape index: {}]   ;;  %s960_s3 = inlined_call_operand.vmem [shape: f32[1,128], index: 3, kind: input, shape index: {}]   ;;  %s961_s4 = inlined_call_operand.vmem [shape: bf16[32,128], index: 4, kind: output, shape index: {}]  }
   0x1   :  { %s857_s17 = smov 0   ;;  %s859_s18 = smov 0  }
   0x2   :  { %s861_s19 = smov 0   ;;  %s863_s20 = smov 0  }
   0x3   :  { %s865_s21 = smov 0  }
   0x4 LB: > { %s26_s22 = sadd.s32 1, %s816_s19  ;;  %s33_s23 = sadd.s32 1, %s820_s20  ;;  %s824_s21 = sphi %s865_s21, %s14_s21   ;;  %s820_s20 = sphi %s863_s20, %s967_s20   ;;  %s816_s19 = sphi %s861_s19, %s966_s19   ;;  %s812_s18 = sphi %s859_s18, %s965_s18   ;;  %s808_s17 = sphi %s857_s17, %s964_s17   ;;  %s804_s16 = sphi %s855_s16, %s963_s16   ;;  %s800_s15 = sphi %s853_s15, %s962_s15  }
   0x5   : > { %p27_p0 = scmp.ge.s32.totalorder %s26_s22, 5  ;;  %p49_p1 = scmp.ne.s32.totalorder %s804_s16, %s800_s15 }
   0x6   : > { %p50_p2 = scmp.eq.s32.totalorder %s824_s21, 0  ;;  %s42_s27 = sadd.s32 1, %s804_s16 }
   0x7   : > { %s969_s22 = smov (%p27_p0, %s26_s22), 0  ;;  %s971_s23 = smov (!%p27_p0, %s33_s23), %s820_s20 }
   0x8   : > { %p51_p3 = por %p50_p2, %p49_p1  ;;  %p35_p4 = scmp.ge.s32.totalorder %s971_s23, 2 }
   0x9   : > { %s38_s24 = ssub.s32 %s816_s19, %s969_s22  ;;  %p637_p6 = scmp.ge.s32.totalorder %s824_s21, 10 }
   0xa   : > { %s973_s23 = smov (%p35_p4, %s971_s23), 0 }
   0xb   : > { %s37_s25 = ssub.s32 %s820_s20, %s973_s23  ;;  %195 = sbr.rel (%p637_p6) target bundleno = 26 (0x1a), region = 24 }
   0xc   : > { %s39_s26 = sor.u32 %s38_s24, %s37_s25 }
   0xd   : > { %p40_p5 = scmp.eq.s32.totalorder %s39_s26, 0 }
   0xf   : > { %s904_s28 = scalar_select %p40_p5, %s804_s16, %s42_s27  }
  0x12   : > { %198 = sbr.rel (!%p51_p3) target bundleno = 26 (0x1a), region = 28  ;;  %s200_s29 = sand.u32 (%p51_p3), 1, %s804_s16  }
  0x13   : > { %s702_s30 = smul.u32 (%p51_p3), 10, %s820_s20  ;;  %s638_s5 = sshll.u32 (%p51_p3), %s200_s29, 3 }
  0x14   : > { %s202_s11 = scalar_lea.vmem (%p51_p3), [#allocation3], %s638_s5 }
  0x15   : > { %s205_s6 = sadd.s32 (%p51_p3), %s816_s19, %s702_s30 }
  0x16   : > { %s641_s7 = sshll.u32 (%p51_p3), %s205_s6, 2 }
  0x17   : > { %s207_s10 = scalar_lea.vmem (%p51_p3), %s957_s0, %s641_s7 }
  0x18   : > { %v223_v0 = vld [vmem:[%s207_s10] sm:$0xf] (%p51_p3)  ;;  %v225_v1 = vld [vmem:[%s207_s10 + $0x14] sm:$0xf] (%p51_p3) }
  0x19   : > { %224 = vst [vmem:[%s202_s11] sm:$0xf] %v223_v0  ;;  %226 = vst [vmem:[%s202_s11 + $0x4] sm:$0xf] %v225_v1 }
  0x1a PF: > { %p642_p7 = scmp.ge.s32.totalorder %s824_s21, 1  ;;  %p264_p8 = scmp.lt.s32.totalorder %s824_s21, 11 }
  0x1c   : > { %p265_p9 = pnand %p642_p7, %p264_p8 }
  0x1d   : > { %s646_s12 = sshll.u32 (!%p265_p9), %s812_s18, 1  ;;  %s644_s13 = sshll.u32 (!%p265_p9), %s808_s17, 4  ;;  %v826_v2 = vmov (!%p265_p9), 0.0   ;;  %vm827_vm0 = vmmov (!%p265_p9), 0  }
  0x1e   : > { %268 = sbr.rel (%p265_p9) target bundleno = 313 (0x139), region = 73  ;;  %p330_p10 = scmp.lt.s32.totalorder (!%p265_p9), %s646_s12, 3  ;;  %682 = vmatprep.subr.bf16.mxu0 (!%p265_p9), %v826_v2  ;;  %698 = vmatprep.mubr.msk.bf16.mxu0 (!%p265_p9), %vm827_vm0, %v826_v2 }
  0x1f   : > { %p315_p11 = scmp.lt.s32.totalorder (!%p265_p9), %s644_s13, 79  ;;  %s271_s5 = sand.u32 (!%p265_p9), 1, %s800_s15  }
  0x20   : > { %s643_s6 = sshll.u32 (!%p265_p9), %s271_s5, 3  ;;  %p657_p12 = scmp.ne.s32.totalorder (!%p265_p9), %s808_s17, 0 }
  0x21   : > { %s273_s7 = scalar_lea.vmem (!%p265_p9), [#allocation3], %s643_s6 }
  0x22   : > { %v769_v11 = vld [vmem:[%s273_s7] sm:$0xff] (!%p265_p9)  }
  0x25   : > { %s975_s12 = smov (!%p330_p10, %s646_s12), 3  ;;  %s977_s13 = smov (!%p315_p11, %s644_s13), 79 }
  0x26   : > { %s647_s14 = sshll.u32 %s975_s12, 2  ;;  %s645_s27 = sshll.u32 %s977_s13, 2 }
  0x27   : > { %s920_s26 = scalar_lea.vmem %s961_s4, %s647_s14  ;;  %s321_s18 = scalar_lea.vmem %s958_s1, %s645_s27 }
  0x28   : > { %v761_v3 = vld [vmem:[%s321_s18] sm:$0xff]   ;;  %v762_v4 = vld [vmem:[%s321_s18 + $0x8] sm:$0xff]   ;;  %v763_v5 = vld [vmem:[%s321_s18 + $0x10] sm:$0xff]  }
  0x29   : > { %683 = vmatpush3.bf16.msra.mxu0 %v761_v3  ;;  %v764_v6 = vld [vmem:[%s321_s18 + $0x18] sm:$0xff]   ;;  %v765_v7 = vld [vmem:[%s321_s18 + $0x20] sm:$0xff]   ;;  %v766_v8 = vld [vmem:[%s321_s18 + $0x28] sm:$0xff]  }
  0x2a   : > { %684 = vmatprep.subr.bf16.mxu0 %v826_v2  ;;  %v767_v9 = vld [vmem:[%s321_s18 + $0x30] sm:$0xff]   ;;  %v768_v10 = vld [vmem:[%s321_s18 + $0x38] sm:$0xff]  }
  0x2d   : > { %685 = vmatpush3.bf16.msra.mxu0 %v762_v4 }
  0x2e   : > { %686 = vmatprep.subr.bf16.mxu0 %v826_v2 }
  0x31   : > { %687 = vmatpush3.bf16.msra.mxu0 %v763_v5 }
  0x32   : > { %688 = vmatprep.subr.bf16.mxu0 %v826_v2 }
  0x35   : > { %689 = vmatpush3.bf16.msra.mxu0 %v764_v6 }
  0x36   : > { %690 = vmatprep.subr.bf16.mxu0 %v826_v2 }
  0x39   : > { %691 = vmatpush3.bf16.msra.mxu0 %v765_v7 }
  0x3a   : > { %692 = vmatprep.subr.bf16.mxu0 %v826_v2 }
  0x3d   : > { %693 = vmatpush3.bf16.msra.mxu0 %v766_v8 }
  0x3e   : > { %694 = vmatprep.subr.bf16.mxu0 %v826_v2 }
  0x41   : > { %695 = vmatpush3.bf16.msra.mxu0 %v767_v9 }
  0x42   : > { %696 = vmatprep.subr.bf16.mxu0 %v826_v2 }
  0x45   : > { %697 = vmatpush3.bf16.msra.mxu0 %v768_v10 }
  0x48   : > { %699 = vmatmul.mubr.bf16.vlgmr.msra.gmra.mrb[0].mxu0 %v769_v11 }
 0x118   : > { %455 = sbr.rel (%p657_p12) target bundleno = 287 (0x11f), region = 81 }
 0x11b   : > { %v445_v12 = vpop.f32.mrb[0].mxu0 }
 0x11c   : > { %v700_v13 = vpop.f32.mrb[1].mxu0  ;;  %456 = vst [vmem:[#allocation2] sm:$0xff] (!%p657_p12), %v445_v12 }
 0x11d   : > { %v448_v14 = vpop.f32.mrb[2].mxu0 }
 0x11e   : > { %v701_v15 = vpop.f32.mrb[3].mxu0  ;;  %457 = vst [vmem:[#allocation2 + $0x8] sm:$0xff] (!%p657_p12), %v448_v14 }
 0x11f PF: > { %p658_p13 = scmp.le.s32.totalorder %s808_s17, 0 }
 0x121   : > { %461 = sbr.rel (%p658_p13) target bundleno = 297 (0x129), region = 85 }
 0x123   : > { %v462_v16 = vld [vmem:[#allocation2] sm:$0xff] (!%p658_p13) }
 0x124   : > { %v464_v18 = vadd.f32 (!%p658_p13), %v462_v16, %v445_v12 }
 0x125   : > { %v463_v17 = vld [vmem:[#allocation2 + $0x8] sm:$0xff] (!%p658_p13) }
 0x126   : > { %v465_v19 = vadd.f32 (!%p658_p13), %v463_v17, %v448_v14  ;;  %466 = vst [vmem:[#allocation2] sm:$0xff] (!%p658_p13), %v464_v18 }
 0x128   : > { %467 = vst [vmem:[#allocation2 + $0x8] sm:$0xff] %v465_v19 }
 0x129 PF: > { %p659_p0 = scmp.ne.s32.totalorder %s808_s17, 4 }
 0x12a   : > { %v660_v22 = vld [vmem:[%s959_s2] ss:$0 sm:$0xff] (!%p659_p0) }
 0x12b   : > { %471 = sbr.rel (%p659_p0) target bundleno = 313 (0x139), region = 89  ;;  %v661_v25 = vld [vmem:[%s960_s3] ss:$0 sm:$0xff] (!%p659_p0) }
 0x12e   : > { %v472_v20 = vld [vmem:[#allocation2] sm:$0xff] (!%p659_p0) }
 0x12f   : > { %v473_v21 = vld [vmem:[#allocation2 + $0x8] sm:$0xff] (!%p659_p0)  ;;  %v481_v23 = vmul.f32 (!%p659_p0), %v660_v22, %v472_v20 }
 0x130   : > { %v482_v24 = vmul.f32 (!%p659_p0), %v660_v22, %v473_v21 }
 0x131   : > { %v490_v26 = vadd.f32 (!%p659_p0), %v661_v25, %v481_v23 }
 0x132   : > { %v491_v27 = vadd.f32 %v661_v25, %v482_v24 }
 0x133   : > { %v492_v28 = vmax.f32 %v490_v26, 0.0 }
 0x134   : > { %v493_v29 = vmax.f32 %v491_v27, 0.0 }
 0x136   : > { %v671_v30 = vpack.c.bf16 %v493_v29, %v492_v28 }
 0x138   : > { %672 = vst [vmem:[%s920_s26] sm:$0xff] %v671_v30  }
 0x139 PF: > { %s14_s21 = sadd.s32 1, %s824_s21   ;;  %s962_s15 = smov %s804_s16 }
 0x13a   : > { %p11_p1 = scmp.ge.s32.totalorder %s14_s21, 12   ;;  %s963_s16 = smov %s904_s28 }
 0x13b   : > { %s964_s17 = smov %s816_s19  ;;  %s965_s18 = smov %s820_s20 }
 0x13c   : > { %s966_s19 = smov %s969_s22  ;;  %s967_s20 = smov %s973_s23 }
 0x13d   :  { %13 = sbr.rel (!%p11_p1) target bundleno = 4 (0x4), region = 133 }

// kernel: resnet34_8s_fuse_forward.82
= control target key start
LH: loop header
LB: loop body
LE: loop exit
PB: predicated region body
PF: predicated region fallthrough
CT: control target
= control target key end

     0   :  { %s735_s15 = smov 0   ;;  %s737_s16 = smov 0   ;;  %s805_s0 = inlined_call_operand.vmem [shape: bf16[32,128], index: 0, kind: input, shape index: {}]   ;;  %s806_s1 = inlined_call_operand.vmem [shape: bf16[128,128], index: 1, kind: input, shape index: {}]   ;;  %s807_s2 = inlined_call_operand.vmem [shape: f32[1,128], index: 2, kind: input, shape index: {}]   ;;  %s808_s3 = inlined_call_operand.vmem [shape: f32[1,128], index: 3, kind: input, shape index: {}]   ;;  %s809_s4 = inlined_call_operand.vmem [shape: bf16[32,128], index: 4, kind: output, shape index: {}]  }
   0x1   :  { %s739_s17 = smov 0  }
   0x2 LB: > { %s33_s18 = sadd.s32 1, %s702_s16  ;;  %p593_p0 = scmp.ge.s32.totalorder %s706_s17, 1  ;;  %s706_s17 = sphi %s739_s17, %s14_s17   ;;  %s702_s16 = sphi %s737_s16, %s811_s16   ;;  %s698_s15 = sphi %s735_s15, %s810_s15  }
   0x3   : > { %p35_p1 = scmp.ge.s32.totalorder %s33_s18, 2  ;;  %p221_p2 = scmp.lt.s32.totalorder %s706_s17, 3 }
   0x5   : > { %s813_s18 = smov (%p35_p1, %s33_s18), 0  ;;  %p222_p3 = pnand %p593_p0, %p221_p2 }
   0x6   : > { %v675_v0 = vld [vmem:[%s806_s1] sm:$0xff] (!%p222_p3)   ;;  %v708_v1 = vmov (!%p222_p3), 0.0   ;;  %v676_v2 = vld [vmem:[%s806_s1 + $0x8] sm:$0xff] (!%p222_p3)   ;;  %vm709_vm0 = vmmov (!%p222_p3), 0   ;;  %s594_s23 = sshll.u32 (!%p222_p3), %s698_s15, 1  ;;  %v677_v3 = vld [vmem:[%s806_s1 + $0x10] sm:$0xff] (!%p222_p3)  }
   0x7   : > { %225 = sbr.rel (%p222_p3) target bundleno = 260 (0x104), region = 36  ;;  %629 = vmatprep.subr.bf16.mxu0 (!%p222_p3), %v708_v1  ;;  %645 = vmatprep.mubr.msk.bf16.mxu0 (!%p222_p3), %vm709_vm0, %v708_v1  ;;  %p268_p4 = scmp.lt.s32.totalorder (!%p222_p3), %s594_s23, 3  ;;  %v678_v4 = vld [vmem:[%s806_s1 + $0x18] sm:$0xff] (!%p222_p3)   ;;  %v679_v5 = vld [vmem:[%s806_s1 + $0x20] sm:$0xff] (!%p222_p3)   ;;  %v680_v6 = vld [vmem:[%s806_s1 + $0x28] sm:$0xff] (!%p222_p3)  }
   0x8   : > { %630 = vmatpush3.bf16.msra.mxu0 (!%p222_p3), %v675_v0  ;;  %v681_v7 = vld [vmem:[%s806_s1 + $0x30] sm:$0xff] (!%p222_p3)   ;;  %v682_v8 = vld [vmem:[%s806_s1 + $0x38] sm:$0xff] (!%p222_p3)   ;;  %v607_v10 = vld [vmem:[%s807_s2] ss:$0 sm:$0xff] (!%p222_p3) }
   0x9   : > { %631 = vmatprep.subr.bf16.mxu0 (!%p222_p3), %v708_v1  ;;  %v608_v14 = vld [vmem:[%s808_s3] ss:$0 sm:$0xff] (!%p222_p3) }
   0xc   : > { %632 = vmatpush3.bf16.msra.mxu0 (!%p222_p3), %v676_v2 }
   0xd   : > { %633 = vmatprep.subr.bf16.mxu0 (!%p222_p3), %v708_v1 }
   0xe   : > { %s815_s23 = smov (!%p268_p4, %s594_s23), 3 }
   0xf   : > { %s595_s26 = sshll.u32 %s815_s23, 2 }
  0x10   : > { %s274_s29 = scalar_lea.vmem %s805_s0, %s595_s26  ;;  %634 = vmatpush3.bf16.msra.mxu0 %v677_v3  ;;  %s298_s24 = scalar_lea.vmem %s809_s4, %s595_s26 }
  0x11   : > { %635 = vmatprep.subr.bf16.mxu0 %v708_v1  ;;  %v683_v9 = vld [vmem:[%s274_s29] sm:$0xff]  }
  0x14   : > { %636 = vmatpush3.bf16.msra.mxu0 %v678_v4 }
  0x15   : > { %637 = vmatprep.subr.bf16.mxu0 %v708_v1 }
  0x18   : > { %638 = vmatpush3.bf16.msra.mxu0 %v679_v5 }
  0x19   : > { %639 = vmatprep.subr.bf16.mxu0 %v708_v1 }
  0x1c   : > { %640 = vmatpush3.bf16.msra.mxu0 %v680_v6 }
  0x1d   : > { %641 = vmatprep.subr.bf16.mxu0 %v708_v1 }
  0x20   : > { %642 = vmatpush3.bf16.msra.mxu0 %v681_v7 }
  0x21   : > { %643 = vmatprep.subr.bf16.mxu0 %v708_v1 }
  0x24   : > { %644 = vmatpush3.bf16.msra.mxu0 %v682_v8 }
  0x27   : > { %646 = vmatmul.mubr.bf16.vlgmr.msra.gmra.mrb[0].mxu0 %v683_v9 }
  0xfa   : > { %v407_v11 = vpop.f32.mrb[0].mxu0 }
  0xfb   : > { %v442_v12 = vmul.f32 %v607_v10, %v407_v11  ;;  %v647_v13 = vpop.f32.mrb[1].mxu0 }
  0xfc   : > { %v410_v15 = vpop.f32.mrb[2].mxu0 }
  0xfd   : > { %v443_v16 = vmul.f32 %v607_v10, %v410_v15  ;;  %v648_v17 = vpop.f32.mrb[3].mxu0  ;;  %v451_v18 = vadd.f32 %v608_v14, %v442_v12 }
  0xff   : > { %v452_v19 = vadd.f32 %v608_v14, %v443_v16 }
 0x101   : > { %v618_v20 = vpack.c.bf16 %v452_v19, %v451_v18 }
 0x103   : > { %619 = vst [vmem:[%s298_s24] sm:$0xff] %v618_v20  }
 0x104 PF: > { %s14_s17 = sadd.s32 1, %s706_s17   ;;  %s810_s15 = smov %s702_s16 }
 0x105   : > { %p11_p5 = scmp.ge.s32.totalorder %s14_s17, 4   ;;  %s811_s16 = smov %s813_s18 }
 0x107   :  { %13 = sbr.rel (!%p11_p5) target bundleno = 2 (0x2), region = 87 }

// kernel: resnet34_8s_fuse_forward.84
= control target key start
LH: loop header
LB: loop body
LE: loop exit
PB: predicated region body
PF: predicated region fallthrough
CT: control target
= control target key end

     0   :  { %s945_s18 = smov 0   ;;  %s947_s19 = smov 0   ;;  %s1055_s0 = inlined_call_operand.vmem [shape: bf16[32,1152], index: 0, kind: input, shape index: {}]   ;;  %s1056_s1 = inlined_call_operand.vmem [shape: bf16[1152,128], index: 1, kind: input, shape index: {}]   ;;  %s1057_s2 = inlined_call_operand.vmem [shape: f32[1,128], index: 2, kind: input, shape index: {}]   ;;  %s1058_s3 = inlined_call_operand.vmem [shape: f32[1,128], index: 3, kind: input, shape index: {}]   ;;  %s1059_s4 = inlined_call_operand.vmem [shape: bf16[32,128], index: 4, kind: input, shape index: {}]   ;;  %s1060_s5 = inlined_call_operand.vmem [shape: bf16[32,128], index: 5, kind: output, shape index: {}]  }
   0x1   :  { %s949_s20 = smov 0   ;;  %s951_s21 = smov 0  }
   0x2   :  { %s953_s22 = smov 0   ;;  %s955_s23 = smov 0  }
   0x3   :  { %s957_s24 = smov 0  }
   0x4 LB: > { %s27_s25 = sadd.s32 1, %s903_s22  ;;  %s34_s26 = sadd.s32 1, %s907_s23  ;;  %s911_s24 = sphi %s957_s24, %s15_s24   ;;  %s907_s23 = sphi %s955_s23, %s1066_s23   ;;  %s903_s22 = sphi %s953_s22, %s1065_s22   ;;  %s899_s21 = sphi %s951_s21, %s1064_s21   ;;  %s895_s20 = sphi %s949_s20, %s1063_s20   ;;  %s891_s19 = sphi %s947_s19, %s1062_s19   ;;  %s887_s18 = sphi %s945_s18, %s1061_s18  }
   0x5   : > { %p28_p0 = scmp.ge.s32.totalorder %s27_s25, 9  ;;  %p50_p1 = scmp.ne.s32.totalorder %s891_s19, %s887_s18 }
   0x6   : > { %p51_p2 = scmp.eq.s32.totalorder %s911_s24, 0  ;;  %s43_s30 = sadd.s32 1, %s891_s19 }
   0x7   : > { %s1068_s25 = smov (%p28_p0, %s27_s25), 0  ;;  %s1070_s26 = smov (!%p28_p0, %s34_s26), %s907_s23 }
   0x8   : > { %p52_p3 = por %p51_p2, %p50_p1  ;;  %p36_p4 = scmp.ge.s32.totalorder %s1070_s26, 2 }
   0x9   : > { %s39_s27 = ssub.s32 %s903_s22, %s1068_s25  ;;  %p718_p6 = scmp.ge.s32.totalorder %s911_s24, 18 }
   0xa   : > { %s1072_s26 = smov (%p36_p4, %s1070_s26), 0 }
   0xb   : > { %s38_s28 = ssub.s32 %s907_s23, %s1072_s26  ;;  %224 = sbr.rel (%p718_p6) target bundleno = 26 (0x1a), region = 24 }
   0xc   : > { %s40_s29 = sor.u32 %s39_s27, %s38_s28 }
   0xd   : > { %p41_p5 = scmp.eq.s32.totalorder %s40_s29, 0 }
   0xf   : > { %s996_s6 = scalar_select %p41_p5, %s891_s19, %s43_s30  }
  0x12   : > { %227 = sbr.rel (!%p52_p3) target bundleno = 26 (0x1a), region = 28  ;;  %s229_s7 = sand.u32 (%p52_p3), 1, %s891_s19  }
  0x13   : > { %s789_s8 = smul.u32 (%p52_p3), 18, %s907_s23  ;;  %s719_s9 = sshll.u32 (%p52_p3), %s229_s7, 3 }
  0x14   : > { %s231_s15 = scalar_lea.vmem (%p52_p3), [#allocation3], %s719_s9 }
  0x15   : > { %s234_s10 = sadd.s32 (%p52_p3), %s903_s22, %s789_s8 }
  0x16   : > { %s722_s11 = sshll.u32 (%p52_p3), %s234_s10, 2 }
  0x17   : > { %s236_s14 = scalar_lea.vmem (%p52_p3), %s1055_s0, %s722_s11 }
  0x18   : > { %v252_v0 = vld [vmem:[%s236_s14] sm:$0xf] (%p52_p3)  ;;  %v254_v1 = vld [vmem:[%s236_s14 + $0x24] sm:$0xf] (%p52_p3) }
  0x19   : > { %253 = vst [vmem:[%s231_s15] sm:$0xf] %v252_v0  ;;  %255 = vst [vmem:[%s231_s15 + $0x4] sm:$0xf] %v254_v1 }
  0x1a PF: > { %p723_p7 = scmp.ge.s32.totalorder %s911_s24, 1  ;;  %p305_p8 = scmp.lt.s32.totalorder %s911_s24, 19 }
  0x1c   : > { %p306_p9 = pnand %p723_p7, %p305_p8 }
  0x1d   : > { %s727_s16 = sshll.u32 (!%p306_p9), %s899_s21, 1  ;;  %s725_s17 = sshll.u32 (!%p306_p9), %s895_s20, 4  ;;  %v913_v2 = vmov (!%p306_p9), 0.0   ;;  %vm914_vm0 = vmmov (!%p306_p9), 0  }
  0x1e   : > { %309 = sbr.rel (%p306_p9) target bundleno = 316 (0x13c), region = 77  ;;  %p381_p10 = scmp.lt.s32.totalorder (!%p306_p9), %s727_s16, 3  ;;  %769 = vmatprep.subr.bf16.mxu0 (!%p306_p9), %v913_v2  ;;  %785 = vmatprep.mubr.msk.bf16.mxu0 (!%p306_p9), %vm914_vm0, %v913_v2 }
  0x1f   : > { %p366_p11 = scmp.lt.s32.totalorder (!%p306_p9), %s725_s17, 143  ;;  %s312_s27 = sand.u32 (!%p306_p9), 1, %s887_s18  }
  0x20   : > { %s724_s29 = sshll.u32 (!%p306_p9), %s312_s27, 3  ;;  %p740_p12 = scmp.ne.s32.totalorder (!%p306_p9), %s895_s20, 0 }
  0x21   : > { %s314_s18 = scalar_lea.vmem (!%p306_p9), [#allocation3], %s724_s29 }
  0x22   : > { %v856_v11 = vld [vmem:[%s314_s18] sm:$0xff] (!%p306_p9)  }
  0x25   : > { %s1074_s16 = smov (!%p381_p10, %s727_s16), 3  ;;  %s1076_s17 = smov (!%p366_p11, %s725_s17), 143 }
  0x26   : > { %s728_s28 = sshll.u32 %s1074_s16, 2  ;;  %s726_s11 = sshll.u32 %s1076_s17, 2 }
  0x27   : > { %s1013_s8 = scalar_lea.vmem %s1059_s4, %s728_s28  ;;  %s1018_s21 = scalar_lea.vmem %s1060_s5, %s728_s28 }
  0x28   : > { %s372_s14 = scalar_lea.vmem %s1056_s1, %s726_s11 }
  0x29   : > { %v848_v3 = vld [vmem:[%s372_s14] sm:$0xff]   ;;  %v849_v4 = vld [vmem:[%s372_s14 + $0x8] sm:$0xff]   ;;  %v850_v5 = vld [vmem:[%s372_s14 + $0x10] sm:$0xff]  }
  0x2a   : > { %770 = vmatpush3.bf16.msra.mxu0 %v848_v3  ;;  %v851_v6 = vld [vmem:[%s372_s14 + $0x18] sm:$0xff]   ;;  %v852_v7 = vld [vmem:[%s372_s14 + $0x20] sm:$0xff]   ;;  %v853_v8 = vld [vmem:[%s372_s14 + $0x28] sm:$0xff]  }
  0x2b   : > { %771 = vmatprep.subr.bf16.mxu0 %v913_v2  ;;  %v854_v9 = vld [vmem:[%s372_s14 + $0x30] sm:$0xff]   ;;  %v855_v10 = vld [vmem:[%s372_s14 + $0x38] sm:$0xff]  }
  0x2e   : > { %772 = vmatpush3.bf16.msra.mxu0 %v849_v4 }
  0x2f   : > { %773 = vmatprep.subr.bf16.mxu0 %v913_v2 }
  0x32   : > { %774 = vmatpush3.bf16.msra.mxu0 %v850_v5 }
  0x33   : > { %775 = vmatprep.subr.bf16.mxu0 %v913_v2 }
  0x36   : > { %776 = vmatpush3.bf16.msra.mxu0 %v851_v6 }
  0x37   : > { %777 = vmatprep.subr.bf16.mxu0 %v913_v2 }
  0x3a   : > { %778 = vmatpush3.bf16.msra.mxu0 %v852_v7 }
  0x3b   : > { %779 = vmatprep.subr.bf16.mxu0 %v913_v2 }
  0x3e   : > { %780 = vmatpush3.bf16.msra.mxu0 %v853_v8 }
  0x3f   : > { %781 = vmatprep.subr.bf16.mxu0 %v913_v2 }
  0x42   : > { %782 = vmatpush3.bf16.msra.mxu0 %v854_v9 }
  0x43   : > { %783 = vmatprep.subr.bf16.mxu0 %v913_v2 }
  0x46   : > { %784 = vmatpush3.bf16.msra.mxu0 %v855_v10 }
  0x49   : > { %786 = vmatmul.mubr.bf16.vlgmr.msra.gmra.mrb[0].mxu0 %v856_v11 }
 0x119   : > { %515 = sbr.rel (%p740_p12) target bundleno = 288 (0x120), region = 85 }
 0x11c   : > { %v505_v12 = vpop.f32.mrb[0].mxu0 }
 0x11d   : > { %v787_v13 = vpop.f32.mrb[1].mxu0  ;;  %516 = vst [vmem:[#allocation2] sm:$0xff] (!%p740_p12), %v505_v12 }
 0x11e   : > { %v508_v14 = vpop.f32.mrb[2].mxu0 }
 0x11f   : > { %v788_v15 = vpop.f32.mrb[3].mxu0  ;;  %517 = vst [vmem:[#allocation2 + $0x8] sm:$0xff] (!%p740_p12), %v508_v14 }
 0x120 PF: > { %p741_p13 = scmp.le.s32.totalorder %s895_s20, 0 }
 0x122   : > { %521 = sbr.rel (%p741_p13) target bundleno = 298 (0x12a), region = 89 }
 0x124   : > { %v522_v16 = vld [vmem:[#allocation2] sm:$0xff] (!%p741_p13) }
 0x125   : > { %v524_v18 = vadd.f32 (!%p741_p13), %v522_v16, %v505_v12 }
 0x126   : > { %v523_v17 = vld [vmem:[#allocation2 + $0x8] sm:$0xff] (!%p741_p13) }
 0x127   : > { %v525_v19 = vadd.f32 (!%p741_p13), %v523_v17, %v508_v14  ;;  %526 = vst [vmem:[#allocation2] sm:$0xff] (!%p741_p13), %v524_v18 }
 0x129   : > { %527 = vst [vmem:[#allocation2 + $0x8] sm:$0xff] %v525_v19 }
 0x12a PF: > { %p742_p0 = scmp.ne.s32.totalorder %s895_s20, 8 }
 0x12b   : > { %v743_v22 = vld [vmem:[%s1057_s2] ss:$0 sm:$0xff] (!%p742_p0) }
 0x12c   : > { %531 = sbr.rel (%p742_p0) target bundleno = 316 (0x13c), region = 93  ;;  %v744_v25 = vld [vmem:[%s1058_s3] ss:$0 sm:$0xff] (!%p742_p0) }
 0x12d   : > { %v752_v26 = vld [vmem:[%s1013_s8] sm:$0xff] (!%p742_p0)  }
 0x12e   : > { %v753_v27 = vunpack.c.l.bf16 (!%p742_p0), %v752_v26  ;;  %v754_v28 = vunpack.c.h.bf16 (!%p742_p0), %v752_v26 }
 0x12f   : > { %v532_v20 = vld [vmem:[#allocation2] sm:$0xff] (!%p742_p0) }
 0x130   : > { %v533_v21 = vld [vmem:[#allocation2 + $0x8] sm:$0xff] (!%p742_p0)  ;;  %v541_v23 = vmul.f32 (!%p742_p0), %v743_v22, %v532_v20 }
 0x131   : > { %v542_v24 = vmul.f32 (!%p742_p0), %v743_v22, %v533_v21 }
 0x132   : > { %v550_v29 = vadd.f32 (!%p742_p0), %v744_v25, %v541_v23 }
 0x133   : > { %v551_v30 = vadd.f32 %v744_v25, %v542_v24 }
 0x134   : > { %v556_v31 = vadd.f32 %v753_v27, %v550_v29 }
 0x135   : > { %v557_v32 = vadd.f32 %v754_v28, %v551_v30 }
 0x136   : > { %v558_v33 = vmax.f32 %v556_v31, 0.0 }
 0x137   : > { %v559_v34 = vmax.f32 %v557_v32, 0.0 }
 0x139   : > { %v758_v35 = vpack.c.bf16 %v559_v34, %v558_v33 }
 0x13b   : > { %759 = vst [vmem:[%s1018_s21] sm:$0xff] %v758_v35  }
 0x13c PF: > { %s15_s24 = sadd.s32 1, %s911_s24   ;;  %s1061_s18 = smov %s891_s19 }
 0x13d   : > { %p12_p1 = scmp.ge.s32.totalorder %s15_s24, 20   ;;  %s1062_s19 = smov %s996_s6 }
 0x13e   : > { %s1063_s20 = smov %s903_s22  ;;  %s1064_s21 = smov %s907_s23 }
 0x13f   : > { %s1065_s22 = smov %s1068_s25  ;;  %s1066_s23 = smov %s1072_s26 }
 0x140   :  { %14 = sbr.rel (!%p12_p1) target bundleno = 4 (0x4), region = 140 }

// kernel: resnet34_8s_fuse_forward.85
= control target key start
LH: loop header
LB: loop body
LE: loop exit
PB: predicated region body
PF: predicated region fallthrough
CT: control target
= control target key end

     0   :  { %s853_s15 = smov 0   ;;  %s855_s16 = smov 0   ;;  %s957_s0 = inlined_call_operand.vmem [shape: bf16[32,1152], index: 0, kind: input, shape index: {}]   ;;  %s958_s1 = inlined_call_operand.vmem [shape: bf16[1152,128], index: 1, kind: input, shape index: {}]   ;;  %s959_s2 = inlined_call_operand.vmem [shape: f32[1,128], index: 2, kind: input, shape index: {}]   ;;  %s960_s3 = inlined_call_operand.vmem [shape: f32[1,128], index: 3, kind: input, shape index: {}]   ;;  %s961_s4 = inlined_call_operand.vmem [shape: bf16[32,128], index: 4, kind: output, shape index: {}]  }
   0x1   :  { %s857_s17 = smov 0   ;;  %s859_s18 = smov 0  }
   0x2   :  { %s861_s19 = smov 0   ;;  %s863_s20 = smov 0  }
   0x3   :  { %s865_s21 = smov 0  }
   0x4 LB: > { %s26_s22 = sadd.s32 1, %s816_s19  ;;  %s33_s23 = sadd.s32 1, %s820_s20  ;;  %s824_s21 = sphi %s865_s21, %s14_s21   ;;  %s820_s20 = sphi %s863_s20, %s967_s20   ;;  %s816_s19 = sphi %s861_s19, %s966_s19   ;;  %s812_s18 = sphi %s859_s18, %s965_s18   ;;  %s808_s17 = sphi %s857_s17, %s964_s17   ;;  %s804_s16 = sphi %s855_s16, %s963_s16   ;;  %s800_s15 = sphi %s853_s15, %s962_s15  }
   0x5   : > { %p27_p0 = scmp.ge.s32.totalorder %s26_s22, 9  ;;  %p49_p1 = scmp.ne.s32.totalorder %s804_s16, %s800_s15 }
   0x6   : > { %p50_p2 = scmp.eq.s32.totalorder %s824_s21, 0  ;;  %s42_s27 = sadd.s32 1, %s804_s16 }
   0x7   : > { %s969_s22 = smov (%p27_p0, %s26_s22), 0  ;;  %s971_s23 = smov (!%p27_p0, %s33_s23), %s820_s20 }
   0x8   : > { %p51_p3 = por %p50_p2, %p49_p1  ;;  %p35_p4 = scmp.ge.s32.totalorder %s971_s23, 2 }
   0x9   : > { %s38_s24 = ssub.s32 %s816_s19, %s969_s22  ;;  %p637_p6 = scmp.ge.s32.totalorder %s824_s21, 18 }
   0xa   : > { %s973_s23 = smov (%p35_p4, %s971_s23), 0 }
   0xb   : > { %s37_s25 = ssub.s32 %s820_s20, %s973_s23  ;;  %195 = sbr.rel (%p637_p6) target bundleno = 26 (0x1a), region = 24 }
   0xc   : > { %s39_s26 = sor.u32 %s38_s24, %s37_s25 }
   0xd   : > { %p40_p5 = scmp.eq.s32.totalorder %s39_s26, 0 }
   0xf   : > { %s904_s28 = scalar_select %p40_p5, %s804_s16, %s42_s27  }
  0x12   : > { %198 = sbr.rel (!%p51_p3) target bundleno = 26 (0x1a), region = 28  ;;  %s200_s29 = sand.u32 (%p51_p3), 1, %s804_s16  }
  0x13   : > { %s702_s30 = smul.u32 (%p51_p3), 18, %s820_s20  ;;  %s638_s5 = sshll.u32 (%p51_p3), %s200_s29, 3 }
  0x14   : > { %s202_s11 = scalar_lea.vmem (%p51_p3), [#allocation3], %s638_s5 }
  0x15   : > { %s205_s6 = sadd.s32 (%p51_p3), %s816_s19, %s702_s30 }
  0x16   : > { %s641_s7 = sshll.u32 (%p51_p3), %s205_s6, 2 }
  0x17   : > { %s207_s10 = scalar_lea.vmem (%p51_p3), %s957_s0, %s641_s7 }
  0x18   : > { %v223_v0 = vld [vmem:[%s207_s10] sm:$0xf] (%p51_p3)  ;;  %v225_v1 = vld [vmem:[%s207_s10 + $0x24] sm:$0xf] (%p51_p3) }
  0x19   : > { %224 = vst [vmem:[%s202_s11] sm:$0xf] %v223_v0  ;;  %226 = vst [vmem:[%s202_s11 + $0x4] sm:$0xf] %v225_v1 }
  0x1a PF: > { %p642_p7 = scmp.ge.s32.totalorder %s824_s21, 1  ;;  %p264_p8 = scmp.lt.s32.totalorder %s824_s21, 19 }
  0x1c   : > { %p265_p9 = pnand %p642_p7, %p264_p8 }
  0x1d   : > { %s646_s12 = sshll.u32 (!%p265_p9), %s812_s18, 1  ;;  %s644_s13 = sshll.u32 (!%p265_p9), %s808_s17, 4  ;;  %v826_v2 = vmov (!%p265_p9), 0.0   ;;  %vm827_vm0 = vmmov (!%p265_p9), 0  }
  0x1e   : > { %268 = sbr.rel (%p265_p9) target bundleno = 313 (0x139), region = 73  ;;  %p330_p10 = scmp.lt.s32.totalorder (!%p265_p9), %s646_s12, 3  ;;  %682 = vmatprep.subr.bf16.mxu0 (!%p265_p9), %v826_v2  ;;  %698 = vmatprep.mubr.msk.bf16.mxu0 (!%p265_p9), %vm827_vm0, %v826_v2 }
  0x1f   : > { %p315_p11 = scmp.lt.s32.totalorder (!%p265_p9), %s644_s13, 143  ;;  %s271_s5 = sand.u32 (!%p265_p9), 1, %s800_s15  }
  0x20   : > { %s643_s6 = sshll.u32 (!%p265_p9), %s271_s5, 3  ;;  %p657_p12 = scmp.ne.s32.totalorder (!%p265_p9), %s808_s17, 0 }
  0x21   : > { %s273_s7 = scalar_lea.vmem (!%p265_p9), [#allocation3], %s643_s6 }
  0x22   : > { %v769_v11 = vld [vmem:[%s273_s7] sm:$0xff] (!%p265_p9)  }
  0x25   : > { %s975_s12 = smov (!%p330_p10, %s646_s12), 3  ;;  %s977_s13 = smov (!%p315_p11, %s644_s13), 143 }
  0x26   : > { %s647_s14 = sshll.u32 %s975_s12, 2  ;;  %s645_s27 = sshll.u32 %s977_s13, 2 }
  0x27   : > { %s920_s26 = scalar_lea.vmem %s961_s4, %s647_s14  ;;  %s321_s18 = scalar_lea.vmem %s958_s1, %s645_s27 }
  0x28   : > { %v761_v3 = vld [vmem:[%s321_s18] sm:$0xff]   ;;  %v762_v4 = vld [vmem:[%s321_s18 + $0x8] sm:$0xff]   ;;  %v763_v5 = vld [vmem:[%s321_s18 + $0x10] sm:$0xff]  }
  0x29   : > { %683 = vmatpush3.bf16.msra.mxu0 %v761_v3  ;;  %v764_v6 = vld [vmem:[%s321_s18 + $0x18] sm:$0xff]   ;;  %v765_v7 = vld [vmem:[%s321_s18 + $0x20] sm:$0xff]   ;;  %v766_v8 = vld [vmem:[%s321_s18 + $0x28] sm:$0xff]  }
  0x2a   : > { %684 = vmatprep.subr.bf16.mxu0 %v826_v2  ;;  %v767_v9 = vld [vmem:[%s321_s18 + $0x30] sm:$0xff]   ;;  %v768_v10 = vld [vmem:[%s321_s18 + $0x38] sm:$0xff]  }
  0x2d   : > { %685 = vmatpush3.bf16.msra.mxu0 %v762_v4 }
  0x2e   : > { %686 = vmatprep.subr.bf16.mxu0 %v826_v2 }
  0x31   : > { %687 = vmatpush3.bf16.msra.mxu0 %v763_v5 }
  0x32   : > { %688 = vmatprep.subr.bf16.mxu0 %v826_v2 }
  0x35   : > { %689 = vmatpush3.bf16.msra.mxu0 %v764_v6 }
  0x36   : > { %690 = vmatprep.subr.bf16.mxu0 %v826_v2 }
  0x39   : > { %691 = vmatpush3.bf16.msra.mxu0 %v765_v7 }
  0x3a   : > { %692 = vmatprep.subr.bf16.mxu0 %v826_v2 }
  0x3d   : > { %693 = vmatpush3.bf16.msra.mxu0 %v766_v8 }
  0x3e   : > { %694 = vmatprep.subr.bf16.mxu0 %v826_v2 }
  0x41   : > { %695 = vmatpush3.bf16.msra.mxu0 %v767_v9 }
  0x42   : > { %696 = vmatprep.subr.bf16.mxu0 %v826_v2 }
  0x45   : > { %697 = vmatpush3.bf16.msra.mxu0 %v768_v10 }
  0x48   : > { %699 = vmatmul.mubr.bf16.vlgmr.msra.gmra.mrb[0].mxu0 %v769_v11 }
 0x118   : > { %455 = sbr.rel (%p657_p12) target bundleno = 287 (0x11f), region = 81 }
 0x11b   : > { %v445_v12 = vpop.f32.mrb[0].mxu0 }
 0x11c   : > { %v700_v13 = vpop.f32.mrb[1].mxu0  ;;  %456 = vst [vmem:[#allocation2] sm:$0xff] (!%p657_p12), %v445_v12 }
 0x11d   : > { %v448_v14 = vpop.f32.mrb[2].mxu0 }
 0x11e   : > { %v701_v15 = vpop.f32.mrb[3].mxu0  ;;  %457 = vst [vmem:[#allocation2 + $0x8] sm:$0xff] (!%p657_p12), %v448_v14 }
 0x11f PF: > { %p658_p13 = scmp.le.s32.totalorder %s808_s17, 0 }
 0x121   : > { %461 = sbr.rel (%p658_p13) target bundleno = 297 (0x129), region = 85 }
 0x123   : > { %v462_v16 = vld [vmem:[#allocation2] sm:$0xff] (!%p658_p13) }
 0x124   : > { %v464_v18 = vadd.f32 (!%p658_p13), %v462_v16, %v445_v12 }
 0x125   : > { %v463_v17 = vld [vmem:[#allocation2 + $0x8] sm:$0xff] (!%p658_p13) }
 0x126   : > { %v465_v19 = vadd.f32 (!%p658_p13), %v463_v17, %v448_v14  ;;  %466 = vst [vmem:[#allocation2] sm:$0xff] (!%p658_p13), %v464_v18 }
 0x128   : > { %467 = vst [vmem:[#allocation2 + $0x8] sm:$0xff] %v465_v19 }
 0x129 PF: > { %p659_p0 = scmp.ne.s32.totalorder %s808_s17, 8 }
 0x12a   : > { %v660_v22 = vld [vmem:[%s959_s2] ss:$0 sm:$0xff] (!%p659_p0) }
 0x12b   : > { %471 = sbr.rel (%p659_p0) target bundleno = 313 (0x139), region = 89  ;;  %v661_v25 = vld [vmem:[%s960_s3] ss:$0 sm:$0xff] (!%p659_p0) }
 0x12e   : > { %v472_v20 = vld [vmem:[#allocation2] sm:$0xff] (!%p659_p0) }
 0x12f   : > { %v473_v21 = vld [vmem:[#allocation2 + $0x8] sm:$0xff] (!%p659_p0)  ;;  %v481_v23 = vmul.f32 (!%p659_p0), %v660_v22, %v472_v20 }
 0x130   : > { %v482_v24 = vmul.f32 (!%p659_p0), %v660_v22, %v473_v21 }
 0x131   : > { %v490_v26 = vadd.f32 (!%p659_p0), %v661_v25, %v481_v23 }
 0x132   : > { %v491_v27 = vadd.f32 %v661_v25, %v482_v24 }
 0x133   : > { %v492_v28 = vmax.f32 %v490_v26, 0.0 }
 0x134   : > { %v493_v29 = vmax.f32 %v491_v27, 0.0 }
 0x136   : > { %v671_v30 = vpack.c.bf16 %v493_v29, %v492_v28 }
 0x138   : > { %672 = vst [vmem:[%s920_s26] sm:$0xff] %v671_v30  }
 0x139 PF: > { %s14_s21 = sadd.s32 1, %s824_s21   ;;  %s962_s15 = smov %s804_s16 }
 0x13a   : > { %p11_p1 = scmp.ge.s32.totalorder %s14_s21, 20   ;;  %s963_s16 = smov %s904_s28 }
 0x13b   : > { %s964_s17 = smov %s816_s19  ;;  %s965_s18 = smov %s820_s20 }
 0x13c   : > { %s966_s19 = smov %s969_s22  ;;  %s967_s20 = smov %s973_s23 }
 0x13d   :  { %13 = sbr.rel (!%p11_p1) target bundleno = 4 (0x4), region = 133 }

// kernel: resnet34_8s_fuse_forward.92
= control target key start
LH: loop header
LB: loop body
LE: loop exit
PB: predicated region body
PF: predicated region fallthrough
CT: control target
= control target key end

     0   :  { %s942_s15 = smov 0   ;;  %s944_s16 = smov 0   ;;  %s1065_s0 = inlined_call_operand.vmem [shape: bf16[32,1152], index: 0, kind: input, shape index: {}]   ;;  %s1066_s1 = inlined_call_operand.vmem [shape: bf16[1152,256], index: 1, kind: input, shape index: {}]   ;;  %s1067_s2 = inlined_call_operand.vmem [shape: f32[1,256], index: 2, kind: input, shape index: {}]   ;;  %s1068_s3 = inlined_call_operand.vmem [shape: f32[1,256], index: 3, kind: input, shape index: {}]   ;;  %s1069_s4 = inlined_call_operand.vmem [shape: bf16[32,256], index: 4, kind: output, shape index: {}]  }
   0x1   :  { %s946_s17 = smov 0   ;;  %s948_s18 = smov 0  }
   0x2   :  { %s950_s19 = smov 0   ;;  %s952_s20 = smov 0  }
   0x3   :  { %s954_s21 = smov 0  }
   0x4 LB: > { %s26_s22 = sadd.s32 1, %s906_s19  ;;  %s33_s23 = sadd.s32 1, %s910_s20  ;;  %s914_s21 = sphi %s954_s21, %s14_s21   ;;  %s910_s20 = sphi %s952_s20, %s1075_s20   ;;  %s906_s19 = sphi %s950_s19, %s1074_s19   ;;  %s902_s18 = sphi %s948_s18, %s1073_s18   ;;  %s898_s17 = sphi %s946_s17, %s1072_s17   ;;  %s894_s16 = sphi %s944_s16, %s1071_s16   ;;  %s890_s15 = sphi %s942_s15, %s1070_s15  }
   0x5   : > { %p27_p0 = scmp.ge.s32.totalorder %s26_s22, 9  ;;  %p49_p1 = scmp.ne.s32.totalorder %s894_s16, %s890_s15 }
   0x6   : > { %p50_p2 = scmp.eq.s32.totalorder %s914_s21, 0  ;;  %s42_s27 = sadd.s32 1, %s894_s16 }
   0x7   : > { %s1077_s22 = smov (%p27_p0, %s26_s22), 0  ;;  %s1079_s23 = smov (!%p27_p0, %s33_s23), %s910_s20 }
   0x8   : > { %p51_p3 = por %p50_p2, %p49_p1  ;;  %p35_p4 = scmp.ge.s32.totalorder %s1079_s23, 2 }
   0x9   : > { %s38_s24 = ssub.s32 %s906_s19, %s1077_s22  ;;  %p736_p6 = scmp.ge.s32.totalorder %s914_s21, 18 }
   0xa   : > { %s1081_s23 = smov (%p35_p4, %s1079_s23), 0 }
   0xb   : > { %s37_s25 = ssub.s32 %s910_s20, %s1081_s23  ;;  %199 = sbr.rel (%p736_p6) target bundleno = 26 (0x1a), region = 24 }
   0xc   : > { %s39_s26 = sor.u32 %s38_s24, %s37_s25 }
   0xd   : > { %p40_p5 = scmp.eq.s32.totalorder %s39_s26, 0 }
   0xf   : > { %s993_s28 = scalar_select %p40_p5, %s894_s16, %s42_s27  }
  0x12   : > { %202 = sbr.rel (!%p51_p3) target bundleno = 26 (0x1a), region = 28  ;;  %s204_s29 = sand.u32 (%p51_p3), 1, %s894_s16  }
  0x13   : > { %s777_s30 = smul.u32 (%p51_p3), 18, %s910_s20  ;;  %s737_s5 = sshll.u32 (%p51_p3), %s204_s29, 3 }
  0x14   : > { %s206_s11 = scalar_lea.vmem (%p51_p3), [#allocation3], %s737_s5 }
  0x15   : > { %s209_s6 = sadd.s32 (%p51_p3), %s906_s19, %s777_s30 }
  0x16   : > { %s740_s7 = sshll.u32 (%p51_p3), %s209_s6, 2 }
  0x17   : > { %s211_s10 = scalar_lea.vmem (%p51_p3), %s1065_s0, %s740_s7 }
  0x18   : > { %v227_v0 = vld [vmem:[%s211_s10] sm:$0xf] (%p51_p3)  ;;  %v229_v1 = vld [vmem:[%s211_s10 + $0x24] sm:$0xf] (%p51_p3) }
  0x19   : > { %228 = vst [vmem:[%s206_s11] sm:$0xf] %v227_v0  ;;  %230 = vst [vmem:[%s206_s11 + $0x4] sm:$0xf] %v229_v1 }
  0x1a PF: > { %p741_p7 = scmp.ge.s32.totalorder %s914_s21, 1  ;;  %p271_p8 = scmp.lt.s32.totalorder %s914_s21, 19 }
  0x1c   : > { %p272_p9 = pnand %p741_p7, %p271_p8 }
  0x1d   : > { %s743_s12 = sshll.u32 (!%p272_p9), %s898_s17, 4  ;;  %s746_s13 = sshll.u32 (!%p272_p9), %s902_s18, 1  ;;  %v916_v2 = vmov (!%p272_p9), 0  }
  0x1e   : > { %275 = sbr.rel (%p272_p9) target bundleno = 317 (0x13d), region = 73  ;;  %p329_p10 = scmp.lt.s32.totalorder (!%p272_p9), %s743_s12, 143  ;;  %498 = vmatprep.mubr.bf16.mxu0 (!%p272_p9), %v916_v2 }
  0x1f   : > { %p351_p11 = scmp.lt.s32.totalorder (!%p272_p9), %s746_s13, 3  ;;  %s278_s5 = sand.u32 (!%p272_p9), 1, %s890_s15  }
  0x20   : > { %s742_s6 = sshll.u32 (!%p272_p9), %s278_s5, 3  ;;  %p766_p12 = scmp.ne.s32.totalorder (!%p272_p9), %s898_s17, 0 }
  0x21   : > { %s280_s7 = scalar_lea.vmem (!%p272_p9), [#allocation3], %s742_s6 }
  0x22   : > { %v859_v19 = vld [vmem:[%s280_s7] sm:$0xff] (!%p272_p9)  }
  0x25   : > { %s1083_s12 = smov (!%p329_p10, %s743_s12), 143  ;;  %s1085_s13 = smov (!%p351_p11, %s746_s13), 3 }
  0x26   : > { %s773_s14 = sshll.u32 %s1083_s12, 3  ;;  %s774_s18 = sshll.u32 %s1085_s13, 3 }
  0x27   : > { %s1009_s26 = scalar_lea.vmem %s1066_s1, %s773_s14  ;;  %s1014_s30 = scalar_lea.vmem %s1069_s4, %s774_s18 }
  0x28   : > { %v835_v3 = vld [vmem:[%s1009_s26 + $0x4] ss:$8 sps:$4 sm:$0xff]   ;;  %v837_v4 = vld [vmem:[%s1009_s26] ss:$8 sps:$4 sm:$0xff]   ;;  %v838_v5 = vld [vmem:[%s1009_s26 + $0x14] ss:$8 sps:$4 sm:$0xff]  }
  0x29   : > { %466 = vmatprep.subr.bf16.mxu0 %v835_v3  ;;  %v840_v6 = vld [vmem:[%s1009_s26 + $0x10] ss:$8 sps:$4 sm:$0xff]   ;;  %v841_v7 = vld [vmem:[%s1009_s26 + $0x24] ss:$8 sps:$4 sm:$0xff]   ;;  %v843_v8 = vld [vmem:[%s1009_s26 + $0x20] ss:$8 sps:$4 sm:$0xff]  }
  0x2a   : > { %467 = vmatpush1.bf16.msra.mxu0 %v837_v4  ;;  %v844_v9 = vld [vmem:[%s1009_s26 + $0x34] ss:$8 sps:$4 sm:$0xff]   ;;  %v846_v10 = vld [vmem:[%s1009_s26 + $0x30] ss:$8 sps:$4 sm:$0xff]   ;;  %v847_v11 = vld [vmem:[%s1009_s26 + $0x44] ss:$8 sps:$4 sm:$0xff]  }
  0x2b   : > { %468 = vmatprep.subr.bf16.mxu0 %v838_v5  ;;  %v849_v12 = vld [vmem:[%s1009_s26 + $0x40] ss:$8 sps:$4 sm:$0xff]   ;;  %v850_v13 = vld [vmem:[%s1009_s26 + $0x54] ss:$8 sps:$4 sm:$0xff]   ;;  %v852_v14 = vld [vmem:[%s1009_s26 + $0x50] ss:$8 sps:$4 sm:$0xff]  }
  0x2c   : > { %v853_v15 = vld [vmem:[%s1009_s26 + $0x64] ss:$8 sps:$4 sm:$0xff]   ;;  %v855_v16 = vld [vmem:[%s1009_s26 + $0x60] ss:$8 sps:$4 sm:$0xff]   ;;  %v856_v17 = vld [vmem:[%s1009_s26 + $0x74] ss:$8 sps:$4 sm:$0xff]  }
  0x2d   : > { %v858_v18 = vld [vmem:[%s1009_s26 + $0x70] ss:$8 sps:$4 sm:$0xff]  }
  0x2e   : > { %469 = vmatpush1.bf16.msra.mxu0 %v840_v6 }
  0x2f   : > { %470 = vmatprep.subr.bf16.mxu0 %v841_v7 }
  0x32   : > { %471 = vmatpush1.bf16.msra.mxu0 %v843_v8 }
  0x33   : > { %472 = vmatprep.subr.bf16.mxu0 %v844_v9 }
  0x36   : > { %473 = vmatpush1.bf16.msra.mxu0 %v846_v10 }
  0x37   : > { %474 = vmatprep.subr.bf16.mxu0 %v847_v11 }
  0x3a   : > { %475 = vmatpush1.bf16.msra.mxu0 %v849_v12 }
  0x3b   : > { %476 = vmatprep.subr.bf16.mxu0 %v850_v13 }
  0x3e   : > { %477 = vmatpush1.bf16.msra.mxu0 %v852_v14 }
  0x3f   : > { %478 = vmatprep.subr.bf16.mxu0 %v853_v15 }
  0x42   : > { %479 = vmatpush1.bf16.msra.mxu0 %v855_v16 }
  0x43   : > { %480 = vmatprep.subr.bf16.mxu0 %v856_v17 }
  0x46   : > { %481 = vmatpush1.bf16.msra.mxu0 %v858_v18 }
  0x49   : > { %499 = vmatmul.mubr.bf16.vlgmr.msra.gmra.mrb[0].mxu0 %v859_v19 }
 0x119   : > { %512 = sbr.rel (%p766_p12) target bundleno = 289 (0x121), region = 81 }
 0x11c   : > { %v500_v20 = vpop.f32.mrb[0].mxu0 }
 0x11d   : > { %v502_v21 = vpop.f32.mrb[1].mxu0  ;;  %513 = vst [vmem:[#allocation2] sm:$0xff] (!%p766_p12), %v500_v20 }
 0x11e   : > { %v504_v22 = vpop.f32.mrb[2].mxu0  ;;  %514 = vst [vmem:[#allocation2 + $0x8] sm:$0xff] (!%p766_p12), %v502_v21 }
 0x11f   : > { %v506_v23 = vpop.f32.mrb[3].mxu0  ;;  %515 = vst [vmem:[#allocation2 + $0x10] sm:$0xff] (!%p766_p12), %v504_v22 }
 0x120   : > { %516 = vst [vmem:[#allocation2 + $0x18] sm:$0xff] %v506_v23 }
 0x121 PF: > { %p767_p13 = scmp.le.s32.totalorder %s898_s17, 0 }
 0x123   : > { %520 = sbr.rel (%p767_p13) target bundleno = 299 (0x12b), region = 85 }
 0x125   : > { %v521_v24 = vld [vmem:[#allocation2] sm:$0xff] (!%p767_p13) }
 0x126   : > { %v522_v25 = vld [vmem:[#allocation2 + $0x8] sm:$0xff] (!%p767_p13)  ;;  %v525_v27 = vadd.f32 (!%p767_p13), %v521_v24, %v500_v20 }
 0x127   : > { %v523_v26 = vld [vmem:[#allocation2 + $0x10] sm:$0xff] (!%p767_p13)  ;;  %v526_v28 = vadd.f32 (!%p767_p13), %v522_v25, %v502_v21  ;;  %v524_v30 = vld [vmem:[#allocation2 + $0x18] sm:$0xff] (!%p767_p13) }
 0x128   : > { %v527_v29 = vadd.f32 (!%p767_p13), %v523_v26, %v504_v22  ;;  %v528_v31 = vadd.f32 (!%p767_p13), %v524_v30, %v506_v23  ;;  %529 = vst [vmem:[#allocation2] sm:$0xff] (!%p767_p13), %v525_v27 }
 0x129   : > { %530 = vst [vmem:[#allocation2 + $0x8] sm:$0xff] (!%p767_p13), %v526_v28 }
 0x12a   : > { %531 = vst [vmem:[#allocation2 + $0x10] sm:$0xff] %v527_v29  ;;  %532 = vst [vmem:[#allocation2 + $0x18] sm:$0xff] %v528_v31 }
 0x12b PF: > { %p768_p0 = scmp.ne.s32.totalorder %s898_s17, 8 }
 0x12c   : > { %v543_v32 = vlaneseq (!%p768_p0)  ;;  %v541_v34 = vld [vmem:[%s1067_s2] sm:$0x3] (!%p768_p0) }
 0x12d   : > { %536 = sbr.rel (%p768_p0) target bundleno = 317 (0x13d), region = 89  ;;  %v557_v35 = vld [vmem:[%s1068_s3] sm:$0x3] (!%p768_p0) }
 0x12e   : > { %v544_v33 = vshrl.u32 (!%p768_p0), %v543_v32, 7 }
 0x130   : > { %v537_v36 = vld [vmem:[#allocation2] sm:$0xff] (!%p768_p0)  ;;  %v545_v37 = vsub.s32 (!%p768_p0), 0, %v544_v33  ;;  %v549_v38 = vsub.s32 (!%p768_p0), 1, %v544_v33 }
 0x131   : > { %v538_v39 = vld [vmem:[#allocation2 + $0x8] sm:$0xff] (!%p768_p0)  ;;  %v539_v40 = vld [vmem:[#allocation2 + $0x10] sm:$0xff] (!%p768_p0)  ;;  %v540_v41 = vld [vmem:[#allocation2 + $0x18] sm:$0xff] (!%p768_p0) }
 0x132   : > { %v546_v42 = vrot.slane (!%p768_p0), %v541_v34, %v545_v37  ;;  %v550_v43 = vrot.slane (!%p768_p0), %v541_v34, %v549_v38  ;;  %v562_v44 = vrot.slane (!%p768_p0), %v557_v35, %v545_v37  ;;  %v566_v45 = vrot.slane (!%p768_p0), %v557_v35, %v549_v38 }
 0x134   : > { %v553_v46 = vmul.f32 %v546_v42, %v537_v36  ;;  %v554_v47 = vmul.f32 %v550_v43, %v538_v39  ;;  %v555_v48 = vmul.f32 %v546_v42, %v539_v40  ;;  %v556_v49 = vmul.f32 %v550_v43, %v540_v41 }
 0x136   : > { %v569_v50 = vadd.f32 %v562_v44, %v553_v46  ;;  %v570_v51 = vadd.f32 %v566_v45, %v554_v47  ;;  %v571_v52 = vadd.f32 %v562_v44, %v555_v48  ;;  %v572_v53 = vadd.f32 %v566_v45, %v556_v49 }
 0x138   : > { %v573_v54 = vmax.f32 %v569_v50, 0.0  ;;  %v574_v55 = vmax.f32 %v570_v51, 0.0  ;;  %v575_v56 = vmax.f32 %v571_v52, 0.0  ;;  %v576_v57 = vmax.f32 %v572_v53, 0.0 }
 0x13a   : > { %v775_v58 = vpack.c.bf16 %v574_v55, %v573_v54  ;;  %v776_v59 = vpack.c.bf16 %v576_v57, %v575_v56 }
 0x13c   : > { %589 = vst [vmem:[%s1014_s30] sm:$0xff] %v775_v58  ;;  %590 = vst [vmem:[%s1014_s30 + $0x8] sm:$0xff] %v776_v59 }
 0x13d PF: > { %s14_s21 = sadd.s32 1, %s914_s21   ;;  %s1070_s15 = smov %s894_s16 }
 0x13e   : > { %p11_p1 = scmp.ge.s32.totalorder %s14_s21, 20   ;;  %s1071_s16 = smov %s993_s28 }
 0x13f   : > { %s1072_s17 = smov %s906_s19  ;;  %s1073_s18 = smov %s910_s20 }
 0x140   : > { %s1074_s19 = smov %s1077_s22  ;;  %s1075_s20 = smov %s1081_s23 }
 0x141   :  { %13 = sbr.rel (!%p11_p1) target bundleno = 4 (0x4), region = 133 }

// kernel: resnet34_8s_fuse_forward.91
= control target key start
LH: loop header
LB: loop body
LE: loop exit
PB: predicated region body
PF: predicated region fallthrough
CT: control target
= control target key end

     0   :  { %s820_s15 = smov 0   ;;  %s822_s16 = smov 0   ;;  %s911_s0 = inlined_call_operand.vmem [shape: bf16[32,128], index: 0, kind: input, shape index: {}]   ;;  %s912_s1 = inlined_call_operand.vmem [shape: bf16[128,256], index: 1, kind: input, shape index: {}]   ;;  %s913_s2 = inlined_call_operand.vmem [shape: f32[1,256], index: 2, kind: input, shape index: {}]   ;;  %s914_s3 = inlined_call_operand.vmem [shape: f32[1,256], index: 3, kind: input, shape index: {}]   ;;  %s915_s4 = inlined_call_operand.vmem [shape: bf16[32,256], index: 4, kind: output, shape index: {}]  }
   0x1   :  { %s824_s17 = smov 0  }
   0x2 LB: > { %s33_s18 = sadd.s32 1, %s788_s16  ;;  %p690_p0 = scmp.ge.s32.totalorder %s792_s17, 1  ;;  %s792_s17 = sphi %s824_s17, %s14_s17   ;;  %s788_s16 = sphi %s822_s16, %s917_s16   ;;  %s784_s15 = sphi %s820_s15, %s916_s15  }
   0x3   : > { %p35_p1 = scmp.ge.s32.totalorder %s33_s18, 2  ;;  %p228_p2 = scmp.lt.s32.totalorder %s792_s17, 3 }
   0x5   : > { %s919_s18 = smov (%p35_p1, %s33_s18), 0  ;;  %p229_p3 = pnand %p690_p0, %p228_p2 }
   0x6   : > { %v745_v0 = vld [vmem:[%s912_s1 + $0x4] ss:$8 sps:$4 sm:$0xff] (!%p229_p3)   ;;  %s691_s21 = sshll.u32 (!%p229_p3), %s784_s15, 1  ;;  %v747_v1 = vld [vmem:[%s912_s1] ss:$8 sps:$4 sm:$0xff] (!%p229_p3)   ;;  %v794_v2 = vmov (!%p229_p3), 0   ;;  %v504_v18 = vlaneseq (!%p229_p3) }
   0x7   : > { %232 = sbr.rel (%p229_p3) target bundleno = 261 (0x105), region = 36  ;;  %460 = vmatprep.mubr.bf16.mxu0 (!%p229_p3), %v794_v2  ;;  %p281_p4 = scmp.lt.s32.totalorder (!%p229_p3), %s691_s21, 3  ;;  %428 = vmatprep.subr.bf16.mxu0 (!%p229_p3), %v745_v0  ;;  %v748_v3 = vld [vmem:[%s912_s1 + $0x14] ss:$8 sps:$4 sm:$0xff] (!%p229_p3)   ;;  %v750_v4 = vld [vmem:[%s912_s1 + $0x10] ss:$8 sps:$4 sm:$0xff] (!%p229_p3)  }
   0x8   : > { %429 = vmatpush1.bf16.msra.mxu0 (!%p229_p3), %v747_v1  ;;  %v751_v5 = vld [vmem:[%s912_s1 + $0x24] ss:$8 sps:$4 sm:$0xff] (!%p229_p3)   ;;  %v753_v6 = vld [vmem:[%s912_s1 + $0x20] ss:$8 sps:$4 sm:$0xff] (!%p229_p3)   ;;  %v754_v7 = vld [vmem:[%s912_s1 + $0x34] ss:$8 sps:$4 sm:$0xff] (!%p229_p3)  }
   0x9   : > { %430 = vmatprep.subr.bf16.mxu0 (!%p229_p3), %v748_v3  ;;  %v756_v8 = vld [vmem:[%s912_s1 + $0x30] ss:$8 sps:$4 sm:$0xff] (!%p229_p3)   ;;  %v757_v9 = vld [vmem:[%s912_s1 + $0x44] ss:$8 sps:$4 sm:$0xff] (!%p229_p3)   ;;  %v759_v10 = vld [vmem:[%s912_s1 + $0x40] ss:$8 sps:$4 sm:$0xff] (!%p229_p3)  }
   0xa   : > { %v760_v11 = vld [vmem:[%s912_s1 + $0x54] ss:$8 sps:$4 sm:$0xff] (!%p229_p3)   ;;  %v762_v12 = vld [vmem:[%s912_s1 + $0x50] ss:$8 sps:$4 sm:$0xff] (!%p229_p3)   ;;  %v763_v13 = vld [vmem:[%s912_s1 + $0x64] ss:$8 sps:$4 sm:$0xff] (!%p229_p3)  }
   0xb   : > { %v765_v14 = vld [vmem:[%s912_s1 + $0x60] ss:$8 sps:$4 sm:$0xff] (!%p229_p3)   ;;  %v766_v15 = vld [vmem:[%s912_s1 + $0x74] ss:$8 sps:$4 sm:$0xff] (!%p229_p3)   ;;  %v768_v16 = vld [vmem:[%s912_s1 + $0x70] ss:$8 sps:$4 sm:$0xff] (!%p229_p3)  }
   0xc   : > { %431 = vmatpush1.bf16.msra.mxu0 (!%p229_p3), %v750_v4  ;;  %v505_v19 = vshrl.u32 (!%p229_p3), %v504_v18, 7  ;;  %v502_v21 = vld [vmem:[%s913_s2] sm:$0x3] (!%p229_p3) }
   0xd   : > { %432 = vmatprep.subr.bf16.mxu0 (!%p229_p3), %v751_v5  ;;  %v518_v23 = vld [vmem:[%s914_s3] sm:$0x3] (!%p229_p3) }
   0xe   : > { %s921_s21 = smov (!%p281_p4, %s691_s21), 3  ;;  %v506_v20 = vsub.s32 0, %v505_v19  ;;  %v510_v22 = vsub.s32 1, %v505_v19 }
   0xf   : > { %s692_s30 = sshll.u32 %s921_s21, 2 }
  0x10   : > { %s287_s11 = scalar_lea.vmem %s911_s0, %s692_s30  ;;  %433 = vmatpush1.bf16.msra.mxu0 %v753_v6  ;;  %v507_v24 = vrot.slane %v502_v21, %v506_v20  ;;  %v511_v25 = vrot.slane %v502_v21, %v510_v22  ;;  %v523_v26 = vrot.slane %v518_v23, %v506_v20  ;;  %v527_v28 = vrot.slane %v518_v23, %v510_v22 }
  0x11   : > { %434 = vmatprep.subr.bf16.mxu0 %v754_v7  ;;  %v769_v17 = vld [vmem:[%s287_s11] sm:$0xff]   ;;  %s717_s11 = sshll.u32 %s921_s21, 3 }
  0x12   : > { %s320_s15 = scalar_lea.vmem %s915_s4, %s717_s11 }
  0x14   : > { %435 = vmatpush1.bf16.msra.mxu0 %v756_v8 }
  0x15   : > { %436 = vmatprep.subr.bf16.mxu0 %v757_v9 }
  0x18   : > { %437 = vmatpush1.bf16.msra.mxu0 %v759_v10 }
  0x19   : > { %438 = vmatprep.subr.bf16.mxu0 %v760_v11 }
  0x1c   : > { %439 = vmatpush1.bf16.msra.mxu0 %v762_v12 }
  0x1d   : > { %440 = vmatprep.subr.bf16.mxu0 %v763_v13 }
  0x20   : > { %441 = vmatpush1.bf16.msra.mxu0 %v765_v14 }
  0x21   : > { %442 = vmatprep.subr.bf16.mxu0 %v766_v15 }
  0x24   : > { %443 = vmatpush1.bf16.msra.mxu0 %v768_v16 }
  0x27   : > { %461 = vmatmul.mubr.bf16.vlgmr.msra.gmra.mrb[0].mxu0 %v769_v17 }
  0xfa   : > { %v462_v27 = vpop.f32.mrb[0].mxu0 }
  0xfb   : > { %v514_v29 = vmul.f32 %v507_v24, %v462_v27  ;;  %v464_v30 = vpop.f32.mrb[1].mxu0 }
  0xfc   : > { %v515_v31 = vmul.f32 %v511_v25, %v464_v30  ;;  %v466_v32 = vpop.f32.mrb[2].mxu0 }
  0xfd   : > { %v530_v33 = vadd.f32 %v523_v26, %v514_v29  ;;  %v516_v34 = vmul.f32 %v507_v24, %v466_v32  ;;  %v468_v35 = vpop.f32.mrb[3].mxu0 }
  0xfe   : > { %v531_v36 = vadd.f32 %v527_v28, %v515_v31  ;;  %v517_v37 = vmul.f32 %v511_v25, %v468_v35 }
  0xff   : > { %v532_v38 = vadd.f32 %v523_v26, %v516_v34 }
 0x100   : > { %v718_v39 = vpack.c.bf16 %v531_v36, %v530_v33  ;;  %v533_v40 = vadd.f32 %v527_v28, %v517_v37 }
 0x102   : > { %546 = vst [vmem:[%s320_s15] sm:$0xff] %v718_v39  ;;  %v719_v41 = vpack.c.bf16 %v533_v40, %v532_v38 }
 0x104   : > { %547 = vst [vmem:[%s320_s15 + $0x8] sm:$0xff] %v719_v41 }
 0x105 PF: > { %s14_s17 = sadd.s32 1, %s792_s17   ;;  %s916_s15 = smov %s788_s16 }
 0x106   : > { %p11_p5 = scmp.ge.s32.totalorder %s14_s17, 4   ;;  %s917_s16 = smov %s919_s18 }
 0x108   :  { %13 = sbr.rel (!%p11_p5) target bundleno = 2 (0x2), region = 87 }

// kernel: resnet34_8s_fuse_forward.93
= control target key start
LH: loop header
LB: loop body
LE: loop exit
PB: predicated region body
PF: predicated region fallthrough
CT: control target
= control target key end

     0   :  { %s1184_s18 = smov 0   ;;  %s1186_s19 = smov 0   ;;  %s1337_s0 = inlined_call_operand.vmem [shape: bf16[32,2304], index: 0, kind: input, shape index: {}]   ;;  %s1338_s1 = inlined_call_operand.vmem [shape: bf16[2304,256], index: 1, kind: input, shape index: {}]   ;;  %s1339_s2 = inlined_call_operand.vmem [shape: f32[1,256], index: 2, kind: input, shape index: {}]   ;;  %s1340_s3 = inlined_call_operand.vmem [shape: f32[1,256], index: 3, kind: input, shape index: {}]   ;;  %s1341_s4 = inlined_call_operand.vmem [shape: bf16[32,256], index: 4, kind: input, shape index: {}]   ;;  %s1342_s5 = inlined_call_operand.vmem [shape: bf16[32,256], index: 5, kind: output, shape index: {}]  }
   0x1   :  { %s1188_s20 = smov 0   ;;  %s1190_s21 = smov 0  }
   0x2   :  { %s1192_s22 = smov 0   ;;  %s1194_s23 = smov 0  }
   0x3   :  { %s1196_s24 = smov 0  }
   0x4 LB: > { %s27_s25 = sadd.s32 1, %s1144_s22  ;;  %s34_s26 = sadd.s32 1, %s1148_s23  ;;  %s1152_s24 = sphi %s1196_s24, %s15_s24   ;;  %s1148_s23 = sphi %s1194_s23, %s1348_s23   ;;  %s1144_s22 = sphi %s1192_s22, %s1347_s22   ;;  %s1140_s21 = sphi %s1190_s21, %s1346_s21   ;;  %s1136_s20 = sphi %s1188_s20, %s1345_s20   ;;  %s1132_s19 = sphi %s1186_s19, %s1344_s19   ;;  %s1128_s18 = sphi %s1184_s18, %s1343_s18  }
   0x5   : > { %p28_p0 = scmp.ge.s32.totalorder %s27_s25, 9  ;;  %p50_p1 = scmp.ne.s32.totalorder %s1132_s19, %s1128_s18 }
   0x6   : > { %p51_p2 = scmp.eq.s32.totalorder %s1152_s24, 0  ;;  %s43_s30 = sadd.s32 1, %s1132_s19 }
   0x7   : > { %s1350_s25 = smov (%p28_p0, %s27_s25), 0  ;;  %s1352_s26 = smov (!%p28_p0, %s34_s26), %s1148_s23 }
   0x8   : > { %p52_p3 = por %p51_p2, %p50_p1  ;;  %p36_p4 = scmp.ge.s32.totalorder %s1352_s26, 2 }
   0x9   : > { %s39_s27 = ssub.s32 %s1144_s22, %s1350_s25  ;;  %p927_p6 = scmp.ge.s32.totalorder %s1152_s24, 18 }
   0xa   : > { %s1354_s26 = smov (%p36_p4, %s1352_s26), 0 }
   0xb   : > { %s38_s28 = ssub.s32 %s1148_s23, %s1354_s26  ;;  %228 = sbr.rel (%p927_p6) target bundleno = 27 (0x1b), region = 24 }
   0xc   : > { %s40_s29 = sor.u32 %s39_s27, %s38_s28 }
   0xd   : > { %p41_p5 = scmp.eq.s32.totalorder %s40_s29, 0 }
   0xf   : > { %s1235_s6 = scalar_select %p41_p5, %s1132_s19, %s43_s30  }
  0x12   : > { %231 = sbr.rel (!%p52_p3) target bundleno = 27 (0x1b), region = 28  ;;  %s233_s7 = sand.u32 (%p52_p3), 1, %s1132_s19  }
  0x13   : > { %s930_s8 = sshll.u32 (%p52_p3), %s1144_s22, 1  ;;  %s928_s9 = sshll.u32 (%p52_p3), %s233_s7, 4 }
  0x14   : > { %s990_s10 = smul.u32 (%p52_p3), 36, %s1148_s23  ;;  %s235_s16 = scalar_lea.vmem (%p52_p3), [#allocation3], %s928_s9 }
  0x16   : > { %s239_s11 = sadd.s32 (%p52_p3), %s990_s10, %s930_s8 }
  0x17   : > { %s932_s12 = sshll.u32 (%p52_p3), %s239_s11, 2 }
  0x18   : > { %s241_s15 = scalar_lea.vmem (%p52_p3), %s1337_s0, %s932_s12 }
  0x19   : > { %v271_v0 = vld [vmem:[%s241_s15] sm:$0xff]  ;;  %v273_v1 = vld [vmem:[%s241_s15 + $0x48] sm:$0xff] }
  0x1a   : > { %272 = vst [vmem:[%s235_s16] sm:$0xff] %v271_v0  ;;  %274 = vst [vmem:[%s235_s16 + $0x8] sm:$0xff] %v273_v1 }
  0x1b PF: > { %p933_p7 = scmp.ge.s32.totalorder %s1152_s24, 1  ;;  %p309_p8 = scmp.lt.s32.totalorder %s1152_s24, 19 }
  0x1d   : > { %p310_p9 = pnand %p933_p7, %p309_p8 }
  0x1e   : > { %s935_s17 = sshll.u32 (!%p310_p9), %s1136_s20, 5  ;;  %s938_s27 = sshll.u32 (!%p310_p9), %s1140_s21, 1 }
  0x1f   : > { %313 = sbr.rel (%p310_p9) target bundleno = 352 (0x160), region = 74  ;;  %p380_p10 = scmp.lt.s32.totalorder (!%p310_p9), %s935_s17, 287 }
  0x20   : > { %p402_p11 = scmp.lt.s32.totalorder (!%p310_p9), %s938_s27, 3  ;;  %s316_s14 = sand.u32 (!%p310_p9), 1, %s1128_s18  }
  0x21   : > { %s1275_s15 = sshll.u32 (!%p310_p9), %s316_s14, 4  ;;  %p978_p12 = scmp.ne.s32.totalorder (!%p310_p9), %s1136_s20, 0 }
  0x22   : > { %s318_s16 = scalar_lea.vmem (!%p310_p9), [#allocation3], %s1275_s15 }
  0x23   : > { %v1097_v15 = vld [vmem:[%s318_s16 + $0x4] ss:$8 sps:$4 sm:$0xff] (!%p310_p9)   ;;  %v1095_v35 = vld [vmem:[%s318_s16] ss:$8 sps:$4 sm:$0xff] (!%p310_p9)  }
  0x24   : > { %660 = vmatprep.mubr.bf16.mxu0 (!%p310_p9), %v1097_v15 }
  0x26   : > { %s1356_s17 = smov (!%p380_p10, %s935_s17), 287  ;;  %s1358_s27 = smov (!%p402_p11, %s938_s27), 3 }
  0x27   : > { %s985_s28 = sshll.u32 %s1356_s17, 3  ;;  %s986_s8 = sshll.u32 %s1358_s27, 3 }
  0x28   : > { %s1251_s7 = scalar_lea.vmem %s1338_s1, %s985_s28  ;;  %s1256_s10 = scalar_lea.vmem %s1341_s4, %s986_s8 }
  0x29   : > { %s1261_s13 = scalar_lea.vmem %s1342_s5, %s986_s8  ;;  %v1047_v2 = vld [vmem:[%s1251_s7 + $0x4] ss:$8 sps:$4 sm:$0xff]   ;;  %v1049_v3 = vld [vmem:[%s1251_s7] ss:$8 sps:$4 sm:$0xff]   ;;  %v1050_v4 = vld [vmem:[%s1251_s7 + $0x14] ss:$8 sps:$4 sm:$0xff]  }
  0x2a   : > { %628 = vmatprep.subr.bf16.mxu0 %v1047_v2  ;;  %v1052_v5 = vld [vmem:[%s1251_s7 + $0x10] ss:$8 sps:$4 sm:$0xff]   ;;  %v1053_v6 = vld [vmem:[%s1251_s7 + $0x24] ss:$8 sps:$4 sm:$0xff]   ;;  %v1055_v7 = vld [vmem:[%s1251_s7 + $0x20] ss:$8 sps:$4 sm:$0xff]  }
  0x2b   : > { %629 = vmatpush1.bf16.msra.mxu0 %v1049_v3  ;;  %v1056_v8 = vld [vmem:[%s1251_s7 + $0x34] ss:$8 sps:$4 sm:$0xff]   ;;  %v1058_v9 = vld [vmem:[%s1251_s7 + $0x30] ss:$8 sps:$4 sm:$0xff]   ;;  %v1059_v10 = vld [vmem:[%s1251_s7 + $0x44] ss:$8 sps:$4 sm:$0xff]  }
  0x2c   : > { %630 = vmatprep.subr.bf16.mxu0 %v1050_v4  ;;  %v1061_v11 = vld [vmem:[%s1251_s7 + $0x40] ss:$8 sps:$4 sm:$0xff]   ;;  %v1062_v12 = vld [vmem:[%s1251_s7 + $0x54] ss:$8 sps:$4 sm:$0xff]   ;;  %v1064_v13 = vld [vmem:[%s1251_s7 + $0x50] ss:$8 sps:$4 sm:$0xff]  }
  0x2d   : > { %v1065_v14 = vld [vmem:[%s1251_s7 + $0x64] ss:$8 sps:$4 sm:$0xff]   ;;  %v1067_v16 = vld [vmem:[%s1251_s7 + $0x60] ss:$8 sps:$4 sm:$0xff]   ;;  %v1068_v17 = vld [vmem:[%s1251_s7 + $0x74] ss:$8 sps:$4 sm:$0xff]  }
  0x2e   : > { %v1070_v18 = vld [vmem:[%s1251_s7 + $0x70] ss:$8 sps:$4 sm:$0xff]   ;;  %v1071_v19 = vld [vmem:[%s1251_s7 + $0x84] ss:$8 sps:$4 sm:$0xff]   ;;  %v1073_v20 = vld [vmem:[%s1251_s7 + $0x80] ss:$8 sps:$4 sm:$0xff]  }
  0x2f   : > { %631 = vmatpush1.bf16.msra.mxu0 %v1052_v5  ;;  %v1074_v21 = vld [vmem:[%s1251_s7 + $0x94] ss:$8 sps:$4 sm:$0xff]   ;;  %v1076_v22 = vld [vmem:[%s1251_s7 + $0x90] ss:$8 sps:$4 sm:$0xff]   ;;  %v1077_v23 = vld [vmem:[%s1251_s7 + $0xa4] ss:$8 sps:$4 sm:$0xff]  }
  0x30   : > { %632 = vmatprep.subr.bf16.mxu0 %v1053_v6  ;;  %v1079_v24 = vld [vmem:[%s1251_s7 + $0xa0] ss:$8 sps:$4 sm:$0xff]   ;;  %v1080_v25 = vld [vmem:[%s1251_s7 + $0xb4] ss:$8 sps:$4 sm:$0xff]   ;;  %v1082_v26 = vld [vmem:[%s1251_s7 + $0xb0] ss:$8 sps:$4 sm:$0xff]  }
  0x31   : > { %v1083_v27 = vld [vmem:[%s1251_s7 + $0xc4] ss:$8 sps:$4 sm:$0xff]   ;;  %v1085_v28 = vld [vmem:[%s1251_s7 + $0xc0] ss:$8 sps:$4 sm:$0xff]   ;;  %v1086_v29 = vld [vmem:[%s1251_s7 + $0xd4] ss:$8 sps:$4 sm:$0xff]  }
  0x32   : > { %v1088_v30 = vld [vmem:[%s1251_s7 + $0xd0] ss:$8 sps:$4 sm:$0xff]   ;;  %v1089_v31 = vld [vmem:[%s1251_s7 + $0xe4] ss:$8 sps:$4 sm:$0xff]   ;;  %v1091_v32 = vld [vmem:[%s1251_s7 + $0xe0] ss:$8 sps:$4 sm:$0xff]  }
  0x33   : > { %633 = vmatpush1.bf16.msra.mxu0 %v1055_v7  ;;  %v1092_v33 = vld [vmem:[%s1251_s7 + $0xf4] ss:$8 sps:$4 sm:$0xff]   ;;  %v1094_v34 = vld [vmem:[%s1251_s7 + $0xf0] ss:$8 sps:$4 sm:$0xff]  }
  0x34   : > { %634 = vmatprep.subr.bf16.mxu0 %v1056_v8 }
  0x37   : > { %635 = vmatpush1.bf16.msra.mxu0 %v1058_v9 }
  0x38   : > { %636 = vmatprep.subr.bf16.mxu0 %v1059_v10 }
  0x3b   : > { %637 = vmatpush1.bf16.msra.mxu0 %v1061_v11 }
  0x3c   : > { %638 = vmatprep.subr.bf16.mxu0 %v1062_v12 }
  0x3f   : > { %639 = vmatpush1.bf16.msra.mxu0 %v1064_v13 }
  0x40   : > { %640 = vmatprep.subr.bf16.mxu0 %v1065_v14 }
  0x43   : > { %641 = vmatpush1.bf16.msra.mxu0 %v1067_v16 }
  0x44   : > { %642 = vmatprep.subr.bf16.mxu0 %v1068_v17 }
  0x47   : > { %643 = vmatpush1.bf16.msra.mxu0 %v1070_v18 }
  0x48   : > { %644 = vmatprep.subr.bf16.mxu0 %v1071_v19 }
  0x4b   : > { %645 = vmatpush1.bf16.msra.mxu0 %v1073_v20 }
  0x4c   : > { %646 = vmatprep.subr.bf16.mxu0 %v1074_v21 }
  0x4f   : > { %647 = vmatpush1.bf16.msra.mxu0 %v1076_v22 }
  0x50   : > { %648 = vmatprep.subr.bf16.mxu0 %v1077_v23 }
  0x53   : > { %649 = vmatpush1.bf16.msra.mxu0 %v1079_v24 }
  0x54   : > { %650 = vmatprep.subr.bf16.mxu0 %v1080_v25 }
  0x57   : > { %651 = vmatpush1.bf16.msra.mxu0 %v1082_v26 }
  0x58   : > { %652 = vmatprep.subr.bf16.mxu0 %v1083_v27 }
  0x5b   : > { %653 = vmatpush1.bf16.msra.mxu0 %v1085_v28 }
  0x5c   : > { %654 = vmatprep.subr.bf16.mxu0 %v1086_v29 }
  0x5f   : > { %655 = vmatpush1.bf16.msra.mxu0 %v1088_v30 }
  0x60   : > { %656 = vmatprep.subr.bf16.mxu0 %v1089_v31 }
  0x63   : > { %657 = vmatpush1.bf16.msra.mxu0 %v1091_v32 }
  0x64   : > { %658 = vmatprep.subr.bf16.mxu0 %v1092_v33 }
  0x67   : > { %659 = vmatpush1.bf16.msra.mxu0 %v1094_v34 }
  0x6a   : > { %661 = vmatmul.mubr.bf16.vlgmr.msra.gmra.mrb[0].mxu0 %v1095_v35 }
 0x13a   : > { %674 = sbr.rel (%p978_p12) target bundleno = 322 (0x142), region = 82 }
 0x13d   : > { %v662_v36 = vpop.f32.mrb[0].mxu0 }
 0x13e   : > { %v664_v37 = vpop.f32.mrb[1].mxu0  ;;  %675 = vst [vmem:[#allocation2] sm:$0xff] (!%p978_p12), %v662_v36 }
 0x13f   : > { %v666_v38 = vpop.f32.mrb[2].mxu0  ;;  %676 = vst [vmem:[#allocation2 + $0x8] sm:$0xff] (!%p978_p12), %v664_v37 }
 0x140   : > { %v668_v39 = vpop.f32.mrb[3].mxu0  ;;  %677 = vst [vmem:[#allocation2 + $0x10] sm:$0xff] (!%p978_p12), %v666_v38 }
 0x141   : > { %678 = vst [vmem:[#allocation2 + $0x18] sm:$0xff] %v668_v39 }
 0x142 PF: > { %p979_p13 = scmp.le.s32.totalorder %s1136_s20, 0 }
 0x144   : > { %682 = sbr.rel (%p979_p13) target bundleno = 332 (0x14c), region = 86 }
 0x146   : > { %v683_v40 = vld [vmem:[#allocation2] sm:$0xff] (!%p979_p13) }
 0x147   : > { %v684_v41 = vld [vmem:[#allocation2 + $0x8] sm:$0xff] (!%p979_p13)  ;;  %v687_v43 = vadd.f32 (!%p979_p13), %v683_v40, %v662_v36 }
 0x148   : > { %v685_v42 = vld [vmem:[#allocation2 + $0x10] sm:$0xff] (!%p979_p13)  ;;  %v688_v44 = vadd.f32 (!%p979_p13), %v684_v41, %v664_v37  ;;  %v686_v46 = vld [vmem:[#allocation2 + $0x18] sm:$0xff] (!%p979_p13) }
 0x149   : > { %v689_v45 = vadd.f32 (!%p979_p13), %v685_v42, %v666_v38  ;;  %v690_v47 = vadd.f32 (!%p979_p13), %v686_v46, %v668_v39  ;;  %691 = vst [vmem:[#allocation2] sm:$0xff] (!%p979_p13), %v687_v43 }
 0x14a   : > { %692 = vst [vmem:[#allocation2 + $0x8] sm:$0xff] (!%p979_p13), %v688_v44 }
 0x14b   : > { %693 = vst [vmem:[#allocation2 + $0x10] sm:$0xff] %v689_v45  ;;  %694 = vst [vmem:[#allocation2 + $0x18] sm:$0xff] %v690_v47 }
 0x14c PF: > { %p980_p0 = scmp.ne.s32.totalorder %s1136_s20, 8 }
 0x14d   : > { %v705_v48 = vlaneseq (!%p980_p0)  ;;  %v703_v50 = vld [vmem:[%s1339_s2] sm:$0x3] (!%p980_p0)  ;;  %v736_v56 = vld [vmem:[%s1256_s10 + $0x8] sm:$0xff] (!%p980_p0) }
 0x14e   : > { %698 = sbr.rel (%p980_p0) target bundleno = 352 (0x160), region = 90  ;;  %v719_v51 = vld [vmem:[%s1340_s3] sm:$0x3] (!%p980_p0)  ;;  %v739_v2 = vunpack.c.l.bf16 (!%p980_p0), %v736_v56  ;;  %v740_v3 = vunpack.c.h.bf16 (!%p980_p0), %v736_v56 }
 0x14f   : > { %v706_v49 = vshrl.u32 (!%p980_p0), %v705_v48, 7  ;;  %v735_v55 = vld [vmem:[%s1256_s10] sm:$0xff] (!%p980_p0) }
 0x150   : > { %v737_v0 = vunpack.c.l.bf16 (!%p980_p0), %v735_v55  ;;  %v738_v1 = vunpack.c.h.bf16 (!%p980_p0), %v735_v55 }
 0x151   : > { %v699_v52 = vld [vmem:[#allocation2] sm:$0xff] (!%p980_p0)  ;;  %v707_v53 = vsub.s32 (!%p980_p0), 0, %v706_v49  ;;  %v711_v54 = vsub.s32 (!%p980_p0), 1, %v706_v49 }
 0x152   : > { %v700_v57 = vld [vmem:[#allocation2 + $0x8] sm:$0xff] (!%p980_p0)  ;;  %v701_v58 = vld [vmem:[#allocation2 + $0x10] sm:$0xff] (!%p980_p0)  ;;  %v702_v59 = vld [vmem:[#allocation2 + $0x18] sm:$0xff] (!%p980_p0) }
 0x153   : > { %v708_v60 = vrot.slane (!%p980_p0), %v703_v50, %v707_v53  ;;  %v712_v61 = vrot.slane (!%p980_p0), %v703_v50, %v711_v54  ;;  %v724_v62 = vrot.slane (!%p980_p0), %v719_v51, %v707_v53  ;;  %v728_v63 = vrot.slane (!%p980_p0), %v719_v51, %v711_v54 }
 0x155   : > { %v715_v4 = vmul.f32 %v708_v60, %v699_v52  ;;  %v716_v5 = vmul.f32 %v712_v61, %v700_v57  ;;  %v717_v6 = vmul.f32 %v708_v60, %v701_v58  ;;  %v718_v7 = vmul.f32 %v712_v61, %v702_v59 }
 0x157   : > { %v731_v8 = vadd.f32 %v724_v62, %v715_v4  ;;  %v732_v9 = vadd.f32 %v728_v63, %v716_v5  ;;  %v733_v10 = vadd.f32 %v724_v62, %v717_v6  ;;  %v734_v11 = vadd.f32 %v728_v63, %v718_v7 }
 0x159   : > { %v741_v12 = vadd.f32 %v737_v0, %v731_v8  ;;  %v742_v13 = vadd.f32 %v738_v1, %v732_v9  ;;  %v743_v14 = vadd.f32 %v739_v2, %v733_v10  ;;  %v744_v15 = vadd.f32 %v740_v3, %v734_v11 }
 0x15b   : > { %v745_v16 = vmax.f32 %v741_v12, 0.0  ;;  %v746_v17 = vmax.f32 %v742_v13, 0.0  ;;  %v747_v18 = vmax.f32 %v743_v14, 0.0  ;;  %v748_v19 = vmax.f32 %v744_v15, 0.0 }
 0x15d   : > { %v988_v20 = vpack.c.bf16 %v746_v17, %v745_v16  ;;  %v989_v21 = vpack.c.bf16 %v748_v19, %v747_v18 }
 0x15f   : > { %761 = vst [vmem:[%s1261_s13] sm:$0xff] %v988_v20  ;;  %762 = vst [vmem:[%s1261_s13 + $0x8] sm:$0xff] %v989_v21 }
 0x160 PF: > { %s15_s24 = sadd.s32 1, %s1152_s24   ;;  %s1343_s18 = smov %s1132_s19 }
 0x161   : > { %p12_p1 = scmp.ge.s32.totalorder %s15_s24, 20   ;;  %s1344_s19 = smov %s1235_s6 }
 0x162   : > { %s1345_s20 = smov %s1144_s22  ;;  %s1346_s21 = smov %s1148_s23 }
 0x163   : > { %s1347_s22 = smov %s1350_s25  ;;  %s1348_s23 = smov %s1354_s26 }
 0x164   :  { %14 = sbr.rel (!%p12_p1) target bundleno = 4 (0x4), region = 137 }

// kernel: resnet34_8s_fuse_forward.94
= control target key start
LH: loop header
LB: loop body
LE: loop exit
PB: predicated region body
PF: predicated region fallthrough
CT: control target
= control target key end

     0   :  { %s1079_s15 = smov 0   ;;  %s1081_s16 = smov 0   ;;  %s1225_s0 = inlined_call_operand.vmem [shape: bf16[32,2304], index: 0, kind: input, shape index: {}]   ;;  %s1226_s1 = inlined_call_operand.vmem [shape: bf16[2304,256], index: 1, kind: input, shape index: {}]   ;;  %s1227_s2 = inlined_call_operand.vmem [shape: f32[1,256], index: 2, kind: input, shape index: {}]   ;;  %s1228_s3 = inlined_call_operand.vmem [shape: f32[1,256], index: 3, kind: input, shape index: {}]   ;;  %s1229_s4 = inlined_call_operand.vmem [shape: bf16[32,256], index: 4, kind: output, shape index: {}]  }
   0x1   :  { %s1083_s17 = smov 0   ;;  %s1085_s18 = smov 0  }
   0x2   :  { %s1087_s19 = smov 0   ;;  %s1089_s20 = smov 0  }
   0x3   :  { %s1091_s21 = smov 0  }
   0x4 LB: > { %s26_s22 = sadd.s32 1, %s1044_s19  ;;  %s33_s23 = sadd.s32 1, %s1048_s20  ;;  %s1052_s21 = sphi %s1091_s21, %s14_s21   ;;  %s1048_s20 = sphi %s1089_s20, %s1235_s20   ;;  %s1044_s19 = sphi %s1087_s19, %s1234_s19   ;;  %s1040_s18 = sphi %s1085_s18, %s1233_s18   ;;  %s1036_s17 = sphi %s1083_s17, %s1232_s17   ;;  %s1032_s16 = sphi %s1081_s16, %s1231_s16   ;;  %s1028_s15 = sphi %s1079_s15, %s1230_s15  }
   0x5   : > { %p27_p0 = scmp.ge.s32.totalorder %s26_s22, 9  ;;  %p49_p1 = scmp.ne.s32.totalorder %s1032_s16, %s1028_s15 }
   0x6   : > { %p50_p2 = scmp.eq.s32.totalorder %s1052_s21, 0  ;;  %s42_s27 = sadd.s32 1, %s1032_s16 }
   0x7   : > { %s1237_s22 = smov (%p27_p0, %s26_s22), 0  ;;  %s1239_s23 = smov (!%p27_p0, %s33_s23), %s1048_s20 }
   0x8   : > { %p51_p3 = por %p50_p2, %p49_p1  ;;  %p35_p4 = scmp.ge.s32.totalorder %s1239_s23, 2 }
   0x9   : > { %s38_s24 = ssub.s32 %s1044_s19, %s1237_s22  ;;  %p831_p6 = scmp.ge.s32.totalorder %s1052_s21, 18 }
   0xa   : > { %s1241_s23 = smov (%p35_p4, %s1239_s23), 0 }
   0xb   : > { %s37_s25 = ssub.s32 %s1048_s20, %s1241_s23  ;;  %199 = sbr.rel (%p831_p6) target bundleno = 27 (0x1b), region = 24 }
   0xc   : > { %s39_s26 = sor.u32 %s38_s24, %s37_s25 }
   0xd   : > { %p40_p5 = scmp.eq.s32.totalorder %s39_s26, 0 }
   0xf   : > { %s1130_s28 = scalar_select %p40_p5, %s1032_s16, %s42_s27  }
  0x12   : > { %202 = sbr.rel (!%p51_p3) target bundleno = 27 (0x1b), region = 28  ;;  %s204_s29 = sand.u32 (%p51_p3), 1, %s1032_s16  }
  0x13   : > { %s834_s30 = sshll.u32 (%p51_p3), %s1044_s19, 1  ;;  %s832_s5 = sshll.u32 (%p51_p3), %s204_s29, 4 }
  0x14   : > { %s890_s6 = smul.u32 (%p51_p3), 36, %s1048_s20  ;;  %s206_s12 = scalar_lea.vmem (%p51_p3), [#allocation3], %s832_s5 }
  0x16   : > { %s210_s7 = sadd.s32 (%p51_p3), %s890_s6, %s834_s30 }
  0x17   : > { %s836_s8 = sshll.u32 (%p51_p3), %s210_s7, 2 }
  0x18   : > { %s212_s11 = scalar_lea.vmem (%p51_p3), %s1225_s0, %s836_s8 }
  0x19   : > { %v242_v0 = vld [vmem:[%s212_s11] sm:$0xff]  ;;  %v244_v1 = vld [vmem:[%s212_s11 + $0x48] sm:$0xff] }
  0x1a   : > { %243 = vst [vmem:[%s206_s12] sm:$0xff] %v242_v0  ;;  %245 = vst [vmem:[%s206_s12 + $0x8] sm:$0xff] %v244_v1 }
  0x1b PF: > { %p837_p7 = scmp.ge.s32.totalorder %s1052_s21, 1  ;;  %p265_p8 = scmp.lt.s32.totalorder %s1052_s21, 19 }
  0x1d   : > { %p266_p9 = pnand %p837_p7, %p265_p8 }
  0x1e   : > { %s839_s13 = sshll.u32 (!%p266_p9), %s1036_s17, 5  ;;  %s842_s14 = sshll.u32 (!%p266_p9), %s1040_s18, 1 }
  0x1f   : > { %269 = sbr.rel (%p266_p9) target bundleno = 350 (0x15e), region = 70  ;;  %p324_p10 = scmp.lt.s32.totalorder (!%p266_p9), %s839_s13, 287 }
  0x20   : > { %p346_p11 = scmp.lt.s32.totalorder (!%p266_p9), %s842_s14, 3  ;;  %s272_s6 = sand.u32 (!%p266_p9), 1, %s1028_s15  }
  0x21   : > { %s1165_s7 = sshll.u32 (!%p266_p9), %s272_s6, 4  ;;  %p879_p12 = scmp.ne.s32.totalorder (!%p266_p9), %s1036_s17, 0 }
  0x22   : > { %s274_s8 = scalar_lea.vmem (!%p266_p9), [#allocation3], %s1165_s7 }
  0x23   : > { %v997_v15 = vld [vmem:[%s274_s8 + $0x4] ss:$8 sps:$4 sm:$0xff] (!%p266_p9)   ;;  %v995_v35 = vld [vmem:[%s274_s8] ss:$8 sps:$4 sm:$0xff] (!%p266_p9)  }
  0x24   : > { %592 = vmatprep.mubr.bf16.mxu0 (!%p266_p9), %v997_v15 }
  0x26   : > { %s1243_s13 = smov (!%p324_p10, %s839_s13), 287  ;;  %s1245_s14 = smov (!%p346_p11, %s842_s14), 3 }
  0x27   : > { %s886_s24 = sshll.u32 %s1243_s13, 3  ;;  %s887_s29 = sshll.u32 %s1245_s14, 3 }
  0x28   : > { %s1146_s27 = scalar_lea.vmem %s1226_s1, %s886_s24  ;;  %s1151_s5 = scalar_lea.vmem %s1229_s4, %s887_s29 }
  0x29   : > { %v947_v2 = vld [vmem:[%s1146_s27 + $0x4] ss:$8 sps:$4 sm:$0xff]   ;;  %v949_v3 = vld [vmem:[%s1146_s27] ss:$8 sps:$4 sm:$0xff]   ;;  %v950_v4 = vld [vmem:[%s1146_s27 + $0x14] ss:$8 sps:$4 sm:$0xff]  }
  0x2a   : > { %560 = vmatprep.subr.bf16.mxu0 %v947_v2  ;;  %v952_v5 = vld [vmem:[%s1146_s27 + $0x10] ss:$8 sps:$4 sm:$0xff]   ;;  %v953_v6 = vld [vmem:[%s1146_s27 + $0x24] ss:$8 sps:$4 sm:$0xff]   ;;  %v955_v7 = vld [vmem:[%s1146_s27 + $0x20] ss:$8 sps:$4 sm:$0xff]  }
  0x2b   : > { %561 = vmatpush1.bf16.msra.mxu0 %v949_v3  ;;  %v956_v8 = vld [vmem:[%s1146_s27 + $0x34] ss:$8 sps:$4 sm:$0xff]   ;;  %v958_v9 = vld [vmem:[%s1146_s27 + $0x30] ss:$8 sps:$4 sm:$0xff]   ;;  %v959_v10 = vld [vmem:[%s1146_s27 + $0x44] ss:$8 sps:$4 sm:$0xff]  }
  0x2c   : > { %562 = vmatprep.subr.bf16.mxu0 %v950_v4  ;;  %v961_v11 = vld [vmem:[%s1146_s27 + $0x40] ss:$8 sps:$4 sm:$0xff]   ;;  %v962_v12 = vld [vmem:[%s1146_s27 + $0x54] ss:$8 sps:$4 sm:$0xff]   ;;  %v964_v13 = vld [vmem:[%s1146_s27 + $0x50] ss:$8 sps:$4 sm:$0xff]  }
  0x2d   : > { %v965_v14 = vld [vmem:[%s1146_s27 + $0x64] ss:$8 sps:$4 sm:$0xff]   ;;  %v967_v16 = vld [vmem:[%s1146_s27 + $0x60] ss:$8 sps:$4 sm:$0xff]   ;;  %v968_v17 = vld [vmem:[%s1146_s27 + $0x74] ss:$8 sps:$4 sm:$0xff]  }
  0x2e   : > { %v970_v18 = vld [vmem:[%s1146_s27 + $0x70] ss:$8 sps:$4 sm:$0xff]   ;;  %v971_v19 = vld [vmem:[%s1146_s27 + $0x84] ss:$8 sps:$4 sm:$0xff]   ;;  %v973_v20 = vld [vmem:[%s1146_s27 + $0x80] ss:$8 sps:$4 sm:$0xff]  }
  0x2f   : > { %563 = vmatpush1.bf16.msra.mxu0 %v952_v5  ;;  %v974_v21 = vld [vmem:[%s1146_s27 + $0x94] ss:$8 sps:$4 sm:$0xff]   ;;  %v976_v22 = vld [vmem:[%s1146_s27 + $0x90] ss:$8 sps:$4 sm:$0xff]   ;;  %v977_v23 = vld [vmem:[%s1146_s27 + $0xa4] ss:$8 sps:$4 sm:$0xff]  }
  0x30   : > { %564 = vmatprep.subr.bf16.mxu0 %v953_v6  ;;  %v979_v24 = vld [vmem:[%s1146_s27 + $0xa0] ss:$8 sps:$4 sm:$0xff]   ;;  %v980_v25 = vld [vmem:[%s1146_s27 + $0xb4] ss:$8 sps:$4 sm:$0xff]   ;;  %v982_v26 = vld [vmem:[%s1146_s27 + $0xb0] ss:$8 sps:$4 sm:$0xff]  }
  0x31   : > { %v983_v27 = vld [vmem:[%s1146_s27 + $0xc4] ss:$8 sps:$4 sm:$0xff]   ;;  %v985_v28 = vld [vmem:[%s1146_s27 + $0xc0] ss:$8 sps:$4 sm:$0xff]   ;;  %v986_v29 = vld [vmem:[%s1146_s27 + $0xd4] ss:$8 sps:$4 sm:$0xff]  }
  0x32   : > { %v988_v30 = vld [vmem:[%s1146_s27 + $0xd0] ss:$8 sps:$4 sm:$0xff]   ;;  %v989_v31 = vld [vmem:[%s1146_s27 + $0xe4] ss:$8 sps:$4 sm:$0xff]   ;;  %v991_v32 = vld [vmem:[%s1146_s27 + $0xe0] ss:$8 sps:$4 sm:$0xff]  }
  0x33   : > { %565 = vmatpush1.bf16.msra.mxu0 %v955_v7  ;;  %v992_v33 = vld [vmem:[%s1146_s27 + $0xf4] ss:$8 sps:$4 sm:$0xff]   ;;  %v994_v34 = vld [vmem:[%s1146_s27 + $0xf0] ss:$8 sps:$4 sm:$0xff]  }
  0x34   : > { %566 = vmatprep.subr.bf16.mxu0 %v956_v8 }
  0x37   : > { %567 = vmatpush1.bf16.msra.mxu0 %v958_v9 }
  0x38   : > { %568 = vmatprep.subr.bf16.mxu0 %v959_v10 }
  0x3b   : > { %569 = vmatpush1.bf16.msra.mxu0 %v961_v11 }
  0x3c   : > { %570 = vmatprep.subr.bf16.mxu0 %v962_v12 }
  0x3f   : > { %571 = vmatpush1.bf16.msra.mxu0 %v964_v13 }
  0x40   : > { %572 = vmatprep.subr.bf16.mxu0 %v965_v14 }
  0x43   : > { %573 = vmatpush1.bf16.msra.mxu0 %v967_v16 }
  0x44   : > { %574 = vmatprep.subr.bf16.mxu0 %v968_v17 }
  0x47   : > { %575 = vmatpush1.bf16.msra.mxu0 %v970_v18 }
  0x48   : > { %576 = vmatprep.subr.bf16.mxu0 %v971_v19 }
  0x4b   : > { %577 = vmatpush1.bf16.msra.mxu0 %v973_v20 }
  0x4c   : > { %578 = vmatprep.subr.bf16.mxu0 %v974_v21 }
  0x4f   : > { %579 = vmatpush1.bf16.msra.mxu0 %v976_v22 }
  0x50   : > { %580 = vmatprep.subr.bf16.mxu0 %v977_v23 }
  0x53   : > { %581 = vmatpush1.bf16.msra.mxu0 %v979_v24 }
  0x54   : > { %582 = vmatprep.subr.bf16.mxu0 %v980_v25 }
  0x57   : > { %583 = vmatpush1.bf16.msra.mxu0 %v982_v26 }
  0x58   : > { %584 = vmatprep.subr.bf16.mxu0 %v983_v27 }
  0x5b   : > { %585 = vmatpush1.bf16.msra.mxu0 %v985_v28 }
  0x5c   : > { %586 = vmatprep.subr.bf16.mxu0 %v986_v29 }
  0x5f   : > { %587 = vmatpush1.bf16.msra.mxu0 %v988_v30 }
  0x60   : > { %588 = vmatprep.subr.bf16.mxu0 %v989_v31 }
  0x63   : > { %589 = vmatpush1.bf16.msra.mxu0 %v991_v32 }
  0x64   : > { %590 = vmatprep.subr.bf16.mxu0 %v992_v33 }
  0x67   : > { %591 = vmatpush1.bf16.msra.mxu0 %v994_v34 }
  0x6a   : > { %593 = vmatmul.mubr.bf16.vlgmr.msra.gmra.mrb[0].mxu0 %v995_v35 }
 0x13a   : > { %606 = sbr.rel (%p879_p12) target bundleno = 322 (0x142), region = 78 }
 0x13d   : > { %v594_v36 = vpop.f32.mrb[0].mxu0 }
 0x13e   : > { %v596_v37 = vpop.f32.mrb[1].mxu0  ;;  %607 = vst [vmem:[#allocation2] sm:$0xff] (!%p879_p12), %v594_v36 }
 0x13f   : > { %v598_v38 = vpop.f32.mrb[2].mxu0  ;;  %608 = vst [vmem:[#allocation2 + $0x8] sm:$0xff] (!%p879_p12), %v596_v37 }
 0x140   : > { %v600_v39 = vpop.f32.mrb[3].mxu0  ;;  %609 = vst [vmem:[#allocation2 + $0x10] sm:$0xff] (!%p879_p12), %v598_v38 }
 0x141   : > { %610 = vst [vmem:[#allocation2 + $0x18] sm:$0xff] %v600_v39 }
 0x142 PF: > { %p880_p13 = scmp.le.s32.totalorder %s1036_s17, 0 }
 0x144   : > { %614 = sbr.rel (%p880_p13) target bundleno = 332 (0x14c), region = 82 }
 0x146   : > { %v615_v40 = vld [vmem:[#allocation2] sm:$0xff] (!%p880_p13) }
 0x147   : > { %v616_v41 = vld [vmem:[#allocation2 + $0x8] sm:$0xff] (!%p880_p13)  ;;  %v619_v43 = vadd.f32 (!%p880_p13), %v615_v40, %v594_v36 }
 0x148   : > { %v617_v42 = vld [vmem:[#allocation2 + $0x10] sm:$0xff] (!%p880_p13)  ;;  %v620_v44 = vadd.f32 (!%p880_p13), %v616_v41, %v596_v37  ;;  %v618_v46 = vld [vmem:[#allocation2 + $0x18] sm:$0xff] (!%p880_p13) }
 0x149   : > { %v621_v45 = vadd.f32 (!%p880_p13), %v617_v42, %v598_v38  ;;  %v622_v47 = vadd.f32 (!%p880_p13), %v618_v46, %v600_v39  ;;  %623 = vst [vmem:[#allocation2] sm:$0xff] (!%p880_p13), %v619_v43 }
 0x14a   : > { %624 = vst [vmem:[#allocation2 + $0x8] sm:$0xff] (!%p880_p13), %v620_v44 }
 0x14b   : > { %625 = vst [vmem:[#allocation2 + $0x10] sm:$0xff] %v621_v45  ;;  %626 = vst [vmem:[#allocation2 + $0x18] sm:$0xff] %v622_v47 }
 0x14c PF: > { %p881_p0 = scmp.ne.s32.totalorder %s1036_s17, 8 }
 0x14d   : > { %v637_v48 = vlaneseq (!%p881_p0)  ;;  %v635_v50 = vld [vmem:[%s1227_s2] sm:$0x3] (!%p881_p0) }
 0x14e   : > { %630 = sbr.rel (%p881_p0) target bundleno = 350 (0x15e), region = 86  ;;  %v651_v51 = vld [vmem:[%s1228_s3] sm:$0x3] (!%p881_p0) }
 0x14f   : > { %v638_v49 = vshrl.u32 (!%p881_p0), %v637_v48, 7 }
 0x151   : > { %v631_v52 = vld [vmem:[#allocation2] sm:$0xff] (!%p881_p0)  ;;  %v639_v53 = vsub.s32 (!%p881_p0), 0, %v638_v49  ;;  %v643_v54 = vsub.s32 (!%p881_p0), 1, %v638_v49 }
 0x152   : > { %v632_v55 = vld [vmem:[#allocation2 + $0x8] sm:$0xff] (!%p881_p0)  ;;  %v633_v56 = vld [vmem:[#allocation2 + $0x10] sm:$0xff] (!%p881_p0)  ;;  %v634_v57 = vld [vmem:[#allocation2 + $0x18] sm:$0xff] (!%p881_p0) }
 0x153   : > { %v640_v58 = vrot.slane (!%p881_p0), %v635_v50, %v639_v53  ;;  %v644_v59 = vrot.slane (!%p881_p0), %v635_v50, %v643_v54  ;;  %v656_v60 = vrot.slane (!%p881_p0), %v651_v51, %v639_v53  ;;  %v660_v61 = vrot.slane (!%p881_p0), %v651_v51, %v643_v54 }
 0x155   : > { %v647_v62 = vmul.f32 %v640_v58, %v631_v52  ;;  %v648_v63 = vmul.f32 %v644_v59, %v632_v55  ;;  %v649_v0 = vmul.f32 %v640_v58, %v633_v56  ;;  %v650_v1 = vmul.f32 %v644_v59, %v634_v57 }
 0x157   : > { %v663_v2 = vadd.f32 %v656_v60, %v647_v62  ;;  %v664_v3 = vadd.f32 %v660_v61, %v648_v63  ;;  %v665_v4 = vadd.f32 %v656_v60, %v649_v0  ;;  %v666_v5 = vadd.f32 %v660_v61, %v650_v1 }
 0x159   : > { %v667_v6 = vmax.f32 %v663_v2, 0.0  ;;  %v668_v7 = vmax.f32 %v664_v3, 0.0  ;;  %v669_v8 = vmax.f32 %v665_v4, 0.0  ;;  %v670_v9 = vmax.f32 %v666_v5, 0.0 }
 0x15b   : > { %v888_v10 = vpack.c.bf16 %v668_v7, %v667_v6  ;;  %v889_v11 = vpack.c.bf16 %v670_v9, %v669_v8 }
 0x15d   : > { %683 = vst [vmem:[%s1151_s5] sm:$0xff] %v888_v10  ;;  %684 = vst [vmem:[%s1151_s5 + $0x8] sm:$0xff] %v889_v11 }
 0x15e PF: > { %s14_s21 = sadd.s32 1, %s1052_s21   ;;  %s1230_s15 = smov %s1032_s16 }
 0x15f   : > { %p11_p1 = scmp.ge.s32.totalorder %s14_s21, 20   ;;  %s1231_s16 = smov %s1130_s28 }
 0x160   : > { %s1232_s17 = smov %s1044_s19  ;;  %s1233_s18 = smov %s1048_s20 }
 0x161   : > { %s1234_s19 = smov %s1237_s22  ;;  %s1235_s20 = smov %s1241_s23 }
 0x162   :  { %13 = sbr.rel (!%p11_p1) target bundleno = 4 (0x4), region = 130 }

// kernel: resnet34_8s_fuse_forward.105
= control target key start
LH: loop header
LB: loop body
LE: loop exit
PB: predicated region body
PF: predicated region fallthrough
CT: control target
= control target key end

     0   :  { %s1464_s15 = smov 0   ;;  %s1466_s16 = smov 0   ;;  %s1644_s0 = inlined_call_operand.vmem [shape: bf16[32,2304], index: 0, kind: input, shape index: {}]   ;;  %s1645_s1 = inlined_call_operand.vmem [shape: bf16[2304,512], index: 1, kind: input, shape index: {}]   ;;  %s1646_s2 = inlined_call_operand.vmem [shape: f32[1,512], index: 2, kind: input, shape index: {}]   ;;  %s1647_s3 = inlined_call_operand.vmem [shape: f32[1,512], index: 3, kind: input, shape index: {}]   ;;  %s1648_s4 = inlined_call_operand.vmem [shape: bf16[32,512], index: 4, kind: output, shape index: {}]  }
   0x1   :  { %s1468_s17 = smov 0   ;;  %s1470_s18 = smov 0  }
   0x2   :  { %s1472_s19 = smov 0   ;;  %s1474_s20 = smov 0  }
   0x3   :  { %s1476_s21 = smov 0  }
   0x4 LB: > { %s26_s22 = sadd.s32 1, %s1429_s19  ;;  %s33_s23 = sadd.s32 1, %s1433_s20  ;;  %s1437_s21 = sphi %s1476_s21, %s14_s21   ;;  %s1433_s20 = sphi %s1474_s20, %s1654_s20   ;;  %s1429_s19 = sphi %s1472_s19, %s1653_s19   ;;  %s1425_s18 = sphi %s1470_s18, %s1652_s18   ;;  %s1421_s17 = sphi %s1468_s17, %s1651_s17   ;;  %s1417_s16 = sphi %s1466_s16, %s1650_s16   ;;  %s1413_s15 = sphi %s1464_s15, %s1649_s15  }
   0x5   : > { %p27_p0 = scmp.ge.s32.totalorder %s26_s22, 9  ;;  %p49_p1 = scmp.ne.s32.totalorder %s1417_s16, %s1413_s15 }
   0x6   : > { %p50_p2 = scmp.eq.s32.totalorder %s1437_s21, 0  ;;  %s42_s27 = sadd.s32 1, %s1417_s16 }
   0x7   : > { %s1656_s22 = smov (%p27_p0, %s26_s22), 0  ;;  %s1658_s23 = smov (!%p27_p0, %s33_s23), %s1433_s20 }
   0x8   : > { %p51_p3 = por %p50_p2, %p49_p1  ;;  %p35_p4 = scmp.ge.s32.totalorder %s1658_s23, 2 }
   0x9   : > { %s38_s24 = ssub.s32 %s1429_s19, %s1656_s22  ;;  %p1132_p6 = scmp.ge.s32.totalorder %s1437_s21, 18 }
   0xa   : > { %s1660_s23 = smov (%p35_p4, %s1658_s23), 0 }
   0xb   : > { %s37_s25 = ssub.s32 %s1433_s20, %s1660_s23  ;;  %199 = sbr.rel (%p1132_p6) target bundleno = 27 (0x1b), region = 24 }
   0xc   : > { %s39_s26 = sor.u32 %s38_s24, %s37_s25 }
   0xd   : > { %p40_p5 = scmp.eq.s32.totalorder %s39_s26, 0 }
   0xf   : > { %s1515_s28 = scalar_select %p40_p5, %s1417_s16, %s42_s27  }
  0x12   : > { %202 = sbr.rel (!%p51_p3) target bundleno = 27 (0x1b), region = 28  ;;  %s204_s29 = sand.u32 (%p51_p3), 1, %s1417_s16  }
  0x13   : > { %s1135_s30 = sshll.u32 (%p51_p3), %s1429_s19, 1  ;;  %s1133_s5 = sshll.u32 (%p51_p3), %s204_s29, 4 }
  0x14   : > { %s1227_s6 = smul.u32 (%p51_p3), 36, %s1433_s20  ;;  %s206_s12 = scalar_lea.vmem (%p51_p3), [#allocation3], %s1133_s5 }
  0x16   : > { %s210_s7 = sadd.s32 (%p51_p3), %s1227_s6, %s1135_s30 }
  0x17   : > { %s1137_s8 = sshll.u32 (%p51_p3), %s210_s7, 2 }
  0x18   : > { %s212_s11 = scalar_lea.vmem (%p51_p3), %s1644_s0, %s1137_s8 }
  0x19   : > { %v242_v0 = vld [vmem:[%s212_s11] sm:$0xff]  ;;  %v244_v1 = vld [vmem:[%s212_s11 + $0x48] sm:$0xff] }
  0x1a   : > { %243 = vst [vmem:[%s206_s12] sm:$0xff] %v242_v0  ;;  %245 = vst [vmem:[%s206_s12 + $0x8] sm:$0xff] %v244_v1 }
  0x1b PF: > { %p1138_p7 = scmp.ge.s32.totalorder %s1437_s21, 1  ;;  %p265_p8 = scmp.lt.s32.totalorder %s1437_s21, 19 }
  0x1d   : > { %p266_p9 = pnand %p1138_p7, %p265_p8 }
  0x1e   : > { %s1140_s13 = sshll.u32 (!%p266_p9), %s1421_s17, 5  ;;  %s1143_s14 = sshll.u32 (!%p266_p9), %s1425_s18, 1 }
  0x1f   : > { %269 = sbr.rel (%p266_p9) target bundleno = 352 (0x160), region = 70  ;;  %p324_p10 = scmp.lt.s32.totalorder (!%p266_p9), %s1140_s13, 287 }
  0x20   : > { %p346_p11 = scmp.lt.s32.totalorder (!%p266_p9), %s1143_s14, 3  ;;  %s272_s6 = sand.u32 (!%p266_p9), 1, %s1413_s15  }
  0x21   : > { %s1581_s7 = sshll.u32 (!%p266_p9), %s272_s6, 4  ;;  %p1212_p12 = scmp.ne.s32.totalorder (!%p266_p9), %s1421_s17, 0 }
  0x22   : > { %s274_s15 = scalar_lea.vmem (!%p266_p9), [#allocation3], %s1581_s7 }
  0x23   : > { %v1382_v48 = vld [vmem:[%s274_s15 + $0x4] ss:$8 sps:$4 sm:$0xff] (!%p266_p9)  }
  0x24   : > { %784 = vmatprep.mubr.bf16.mxu0 (!%p266_p9), %v1382_v48  ;;  %827 = vmatprep.mubr.bf16.mxu1 (!%p266_p9), %v1382_v48 }
  0x26   : > { %s1662_s13 = smov (!%p324_p10, %s1140_s13), 287  ;;  %s1664_s14 = smov (!%p346_p11, %s1143_s14), 3 }
  0x27   : > { %s1221_s24 = sshll.u32 %s1662_s13, 4  ;;  %s1222_s29 = sshll.u32 %s1664_s14, 4 }
  0x28   : > { %s1531_s27 = scalar_lea.vmem %s1645_s1, %s1221_s24  ;;  %s1536_s5 = scalar_lea.vmem %s1648_s4, %s1222_s29 }
  0x29   : > { %v1284_v2 = vld [vmem:[%s1531_s27 + $0x4] ss:$16 sps:$4 sm:$0xff]   ;;  %v1286_v3 = vld [vmem:[%s1531_s27 + $0xc] ss:$16 sps:$4 sm:$0xff]   ;;  %v1288_v4 = vld [vmem:[%s1531_s27] ss:$16 sps:$4 sm:$0xff]  }
  0x2a   : > { %752 = vmatprep.subr.bf16.mxu0 %v1284_v2  ;;  %v1289_v5 = vld [vmem:[%s1531_s27 + $0x8] ss:$16 sps:$4 sm:$0xff]   ;;  %795 = vmatprep.subr.bf16.mxu1 %v1286_v3  ;;  %v1290_v6 = vld [vmem:[%s1531_s27 + $0x24] ss:$16 sps:$4 sm:$0xff]   ;;  %v1292_v7 = vld [vmem:[%s1531_s27 + $0x2c] ss:$16 sps:$4 sm:$0xff]  }
  0x2b   : > { %753 = vmatpush1.bf16.msra.mxu0 %v1288_v4  ;;  %796 = vmatpush1.bf16.msra.mxu1 %v1289_v5  ;;  %v1294_v8 = vld [vmem:[%s1531_s27 + $0x20] ss:$16 sps:$4 sm:$0xff]   ;;  %v1295_v9 = vld [vmem:[%s1531_s27 + $0x28] ss:$16 sps:$4 sm:$0xff]   ;;  %v1296_v10 = vld [vmem:[%s1531_s27 + $0x44] ss:$16 sps:$4 sm:$0xff]  }
  0x2c   : > { %754 = vmatprep.subr.bf16.mxu0 %v1290_v6  ;;  %797 = vmatprep.subr.bf16.mxu1 %v1292_v7  ;;  %v1298_v11 = vld [vmem:[%s1531_s27 + $0x4c] ss:$16 sps:$4 sm:$0xff]   ;;  %v1300_v12 = vld [vmem:[%s1531_s27 + $0x40] ss:$16 sps:$4 sm:$0xff]   ;;  %v1301_v13 = vld [vmem:[%s1531_s27 + $0x48] ss:$16 sps:$4 sm:$0xff]  }
  0x2d   : > { %v1302_v14 = vld [vmem:[%s1531_s27 + $0x64] ss:$16 sps:$4 sm:$0xff]   ;;  %v1304_v15 = vld [vmem:[%s1531_s27 + $0x6c] ss:$16 sps:$4 sm:$0xff]   ;;  %v1306_v16 = vld [vmem:[%s1531_s27 + $0x60] ss:$16 sps:$4 sm:$0xff]  }
  0x2e   : > { %v1307_v17 = vld [vmem:[%s1531_s27 + $0x68] ss:$16 sps:$4 sm:$0xff]   ;;  %v1308_v18 = vld [vmem:[%s1531_s27 + $0x84] ss:$16 sps:$4 sm:$0xff]   ;;  %v1310_v19 = vld [vmem:[%s1531_s27 + $0x8c] ss:$16 sps:$4 sm:$0xff]  }
  0x2f   : > { %755 = vmatpush1.bf16.msra.mxu0 %v1294_v8  ;;  %798 = vmatpush1.bf16.msra.mxu1 %v1295_v9  ;;  %v1312_v20 = vld [vmem:[%s1531_s27 + $0x80] ss:$16 sps:$4 sm:$0xff]   ;;  %v1313_v21 = vld [vmem:[%s1531_s27 + $0x88] ss:$16 sps:$4 sm:$0xff]   ;;  %v1314_v22 = vld [vmem:[%s1531_s27 + $0xa4] ss:$16 sps:$4 sm:$0xff]  }
  0x30   : > { %756 = vmatprep.subr.bf16.mxu0 %v1296_v10  ;;  %799 = vmatprep.subr.bf16.mxu1 %v1298_v11  ;;  %v1316_v23 = vld [vmem:[%s1531_s27 + $0xac] ss:$16 sps:$4 sm:$0xff]   ;;  %v1318_v24 = vld [vmem:[%s1531_s27 + $0xa0] ss:$16 sps:$4 sm:$0xff]   ;;  %v1319_v25 = vld [vmem:[%s1531_s27 + $0xa8] ss:$16 sps:$4 sm:$0xff]  }
  0x31   : > { %v1320_v26 = vld [vmem:[%s1531_s27 + $0xc4] ss:$16 sps:$4 sm:$0xff]   ;;  %v1322_v27 = vld [vmem:[%s1531_s27 + $0xcc] ss:$16 sps:$4 sm:$0xff]   ;;  %v1324_v28 = vld [vmem:[%s1531_s27 + $0xc0] ss:$16 sps:$4 sm:$0xff]  }
  0x32   : > { %v1325_v29 = vld [vmem:[%s1531_s27 + $0xc8] ss:$16 sps:$4 sm:$0xff]   ;;  %v1326_v30 = vld [vmem:[%s1531_s27 + $0xe4] ss:$16 sps:$4 sm:$0xff]   ;;  %v1328_v31 = vld [vmem:[%s1531_s27 + $0xec] ss:$16 sps:$4 sm:$0xff]  }
  0x33   : > { %757 = vmatpush1.bf16.msra.mxu0 %v1300_v12  ;;  %800 = vmatpush1.bf16.msra.mxu1 %v1301_v13  ;;  %v1330_v32 = vld [vmem:[%s1531_s27 + $0xe0] ss:$16 sps:$4 sm:$0xff]   ;;  %v1331_v33 = vld [vmem:[%s1531_s27 + $0xe8] ss:$16 sps:$4 sm:$0xff]   ;;  %v1332_v34 = vld [vmem:[%s1531_s27 + $0x104] ss:$16 sps:$4 sm:$0xff]  }
  0x34   : > { %758 = vmatprep.subr.bf16.mxu0 %v1302_v14  ;;  %801 = vmatprep.subr.bf16.mxu1 %v1304_v15  ;;  %v1334_v35 = vld [vmem:[%s1531_s27 + $0x10c] ss:$16 sps:$4 sm:$0xff]   ;;  %v1336_v36 = vld [vmem:[%s1531_s27 + $0x100] ss:$16 sps:$4 sm:$0xff]   ;;  %v1337_v37 = vld [vmem:[%s1531_s27 + $0x108] ss:$16 sps:$4 sm:$0xff]  }
  0x35   : > { %v1338_v38 = vld [vmem:[%s1531_s27 + $0x124] ss:$16 sps:$4 sm:$0xff]   ;;  %v1340_v39 = vld [vmem:[%s1531_s27 + $0x12c] ss:$16 sps:$4 sm:$0xff]   ;;  %v1342_v40 = vld [vmem:[%s1531_s27 + $0x120] ss:$16 sps:$4 sm:$0xff]  }
  0x36   : > { %v1343_v41 = vld [vmem:[%s1531_s27 + $0x128] ss:$16 sps:$4 sm:$0xff]   ;;  %v1344_v42 = vld [vmem:[%s1531_s27 + $0x144] ss:$16 sps:$4 sm:$0xff]   ;;  %v1346_v43 = vld [vmem:[%s1531_s27 + $0x14c] ss:$16 sps:$4 sm:$0xff]  }
  0x37   : > { %759 = vmatpush1.bf16.msra.mxu0 %v1306_v16  ;;  %802 = vmatpush1.bf16.msra.mxu1 %v1307_v17  ;;  %v1348_v44 = vld [vmem:[%s1531_s27 + $0x140] ss:$16 sps:$4 sm:$0xff]   ;;  %v1349_v45 = vld [vmem:[%s1531_s27 + $0x148] ss:$16 sps:$4 sm:$0xff]   ;;  %v1350_v46 = vld [vmem:[%s1531_s27 + $0x164] ss:$16 sps:$4 sm:$0xff]  }
  0x38   : > { %760 = vmatprep.subr.bf16.mxu0 %v1308_v18  ;;  %803 = vmatprep.subr.bf16.mxu1 %v1310_v19  ;;  %v1352_v47 = vld [vmem:[%s1531_s27 + $0x16c] ss:$16 sps:$4 sm:$0xff]   ;;  %v1354_v49 = vld [vmem:[%s1531_s27 + $0x160] ss:$16 sps:$4 sm:$0xff]   ;;  %v1355_v50 = vld [vmem:[%s1531_s27 + $0x168] ss:$16 sps:$4 sm:$0xff]  }
  0x39   : > { %v1356_v51 = vld [vmem:[%s1531_s27 + $0x184] ss:$16 sps:$4 sm:$0xff]   ;;  %v1358_v52 = vld [vmem:[%s1531_s27 + $0x18c] ss:$16 sps:$4 sm:$0xff]   ;;  %v1360_v53 = vld [vmem:[%s1531_s27 + $0x180] ss:$16 sps:$4 sm:$0xff]  }
  0x3a   : > { %v1361_v54 = vld [vmem:[%s1531_s27 + $0x188] ss:$16 sps:$4 sm:$0xff]   ;;  %v1362_v55 = vld [vmem:[%s1531_s27 + $0x1a4] ss:$16 sps:$4 sm:$0xff]   ;;  %v1364_v56 = vld [vmem:[%s1531_s27 + $0x1ac] ss:$16 sps:$4 sm:$0xff]  }
  0x3b   : > { %761 = vmatpush1.bf16.msra.mxu0 %v1312_v20  ;;  %804 = vmatpush1.bf16.msra.mxu1 %v1313_v21  ;;  %v1366_v57 = vld [vmem:[%s1531_s27 + $0x1a0] ss:$16 sps:$4 sm:$0xff]   ;;  %v1367_v58 = vld [vmem:[%s1531_s27 + $0x1a8] ss:$16 sps:$4 sm:$0xff]   ;;  %v1368_v59 = vld [vmem:[%s1531_s27 + $0x1c4] ss:$16 sps:$4 sm:$0xff]  }
  0x3c   : > { %762 = vmatprep.subr.bf16.mxu0 %v1314_v22  ;;  %805 = vmatprep.subr.bf16.mxu1 %v1316_v23  ;;  %v1370_v60 = vld [vmem:[%s1531_s27 + $0x1cc] ss:$16 sps:$4 sm:$0xff]   ;;  %v1372_v61 = vld [vmem:[%s1531_s27 + $0x1c0] ss:$16 sps:$4 sm:$0xff]   ;;  %v1373_v62 = vld [vmem:[%s1531_s27 + $0x1c8] ss:$16 sps:$4 sm:$0xff]  }
  0x3d   : > { %v1374_v63 = vld [vmem:[%s1531_s27 + $0x1e4] ss:$16 sps:$4 sm:$0xff]   ;;  %v1376_v0 = vld [vmem:[%s1531_s27 + $0x1ec] ss:$16 sps:$4 sm:$0xff]   ;;  %v1378_v1 = vld [vmem:[%s1531_s27 + $0x1e0] ss:$16 sps:$4 sm:$0xff]  }
  0x3e   : > { %v1379_v2 = vld [vmem:[%s1531_s27 + $0x1e8] ss:$16 sps:$4 sm:$0xff]  }
  0x3f   : > { %763 = vmatpush1.bf16.msra.mxu0 %v1318_v24  ;;  %806 = vmatpush1.bf16.msra.mxu1 %v1319_v25  ;;  %v1380_v3 = vld [vmem:[%s274_s15] ss:$8 sps:$4 sm:$0xff]  }
  0x40   : > { %764 = vmatprep.subr.bf16.mxu0 %v1320_v26  ;;  %807 = vmatprep.subr.bf16.mxu1 %v1322_v27 }
  0x43   : > { %765 = vmatpush1.bf16.msra.mxu0 %v1324_v28  ;;  %808 = vmatpush1.bf16.msra.mxu1 %v1325_v29 }
  0x44   : > { %766 = vmatprep.subr.bf16.mxu0 %v1326_v30  ;;  %809 = vmatprep.subr.bf16.mxu1 %v1328_v31 }
  0x47   : > { %767 = vmatpush1.bf16.msra.mxu0 %v1330_v32  ;;  %810 = vmatpush1.bf16.msra.mxu1 %v1331_v33 }
  0x48   : > { %768 = vmatprep.subr.bf16.mxu0 %v1332_v34  ;;  %811 = vmatprep.subr.bf16.mxu1 %v1334_v35 }
  0x4b   : > { %769 = vmatpush1.bf16.msra.mxu0 %v1336_v36  ;;  %812 = vmatpush1.bf16.msra.mxu1 %v1337_v37 }
  0x4c   : > { %770 = vmatprep.subr.bf16.mxu0 %v1338_v38  ;;  %813 = vmatprep.subr.bf16.mxu1 %v1340_v39 }
  0x4f   : > { %771 = vmatpush1.bf16.msra.mxu0 %v1342_v40  ;;  %814 = vmatpush1.bf16.msra.mxu1 %v1343_v41 }
  0x50   : > { %772 = vmatprep.subr.bf16.mxu0 %v1344_v42  ;;  %815 = vmatprep.subr.bf16.mxu1 %v1346_v43 }
  0x53   : > { %773 = vmatpush1.bf16.msra.mxu0 %v1348_v44  ;;  %816 = vmatpush1.bf16.msra.mxu1 %v1349_v45 }
  0x54   : > { %774 = vmatprep.subr.bf16.mxu0 %v1350_v46  ;;  %817 = vmatprep.subr.bf16.mxu1 %v1352_v47 }
  0x57   : > { %775 = vmatpush1.bf16.msra.mxu0 %v1354_v49  ;;  %818 = vmatpush1.bf16.msra.mxu1 %v1355_v50 }
  0x58   : > { %776 = vmatprep.subr.bf16.mxu0 %v1356_v51  ;;  %819 = vmatprep.subr.bf16.mxu1 %v1358_v52 }
  0x5b   : > { %777 = vmatpush1.bf16.msra.mxu0 %v1360_v53  ;;  %820 = vmatpush1.bf16.msra.mxu1 %v1361_v54 }
  0x5c   : > { %778 = vmatprep.subr.bf16.mxu0 %v1362_v55  ;;  %821 = vmatprep.subr.bf16.mxu1 %v1364_v56 }
  0x5f   : > { %779 = vmatpush1.bf16.msra.mxu0 %v1366_v57  ;;  %822 = vmatpush1.bf16.msra.mxu1 %v1367_v58 }
  0x60   : > { %780 = vmatprep.subr.bf16.mxu0 %v1368_v59  ;;  %823 = vmatprep.subr.bf16.mxu1 %v1370_v60 }
  0x63   : > { %781 = vmatpush1.bf16.msra.mxu0 %v1372_v61  ;;  %824 = vmatpush1.bf16.msra.mxu1 %v1373_v62 }
  0x64   : > { %782 = vmatprep.subr.bf16.mxu0 %v1374_v63  ;;  %825 = vmatprep.subr.bf16.mxu1 %v1376_v0 }
  0x67   : > { %783 = vmatpush1.bf16.msra.mxu0 %v1378_v1  ;;  %826 = vmatpush1.bf16.msra.mxu1 %v1379_v2 }
  0x6a   : > { %785 = vmatmul.mubr.bf16.vlgmr.msra.gmra.mrb[0].mxu0 %v1380_v3  ;;  %828 = vmatmul.mubr.bf16.vlgmr.msra.gmra.mrb[0].mxu1 %v1380_v3 }
 0x13a   : > { %841 = sbr.rel (%p1212_p12) target bundleno = 322 (0x142), region = 78 }
 0x13d   : > { %v786_v4 = vpop.f32.mrb[0].mxu0  ;;  %v829_v5 = vpop.f32.mrb[0].mxu1 }
 0x13e   : > { %v788_v6 = vpop.f32.mrb[1].mxu0  ;;  %v831_v7 = vpop.f32.mrb[1].mxu1  ;;  %842 = vst [vmem:[#allocation2] sm:$0xff] (!%p1212_p12), %v786_v4  ;;  %844 = vst [vmem:[#allocation2 + $0x10] sm:$0xff] (!%p1212_p12), %v829_v5 }
 0x13f   : > { %v790_v8 = vpop.f32.mrb[2].mxu0  ;;  %v833_v9 = vpop.f32.mrb[2].mxu1  ;;  %843 = vst [vmem:[#allocation2 + $0x8] sm:$0xff] (!%p1212_p12), %v788_v6  ;;  %845 = vst [vmem:[#allocation2 + $0x18] sm:$0xff] (!%p1212_p12), %v831_v7 }
 0x140   : > { %v792_v10 = vpop.f32.mrb[3].mxu0  ;;  %v835_v11 = vpop.f32.mrb[3].mxu1  ;;  %846 = vst [vmem:[#allocation2 + $0x20] sm:$0xff] (!%p1212_p12), %v790_v8  ;;  %848 = vst [vmem:[#allocation2 + $0x30] sm:$0xff] (!%p1212_p12), %v833_v9 }
 0x141   : > { %847 = vst [vmem:[#allocation2 + $0x28] sm:$0xff] %v792_v10  ;;  %849 = vst [vmem:[#allocation2 + $0x38] sm:$0xff] %v835_v11 }
 0x142 PF: > { %p1213_p13 = scmp.le.s32.totalorder %s1421_s17, 0 }
 0x144   : > { %853 = sbr.rel (%p1213_p13) target bundleno = 333 (0x14d), region = 82 }
 0x146   : > { %v854_v12 = vld [vmem:[#allocation2] sm:$0xff] (!%p1213_p13)  ;;  %v856_v14 = vld [vmem:[#allocation2 + $0x10] sm:$0xff] (!%p1213_p13) }
 0x147   : > { %v855_v13 = vld [vmem:[#allocation2 + $0x8] sm:$0xff] (!%p1213_p13)  ;;  %v862_v15 = vadd.f32 (!%p1213_p13), %v854_v12, %v786_v4  ;;  %v864_v17 = vadd.f32 (!%p1213_p13), %v856_v14, %v829_v5  ;;  %v857_v18 = vld [vmem:[#allocation2 + $0x18] sm:$0xff] (!%p1213_p13) }
 0x148   : > { %v863_v16 = vadd.f32 (!%p1213_p13), %v855_v13, %v788_v6  ;;  %v858_v19 = vld [vmem:[#allocation2 + $0x20] sm:$0xff] (!%p1213_p13)  ;;  %v859_v20 = vld [vmem:[#allocation2 + $0x28] sm:$0xff] (!%p1213_p13)  ;;  %v865_v21 = vadd.f32 (!%p1213_p13), %v857_v18, %v831_v7  ;;  %v860_v24 = vld [vmem:[#allocation2 + $0x30] sm:$0xff] (!%p1213_p13) }
 0x149   : > { %v866_v22 = vadd.f32 (!%p1213_p13), %v858_v19, %v790_v8  ;;  %v867_v23 = vadd.f32 (!%p1213_p13), %v859_v20, %v792_v10  ;;  %v861_v25 = vld [vmem:[#allocation2 + $0x38] sm:$0xff] (!%p1213_p13)  ;;  %870 = vst [vmem:[#allocation2] sm:$0xff] (!%p1213_p13), %v862_v15  ;;  %872 = vst [vmem:[#allocation2 + $0x10] sm:$0xff] (!%p1213_p13), %v864_v17  ;;  %v868_v26 = vadd.f32 (!%p1213_p13), %v860_v24, %v833_v9 }
 0x14a   : > { %871 = vst [vmem:[#allocation2 + $0x8] sm:$0xff] (!%p1213_p13), %v863_v16  ;;  %v869_v27 = vadd.f32 (!%p1213_p13), %v861_v25, %v835_v11  ;;  %873 = vst [vmem:[#allocation2 + $0x18] sm:$0xff] (!%p1213_p13), %v865_v21 }
 0x14b   : > { %874 = vst [vmem:[#allocation2 + $0x20] sm:$0xff] %v866_v22  ;;  %875 = vst [vmem:[#allocation2 + $0x28] sm:$0xff] %v867_v23 }
 0x14c   : > { %876 = vst [vmem:[#allocation2 + $0x30] sm:$0xff] %v868_v26  ;;  %877 = vst [vmem:[#allocation2 + $0x38] sm:$0xff] %v869_v27 }
 0x14d PF: > { %p1214_p0 = scmp.ne.s32.totalorder %s1421_s17, 8 }
 0x14e   : > { %v892_v28 = vlaneseq (!%p1214_p0)  ;;  %v890_v30 = vld [vmem:[%s1646_s2] sm:$0xf] (!%p1214_p0) }
 0x14f   : > { %881 = sbr.rel (%p1214_p0) target bundleno = 352 (0x160), region = 86  ;;  %v920_v31 = vld [vmem:[%s1647_s3] sm:$0xf] (!%p1214_p0) }
 0x150   : > { %v893_v29 = vshrl.u32 (!%p1214_p0), %v892_v28, 7 }
 0x152   : > { %v882_v32 = vld [vmem:[#allocation2] sm:$0xff] (!%p1214_p0)  ;;  %v894_v34 = vsub.s32 (!%p1214_p0), 0, %v893_v29  ;;  %v898_v35 = vsub.s32 (!%p1214_p0), 1, %v893_v29  ;;  %v902_v36 = vsub.s32 (!%p1214_p0), 2, %v893_v29  ;;  %v906_v37 = vsub.s32 (!%p1214_p0), 3, %v893_v29  ;;  %v884_v38 = vld [vmem:[#allocation2 + $0x10] sm:$0xff] (!%p1214_p0) }
 0x153   : > { %v883_v33 = vld [vmem:[#allocation2 + $0x8] sm:$0xff] (!%p1214_p0)  ;;  %v885_v45 = vld [vmem:[#allocation2 + $0x18] sm:$0xff] (!%p1214_p0)  ;;  %v888_v46 = vld [vmem:[#allocation2 + $0x30] sm:$0xff] (!%p1214_p0) }
 0x154   : > { %v886_v39 = vld [vmem:[#allocation2 + $0x20] sm:$0xff] (!%p1214_p0)  ;;  %v887_v40 = vld [vmem:[#allocation2 + $0x28] sm:$0xff] (!%p1214_p0)  ;;  %v895_v41 = vrot.slane (!%p1214_p0), %v890_v30, %v894_v34  ;;  %v899_v42 = vrot.slane (!%p1214_p0), %v890_v30, %v898_v35  ;;  %v925_v43 = vrot.slane (!%p1214_p0), %v920_v31, %v894_v34  ;;  %v929_v44 = vrot.slane (!%p1214_p0), %v920_v31, %v898_v35  ;;  %v889_v47 = vld [vmem:[#allocation2 + $0x38] sm:$0xff] (!%p1214_p0) }
 0x155   : > { %v903_v48 = vrot.slane (!%p1214_p0), %v890_v30, %v902_v36  ;;  %v907_v49 = vrot.slane (!%p1214_p0), %v890_v30, %v906_v37  ;;  %v933_v50 = vrot.slane (!%p1214_p0), %v920_v31, %v902_v36  ;;  %v937_v51 = vrot.slane (!%p1214_p0), %v920_v31, %v906_v37 }
 0x156   : > { %v912_v52 = vmul.f32 %v895_v41, %v882_v32  ;;  %v913_v53 = vmul.f32 %v899_v42, %v883_v33  ;;  %v916_v54 = vmul.f32 %v895_v41, %v886_v39  ;;  %v917_v55 = vmul.f32 %v899_v42, %v887_v40 }
 0x157   : > { %v914_v56 = vmul.f32 %v903_v48, %v884_v38  ;;  %v915_v57 = vmul.f32 %v907_v49, %v885_v45  ;;  %v918_v58 = vmul.f32 %v903_v48, %v888_v46  ;;  %v919_v59 = vmul.f32 %v907_v49, %v889_v47 }
 0x158   : > { %v942_v60 = vadd.f32 %v925_v43, %v912_v52  ;;  %v943_v61 = vadd.f32 %v929_v44, %v913_v53  ;;  %v946_v62 = vadd.f32 %v925_v43, %v916_v54  ;;  %v947_v63 = vadd.f32 %v929_v44, %v917_v55 }
 0x159   : > { %v944_v0 = vadd.f32 %v933_v50, %v914_v56  ;;  %v945_v1 = vadd.f32 %v937_v51, %v915_v57  ;;  %v948_v2 = vadd.f32 %v933_v50, %v918_v58  ;;  %v949_v3 = vadd.f32 %v937_v51, %v919_v59 }
 0x15a   : > { %v950_v4 = vmax.f32 %v942_v60, 0.0  ;;  %v951_v5 = vmax.f32 %v943_v61, 0.0  ;;  %v954_v6 = vmax.f32 %v946_v62, 0.0  ;;  %v955_v7 = vmax.f32 %v947_v63, 0.0 }
 0x15b   : > { %v952_v8 = vmax.f32 %v944_v0, 0.0  ;;  %v953_v9 = vmax.f32 %v945_v1, 0.0  ;;  %v956_v10 = vmax.f32 %v948_v2, 0.0  ;;  %v957_v11 = vmax.f32 %v949_v3, 0.0 }
 0x15c   : > { %v1223_v12 = vpack.c.bf16 %v951_v5, %v950_v4  ;;  %v1225_v13 = vpack.c.bf16 %v955_v7, %v954_v6 }
 0x15d   : > { %v1224_v14 = vpack.c.bf16 %v953_v9, %v952_v8  ;;  %v1226_v15 = vpack.c.bf16 %v957_v11, %v956_v10 }
 0x15e   : > { %982 = vst [vmem:[%s1536_s5] sm:$0xff] %v1223_v12  ;;  %984 = vst [vmem:[%s1536_s5 + $0x10] sm:$0xff] %v1225_v13 }
 0x15f   : > { %983 = vst [vmem:[%s1536_s5 + $0x8] sm:$0xff] %v1224_v14  ;;  %985 = vst [vmem:[%s1536_s5 + $0x18] sm:$0xff] %v1226_v15 }
 0x160 PF: > { %s14_s21 = sadd.s32 1, %s1437_s21   ;;  %s1649_s15 = smov %s1417_s16 }
 0x161   : > { %p11_p1 = scmp.ge.s32.totalorder %s14_s21, 20   ;;  %s1650_s16 = smov %s1515_s28 }
 0x162   : > { %s1651_s17 = smov %s1429_s19  ;;  %s1652_s18 = smov %s1433_s20 }
 0x163   : > { %s1653_s19 = smov %s1656_s22  ;;  %s1654_s20 = smov %s1660_s23 }
 0x164   :  { %13 = sbr.rel (!%p11_p1) target bundleno = 4 (0x4), region = 130 }

// kernel: resnet34_8s_fuse_forward.104
= control target key start
LH: loop header
LB: loop body
LE: loop exit
PB: predicated region body
PF: predicated region fallthrough
CT: control target
= control target key end

     0   :  { %s1354_s15 = smov 0   ;;  %s1356_s16 = smov 0   ;;  %s1596_s0 = inlined_call_operand.vmem [shape: bf16[32,256], index: 0, kind: input, shape index: {}]   ;;  %s1597_s1 = inlined_call_operand.vmem [shape: bf16[256,512], index: 1, kind: input, shape index: {}]   ;;  %s1598_s2 = inlined_call_operand.vmem [shape: f32[1,512], index: 2, kind: input, shape index: {}]   ;;  %s1599_s3 = inlined_call_operand.vmem [shape: f32[1,512], index: 3, kind: input, shape index: {}]   ;;  %s1600_s4 = inlined_call_operand.vmem [shape: bf16[32,512], index: 4, kind: output, shape index: {}]  }
   0x1   :  { %s1358_s17 = smov 0  }
   0x2 LB: > { %s33_s18 = sadd.s32 1, %s1323_s16  ;;  %p1097_p0 = scmp.ge.s32.totalorder %s1327_s17, 1  ;;  %s1327_s17 = sphi %s1358_s17, %s14_s17   ;;  %s1323_s16 = sphi %s1356_s16, %s1602_s16   ;;  %s1319_s15 = sphi %s1354_s15, %s1601_s15  }
   0x3   : > { %p35_p1 = scmp.ge.s32.totalorder %s33_s18, 2  ;;  %p231_p2 = scmp.lt.s32.totalorder %s1327_s17, 3 }
   0x5   : > { %s1604_s18 = smov (%p35_p1, %s33_s18), 0  ;;  %p232_p3 = pnand %p1097_p0, %p231_p2 }
   0x6   : > { %v1206_v0 = vld [vmem:[%s1597_s1 + $0x4] ss:$16 sps:$4 sm:$0xff] (!%p232_p3)   ;;  %v1208_v1 = vld [vmem:[%s1597_s1 + $0xc] ss:$16 sps:$4 sm:$0xff] (!%p232_p3)   ;;  %v1210_v2 = vld [vmem:[%s1597_s1] ss:$16 sps:$4 sm:$0xff] (!%p232_p3)  }
   0x7   : > { %235 = sbr.rel (%p232_p3) target bundleno = 293 (0x125), region = 36  ;;  %727 = vmatprep.subr.bf16.mxu0 (!%p232_p3), %v1206_v0  ;;  %v1211_v3 = vld [vmem:[%s1597_s1 + $0x8] ss:$16 sps:$4 sm:$0xff] (!%p232_p3)   ;;  %770 = vmatprep.subr.bf16.mxu1 (!%p232_p3), %v1208_v1  ;;  %v1212_v4 = vld [vmem:[%s1597_s1 + $0x24] ss:$16 sps:$4 sm:$0xff] (!%p232_p3)   ;;  %s1098_s9 = sshll.u32 (!%p232_p3), %s1319_s15, 1 }
   0x8   : > { %728 = vmatpush1.bf16.msra.mxu0 (!%p232_p3), %v1210_v2  ;;  %771 = vmatpush1.bf16.msra.mxu1 (!%p232_p3), %v1211_v3  ;;  %v1214_v5 = vld [vmem:[%s1597_s1 + $0x2c] ss:$16 sps:$4 sm:$0xff] (!%p232_p3)   ;;  %v1216_v6 = vld [vmem:[%s1597_s1 + $0x20] ss:$16 sps:$4 sm:$0xff] (!%p232_p3)   ;;  %v1217_v7 = vld [vmem:[%s1597_s1 + $0x28] ss:$16 sps:$4 sm:$0xff] (!%p232_p3)   ;;  %v866_v2 = vlaneseq (!%p232_p3) }
   0x9   : > { %729 = vmatprep.subr.bf16.mxu0 (!%p232_p3), %v1212_v4  ;;  %772 = vmatprep.subr.bf16.mxu1 (!%p232_p3), %v1214_v5  ;;  %v1218_v8 = vld [vmem:[%s1597_s1 + $0x44] ss:$16 sps:$4 sm:$0xff] (!%p232_p3)   ;;  %v1220_v9 = vld [vmem:[%s1597_s1 + $0x4c] ss:$16 sps:$4 sm:$0xff] (!%p232_p3)   ;;  %v1222_v10 = vld [vmem:[%s1597_s1 + $0x40] ss:$16 sps:$4 sm:$0xff] (!%p232_p3)  }
   0xa   : > { %v1223_v11 = vld [vmem:[%s1597_s1 + $0x48] ss:$16 sps:$4 sm:$0xff] (!%p232_p3)   ;;  %v1224_v12 = vld [vmem:[%s1597_s1 + $0x64] ss:$16 sps:$4 sm:$0xff] (!%p232_p3)   ;;  %v1226_v13 = vld [vmem:[%s1597_s1 + $0x6c] ss:$16 sps:$4 sm:$0xff] (!%p232_p3)  }
   0xb   : > { %v1228_v14 = vld [vmem:[%s1597_s1 + $0x60] ss:$16 sps:$4 sm:$0xff] (!%p232_p3)   ;;  %v1229_v15 = vld [vmem:[%s1597_s1 + $0x68] ss:$16 sps:$4 sm:$0xff] (!%p232_p3)   ;;  %v1230_v16 = vld [vmem:[%s1597_s1 + $0x84] ss:$16 sps:$4 sm:$0xff] (!%p232_p3)  }
   0xc   : > { %730 = vmatpush1.bf16.msra.mxu0 (!%p232_p3), %v1216_v6  ;;  %773 = vmatpush1.bf16.msra.mxu1 (!%p232_p3), %v1217_v7  ;;  %v1232_v17 = vld [vmem:[%s1597_s1 + $0x8c] ss:$16 sps:$4 sm:$0xff] (!%p232_p3)   ;;  %v1234_v18 = vld [vmem:[%s1597_s1 + $0x80] ss:$16 sps:$4 sm:$0xff] (!%p232_p3)   ;;  %v1235_v19 = vld [vmem:[%s1597_s1 + $0x88] ss:$16 sps:$4 sm:$0xff] (!%p232_p3)  }
   0xd   : > { %731 = vmatprep.subr.bf16.mxu0 (!%p232_p3), %v1218_v8  ;;  %774 = vmatprep.subr.bf16.mxu1 (!%p232_p3), %v1220_v9  ;;  %v1236_v20 = vld [vmem:[%s1597_s1 + $0xa4] ss:$16 sps:$4 sm:$0xff] (!%p232_p3)   ;;  %v1238_v21 = vld [vmem:[%s1597_s1 + $0xac] ss:$16 sps:$4 sm:$0xff] (!%p232_p3)   ;;  %v1240_v22 = vld [vmem:[%s1597_s1 + $0xa0] ss:$16 sps:$4 sm:$0xff] (!%p232_p3)  }
   0xe   : > { %v1241_v23 = vld [vmem:[%s1597_s1 + $0xa8] ss:$16 sps:$4 sm:$0xff]   ;;  %v1242_v24 = vld [vmem:[%s1597_s1 + $0xc4] ss:$16 sps:$4 sm:$0xff]   ;;  %v1244_v25 = vld [vmem:[%s1597_s1 + $0xcc] ss:$16 sps:$4 sm:$0xff]  }
   0xf   : > { %v1246_v26 = vld [vmem:[%s1597_s1 + $0xc0] ss:$16 sps:$4 sm:$0xff]   ;;  %v1247_v27 = vld [vmem:[%s1597_s1 + $0xc8] ss:$16 sps:$4 sm:$0xff]   ;;  %v1248_v28 = vld [vmem:[%s1597_s1 + $0xe4] ss:$16 sps:$4 sm:$0xff]  }
  0x10   : > { %732 = vmatpush1.bf16.msra.mxu0 %v1222_v10  ;;  %775 = vmatpush1.bf16.msra.mxu1 %v1223_v11  ;;  %v1250_v29 = vld [vmem:[%s1597_s1 + $0xec] ss:$16 sps:$4 sm:$0xff]   ;;  %v1252_v30 = vld [vmem:[%s1597_s1 + $0xe0] ss:$16 sps:$4 sm:$0xff]   ;;  %v1253_v31 = vld [vmem:[%s1597_s1 + $0xe8] ss:$16 sps:$4 sm:$0xff]  }
  0x11   : > { %733 = vmatprep.subr.bf16.mxu0 %v1224_v12  ;;  %776 = vmatprep.subr.bf16.mxu1 %v1226_v13  ;;  %v1254_v32 = vld [vmem:[%s1597_s1 + $0x104] ss:$16 sps:$4 sm:$0xff]   ;;  %v1256_v33 = vld [vmem:[%s1597_s1 + $0x10c] ss:$16 sps:$4 sm:$0xff]   ;;  %p287_p4 = scmp.lt.s32.totalorder %s1098_s9, 3  ;;  %v867_v3 = vshrl.u32 %v866_v2, 7 }
  0x12   : > { %v1258_v34 = vld [vmem:[%s1597_s1 + $0x100] ss:$16 sps:$4 sm:$0xff]   ;;  %v1259_v35 = vld [vmem:[%s1597_s1 + $0x108] ss:$16 sps:$4 sm:$0xff]   ;;  %v1260_v36 = vld [vmem:[%s1597_s1 + $0x124] ss:$16 sps:$4 sm:$0xff]  }
  0x13   : > { %v1262_v37 = vld [vmem:[%s1597_s1 + $0x12c] ss:$16 sps:$4 sm:$0xff]   ;;  %s1606_s9 = smov (!%p287_p4, %s1098_s9), 3  ;;  %v1264_v38 = vld [vmem:[%s1597_s1 + $0x120] ss:$16 sps:$4 sm:$0xff]   ;;  %v868_v4 = vsub.s32 0, %v867_v3 }
  0x14   : > { %734 = vmatpush1.bf16.msra.mxu0 %v1228_v14  ;;  %777 = vmatpush1.bf16.msra.mxu1 %v1229_v15  ;;  %v1265_v39 = vld [vmem:[%s1597_s1 + $0x128] ss:$16 sps:$4 sm:$0xff]   ;;  %v1266_v40 = vld [vmem:[%s1597_s1 + $0x144] ss:$16 sps:$4 sm:$0xff]   ;;  %v1268_v41 = vld [vmem:[%s1597_s1 + $0x14c] ss:$16 sps:$4 sm:$0xff]  }
  0x15   : > { %735 = vmatprep.subr.bf16.mxu0 %v1230_v16  ;;  %778 = vmatprep.subr.bf16.mxu1 %v1232_v17  ;;  %s1176_s12 = sshll.u32 %s1606_s9, 3  ;;  %v1270_v42 = vld [vmem:[%s1597_s1 + $0x140] ss:$16 sps:$4 sm:$0xff]   ;;  %v1271_v43 = vld [vmem:[%s1597_s1 + $0x148] ss:$16 sps:$4 sm:$0xff]   ;;  %v876_v5 = vsub.s32 2, %v867_v3 }
  0x16   : > { %v1272_v44 = vld [vmem:[%s1597_s1 + $0x164] ss:$16 sps:$4 sm:$0xff]   ;;  %s1516_s24 = scalar_lea.vmem %s1596_s0, %s1176_s12  ;;  %v1274_v45 = vld [vmem:[%s1597_s1 + $0x16c] ss:$16 sps:$4 sm:$0xff]   ;;  %v1276_v47 = vld [vmem:[%s1597_s1 + $0x160] ss:$16 sps:$4 sm:$0xff]  }
  0x17   : > { %v1304_v46 = vld [vmem:[%s1516_s24 + $0x4] ss:$8 sps:$4 sm:$0xff]   ;;  %v1277_v48 = vld [vmem:[%s1597_s1 + $0x168] ss:$16 sps:$4 sm:$0xff]   ;;  %v1282_v51 = vld [vmem:[%s1597_s1 + $0x180] ss:$16 sps:$4 sm:$0xff]  }
  0x18   : > { %736 = vmatpush1.bf16.msra.mxu0 %v1234_v18  ;;  %779 = vmatpush1.bf16.msra.mxu1 %v1235_v19  ;;  %v1278_v49 = vld [vmem:[%s1597_s1 + $0x184] ss:$16 sps:$4 sm:$0xff]   ;;  %v1280_v50 = vld [vmem:[%s1597_s1 + $0x18c] ss:$16 sps:$4 sm:$0xff]   ;;  %v1283_v52 = vld [vmem:[%s1597_s1 + $0x188] ss:$16 sps:$4 sm:$0xff]  }
  0x19   : > { %737 = vmatprep.subr.bf16.mxu0 %v1236_v20  ;;  %780 = vmatprep.subr.bf16.mxu1 %v1238_v21  ;;  %v1284_v53 = vld [vmem:[%s1597_s1 + $0x1a4] ss:$16 sps:$4 sm:$0xff]   ;;  %v1286_v54 = vld [vmem:[%s1597_s1 + $0x1ac] ss:$16 sps:$4 sm:$0xff]   ;;  %v1288_v55 = vld [vmem:[%s1597_s1 + $0x1a0] ss:$16 sps:$4 sm:$0xff]  }
  0x1a   : > { %759 = vmatprep.mubr.bf16.mxu0 %v1304_v46  ;;  %802 = vmatprep.mubr.bf16.mxu1 %v1304_v46  ;;  %v1289_v56 = vld [vmem:[%s1597_s1 + $0x1a8] ss:$16 sps:$4 sm:$0xff]   ;;  %v1290_v57 = vld [vmem:[%s1597_s1 + $0x1c4] ss:$16 sps:$4 sm:$0xff]   ;;  %v1292_v58 = vld [vmem:[%s1597_s1 + $0x1cc] ss:$16 sps:$4 sm:$0xff]  }
  0x1b   : > { %v1294_v59 = vld [vmem:[%s1597_s1 + $0x1c0] ss:$16 sps:$4 sm:$0xff]   ;;  %v1295_v60 = vld [vmem:[%s1597_s1 + $0x1c8] ss:$16 sps:$4 sm:$0xff]   ;;  %v1296_v61 = vld [vmem:[%s1597_s1 + $0x1e4] ss:$16 sps:$4 sm:$0xff]  }
  0x1c   : > { %738 = vmatpush1.bf16.msra.mxu0 %v1240_v22  ;;  %781 = vmatpush1.bf16.msra.mxu1 %v1241_v23  ;;  %v1298_v62 = vld [vmem:[%s1597_s1 + $0x1ec] ss:$16 sps:$4 sm:$0xff]   ;;  %v1300_v63 = vld [vmem:[%s1597_s1 + $0x1e0] ss:$16 sps:$4 sm:$0xff]   ;;  %v1301_v0 = vld [vmem:[%s1597_s1 + $0x1e8] ss:$16 sps:$4 sm:$0xff]  }
  0x1d   : > { %739 = vmatprep.subr.bf16.mxu0 %v1242_v24  ;;  %782 = vmatprep.subr.bf16.mxu1 %v1244_v25  ;;  %v1302_v1 = vld [vmem:[%s1516_s24] ss:$8 sps:$4 sm:$0xff]   ;;  %v872_v7 = vsub.s32 1, %v867_v3  ;;  %v880_v8 = vsub.s32 3, %v867_v3  ;;  %s1177_s24 = sshll.u32 %s1606_s9, 4 }
  0x1e   : > { %v864_v6 = vld [vmem:[%s1598_s2] sm:$0xf]  ;;  %s328_s27 = scalar_lea.vmem %s1600_s4, %s1177_s24 }
  0x1f   : > { %v894_v9 = vld [vmem:[%s1599_s3] sm:$0xf]  ;;  %v869_v10 = vrot.slane %v864_v6, %v868_v4  ;;  %v877_v11 = vrot.slane %v864_v6, %v876_v5  ;;  %v873_v12 = vrot.slane %v864_v6, %v872_v7  ;;  %v881_v13 = vrot.slane %v864_v6, %v880_v8 }
  0x20   : > { %740 = vmatpush1.bf16.msra.mxu0 %v1246_v26  ;;  %783 = vmatpush1.bf16.msra.mxu1 %v1247_v27  ;;  %v899_v14 = vrot.slane %v894_v9, %v868_v4  ;;  %v907_v15 = vrot.slane %v894_v9, %v876_v5  ;;  %v903_v18 = vrot.slane %v894_v9, %v872_v7 }
  0x21   : > { %741 = vmatprep.subr.bf16.mxu0 %v1248_v28  ;;  %784 = vmatprep.subr.bf16.mxu1 %v1250_v29  ;;  %v911_v19 = vrot.slane %v894_v9, %v880_v8 }
  0x24   : > { %742 = vmatpush1.bf16.msra.mxu0 %v1252_v30  ;;  %785 = vmatpush1.bf16.msra.mxu1 %v1253_v31 }
  0x25   : > { %743 = vmatprep.subr.bf16.mxu0 %v1254_v32  ;;  %786 = vmatprep.subr.bf16.mxu1 %v1256_v33 }
  0x28   : > { %744 = vmatpush1.bf16.msra.mxu0 %v1258_v34  ;;  %787 = vmatpush1.bf16.msra.mxu1 %v1259_v35 }
  0x29   : > { %745 = vmatprep.subr.bf16.mxu0 %v1260_v36  ;;  %788 = vmatprep.subr.bf16.mxu1 %v1262_v37 }
  0x2c   : > { %746 = vmatpush1.bf16.msra.mxu0 %v1264_v38  ;;  %789 = vmatpush1.bf16.msra.mxu1 %v1265_v39 }
  0x2d   : > { %747 = vmatprep.subr.bf16.mxu0 %v1266_v40  ;;  %790 = vmatprep.subr.bf16.mxu1 %v1268_v41 }
  0x30   : > { %748 = vmatpush1.bf16.msra.mxu0 %v1270_v42  ;;  %791 = vmatpush1.bf16.msra.mxu1 %v1271_v43 }
  0x31   : > { %749 = vmatprep.subr.bf16.mxu0 %v1272_v44  ;;  %792 = vmatprep.subr.bf16.mxu1 %v1274_v45 }
  0x34   : > { %750 = vmatpush1.bf16.msra.mxu0 %v1276_v47  ;;  %793 = vmatpush1.bf16.msra.mxu1 %v1277_v48 }
  0x35   : > { %751 = vmatprep.subr.bf16.mxu0 %v1278_v49  ;;  %794 = vmatprep.subr.bf16.mxu1 %v1280_v50 }
  0x38   : > { %752 = vmatpush1.bf16.msra.mxu0 %v1282_v51  ;;  %795 = vmatpush1.bf16.msra.mxu1 %v1283_v52 }
  0x39   : > { %753 = vmatprep.subr.bf16.mxu0 %v1284_v53  ;;  %796 = vmatprep.subr.bf16.mxu1 %v1286_v54 }
  0x3c   : > { %754 = vmatpush1.bf16.msra.mxu0 %v1288_v55  ;;  %797 = vmatpush1.bf16.msra.mxu1 %v1289_v56 }
  0x3d   : > { %755 = vmatprep.subr.bf16.mxu0 %v1290_v57  ;;  %798 = vmatprep.subr.bf16.mxu1 %v1292_v58 }
  0x40   : > { %756 = vmatpush1.bf16.msra.mxu0 %v1294_v59  ;;  %799 = vmatpush1.bf16.msra.mxu1 %v1295_v60 }
  0x41   : > { %757 = vmatprep.subr.bf16.mxu0 %v1296_v61  ;;  %800 = vmatprep.subr.bf16.mxu1 %v1298_v62 }
  0x44   : > { %758 = vmatpush1.bf16.msra.mxu0 %v1300_v63  ;;  %801 = vmatpush1.bf16.msra.mxu1 %v1301_v0 }
  0x47   : > { %760 = vmatmul.mubr.bf16.vlgmr.msra.gmra.mrb[0].mxu0 %v1302_v1  ;;  %803 = vmatmul.mubr.bf16.vlgmr.msra.gmra.mrb[0].mxu1 %v1302_v1 }
 0x11a   : > { %v761_v16 = vpop.f32.mrb[0].mxu0  ;;  %v804_v17 = vpop.f32.mrb[0].mxu1 }
 0x11b   : > { %v886_v20 = vmul.f32 %v869_v10, %v761_v16  ;;  %v888_v21 = vmul.f32 %v877_v11, %v804_v17  ;;  %v763_v22 = vpop.f32.mrb[1].mxu0  ;;  %v806_v23 = vpop.f32.mrb[1].mxu1 }
 0x11c   : > { %v887_v24 = vmul.f32 %v873_v12, %v763_v22  ;;  %v889_v25 = vmul.f32 %v881_v13, %v806_v23  ;;  %v765_v26 = vpop.f32.mrb[2].mxu0  ;;  %v808_v27 = vpop.f32.mrb[2].mxu1 }
 0x11d   : > { %v916_v28 = vadd.f32 %v899_v14, %v886_v20  ;;  %v918_v29 = vadd.f32 %v907_v15, %v888_v21  ;;  %v890_v30 = vmul.f32 %v869_v10, %v765_v26  ;;  %v892_v31 = vmul.f32 %v877_v11, %v808_v27  ;;  %v767_v32 = vpop.f32.mrb[3].mxu0  ;;  %v810_v33 = vpop.f32.mrb[3].mxu1 }
 0x11e   : > { %v917_v34 = vadd.f32 %v903_v18, %v887_v24  ;;  %v919_v35 = vadd.f32 %v911_v19, %v889_v25  ;;  %v891_v36 = vmul.f32 %v873_v12, %v767_v32  ;;  %v893_v37 = vmul.f32 %v881_v13, %v810_v33 }
 0x11f   : > { %v920_v38 = vadd.f32 %v899_v14, %v890_v30  ;;  %v922_v39 = vadd.f32 %v907_v15, %v892_v31 }
 0x120   : > { %v1178_v40 = vpack.c.bf16 %v917_v34, %v916_v28  ;;  %v1179_v41 = vpack.c.bf16 %v919_v35, %v918_v29  ;;  %v921_v42 = vadd.f32 %v903_v18, %v891_v36  ;;  %v923_v43 = vadd.f32 %v911_v19, %v893_v37 }
 0x122   : > { %948 = vst [vmem:[%s328_s27] sm:$0xff] %v1178_v40  ;;  %949 = vst [vmem:[%s328_s27 + $0x8] sm:$0xff] %v1179_v41  ;;  %v1180_v44 = vpack.c.bf16 %v921_v42, %v920_v38  ;;  %v1181_v45 = vpack.c.bf16 %v923_v43, %v922_v39 }
 0x124   : > { %950 = vst [vmem:[%s328_s27 + $0x10] sm:$0xff] %v1180_v44  ;;  %951 = vst [vmem:[%s328_s27 + $0x18] sm:$0xff] %v1181_v45 }
 0x125 PF: > { %s14_s17 = sadd.s32 1, %s1327_s17   ;;  %s1601_s15 = smov %s1323_s16 }
 0x126   : > { %p11_p5 = scmp.ge.s32.totalorder %s14_s17, 4   ;;  %s1602_s16 = smov %s1604_s18 }
 0x128   :  { %13 = sbr.rel (!%p11_p5) target bundleno = 2 (0x2), region = 87 }

// kernel: resnet34_8s_fuse_forward.106
= control target key start
LH: loop header
LB: loop body
LE: loop exit
PB: predicated region body
PF: predicated region fallthrough
CT: control target
= control target key end

     0   :  { %s2221_s18 = smov 0   ;;  %s2223_s19 = smov 0   ;;  %s2473_s0 = inlined_call_operand.vmem [shape: bf16[32,4608], index: 0, kind: input, shape index: {}]   ;;  %s2474_s1 = inlined_call_operand.vmem [shape: bf16[4608,512], index: 1, kind: input, shape index: {}]   ;;  %s2475_s2 = inlined_call_operand.vmem [shape: f32[1,512], index: 2, kind: input, shape index: {}]   ;;  %s2476_s3 = inlined_call_operand.vmem [shape: f32[1,512], index: 3, kind: input, shape index: {}]   ;;  %s2477_s4 = inlined_call_operand.vmem [shape: bf16[32,512], index: 4, kind: input, shape index: {}]   ;;  %s2478_s5 = inlined_call_operand.vmem [shape: bf16[32,512], index: 5, kind: output, shape index: {}]  }
   0x1   :  { %s2225_s20 = smov 0   ;;  %s2227_s21 = smov 0  }
   0x2   :  { %s2229_s22 = smov 0   ;;  %s2231_s23 = smov 0  }
   0x3   :  { %s2233_s24 = smov 0  }
   0x4 LB: > { %s27_s25 = sadd.s32 1, %s2181_s22  ;;  %s34_s26 = sadd.s32 1, %s2185_s23  ;;  %s2189_s24 = sphi %s2233_s24, %s15_s24   ;;  %s2185_s23 = sphi %s2231_s23, %s2484_s23   ;;  %s2181_s22 = sphi %s2229_s22, %s2483_s22   ;;  %s2177_s21 = sphi %s2227_s21, %s2482_s21   ;;  %s2173_s20 = sphi %s2225_s20, %s2481_s20   ;;  %s2169_s19 = sphi %s2223_s19, %s2480_s19   ;;  %s2165_s18 = sphi %s2221_s18, %s2479_s18  }
   0x5   : > { %p28_p0 = scmp.ge.s32.totalorder %s27_s25, 9  ;;  %p50_p1 = scmp.ne.s32.totalorder %s2169_s19, %s2165_s18 }
   0x6   : > { %p51_p2 = scmp.eq.s32.totalorder %s2189_s24, 0  ;;  %s43_s30 = sadd.s32 1, %s2169_s19 }
   0x7   : > { %s2486_s25 = smov (%p28_p0, %s27_s25), 0  ;;  %s2488_s26 = smov (!%p28_p0, %s34_s26), %s2185_s23 }
   0x8   : > { %p52_p3 = por %p51_p2, %p50_p1  ;;  %p36_p4 = scmp.ge.s32.totalorder %s2488_s26, 2 }
   0x9   : > { %s39_s27 = ssub.s32 %s2181_s22, %s2486_s25  ;;  %p1707_p6 = scmp.ge.s32.totalorder %s2189_s24, 18 }
   0xa   : > { %s2490_s26 = smov (%p36_p4, %s2488_s26), 0 }
   0xb   : > { %s38_s28 = ssub.s32 %s2185_s23, %s2490_s26  ;;  %228 = sbr.rel (%p1707_p6) target bundleno = 28 (0x1c), region = 24 }
   0xc   : > { %s40_s29 = sor.u32 %s39_s27, %s38_s28 }
   0xd   : > { %p41_p5 = scmp.eq.s32.totalorder %s40_s29, 0 }
   0xf   : > { %s2272_s6 = scalar_select %p41_p5, %s2169_s19, %s43_s30  }
  0x12   : > { %231 = sbr.rel (!%p52_p3) target bundleno = 28 (0x1c), region = 28  ;;  %s233_s7 = sand.u32 (%p52_p3), 1, %s2169_s19  }
  0x13   : > { %s1710_s8 = sshll.u32 (%p52_p3), %s2181_s22, 2  ;;  %s1708_s9 = sshll.u32 (%p52_p3), %s233_s7, 5 }
  0x14   : > { %s1880_s10 = smul.u32 (%p52_p3), 72, %s2185_s23  ;;  %s235_s16 = scalar_lea.vmem (%p52_p3), [#allocation3], %s1708_s9 }
  0x16   : > { %s239_s11 = sadd.s32 (%p52_p3), %s1880_s10, %s1710_s8 }
  0x17   : > { %s1712_s12 = sshll.u32 (%p52_p3), %s239_s11, 2 }
  0x18   : > { %s241_s15 = scalar_lea.vmem (%p52_p3), %s2473_s0, %s1712_s12 }
  0x19   : > { %v254_v0 = vld [vmem:[%s241_s15] sm:$0xff]  ;;  %v256_v1 = vld [vmem:[%s241_s15 + $0x8] sm:$0xff]  ;;  %v258_v2 = vld [vmem:[%s241_s15 + $0x90] sm:$0xff] }
  0x1a   : > { %255 = vst [vmem:[%s235_s16] sm:$0xff] %v254_v0  ;;  %257 = vst [vmem:[%s235_s16 + $0x8] sm:$0xff] %v256_v1  ;;  %v260_v3 = vld [vmem:[%s241_s15 + $0x98] sm:$0xff] }
  0x1b   : > { %259 = vst [vmem:[%s235_s16 + $0x10] sm:$0xff] %v258_v2  ;;  %261 = vst [vmem:[%s235_s16 + $0x18] sm:$0xff] %v260_v3 }
  0x1c PF: > { %p1713_p7 = scmp.ge.s32.totalorder %s2189_s24, 1  ;;  %p296_p8 = scmp.lt.s32.totalorder %s2189_s24, 19 }
  0x1e   : > { %p297_p9 = pnand %p1713_p7, %p296_p8 }
  0x1f   : > { %s1715_s17 = sshll.u32 (!%p297_p9), %s2173_s20, 6  ;;  %s1718_s27 = sshll.u32 (!%p297_p9), %s2177_s21, 1 }
  0x20   : > { %300 = sbr.rel (%p297_p9) target bundleno = 419 (0x1a3), region = 59  ;;  %p367_p10 = scmp.lt.s32.totalorder (!%p297_p9), %s1715_s17, 575 }
  0x21   : > { %p389_p11 = scmp.lt.s32.totalorder (!%p297_p9), %s1718_s27, 3  ;;  %s303_s14 = sand.u32 (!%p297_p9), 1, %s2165_s18  }
  0x22   : > { %s1714_s15 = sshll.u32 (!%p297_p9), %s303_s14, 5  ;;  %p1856_p12 = scmp.ne.s32.totalorder (!%p297_p9), %s2173_s20, 0 }
  0x23   : > { %s2348_s18 = scalar_lea.vmem (!%p297_p9), [#allocation3], %s1714_s15 }
  0x24   : > { %v2035_v52 = vld [vmem:[%s2348_s18 + $0x4] ss:$16 sps:$4 sm:$0xff] (!%p297_p9)  }
  0x25   : > { %1235 = vmatprep.mubr.bf16.mxu0 (!%p297_p9), %v2035_v52  ;;  %1321 = vmatprep.mubr.bf16.mxu1 (!%p297_p9), %v2035_v52 }
  0x27   : > { %s2492_s17 = smov (!%p367_p10, %s1715_s17), 575  ;;  %s2494_s27 = smov (!%p389_p11, %s1718_s27), 3 }
  0x28   : > { %s1865_s28 = sshll.u32 %s2492_s17, 4  ;;  %s1866_s8 = sshll.u32 %s2494_s27, 4 }
  0x29   : > { %s2288_s7 = scalar_lea.vmem %s2474_s1, %s1865_s28  ;;  %s2293_s10 = scalar_lea.vmem %s2477_s4, %s1866_s8 }
  0x2a   : > { %s2298_s13 = scalar_lea.vmem %s2478_s5, %s1866_s8  ;;  %v1937_v4 = vld [vmem:[%s2288_s7 + $0x4] ss:$16 sps:$4 sm:$0xff]   ;;  %v1939_v5 = vld [vmem:[%s2288_s7 + $0xc] ss:$16 sps:$4 sm:$0xff]   ;;  %v1941_v6 = vld [vmem:[%s2288_s7] ss:$16 sps:$4 sm:$0xff]  }
  0x2b   : > { %1203 = vmatprep.subr.bf16.mxu0 %v1937_v4  ;;  %v1942_v7 = vld [vmem:[%s2288_s7 + $0x8] ss:$16 sps:$4 sm:$0xff]   ;;  %1289 = vmatprep.subr.bf16.mxu1 %v1939_v5  ;;  %v1943_v8 = vld [vmem:[%s2288_s7 + $0x24] ss:$16 sps:$4 sm:$0xff]   ;;  %v1945_v9 = vld [vmem:[%s2288_s7 + $0x2c] ss:$16 sps:$4 sm:$0xff]  }
  0x2c   : > { %1204 = vmatpush1.bf16.msra.mxu0 %v1941_v6  ;;  %1290 = vmatpush1.bf16.msra.mxu1 %v1942_v7  ;;  %v1947_v10 = vld [vmem:[%s2288_s7 + $0x20] ss:$16 sps:$4 sm:$0xff]   ;;  %v1948_v11 = vld [vmem:[%s2288_s7 + $0x28] ss:$16 sps:$4 sm:$0xff]   ;;  %v1949_v12 = vld [vmem:[%s2288_s7 + $0x44] ss:$16 sps:$4 sm:$0xff]  }
  0x2d   : > { %1205 = vmatprep.subr.bf16.mxu0 %v1943_v8  ;;  %1291 = vmatprep.subr.bf16.mxu1 %v1945_v9  ;;  %v1951_v13 = vld [vmem:[%s2288_s7 + $0x4c] ss:$16 sps:$4 sm:$0xff]   ;;  %v1953_v14 = vld [vmem:[%s2288_s7 + $0x40] ss:$16 sps:$4 sm:$0xff]   ;;  %v1954_v15 = vld [vmem:[%s2288_s7 + $0x48] ss:$16 sps:$4 sm:$0xff]  }
  0x2e   : > { %v1955_v16 = vld [vmem:[%s2288_s7 + $0x64] ss:$16 sps:$4 sm:$0xff]   ;;  %v1957_v17 = vld [vmem:[%s2288_s7 + $0x6c] ss:$16 sps:$4 sm:$0xff]   ;;  %v1959_v18 = vld [vmem:[%s2288_s7 + $0x60] ss:$16 sps:$4 sm:$0xff]  }
  0x2f   : > { %v1960_v19 = vld [vmem:[%s2288_s7 + $0x68] ss:$16 sps:$4 sm:$0xff]   ;;  %v1961_v20 = vld [vmem:[%s2288_s7 + $0x84] ss:$16 sps:$4 sm:$0xff]   ;;  %v1963_v21 = vld [vmem:[%s2288_s7 + $0x8c] ss:$16 sps:$4 sm:$0xff]  }
  0x30   : > { %1206 = vmatpush1.bf16.msra.mxu0 %v1947_v10  ;;  %1292 = vmatpush1.bf16.msra.mxu1 %v1948_v11  ;;  %v1965_v22 = vld [vmem:[%s2288_s7 + $0x80] ss:$16 sps:$4 sm:$0xff]   ;;  %v1966_v23 = vld [vmem:[%s2288_s7 + $0x88] ss:$16 sps:$4 sm:$0xff]   ;;  %v1967_v24 = vld [vmem:[%s2288_s7 + $0xa4] ss:$16 sps:$4 sm:$0xff]  }
  0x31   : > { %1207 = vmatprep.subr.bf16.mxu0 %v1949_v12  ;;  %1293 = vmatprep.subr.bf16.mxu1 %v1951_v13  ;;  %v1969_v25 = vld [vmem:[%s2288_s7 + $0xac] ss:$16 sps:$4 sm:$0xff]   ;;  %v1971_v26 = vld [vmem:[%s2288_s7 + $0xa0] ss:$16 sps:$4 sm:$0xff]   ;;  %v1972_v27 = vld [vmem:[%s2288_s7 + $0xa8] ss:$16 sps:$4 sm:$0xff]  }
  0x32   : > { %v1973_v28 = vld [vmem:[%s2288_s7 + $0xc4] ss:$16 sps:$4 sm:$0xff]   ;;  %v1975_v29 = vld [vmem:[%s2288_s7 + $0xcc] ss:$16 sps:$4 sm:$0xff]   ;;  %v1977_v30 = vld [vmem:[%s2288_s7 + $0xc0] ss:$16 sps:$4 sm:$0xff]  }
  0x33   : > { %v1978_v31 = vld [vmem:[%s2288_s7 + $0xc8] ss:$16 sps:$4 sm:$0xff]   ;;  %v1979_v32 = vld [vmem:[%s2288_s7 + $0xe4] ss:$16 sps:$4 sm:$0xff]   ;;  %v1981_v33 = vld [vmem:[%s2288_s7 + $0xec] ss:$16 sps:$4 sm:$0xff]  }
  0x34   : > { %1208 = vmatpush1.bf16.msra.mxu0 %v1953_v14  ;;  %1294 = vmatpush1.bf16.msra.mxu1 %v1954_v15  ;;  %v1983_v34 = vld [vmem:[%s2288_s7 + $0xe0] ss:$16 sps:$4 sm:$0xff]   ;;  %v1984_v35 = vld [vmem:[%s2288_s7 + $0xe8] ss:$16 sps:$4 sm:$0xff]   ;;  %v1985_v36 = vld [vmem:[%s2288_s7 + $0x104] ss:$16 sps:$4 sm:$0xff]  }
  0x35   : > { %1209 = vmatprep.subr.bf16.mxu0 %v1955_v16  ;;  %1295 = vmatprep.subr.bf16.mxu1 %v1957_v17  ;;  %v1987_v37 = vld [vmem:[%s2288_s7 + $0x10c] ss:$16 sps:$4 sm:$0xff]   ;;  %v1989_v38 = vld [vmem:[%s2288_s7 + $0x100] ss:$16 sps:$4 sm:$0xff]   ;;  %v1990_v39 = vld [vmem:[%s2288_s7 + $0x108] ss:$16 sps:$4 sm:$0xff]  }
  0x36   : > { %v1991_v40 = vld [vmem:[%s2288_s7 + $0x124] ss:$16 sps:$4 sm:$0xff]   ;;  %v1993_v41 = vld [vmem:[%s2288_s7 + $0x12c] ss:$16 sps:$4 sm:$0xff]   ;;  %v1995_v42 = vld [vmem:[%s2288_s7 + $0x120] ss:$16 sps:$4 sm:$0xff]  }
  0x37   : > { %v1996_v43 = vld [vmem:[%s2288_s7 + $0x128] ss:$16 sps:$4 sm:$0xff]   ;;  %v1997_v44 = vld [vmem:[%s2288_s7 + $0x144] ss:$16 sps:$4 sm:$0xff]   ;;  %v1999_v45 = vld [vmem:[%s2288_s7 + $0x14c] ss:$16 sps:$4 sm:$0xff]  }
  0x38   : > { %1210 = vmatpush1.bf16.msra.mxu0 %v1959_v18  ;;  %1296 = vmatpush1.bf16.msra.mxu1 %v1960_v19  ;;  %v2001_v46 = vld [vmem:[%s2288_s7 + $0x140] ss:$16 sps:$4 sm:$0xff]   ;;  %v2002_v47 = vld [vmem:[%s2288_s7 + $0x148] ss:$16 sps:$4 sm:$0xff]   ;;  %v2003_v48 = vld [vmem:[%s2288_s7 + $0x164] ss:$16 sps:$4 sm:$0xff]  }
  0x39   : > { %1211 = vmatprep.subr.bf16.mxu0 %v1961_v20  ;;  %1297 = vmatprep.subr.bf16.mxu1 %v1963_v21  ;;  %v2005_v49 = vld [vmem:[%s2288_s7 + $0x16c] ss:$16 sps:$4 sm:$0xff]   ;;  %v2007_v50 = vld [vmem:[%s2288_s7 + $0x160] ss:$16 sps:$4 sm:$0xff]   ;;  %v2008_v51 = vld [vmem:[%s2288_s7 + $0x168] ss:$16 sps:$4 sm:$0xff]  }
  0x3a   : > { %v2009_v53 = vld [vmem:[%s2288_s7 + $0x184] ss:$16 sps:$4 sm:$0xff]   ;;  %v2011_v54 = vld [vmem:[%s2288_s7 + $0x18c] ss:$16 sps:$4 sm:$0xff]   ;;  %v2013_v55 = vld [vmem:[%s2288_s7 + $0x180] ss:$16 sps:$4 sm:$0xff]  }
  0x3b   : > { %v2014_v56 = vld [vmem:[%s2288_s7 + $0x188] ss:$16 sps:$4 sm:$0xff]   ;;  %v2015_v57 = vld [vmem:[%s2288_s7 + $0x1a4] ss:$16 sps:$4 sm:$0xff]   ;;  %v2017_v58 = vld [vmem:[%s2288_s7 + $0x1ac] ss:$16 sps:$4 sm:$0xff]  }
  0x3c   : > { %1212 = vmatpush1.bf16.msra.mxu0 %v1965_v22  ;;  %1298 = vmatpush1.bf16.msra.mxu1 %v1966_v23  ;;  %v2019_v59 = vld [vmem:[%s2288_s7 + $0x1a0] ss:$16 sps:$4 sm:$0xff]   ;;  %v2020_v60 = vld [vmem:[%s2288_s7 + $0x1a8] ss:$16 sps:$4 sm:$0xff]   ;;  %v2021_v61 = vld [vmem:[%s2288_s7 + $0x1c4] ss:$16 sps:$4 sm:$0xff]  }
  0x3d   : > { %1213 = vmatprep.subr.bf16.mxu0 %v1967_v24  ;;  %1299 = vmatprep.subr.bf16.mxu1 %v1969_v25  ;;  %v2023_v62 = vld [vmem:[%s2288_s7 + $0x1cc] ss:$16 sps:$4 sm:$0xff]   ;;  %v2025_v63 = vld [vmem:[%s2288_s7 + $0x1c0] ss:$16 sps:$4 sm:$0xff]   ;;  %v2026_v0 = vld [vmem:[%s2288_s7 + $0x1c8] ss:$16 sps:$4 sm:$0xff]  }
  0x3e   : > { %v2027_v1 = vld [vmem:[%s2288_s7 + $0x1e4] ss:$16 sps:$4 sm:$0xff]   ;;  %v2029_v2 = vld [vmem:[%s2288_s7 + $0x1ec] ss:$16 sps:$4 sm:$0xff]   ;;  %v2031_v3 = vld [vmem:[%s2288_s7 + $0x1e0] ss:$16 sps:$4 sm:$0xff]  }
  0x3f   : > { %v2032_v4 = vld [vmem:[%s2288_s7 + $0x1e8] ss:$16 sps:$4 sm:$0xff]   ;;  %v2038_v5 = vld [vmem:[%s2288_s7 + $0x204] ss:$16 sps:$4 sm:$0xff]   ;;  %v2041_v6 = vld [vmem:[%s2288_s7 + $0x20c] ss:$16 sps:$4 sm:$0xff]  }
  0x40   : > { %1214 = vmatpush1.bf16.msra.mxu0 %v1971_v26  ;;  %1300 = vmatpush1.bf16.msra.mxu1 %v1972_v27  ;;  %v2033_v7 = vld [vmem:[%s2348_s18] ss:$16 sps:$4 sm:$0xff]   ;;  %v2039_v9 = vld [vmem:[%s2288_s7 + $0x208] ss:$16 sps:$4 sm:$0xff]   ;;  %v2044_v10 = vld [vmem:[%s2288_s7 + $0x224] ss:$16 sps:$4 sm:$0xff]  }
  0x41   : > { %1215 = vmatprep.subr.bf16.mxu0 %v1973_v28  ;;  %1301 = vmatprep.subr.bf16.mxu1 %v1975_v29  ;;  %v2036_v8 = vld [vmem:[%s2288_s7 + $0x200] ss:$16 sps:$4 sm:$0xff]   ;;  %v2047_v11 = vld [vmem:[%s2288_s7 + $0x22c] ss:$16 sps:$4 sm:$0xff]   ;;  %v2045_v13 = vld [vmem:[%s2288_s7 + $0x228] ss:$16 sps:$4 sm:$0xff]  }
  0x42   : > { %v2042_v12 = vld [vmem:[%s2288_s7 + $0x220] ss:$16 sps:$4 sm:$0xff]   ;;  %v2050_v14 = vld [vmem:[%s2288_s7 + $0x244] ss:$16 sps:$4 sm:$0xff]   ;;  %v2053_v15 = vld [vmem:[%s2288_s7 + $0x24c] ss:$16 sps:$4 sm:$0xff]  }
  0x43   : > { %v2048_v16 = vld [vmem:[%s2288_s7 + $0x240] ss:$16 sps:$4 sm:$0xff]   ;;  %v2051_v17 = vld [vmem:[%s2288_s7 + $0x248] ss:$16 sps:$4 sm:$0xff]   ;;  %v2056_v18 = vld [vmem:[%s2288_s7 + $0x264] ss:$16 sps:$4 sm:$0xff]  }
  0x44   : > { %1216 = vmatpush1.bf16.msra.mxu0 %v1977_v30  ;;  %1302 = vmatpush1.bf16.msra.mxu1 %v1978_v31  ;;  %v2059_v19 = vld [vmem:[%s2288_s7 + $0x26c] ss:$16 sps:$4 sm:$0xff]   ;;  %v2054_v20 = vld [vmem:[%s2288_s7 + $0x260] ss:$16 sps:$4 sm:$0xff]   ;;  %v2057_v21 = vld [vmem:[%s2288_s7 + $0x268] ss:$16 sps:$4 sm:$0xff]  }
  0x45   : > { %1217 = vmatprep.subr.bf16.mxu0 %v1979_v32  ;;  %1303 = vmatprep.subr.bf16.mxu1 %v1981_v33  ;;  %v2062_v22 = vld [vmem:[%s2288_s7 + $0x284] ss:$16 sps:$4 sm:$0xff]   ;;  %v2065_v23 = vld [vmem:[%s2288_s7 + $0x28c] ss:$16 sps:$4 sm:$0xff]   ;;  %v2060_v24 = vld [vmem:[%s2288_s7 + $0x280] ss:$16 sps:$4 sm:$0xff]  }
  0x46   : > { %v2063_v25 = vld [vmem:[%s2288_s7 + $0x288] ss:$16 sps:$4 sm:$0xff]   ;;  %v2068_v26 = vld [vmem:[%s2288_s7 + $0x2a4] ss:$16 sps:$4 sm:$0xff]   ;;  %v2071_v27 = vld [vmem:[%s2288_s7 + $0x2ac] ss:$16 sps:$4 sm:$0xff]  }
  0x47   : > { %v2066_v28 = vld [vmem:[%s2288_s7 + $0x2a0] ss:$16 sps:$4 sm:$0xff]   ;;  %v2069_v29 = vld [vmem:[%s2288_s7 + $0x2a8] ss:$16 sps:$4 sm:$0xff]   ;;  %v2074_v30 = vld [vmem:[%s2288_s7 + $0x2c4] ss:$16 sps:$4 sm:$0xff]  }
  0x48   : > { %1218 = vmatpush1.bf16.msra.mxu0 %v1983_v34  ;;  %1304 = vmatpush1.bf16.msra.mxu1 %v1984_v35  ;;  %v2077_v31 = vld [vmem:[%s2288_s7 + $0x2cc] ss:$16 sps:$4 sm:$0xff]   ;;  %v2072_v33 = vld [vmem:[%s2288_s7 + $0x2c0] ss:$16 sps:$4 sm:$0xff]   ;;  %v2075_v34 = vld [vmem:[%s2288_s7 + $0x2c8] ss:$16 sps:$4 sm:$0xff]  }
  0x49   : > { %1219 = vmatprep.subr.bf16.mxu0 %v1985_v36  ;;  %1305 = vmatprep.subr.bf16.mxu1 %v1987_v37  ;;  %v2134_v32 = vld [vmem:[%s2348_s18 + $0xc] ss:$16 sps:$4 sm:$0xff]   ;;  %v2080_v35 = vld [vmem:[%s2288_s7 + $0x2e4] ss:$16 sps:$4 sm:$0xff]   ;;  %v2078_v37 = vld [vmem:[%s2288_s7 + $0x2e0] ss:$16 sps:$4 sm:$0xff]  }
  0x4a   : > { %v2083_v36 = vld [vmem:[%s2288_s7 + $0x2ec] ss:$16 sps:$4 sm:$0xff]  }
  0x4b   : > { %v2107_v52 = vld [vmem:[%s2288_s7 + $0x36c] ss:$16 sps:$4 sm:$0xff]  }
  0x4c   : > { %1220 = vmatpush1.bf16.msra.mxu0 %v1989_v38  ;;  %1306 = vmatpush1.bf16.msra.mxu1 %v1990_v39  ;;  %v2081_v38 = vld [vmem:[%s2288_s7 + $0x2e8] ss:$16 sps:$4 sm:$0xff]   ;;  %v2086_v39 = vld [vmem:[%s2288_s7 + $0x304] ss:$16 sps:$4 sm:$0xff]  }
  0x4d   : > { %1221 = vmatprep.subr.bf16.mxu0 %v1991_v40  ;;  %1307 = vmatprep.subr.bf16.mxu1 %v1993_v41  ;;  %v2089_v40 = vld [vmem:[%s2288_s7 + $0x30c] ss:$16 sps:$4 sm:$0xff]   ;;  %v2084_v41 = vld [vmem:[%s2288_s7 + $0x300] ss:$16 sps:$4 sm:$0xff]  }
  0x50   : > { %1222 = vmatpush1.bf16.msra.mxu0 %v1995_v42  ;;  %1308 = vmatpush1.bf16.msra.mxu1 %v1996_v43  ;;  %v2087_v42 = vld [vmem:[%s2288_s7 + $0x308] ss:$16 sps:$4 sm:$0xff]   ;;  %v2092_v43 = vld [vmem:[%s2288_s7 + $0x324] ss:$16 sps:$4 sm:$0xff]  }
  0x51   : > { %1223 = vmatprep.subr.bf16.mxu0 %v1997_v44  ;;  %1309 = vmatprep.subr.bf16.mxu1 %v1999_v45  ;;  %v2095_v44 = vld [vmem:[%s2288_s7 + $0x32c] ss:$16 sps:$4 sm:$0xff]   ;;  %v2090_v45 = vld [vmem:[%s2288_s7 + $0x320] ss:$16 sps:$4 sm:$0xff]  }
  0x54   : > { %1224 = vmatpush1.bf16.msra.mxu0 %v2001_v46  ;;  %1310 = vmatpush1.bf16.msra.mxu1 %v2002_v47  ;;  %v2093_v46 = vld [vmem:[%s2288_s7 + $0x328] ss:$16 sps:$4 sm:$0xff]   ;;  %v2098_v47 = vld [vmem:[%s2288_s7 + $0x344] ss:$16 sps:$4 sm:$0xff]  }
  0x55   : > { %1225 = vmatprep.subr.bf16.mxu0 %v2003_v48  ;;  %1311 = vmatprep.subr.bf16.mxu1 %v2005_v49  ;;  %v2101_v48 = vld [vmem:[%s2288_s7 + $0x34c] ss:$16 sps:$4 sm:$0xff]   ;;  %v2096_v49 = vld [vmem:[%s2288_s7 + $0x340] ss:$16 sps:$4 sm:$0xff]  }
  0x58   : > { %1226 = vmatpush1.bf16.msra.mxu0 %v2007_v50  ;;  %1312 = vmatpush1.bf16.msra.mxu1 %v2008_v51  ;;  %v2099_v50 = vld [vmem:[%s2288_s7 + $0x348] ss:$16 sps:$4 sm:$0xff]   ;;  %v2104_v51 = vld [vmem:[%s2288_s7 + $0x364] ss:$16 sps:$4 sm:$0xff]  }
  0x59   : > { %1227 = vmatprep.subr.bf16.mxu0 %v2009_v53  ;;  %1313 = vmatprep.subr.bf16.mxu1 %v2011_v54  ;;  %v2102_v53 = vld [vmem:[%s2288_s7 + $0x360] ss:$16 sps:$4 sm:$0xff]   ;;  %v2105_v54 = vld [vmem:[%s2288_s7 + $0x368] ss:$16 sps:$4 sm:$0xff]  }
  0x5c   : > { %1228 = vmatpush1.bf16.msra.mxu0 %v2013_v55  ;;  %1314 = vmatpush1.bf16.msra.mxu1 %v2014_v56  ;;  %v2110_v55 = vld [vmem:[%s2288_s7 + $0x384] ss:$16 sps:$4 sm:$0xff]   ;;  %v2113_v56 = vld [vmem:[%s2288_s7 + $0x38c] ss:$16 sps:$4 sm:$0xff]  }
  0x5d   : > { %1229 = vmatprep.subr.bf16.mxu0 %v2015_v57  ;;  %1315 = vmatprep.subr.bf16.mxu1 %v2017_v58  ;;  %v2108_v57 = vld [vmem:[%s2288_s7 + $0x380] ss:$16 sps:$4 sm:$0xff]   ;;  %v2111_v58 = vld [vmem:[%s2288_s7 + $0x388] ss:$16 sps:$4 sm:$0xff]  }
  0x60   : > { %1230 = vmatpush1.bf16.msra.mxu0 %v2019_v59  ;;  %1316 = vmatpush1.bf16.msra.mxu1 %v2020_v60  ;;  %v2116_v59 = vld [vmem:[%s2288_s7 + $0x3a4] ss:$16 sps:$4 sm:$0xff]   ;;  %v2119_v60 = vld [vmem:[%s2288_s7 + $0x3ac] ss:$16 sps:$4 sm:$0xff]  }
  0x61   : > { %1231 = vmatprep.subr.bf16.mxu0 %v2021_v61  ;;  %1317 = vmatprep.subr.bf16.mxu1 %v2023_v62  ;;  %v2114_v61 = vld [vmem:[%s2288_s7 + $0x3a0] ss:$16 sps:$4 sm:$0xff]   ;;  %v2117_v62 = vld [vmem:[%s2288_s7 + $0x3a8] ss:$16 sps:$4 sm:$0xff]  }
  0x64   : > { %1232 = vmatpush1.bf16.msra.mxu0 %v2025_v63  ;;  %1318 = vmatpush1.bf16.msra.mxu1 %v2026_v0  ;;  %v2122_v63 = vld [vmem:[%s2288_s7 + $0x3c4] ss:$16 sps:$4 sm:$0xff]   ;;  %v2125_v0 = vld [vmem:[%s2288_s7 + $0x3cc] ss:$16 sps:$4 sm:$0xff]  }
  0x65   : > { %1233 = vmatprep.subr.bf16.mxu0 %v2027_v1  ;;  %1319 = vmatprep.subr.bf16.mxu1 %v2029_v2  ;;  %v2120_v1 = vld [vmem:[%s2288_s7 + $0x3c0] ss:$16 sps:$4 sm:$0xff]   ;;  %v2123_v2 = vld [vmem:[%s2288_s7 + $0x3c8] ss:$16 sps:$4 sm:$0xff]  }
  0x68   : > { %1234 = vmatpush1.bf16.msra.mxu0 %v2031_v3  ;;  %1320 = vmatpush1.bf16.msra.mxu1 %v2032_v4  ;;  %v2128_v3 = vld [vmem:[%s2288_s7 + $0x3e4] ss:$16 sps:$4 sm:$0xff]   ;;  %v2131_v4 = vld [vmem:[%s2288_s7 + $0x3ec] ss:$16 sps:$4 sm:$0xff]  }
  0x69   : > { %1246 = vmatprep.subr.bf16.mxu0 %v2038_v5  ;;  %1332 = vmatprep.subr.bf16.mxu1 %v2041_v6  ;;  %v2126_v5 = vld [vmem:[%s2288_s7 + $0x3e0] ss:$16 sps:$4 sm:$0xff]   ;;  %v2129_v6 = vld [vmem:[%s2288_s7 + $0x3e8] ss:$16 sps:$4 sm:$0xff]  }
  0x6b   : > { %1236 = vmatmul.mubr.bf16.vlgmr.msra.gmra.mrb[0].mxu0 %v2033_v7  ;;  %1322 = vmatmul.mubr.bf16.vlgmr.msra.gmra.mrb[0].mxu1 %v2033_v7  ;;  %v2132_v7 = vld [vmem:[%s2348_s18 + $0x8] ss:$16 sps:$4 sm:$0xff]  }
  0x6c   : > { %1247 = vmatpush1.bf16.msra.mxu0 %v2036_v8  ;;  %1333 = vmatpush1.bf16.msra.mxu1 %v2039_v9 }
  0x6d   : > { %1248 = vmatprep.subr.bf16.mxu0 %v2044_v10  ;;  %1334 = vmatprep.subr.bf16.mxu1 %v2047_v11 }
  0x6e   : > { %1278 = vmatprep.mubr.bf16.mxu0 %v2134_v32  ;;  %1364 = vmatprep.mubr.bf16.mxu1 %v2134_v32 }
  0x70   : > { %1249 = vmatpush1.bf16.msra.mxu0 %v2042_v12  ;;  %1335 = vmatpush1.bf16.msra.mxu1 %v2045_v13 }
  0x71   : > { %1250 = vmatprep.subr.bf16.mxu0 %v2050_v14  ;;  %1336 = vmatprep.subr.bf16.mxu1 %v2053_v15 }
  0x74   : > { %1251 = vmatpush1.bf16.msra.mxu0 %v2048_v16  ;;  %1337 = vmatpush1.bf16.msra.mxu1 %v2051_v17 }
  0x75   : > { %1252 = vmatprep.subr.bf16.mxu0 %v2056_v18  ;;  %1338 = vmatprep.subr.bf16.mxu1 %v2059_v19 }
  0x78   : > { %1253 = vmatpush1.bf16.msra.mxu0 %v2054_v20  ;;  %1339 = vmatpush1.bf16.msra.mxu1 %v2057_v21 }
  0x79   : > { %1254 = vmatprep.subr.bf16.mxu0 %v2062_v22  ;;  %1340 = vmatprep.subr.bf16.mxu1 %v2065_v23 }
  0x7c   : > { %1255 = vmatpush1.bf16.msra.mxu0 %v2060_v24  ;;  %1341 = vmatpush1.bf16.msra.mxu1 %v2063_v25 }
  0x7d   : > { %1256 = vmatprep.subr.bf16.mxu0 %v2068_v26  ;;  %1342 = vmatprep.subr.bf16.mxu1 %v2071_v27 }
  0x80   : > { %1257 = vmatpush1.bf16.msra.mxu0 %v2066_v28  ;;  %1343 = vmatpush1.bf16.msra.mxu1 %v2069_v29 }
  0x81   : > { %1258 = vmatprep.subr.bf16.mxu0 %v2074_v30  ;;  %1344 = vmatprep.subr.bf16.mxu1 %v2077_v31 }
  0x84   : > { %1259 = vmatpush1.bf16.msra.mxu0 %v2072_v33  ;;  %1345 = vmatpush1.bf16.msra.mxu1 %v2075_v34 }
  0x85   : > { %1260 = vmatprep.subr.bf16.mxu0 %v2080_v35  ;;  %1346 = vmatprep.subr.bf16.mxu1 %v2083_v36 }
  0x88   : > { %1261 = vmatpush1.bf16.msra.mxu0 %v2078_v37  ;;  %1347 = vmatpush1.bf16.msra.mxu1 %v2081_v38 }
  0x89   : > { %1262 = vmatprep.subr.bf16.mxu0 %v2086_v39  ;;  %1348 = vmatprep.subr.bf16.mxu1 %v2089_v40 }
  0x8c   : > { %1263 = vmatpush1.bf16.msra.mxu0 %v2084_v41  ;;  %1349 = vmatpush1.bf16.msra.mxu1 %v2087_v42 }
  0x8d   : > { %1264 = vmatprep.subr.bf16.mxu0 %v2092_v43  ;;  %1350 = vmatprep.subr.bf16.mxu1 %v2095_v44 }
  0x90   : > { %1265 = vmatpush1.bf16.msra.mxu0 %v2090_v45  ;;  %1351 = vmatpush1.bf16.msra.mxu1 %v2093_v46 }
  0x91   : > { %1266 = vmatprep.subr.bf16.mxu0 %v2098_v47  ;;  %1352 = vmatprep.subr.bf16.mxu1 %v2101_v48 }
  0x94   : > { %1267 = vmatpush1.bf16.msra.mxu0 %v2096_v49  ;;  %1353 = vmatpush1.bf16.msra.mxu1 %v2099_v50 }
  0x95   : > { %1268 = vmatprep.subr.bf16.mxu0 %v2104_v51  ;;  %1354 = vmatprep.subr.bf16.mxu1 %v2107_v52 }
  0x98   : > { %1269 = vmatpush1.bf16.msra.mxu0 %v2102_v53  ;;  %1355 = vmatpush1.bf16.msra.mxu1 %v2105_v54 }
  0x99   : > { %1270 = vmatprep.subr.bf16.mxu0 %v2110_v55  ;;  %1356 = vmatprep.subr.bf16.mxu1 %v2113_v56 }
  0x9c   : > { %1271 = vmatpush1.bf16.msra.mxu0 %v2108_v57  ;;  %1357 = vmatpush1.bf16.msra.mxu1 %v2111_v58 }
  0x9d   : > { %1272 = vmatprep.subr.bf16.mxu0 %v2116_v59  ;;  %1358 = vmatprep.subr.bf16.mxu1 %v2119_v60 }
  0xa0   : > { %1273 = vmatpush1.bf16.msra.mxu0 %v2114_v61  ;;  %1359 = vmatpush1.bf16.msra.mxu1 %v2117_v62 }
  0xa1   : > { %1274 = vmatprep.subr.bf16.mxu0 %v2122_v63  ;;  %1360 = vmatprep.subr.bf16.mxu1 %v2125_v0 }
  0xa4   : > { %1275 = vmatpush1.bf16.msra.mxu0 %v2120_v1  ;;  %1361 = vmatpush1.bf16.msra.mxu1 %v2123_v2 }
  0xa5   : > { %1276 = vmatprep.subr.bf16.mxu0 %v2128_v3  ;;  %1362 = vmatprep.subr.bf16.mxu1 %v2131_v4 }
  0xa8   : > { %1277 = vmatpush1.bf16.msra.mxu0 %v2126_v5  ;;  %1363 = vmatpush1.bf16.msra.mxu1 %v2129_v6 }
  0xab   : > { %1279 = vmatmul.mubr.bf16.vlgmr.msra.gmra.mrb[0].mxu0 %v2132_v7  ;;  %1365 = vmatmul.mubr.bf16.vlgmr.msra.gmra.mrb[0].mxu1 %v2132_v7 }
 0x17b   : > { %1378 = sbr.rel (%p1856_p12) target bundleno = 387 (0x183), region = 67 }
 0x17e   : > { %v1280_v8 = vpop.f32.mrb[0].mxu0  ;;  %v1366_v9 = vpop.f32.mrb[0].mxu1 }
 0x17f   : > { %v1282_v10 = vpop.f32.mrb[1].mxu0  ;;  %v1368_v11 = vpop.f32.mrb[1].mxu1  ;;  %1379 = vst [vmem:[#allocation2] sm:$0xff] (!%p1856_p12), %v1280_v8  ;;  %1381 = vst [vmem:[#allocation2 + $0x10] sm:$0xff] (!%p1856_p12), %v1366_v9 }
 0x180   : > { %v1284_v12 = vpop.f32.mrb[2].mxu0  ;;  %v1370_v13 = vpop.f32.mrb[2].mxu1  ;;  %1380 = vst [vmem:[#allocation2 + $0x8] sm:$0xff] (!%p1856_p12), %v1282_v10  ;;  %1382 = vst [vmem:[#allocation2 + $0x18] sm:$0xff] (!%p1856_p12), %v1368_v11 }
 0x181   : > { %v1286_v14 = vpop.f32.mrb[3].mxu0  ;;  %v1372_v15 = vpop.f32.mrb[3].mxu1  ;;  %1383 = vst [vmem:[#allocation2 + $0x20] sm:$0xff] (!%p1856_p12), %v1284_v12  ;;  %1385 = vst [vmem:[#allocation2 + $0x30] sm:$0xff] (!%p1856_p12), %v1370_v13 }
 0x182   : > { %1384 = vst [vmem:[#allocation2 + $0x28] sm:$0xff] %v1286_v14  ;;  %1386 = vst [vmem:[#allocation2 + $0x38] sm:$0xff] %v1372_v15 }
 0x183 PF: > { %p1857_p13 = scmp.le.s32.totalorder %s2173_s20, 0 }
 0x185   : > { %1390 = sbr.rel (%p1857_p13) target bundleno = 398 (0x18e), region = 71 }
 0x187   : > { %v1391_v16 = vld [vmem:[#allocation2] sm:$0xff] (!%p1857_p13)  ;;  %v1393_v18 = vld [vmem:[#allocation2 + $0x10] sm:$0xff] (!%p1857_p13) }
 0x188   : > { %v1392_v17 = vld [vmem:[#allocation2 + $0x8] sm:$0xff] (!%p1857_p13)  ;;  %v1399_v19 = vadd.f32 (!%p1857_p13), %v1391_v16, %v1280_v8  ;;  %v1401_v21 = vadd.f32 (!%p1857_p13), %v1393_v18, %v1366_v9  ;;  %v1394_v22 = vld [vmem:[#allocation2 + $0x18] sm:$0xff] (!%p1857_p13) }
 0x189   : > { %v1400_v20 = vadd.f32 (!%p1857_p13), %v1392_v17, %v1282_v10  ;;  %v1395_v23 = vld [vmem:[#allocation2 + $0x20] sm:$0xff] (!%p1857_p13)  ;;  %v1396_v24 = vld [vmem:[#allocation2 + $0x28] sm:$0xff] (!%p1857_p13)  ;;  %v1402_v25 = vadd.f32 (!%p1857_p13), %v1394_v22, %v1368_v11  ;;  %v1397_v28 = vld [vmem:[#allocation2 + $0x30] sm:$0xff] (!%p1857_p13) }
 0x18a   : > { %v1403_v26 = vadd.f32 (!%p1857_p13), %v1395_v23, %v1284_v12  ;;  %v1404_v27 = vadd.f32 (!%p1857_p13), %v1396_v24, %v1286_v14  ;;  %v1398_v29 = vld [vmem:[#allocation2 + $0x38] sm:$0xff] (!%p1857_p13)  ;;  %1407 = vst [vmem:[#allocation2] sm:$0xff] (!%p1857_p13), %v1399_v19  ;;  %1409 = vst [vmem:[#allocation2 + $0x10] sm:$0xff] (!%p1857_p13), %v1401_v21  ;;  %v1405_v30 = vadd.f32 (!%p1857_p13), %v1397_v28, %v1370_v13 }
 0x18b   : > { %1408 = vst [vmem:[#allocation2 + $0x8] sm:$0xff] (!%p1857_p13), %v1400_v20  ;;  %v1406_v31 = vadd.f32 (!%p1857_p13), %v1398_v29, %v1372_v15  ;;  %1410 = vst [vmem:[#allocation2 + $0x18] sm:$0xff] (!%p1857_p13), %v1402_v25 }
 0x18c   : > { %1411 = vst [vmem:[#allocation2 + $0x20] sm:$0xff] %v1403_v26  ;;  %1412 = vst [vmem:[#allocation2 + $0x28] sm:$0xff] %v1404_v27 }
 0x18d   : > { %1413 = vst [vmem:[#allocation2 + $0x30] sm:$0xff] %v1405_v30  ;;  %1414 = vst [vmem:[#allocation2 + $0x38] sm:$0xff] %v1406_v31 }
 0x18e PF: > { %p1858_p0 = scmp.ne.s32.totalorder %s2173_s20, 8 }
 0x18f   : > { %v1429_v32 = vlaneseq (!%p1858_p0)  ;;  %v1487_v33 = vld [vmem:[%s2293_s10] sm:$0xff] (!%p1858_p0)  ;;  %v1488_v35 = vld [vmem:[%s2293_s10 + $0x8] sm:$0xff] (!%p1858_p0)  ;;  %v1489_v43 = vld [vmem:[%s2293_s10 + $0x10] sm:$0xff] (!%p1858_p0) }
 0x190   : > { %1418 = sbr.rel (%p1858_p0) target bundleno = 419 (0x1a3), region = 75  ;;  %v1427_v37 = vld [vmem:[%s2475_s2] sm:$0xf] (!%p1858_p0)  ;;  %v1491_v39 = vunpack.c.l.bf16 (!%p1858_p0), %v1487_v33  ;;  %v1492_v40 = vunpack.c.h.bf16 (!%p1858_p0), %v1487_v33  ;;  %v1493_v41 = vunpack.c.l.bf16 (!%p1858_p0), %v1488_v35  ;;  %v1494_v42 = vunpack.c.h.bf16 (!%p1858_p0), %v1488_v35  ;;  %v1490_v49 = vld [vmem:[%s2293_s10 + $0x18] sm:$0xff] (!%p1858_p0) }
 0x191   : > { %v1430_v34 = vshrl.u32 (!%p1858_p0), %v1429_v32, 7  ;;  %v1457_v38 = vld [vmem:[%s2476_s3] sm:$0xf] (!%p1858_p0)  ;;  %v1495_v53 = vunpack.c.l.bf16 (!%p1858_p0), %v1489_v43  ;;  %v1496_v54 = vunpack.c.h.bf16 (!%p1858_p0), %v1489_v43  ;;  %v1497_v55 = vunpack.c.l.bf16 (!%p1858_p0), %v1490_v49 }
 0x192   : > { %v1498_v56 = vunpack.c.h.bf16 (!%p1858_p0), %v1490_v49 }
 0x193   : > { %v1419_v36 = vld [vmem:[#allocation2] sm:$0xff] (!%p1858_p0)  ;;  %v1431_v45 = vsub.s32 (!%p1858_p0), 0, %v1430_v34  ;;  %v1435_v46 = vsub.s32 (!%p1858_p0), 1, %v1430_v34  ;;  %v1439_v47 = vsub.s32 (!%p1858_p0), 2, %v1430_v34  ;;  %v1443_v48 = vsub.s32 (!%p1858_p0), 3, %v1430_v34  ;;  %v1421_v50 = vld [vmem:[#allocation2 + $0x10] sm:$0xff] (!%p1858_p0) }
 0x194   : > { %v1420_v44 = vld [vmem:[#allocation2 + $0x8] sm:$0xff] (!%p1858_p0)  ;;  %v1422_v61 = vld [vmem:[#allocation2 + $0x18] sm:$0xff] (!%p1858_p0)  ;;  %v1425_v62 = vld [vmem:[#allocation2 + $0x30] sm:$0xff] (!%p1858_p0) }
 0x195   : > { %v1423_v51 = vld [vmem:[#allocation2 + $0x20] sm:$0xff] (!%p1858_p0)  ;;  %v1424_v52 = vld [vmem:[#allocation2 + $0x28] sm:$0xff] (!%p1858_p0)  ;;  %v1432_v57 = vrot.slane (!%p1858_p0), %v1427_v37, %v1431_v45  ;;  %v1436_v58 = vrot.slane (!%p1858_p0), %v1427_v37, %v1435_v46  ;;  %v1462_v59 = vrot.slane (!%p1858_p0), %v1457_v38, %v1431_v45  ;;  %v1466_v60 = vrot.slane (!%p1858_p0), %v1457_v38, %v1435_v46  ;;  %v1426_v63 = vld [vmem:[#allocation2 + $0x38] sm:$0xff] (!%p1858_p0) }
 0x196   : > { %v1440_v0 = vrot.slane (!%p1858_p0), %v1427_v37, %v1439_v47  ;;  %v1444_v1 = vrot.slane (!%p1858_p0), %v1427_v37, %v1443_v48  ;;  %v1470_v2 = vrot.slane (!%p1858_p0), %v1457_v38, %v1439_v47  ;;  %v1474_v3 = vrot.slane (!%p1858_p0), %v1457_v38, %v1443_v48 }
 0x197   : > { %v1449_v4 = vmul.f32 %v1432_v57, %v1419_v36  ;;  %v1450_v5 = vmul.f32 %v1436_v58, %v1420_v44  ;;  %v1453_v6 = vmul.f32 %v1432_v57, %v1423_v51  ;;  %v1454_v7 = vmul.f32 %v1436_v58, %v1424_v52 }
 0x198   : > { %v1451_v8 = vmul.f32 %v1440_v0, %v1421_v50  ;;  %v1452_v9 = vmul.f32 %v1444_v1, %v1422_v61  ;;  %v1455_v10 = vmul.f32 %v1440_v0, %v1425_v62  ;;  %v1456_v11 = vmul.f32 %v1444_v1, %v1426_v63 }
 0x199   : > { %v1479_v12 = vadd.f32 %v1462_v59, %v1449_v4  ;;  %v1480_v13 = vadd.f32 %v1466_v60, %v1450_v5  ;;  %v1483_v14 = vadd.f32 %v1462_v59, %v1453_v6  ;;  %v1484_v15 = vadd.f32 %v1466_v60, %v1454_v7 }
 0x19a   : > { %v1481_v16 = vadd.f32 %v1470_v2, %v1451_v8  ;;  %v1482_v17 = vadd.f32 %v1474_v3, %v1452_v9  ;;  %v1485_v18 = vadd.f32 %v1470_v2, %v1455_v10  ;;  %v1486_v19 = vadd.f32 %v1474_v3, %v1456_v11 }
 0x19b   : > { %v1499_v20 = vadd.f32 %v1491_v39, %v1479_v12  ;;  %v1500_v21 = vadd.f32 %v1492_v40, %v1480_v13  ;;  %v1503_v22 = vadd.f32 %v1495_v53, %v1483_v14  ;;  %v1504_v23 = vadd.f32 %v1496_v54, %v1484_v15 }
 0x19c   : > { %v1501_v24 = vadd.f32 %v1493_v41, %v1481_v16  ;;  %v1502_v25 = vadd.f32 %v1494_v42, %v1482_v17  ;;  %v1505_v26 = vadd.f32 %v1497_v55, %v1485_v18  ;;  %v1506_v27 = vadd.f32 %v1498_v56, %v1486_v19 }
 0x19d   : > { %v1507_v28 = vmax.f32 %v1499_v20, 0.0  ;;  %v1508_v29 = vmax.f32 %v1500_v21, 0.0  ;;  %v1511_v30 = vmax.f32 %v1503_v22, 0.0  ;;  %v1512_v31 = vmax.f32 %v1504_v23, 0.0 }
 0x19e   : > { %v1509_v32 = vmax.f32 %v1501_v24, 0.0  ;;  %v1510_v33 = vmax.f32 %v1502_v25, 0.0  ;;  %v1513_v34 = vmax.f32 %v1505_v26, 0.0  ;;  %v1514_v35 = vmax.f32 %v1506_v27, 0.0 }
 0x19f   : > { %v1868_v36 = vpack.c.bf16 %v1508_v29, %v1507_v28  ;;  %v1870_v37 = vpack.c.bf16 %v1512_v31, %v1511_v30 }
 0x1a0   : > { %v1869_v38 = vpack.c.bf16 %v1510_v33, %v1509_v32  ;;  %v1871_v39 = vpack.c.bf16 %v1514_v35, %v1513_v34 }
 0x1a1   : > { %1539 = vst [vmem:[%s2298_s13] sm:$0xff] %v1868_v36  ;;  %1541 = vst [vmem:[%s2298_s13 + $0x10] sm:$0xff] %v1870_v37 }
 0x1a2   : > { %1540 = vst [vmem:[%s2298_s13 + $0x8] sm:$0xff] %v1869_v38  ;;  %1542 = vst [vmem:[%s2298_s13 + $0x18] sm:$0xff] %v1871_v39 }
 0x1a3 PF: > { %s15_s24 = sadd.s32 1, %s2189_s24   ;;  %s2479_s18 = smov %s2169_s19 }
 0x1a4   : > { %p12_p1 = scmp.ge.s32.totalorder %s15_s24, 20   ;;  %s2480_s19 = smov %s2272_s6 }
 0x1a5   : > { %s2481_s20 = smov %s2181_s22  ;;  %s2482_s21 = smov %s2185_s23 }
 0x1a6   : > { %s2483_s22 = smov %s2486_s25  ;;  %s2484_s23 = smov %s2490_s26 }
 0x1a7   :  { %14 = sbr.rel (!%p12_p1) target bundleno = 4 (0x4), region = 122 }

// kernel: resnet34_8s_fuse_forward.107
= control target key start
LH: loop header
LB: loop body
LE: loop exit
PB: predicated region body
PF: predicated region fallthrough
CT: control target
= control target key end

     0   :  { %s2106_s15 = smov 0   ;;  %s2108_s16 = smov 0   ;;  %s2349_s0 = inlined_call_operand.vmem [shape: bf16[32,4608], index: 0, kind: input, shape index: {}]   ;;  %s2350_s1 = inlined_call_operand.vmem [shape: bf16[4608,512], index: 1, kind: input, shape index: {}]   ;;  %s2351_s2 = inlined_call_operand.vmem [shape: f32[1,512], index: 2, kind: input, shape index: {}]   ;;  %s2352_s3 = inlined_call_operand.vmem [shape: f32[1,512], index: 3, kind: input, shape index: {}]   ;;  %s2353_s4 = inlined_call_operand.vmem [shape: bf16[32,512], index: 4, kind: output, shape index: {}]  }
   0x1   :  { %s2110_s17 = smov 0   ;;  %s2112_s18 = smov 0  }
   0x2   :  { %s2114_s19 = smov 0   ;;  %s2116_s20 = smov 0  }
   0x3   :  { %s2118_s21 = smov 0  }
   0x4 LB: > { %s26_s22 = sadd.s32 1, %s2071_s19  ;;  %s33_s23 = sadd.s32 1, %s2075_s20  ;;  %s2079_s21 = sphi %s2118_s21, %s14_s21   ;;  %s2075_s20 = sphi %s2116_s20, %s2359_s20   ;;  %s2071_s19 = sphi %s2114_s19, %s2358_s19   ;;  %s2067_s18 = sphi %s2112_s18, %s2357_s18   ;;  %s2063_s17 = sphi %s2110_s17, %s2356_s17   ;;  %s2059_s16 = sphi %s2108_s16, %s2355_s16   ;;  %s2055_s15 = sphi %s2106_s15, %s2354_s15  }
   0x5   : > { %p27_p0 = scmp.ge.s32.totalorder %s26_s22, 9  ;;  %p49_p1 = scmp.ne.s32.totalorder %s2059_s16, %s2055_s15 }
   0x6   : > { %p50_p2 = scmp.eq.s32.totalorder %s2079_s21, 0  ;;  %s42_s27 = sadd.s32 1, %s2059_s16 }
   0x7   : > { %s2361_s22 = smov (%p27_p0, %s26_s22), 0  ;;  %s2363_s23 = smov (!%p27_p0, %s33_s23), %s2075_s20 }
   0x8   : > { %p51_p3 = por %p50_p2, %p49_p1  ;;  %p35_p4 = scmp.ge.s32.totalorder %s2363_s23, 2 }
   0x9   : > { %s38_s24 = ssub.s32 %s2071_s19, %s2361_s22  ;;  %p1601_p6 = scmp.ge.s32.totalorder %s2079_s21, 18 }
   0xa   : > { %s2365_s23 = smov (%p35_p4, %s2363_s23), 0 }
   0xb   : > { %s37_s25 = ssub.s32 %s2075_s20, %s2365_s23  ;;  %199 = sbr.rel (%p1601_p6) target bundleno = 28 (0x1c), region = 24 }
   0xc   : > { %s39_s26 = sor.u32 %s38_s24, %s37_s25 }
   0xd   : > { %p40_p5 = scmp.eq.s32.totalorder %s39_s26, 0 }
   0xf   : > { %s2157_s28 = scalar_select %p40_p5, %s2059_s16, %s42_s27  }
  0x12   : > { %202 = sbr.rel (!%p51_p3) target bundleno = 28 (0x1c), region = 28  ;;  %s204_s29 = sand.u32 (%p51_p3), 1, %s2059_s16  }
  0x13   : > { %s1604_s30 = sshll.u32 (%p51_p3), %s2071_s19, 2  ;;  %s1602_s5 = sshll.u32 (%p51_p3), %s204_s29, 5 }
  0x14   : > { %s1770_s6 = smul.u32 (%p51_p3), 72, %s2075_s20  ;;  %s206_s12 = scalar_lea.vmem (%p51_p3), [#allocation3], %s1602_s5 }
  0x16   : > { %s210_s7 = sadd.s32 (%p51_p3), %s1770_s6, %s1604_s30 }
  0x17   : > { %s1606_s8 = sshll.u32 (%p51_p3), %s210_s7, 2 }
  0x18   : > { %s212_s11 = scalar_lea.vmem (%p51_p3), %s2349_s0, %s1606_s8 }
  0x19   : > { %v225_v0 = vld [vmem:[%s212_s11] sm:$0xff]  ;;  %v227_v1 = vld [vmem:[%s212_s11 + $0x8] sm:$0xff]  ;;  %v229_v2 = vld [vmem:[%s212_s11 + $0x90] sm:$0xff] }
  0x1a   : > { %226 = vst [vmem:[%s206_s12] sm:$0xff] %v225_v0  ;;  %228 = vst [vmem:[%s206_s12 + $0x8] sm:$0xff] %v227_v1  ;;  %v231_v3 = vld [vmem:[%s212_s11 + $0x98] sm:$0xff] }
  0x1b   : > { %230 = vst [vmem:[%s206_s12 + $0x10] sm:$0xff] %v229_v2  ;;  %232 = vst [vmem:[%s206_s12 + $0x18] sm:$0xff] %v231_v3 }
  0x1c PF: > { %p1607_p7 = scmp.ge.s32.totalorder %s2079_s21, 1  ;;  %p252_p8 = scmp.lt.s32.totalorder %s2079_s21, 19 }
  0x1e   : > { %p253_p9 = pnand %p1607_p7, %p252_p8 }
  0x1f   : > { %s1609_s13 = sshll.u32 (!%p253_p9), %s2063_s17, 6  ;;  %s1612_s14 = sshll.u32 (!%p253_p9), %s2067_s18, 1 }
  0x20   : > { %256 = sbr.rel (%p253_p9) target bundleno = 417 (0x1a1), region = 55  ;;  %p311_p10 = scmp.lt.s32.totalorder (!%p253_p9), %s1609_s13, 575 }
  0x21   : > { %p333_p11 = scmp.lt.s32.totalorder (!%p253_p9), %s1612_s14, 3  ;;  %s259_s6 = sand.u32 (!%p253_p9), 1, %s2055_s15  }
  0x22   : > { %s1608_s7 = sshll.u32 (!%p253_p9), %s259_s6, 5  ;;  %p1747_p12 = scmp.ne.s32.totalorder (!%p253_p9), %s2063_s17, 0 }
  0x23   : > { %s2228_s15 = scalar_lea.vmem (!%p253_p9), [#allocation3], %s1608_s7 }
  0x24   : > { %v1925_v52 = vld [vmem:[%s2228_s15 + $0x4] ss:$16 sps:$4 sm:$0xff] (!%p253_p9)  }
  0x25   : > { %1167 = vmatprep.mubr.bf16.mxu0 (!%p253_p9), %v1925_v52  ;;  %1253 = vmatprep.mubr.bf16.mxu1 (!%p253_p9), %v1925_v52 }
  0x27   : > { %s2367_s13 = smov (!%p311_p10, %s1609_s13), 575  ;;  %s2369_s14 = smov (!%p333_p11, %s1612_s14), 3 }
  0x28   : > { %s1756_s24 = sshll.u32 %s2367_s13, 4  ;;  %s1757_s29 = sshll.u32 %s2369_s14, 4 }
  0x29   : > { %s2173_s27 = scalar_lea.vmem %s2350_s1, %s1756_s24  ;;  %s2178_s5 = scalar_lea.vmem %s2353_s4, %s1757_s29 }
  0x2a   : > { %v1827_v4 = vld [vmem:[%s2173_s27 + $0x4] ss:$16 sps:$4 sm:$0xff]   ;;  %v1829_v5 = vld [vmem:[%s2173_s27 + $0xc] ss:$16 sps:$4 sm:$0xff]   ;;  %v1831_v6 = vld [vmem:[%s2173_s27] ss:$16 sps:$4 sm:$0xff]  }
  0x2b   : > { %1135 = vmatprep.subr.bf16.mxu0 %v1827_v4  ;;  %v1832_v7 = vld [vmem:[%s2173_s27 + $0x8] ss:$16 sps:$4 sm:$0xff]   ;;  %1221 = vmatprep.subr.bf16.mxu1 %v1829_v5  ;;  %v1833_v8 = vld [vmem:[%s2173_s27 + $0x24] ss:$16 sps:$4 sm:$0xff]   ;;  %v1835_v9 = vld [vmem:[%s2173_s27 + $0x2c] ss:$16 sps:$4 sm:$0xff]  }
  0x2c   : > { %1136 = vmatpush1.bf16.msra.mxu0 %v1831_v6  ;;  %1222 = vmatpush1.bf16.msra.mxu1 %v1832_v7  ;;  %v1837_v10 = vld [vmem:[%s2173_s27 + $0x20] ss:$16 sps:$4 sm:$0xff]   ;;  %v1838_v11 = vld [vmem:[%s2173_s27 + $0x28] ss:$16 sps:$4 sm:$0xff]   ;;  %v1839_v12 = vld [vmem:[%s2173_s27 + $0x44] ss:$16 sps:$4 sm:$0xff]  }
  0x2d   : > { %1137 = vmatprep.subr.bf16.mxu0 %v1833_v8  ;;  %1223 = vmatprep.subr.bf16.mxu1 %v1835_v9  ;;  %v1841_v13 = vld [vmem:[%s2173_s27 + $0x4c] ss:$16 sps:$4 sm:$0xff]   ;;  %v1843_v14 = vld [vmem:[%s2173_s27 + $0x40] ss:$16 sps:$4 sm:$0xff]   ;;  %v1844_v15 = vld [vmem:[%s2173_s27 + $0x48] ss:$16 sps:$4 sm:$0xff]  }
  0x2e   : > { %v1845_v16 = vld [vmem:[%s2173_s27 + $0x64] ss:$16 sps:$4 sm:$0xff]   ;;  %v1847_v17 = vld [vmem:[%s2173_s27 + $0x6c] ss:$16 sps:$4 sm:$0xff]   ;;  %v1849_v18 = vld [vmem:[%s2173_s27 + $0x60] ss:$16 sps:$4 sm:$0xff]  }
  0x2f   : > { %v1850_v19 = vld [vmem:[%s2173_s27 + $0x68] ss:$16 sps:$4 sm:$0xff]   ;;  %v1851_v20 = vld [vmem:[%s2173_s27 + $0x84] ss:$16 sps:$4 sm:$0xff]   ;;  %v1853_v21 = vld [vmem:[%s2173_s27 + $0x8c] ss:$16 sps:$4 sm:$0xff]  }
  0x30   : > { %1138 = vmatpush1.bf16.msra.mxu0 %v1837_v10  ;;  %1224 = vmatpush1.bf16.msra.mxu1 %v1838_v11  ;;  %v1855_v22 = vld [vmem:[%s2173_s27 + $0x80] ss:$16 sps:$4 sm:$0xff]   ;;  %v1856_v23 = vld [vmem:[%s2173_s27 + $0x88] ss:$16 sps:$4 sm:$0xff]   ;;  %v1857_v24 = vld [vmem:[%s2173_s27 + $0xa4] ss:$16 sps:$4 sm:$0xff]  }
  0x31   : > { %1139 = vmatprep.subr.bf16.mxu0 %v1839_v12  ;;  %1225 = vmatprep.subr.bf16.mxu1 %v1841_v13  ;;  %v1859_v25 = vld [vmem:[%s2173_s27 + $0xac] ss:$16 sps:$4 sm:$0xff]   ;;  %v1861_v26 = vld [vmem:[%s2173_s27 + $0xa0] ss:$16 sps:$4 sm:$0xff]   ;;  %v1862_v27 = vld [vmem:[%s2173_s27 + $0xa8] ss:$16 sps:$4 sm:$0xff]  }
  0x32   : > { %v1863_v28 = vld [vmem:[%s2173_s27 + $0xc4] ss:$16 sps:$4 sm:$0xff]   ;;  %v1865_v29 = vld [vmem:[%s2173_s27 + $0xcc] ss:$16 sps:$4 sm:$0xff]   ;;  %v1867_v30 = vld [vmem:[%s2173_s27 + $0xc0] ss:$16 sps:$4 sm:$0xff]  }
  0x33   : > { %v1868_v31 = vld [vmem:[%s2173_s27 + $0xc8] ss:$16 sps:$4 sm:$0xff]   ;;  %v1869_v32 = vld [vmem:[%s2173_s27 + $0xe4] ss:$16 sps:$4 sm:$0xff]   ;;  %v1871_v33 = vld [vmem:[%s2173_s27 + $0xec] ss:$16 sps:$4 sm:$0xff]  }
  0x34   : > { %1140 = vmatpush1.bf16.msra.mxu0 %v1843_v14  ;;  %1226 = vmatpush1.bf16.msra.mxu1 %v1844_v15  ;;  %v1873_v34 = vld [vmem:[%s2173_s27 + $0xe0] ss:$16 sps:$4 sm:$0xff]   ;;  %v1874_v35 = vld [vmem:[%s2173_s27 + $0xe8] ss:$16 sps:$4 sm:$0xff]   ;;  %v1875_v36 = vld [vmem:[%s2173_s27 + $0x104] ss:$16 sps:$4 sm:$0xff]  }
  0x35   : > { %1141 = vmatprep.subr.bf16.mxu0 %v1845_v16  ;;  %1227 = vmatprep.subr.bf16.mxu1 %v1847_v17  ;;  %v1877_v37 = vld [vmem:[%s2173_s27 + $0x10c] ss:$16 sps:$4 sm:$0xff]   ;;  %v1879_v38 = vld [vmem:[%s2173_s27 + $0x100] ss:$16 sps:$4 sm:$0xff]   ;;  %v1880_v39 = vld [vmem:[%s2173_s27 + $0x108] ss:$16 sps:$4 sm:$0xff]  }
  0x36   : > { %v1881_v40 = vld [vmem:[%s2173_s27 + $0x124] ss:$16 sps:$4 sm:$0xff]   ;;  %v1883_v41 = vld [vmem:[%s2173_s27 + $0x12c] ss:$16 sps:$4 sm:$0xff]   ;;  %v1885_v42 = vld [vmem:[%s2173_s27 + $0x120] ss:$16 sps:$4 sm:$0xff]  }
  0x37   : > { %v1886_v43 = vld [vmem:[%s2173_s27 + $0x128] ss:$16 sps:$4 sm:$0xff]   ;;  %v1887_v44 = vld [vmem:[%s2173_s27 + $0x144] ss:$16 sps:$4 sm:$0xff]   ;;  %v1889_v45 = vld [vmem:[%s2173_s27 + $0x14c] ss:$16 sps:$4 sm:$0xff]  }
  0x38   : > { %1142 = vmatpush1.bf16.msra.mxu0 %v1849_v18  ;;  %1228 = vmatpush1.bf16.msra.mxu1 %v1850_v19  ;;  %v1891_v46 = vld [vmem:[%s2173_s27 + $0x140] ss:$16 sps:$4 sm:$0xff]   ;;  %v1892_v47 = vld [vmem:[%s2173_s27 + $0x148] ss:$16 sps:$4 sm:$0xff]   ;;  %v1893_v48 = vld [vmem:[%s2173_s27 + $0x164] ss:$16 sps:$4 sm:$0xff]  }
  0x39   : > { %1143 = vmatprep.subr.bf16.mxu0 %v1851_v20  ;;  %1229 = vmatprep.subr.bf16.mxu1 %v1853_v21  ;;  %v1895_v49 = vld [vmem:[%s2173_s27 + $0x16c] ss:$16 sps:$4 sm:$0xff]   ;;  %v1897_v50 = vld [vmem:[%s2173_s27 + $0x160] ss:$16 sps:$4 sm:$0xff]   ;;  %v1898_v51 = vld [vmem:[%s2173_s27 + $0x168] ss:$16 sps:$4 sm:$0xff]  }
  0x3a   : > { %v1899_v53 = vld [vmem:[%s2173_s27 + $0x184] ss:$16 sps:$4 sm:$0xff]   ;;  %v1901_v54 = vld [vmem:[%s2173_s27 + $0x18c] ss:$16 sps:$4 sm:$0xff]   ;;  %v1903_v55 = vld [vmem:[%s2173_s27 + $0x180] ss:$16 sps:$4 sm:$0xff]  }
  0x3b   : > { %v1904_v56 = vld [vmem:[%s2173_s27 + $0x188] ss:$16 sps:$4 sm:$0xff]   ;;  %v1905_v57 = vld [vmem:[%s2173_s27 + $0x1a4] ss:$16 sps:$4 sm:$0xff]   ;;  %v1907_v58 = vld [vmem:[%s2173_s27 + $0x1ac] ss:$16 sps:$4 sm:$0xff]  }
  0x3c   : > { %1144 = vmatpush1.bf16.msra.mxu0 %v1855_v22  ;;  %1230 = vmatpush1.bf16.msra.mxu1 %v1856_v23  ;;  %v1909_v59 = vld [vmem:[%s2173_s27 + $0x1a0] ss:$16 sps:$4 sm:$0xff]   ;;  %v1910_v60 = vld [vmem:[%s2173_s27 + $0x1a8] ss:$16 sps:$4 sm:$0xff]   ;;  %v1911_v61 = vld [vmem:[%s2173_s27 + $0x1c4] ss:$16 sps:$4 sm:$0xff]  }
  0x3d   : > { %1145 = vmatprep.subr.bf16.mxu0 %v1857_v24  ;;  %1231 = vmatprep.subr.bf16.mxu1 %v1859_v25  ;;  %v1913_v62 = vld [vmem:[%s2173_s27 + $0x1cc] ss:$16 sps:$4 sm:$0xff]   ;;  %v1915_v63 = vld [vmem:[%s2173_s27 + $0x1c0] ss:$16 sps:$4 sm:$0xff]   ;;  %v1916_v0 = vld [vmem:[%s2173_s27 + $0x1c8] ss:$16 sps:$4 sm:$0xff]  }
  0x3e   : > { %v1917_v1 = vld [vmem:[%s2173_s27 + $0x1e4] ss:$16 sps:$4 sm:$0xff]   ;;  %v1919_v2 = vld [vmem:[%s2173_s27 + $0x1ec] ss:$16 sps:$4 sm:$0xff]   ;;  %v1921_v3 = vld [vmem:[%s2173_s27 + $0x1e0] ss:$16 sps:$4 sm:$0xff]  }
  0x3f   : > { %v1922_v4 = vld [vmem:[%s2173_s27 + $0x1e8] ss:$16 sps:$4 sm:$0xff]   ;;  %v1928_v5 = vld [vmem:[%s2173_s27 + $0x204] ss:$16 sps:$4 sm:$0xff]   ;;  %v1931_v6 = vld [vmem:[%s2173_s27 + $0x20c] ss:$16 sps:$4 sm:$0xff]  }
  0x40   : > { %1146 = vmatpush1.bf16.msra.mxu0 %v1861_v26  ;;  %1232 = vmatpush1.bf16.msra.mxu1 %v1862_v27  ;;  %v1923_v7 = vld [vmem:[%s2228_s15] ss:$16 sps:$4 sm:$0xff]   ;;  %v1929_v9 = vld [vmem:[%s2173_s27 + $0x208] ss:$16 sps:$4 sm:$0xff]   ;;  %v1934_v10 = vld [vmem:[%s2173_s27 + $0x224] ss:$16 sps:$4 sm:$0xff]  }
  0x41   : > { %1147 = vmatprep.subr.bf16.mxu0 %v1863_v28  ;;  %1233 = vmatprep.subr.bf16.mxu1 %v1865_v29  ;;  %v1926_v8 = vld [vmem:[%s2173_s27 + $0x200] ss:$16 sps:$4 sm:$0xff]   ;;  %v1937_v11 = vld [vmem:[%s2173_s27 + $0x22c] ss:$16 sps:$4 sm:$0xff]   ;;  %v1935_v13 = vld [vmem:[%s2173_s27 + $0x228] ss:$16 sps:$4 sm:$0xff]  }
  0x42   : > { %v1932_v12 = vld [vmem:[%s2173_s27 + $0x220] ss:$16 sps:$4 sm:$0xff]   ;;  %v1940_v14 = vld [vmem:[%s2173_s27 + $0x244] ss:$16 sps:$4 sm:$0xff]   ;;  %v1943_v15 = vld [vmem:[%s2173_s27 + $0x24c] ss:$16 sps:$4 sm:$0xff]  }
  0x43   : > { %v1938_v16 = vld [vmem:[%s2173_s27 + $0x240] ss:$16 sps:$4 sm:$0xff]   ;;  %v1941_v17 = vld [vmem:[%s2173_s27 + $0x248] ss:$16 sps:$4 sm:$0xff]   ;;  %v1946_v18 = vld [vmem:[%s2173_s27 + $0x264] ss:$16 sps:$4 sm:$0xff]  }
  0x44   : > { %1148 = vmatpush1.bf16.msra.mxu0 %v1867_v30  ;;  %1234 = vmatpush1.bf16.msra.mxu1 %v1868_v31  ;;  %v1949_v19 = vld [vmem:[%s2173_s27 + $0x26c] ss:$16 sps:$4 sm:$0xff]   ;;  %v1944_v20 = vld [vmem:[%s2173_s27 + $0x260] ss:$16 sps:$4 sm:$0xff]   ;;  %v1947_v21 = vld [vmem:[%s2173_s27 + $0x268] ss:$16 sps:$4 sm:$0xff]  }
  0x45   : > { %1149 = vmatprep.subr.bf16.mxu0 %v1869_v32  ;;  %1235 = vmatprep.subr.bf16.mxu1 %v1871_v33  ;;  %v1952_v22 = vld [vmem:[%s2173_s27 + $0x284] ss:$16 sps:$4 sm:$0xff]   ;;  %v1955_v23 = vld [vmem:[%s2173_s27 + $0x28c] ss:$16 sps:$4 sm:$0xff]   ;;  %v1950_v24 = vld [vmem:[%s2173_s27 + $0x280] ss:$16 sps:$4 sm:$0xff]  }
  0x46   : > { %v1953_v25 = vld [vmem:[%s2173_s27 + $0x288] ss:$16 sps:$4 sm:$0xff]   ;;  %v1958_v26 = vld [vmem:[%s2173_s27 + $0x2a4] ss:$16 sps:$4 sm:$0xff]   ;;  %v1961_v27 = vld [vmem:[%s2173_s27 + $0x2ac] ss:$16 sps:$4 sm:$0xff]  }
  0x47   : > { %v1956_v28 = vld [vmem:[%s2173_s27 + $0x2a0] ss:$16 sps:$4 sm:$0xff]   ;;  %v1959_v29 = vld [vmem:[%s2173_s27 + $0x2a8] ss:$16 sps:$4 sm:$0xff]   ;;  %v1964_v30 = vld [vmem:[%s2173_s27 + $0x2c4] ss:$16 sps:$4 sm:$0xff]  }
  0x48   : > { %1150 = vmatpush1.bf16.msra.mxu0 %v1873_v34  ;;  %1236 = vmatpush1.bf16.msra.mxu1 %v1874_v35  ;;  %v1967_v31 = vld [vmem:[%s2173_s27 + $0x2cc] ss:$16 sps:$4 sm:$0xff]   ;;  %v1962_v33 = vld [vmem:[%s2173_s27 + $0x2c0] ss:$16 sps:$4 sm:$0xff]   ;;  %v1965_v34 = vld [vmem:[%s2173_s27 + $0x2c8] ss:$16 sps:$4 sm:$0xff]  }
  0x49   : > { %1151 = vmatprep.subr.bf16.mxu0 %v1875_v36  ;;  %1237 = vmatprep.subr.bf16.mxu1 %v1877_v37  ;;  %v2024_v32 = vld [vmem:[%s2228_s15 + $0xc] ss:$16 sps:$4 sm:$0xff]   ;;  %v1970_v35 = vld [vmem:[%s2173_s27 + $0x2e4] ss:$16 sps:$4 sm:$0xff]   ;;  %v1968_v37 = vld [vmem:[%s2173_s27 + $0x2e0] ss:$16 sps:$4 sm:$0xff]  }
  0x4a   : > { %v1973_v36 = vld [vmem:[%s2173_s27 + $0x2ec] ss:$16 sps:$4 sm:$0xff]  }
  0x4b   : > { %v1997_v52 = vld [vmem:[%s2173_s27 + $0x36c] ss:$16 sps:$4 sm:$0xff]  }
  0x4c   : > { %1152 = vmatpush1.bf16.msra.mxu0 %v1879_v38  ;;  %1238 = vmatpush1.bf16.msra.mxu1 %v1880_v39  ;;  %v1971_v38 = vld [vmem:[%s2173_s27 + $0x2e8] ss:$16 sps:$4 sm:$0xff]   ;;  %v1976_v39 = vld [vmem:[%s2173_s27 + $0x304] ss:$16 sps:$4 sm:$0xff]  }
  0x4d   : > { %1153 = vmatprep.subr.bf16.mxu0 %v1881_v40  ;;  %1239 = vmatprep.subr.bf16.mxu1 %v1883_v41  ;;  %v1979_v40 = vld [vmem:[%s2173_s27 + $0x30c] ss:$16 sps:$4 sm:$0xff]   ;;  %v1974_v41 = vld [vmem:[%s2173_s27 + $0x300] ss:$16 sps:$4 sm:$0xff]  }
  0x50   : > { %1154 = vmatpush1.bf16.msra.mxu0 %v1885_v42  ;;  %1240 = vmatpush1.bf16.msra.mxu1 %v1886_v43  ;;  %v1977_v42 = vld [vmem:[%s2173_s27 + $0x308] ss:$16 sps:$4 sm:$0xff]   ;;  %v1982_v43 = vld [vmem:[%s2173_s27 + $0x324] ss:$16 sps:$4 sm:$0xff]  }
  0x51   : > { %1155 = vmatprep.subr.bf16.mxu0 %v1887_v44  ;;  %1241 = vmatprep.subr.bf16.mxu1 %v1889_v45  ;;  %v1985_v44 = vld [vmem:[%s2173_s27 + $0x32c] ss:$16 sps:$4 sm:$0xff]   ;;  %v1980_v45 = vld [vmem:[%s2173_s27 + $0x320] ss:$16 sps:$4 sm:$0xff]  }
  0x54   : > { %1156 = vmatpush1.bf16.msra.mxu0 %v1891_v46  ;;  %1242 = vmatpush1.bf16.msra.mxu1 %v1892_v47  ;;  %v1983_v46 = vld [vmem:[%s2173_s27 + $0x328] ss:$16 sps:$4 sm:$0xff]   ;;  %v1988_v47 = vld [vmem:[%s2173_s27 + $0x344] ss:$16 sps:$4 sm:$0xff]  }
  0x55   : > { %1157 = vmatprep.subr.bf16.mxu0 %v1893_v48  ;;  %1243 = vmatprep.subr.bf16.mxu1 %v1895_v49  ;;  %v1991_v48 = vld [vmem:[%s2173_s27 + $0x34c] ss:$16 sps:$4 sm:$0xff]   ;;  %v1986_v49 = vld [vmem:[%s2173_s27 + $0x340] ss:$16 sps:$4 sm:$0xff]  }
  0x58   : > { %1158 = vmatpush1.bf16.msra.mxu0 %v1897_v50  ;;  %1244 = vmatpush1.bf16.msra.mxu1 %v1898_v51  ;;  %v1989_v50 = vld [vmem:[%s2173_s27 + $0x348] ss:$16 sps:$4 sm:$0xff]   ;;  %v1994_v51 = vld [vmem:[%s2173_s27 + $0x364] ss:$16 sps:$4 sm:$0xff]  }
  0x59   : > { %1159 = vmatprep.subr.bf16.mxu0 %v1899_v53  ;;  %1245 = vmatprep.subr.bf16.mxu1 %v1901_v54  ;;  %v1992_v53 = vld [vmem:[%s2173_s27 + $0x360] ss:$16 sps:$4 sm:$0xff]   ;;  %v1995_v54 = vld [vmem:[%s2173_s27 + $0x368] ss:$16 sps:$4 sm:$0xff]  }
  0x5c   : > { %1160 = vmatpush1.bf16.msra.mxu0 %v1903_v55  ;;  %1246 = vmatpush1.bf16.msra.mxu1 %v1904_v56  ;;  %v2000_v55 = vld [vmem:[%s2173_s27 + $0x384] ss:$16 sps:$4 sm:$0xff]   ;;  %v2003_v56 = vld [vmem:[%s2173_s27 + $0x38c] ss:$16 sps:$4 sm:$0xff]  }
  0x5d   : > { %1161 = vmatprep.subr.bf16.mxu0 %v1905_v57  ;;  %1247 = vmatprep.subr.bf16.mxu1 %v1907_v58  ;;  %v1998_v57 = vld [vmem:[%s2173_s27 + $0x380] ss:$16 sps:$4 sm:$0xff]   ;;  %v2001_v58 = vld [vmem:[%s2173_s27 + $0x388] ss:$16 sps:$4 sm:$0xff]  }
  0x60   : > { %1162 = vmatpush1.bf16.msra.mxu0 %v1909_v59  ;;  %1248 = vmatpush1.bf16.msra.mxu1 %v1910_v60  ;;  %v2006_v59 = vld [vmem:[%s2173_s27 + $0x3a4] ss:$16 sps:$4 sm:$0xff]   ;;  %v2009_v60 = vld [vmem:[%s2173_s27 + $0x3ac] ss:$16 sps:$4 sm:$0xff]  }
  0x61   : > { %1163 = vmatprep.subr.bf16.mxu0 %v1911_v61  ;;  %1249 = vmatprep.subr.bf16.mxu1 %v1913_v62  ;;  %v2004_v61 = vld [vmem:[%s2173_s27 + $0x3a0] ss:$16 sps:$4 sm:$0xff]   ;;  %v2007_v62 = vld [vmem:[%s2173_s27 + $0x3a8] ss:$16 sps:$4 sm:$0xff]  }
  0x64   : > { %1164 = vmatpush1.bf16.msra.mxu0 %v1915_v63  ;;  %1250 = vmatpush1.bf16.msra.mxu1 %v1916_v0  ;;  %v2012_v63 = vld [vmem:[%s2173_s27 + $0x3c4] ss:$16 sps:$4 sm:$0xff]   ;;  %v2015_v0 = vld [vmem:[%s2173_s27 + $0x3cc] ss:$16 sps:$4 sm:$0xff]  }
  0x65   : > { %1165 = vmatprep.subr.bf16.mxu0 %v1917_v1  ;;  %1251 = vmatprep.subr.bf16.mxu1 %v1919_v2  ;;  %v2010_v1 = vld [vmem:[%s2173_s27 + $0x3c0] ss:$16 sps:$4 sm:$0xff]   ;;  %v2013_v2 = vld [vmem:[%s2173_s27 + $0x3c8] ss:$16 sps:$4 sm:$0xff]  }
  0x68   : > { %1166 = vmatpush1.bf16.msra.mxu0 %v1921_v3  ;;  %1252 = vmatpush1.bf16.msra.mxu1 %v1922_v4  ;;  %v2018_v3 = vld [vmem:[%s2173_s27 + $0x3e4] ss:$16 sps:$4 sm:$0xff]   ;;  %v2021_v4 = vld [vmem:[%s2173_s27 + $0x3ec] ss:$16 sps:$4 sm:$0xff]  }
  0x69   : > { %1178 = vmatprep.subr.bf16.mxu0 %v1928_v5  ;;  %1264 = vmatprep.subr.bf16.mxu1 %v1931_v6  ;;  %v2016_v5 = vld [vmem:[%s2173_s27 + $0x3e0] ss:$16 sps:$4 sm:$0xff]   ;;  %v2019_v6 = vld [vmem:[%s2173_s27 + $0x3e8] ss:$16 sps:$4 sm:$0xff]  }
  0x6b   : > { %1168 = vmatmul.mubr.bf16.vlgmr.msra.gmra.mrb[0].mxu0 %v1923_v7  ;;  %1254 = vmatmul.mubr.bf16.vlgmr.msra.gmra.mrb[0].mxu1 %v1923_v7  ;;  %v2022_v7 = vld [vmem:[%s2228_s15 + $0x8] ss:$16 sps:$4 sm:$0xff]  }
  0x6c   : > { %1179 = vmatpush1.bf16.msra.mxu0 %v1926_v8  ;;  %1265 = vmatpush1.bf16.msra.mxu1 %v1929_v9 }
  0x6d   : > { %1180 = vmatprep.subr.bf16.mxu0 %v1934_v10  ;;  %1266 = vmatprep.subr.bf16.mxu1 %v1937_v11 }
  0x6e   : > { %1210 = vmatprep.mubr.bf16.mxu0 %v2024_v32  ;;  %1296 = vmatprep.mubr.bf16.mxu1 %v2024_v32 }
  0x70   : > { %1181 = vmatpush1.bf16.msra.mxu0 %v1932_v12  ;;  %1267 = vmatpush1.bf16.msra.mxu1 %v1935_v13 }
  0x71   : > { %1182 = vmatprep.subr.bf16.mxu0 %v1940_v14  ;;  %1268 = vmatprep.subr.bf16.mxu1 %v1943_v15 }
  0x74   : > { %1183 = vmatpush1.bf16.msra.mxu0 %v1938_v16  ;;  %1269 = vmatpush1.bf16.msra.mxu1 %v1941_v17 }
  0x75   : > { %1184 = vmatprep.subr.bf16.mxu0 %v1946_v18  ;;  %1270 = vmatprep.subr.bf16.mxu1 %v1949_v19 }
  0x78   : > { %1185 = vmatpush1.bf16.msra.mxu0 %v1944_v20  ;;  %1271 = vmatpush1.bf16.msra.mxu1 %v1947_v21 }
  0x79   : > { %1186 = vmatprep.subr.bf16.mxu0 %v1952_v22  ;;  %1272 = vmatprep.subr.bf16.mxu1 %v1955_v23 }
  0x7c   : > { %1187 = vmatpush1.bf16.msra.mxu0 %v1950_v24  ;;  %1273 = vmatpush1.bf16.msra.mxu1 %v1953_v25 }
  0x7d   : > { %1188 = vmatprep.subr.bf16.mxu0 %v1958_v26  ;;  %1274 = vmatprep.subr.bf16.mxu1 %v1961_v27 }
  0x80   : > { %1189 = vmatpush1.bf16.msra.mxu0 %v1956_v28  ;;  %1275 = vmatpush1.bf16.msra.mxu1 %v1959_v29 }
  0x81   : > { %1190 = vmatprep.subr.bf16.mxu0 %v1964_v30  ;;  %1276 = vmatprep.subr.bf16.mxu1 %v1967_v31 }
  0x84   : > { %1191 = vmatpush1.bf16.msra.mxu0 %v1962_v33  ;;  %1277 = vmatpush1.bf16.msra.mxu1 %v1965_v34 }
  0x85   : > { %1192 = vmatprep.subr.bf16.mxu0 %v1970_v35  ;;  %1278 = vmatprep.subr.bf16.mxu1 %v1973_v36 }
  0x88   : > { %1193 = vmatpush1.bf16.msra.mxu0 %v1968_v37  ;;  %1279 = vmatpush1.bf16.msra.mxu1 %v1971_v38 }
  0x89   : > { %1194 = vmatprep.subr.bf16.mxu0 %v1976_v39  ;;  %1280 = vmatprep.subr.bf16.mxu1 %v1979_v40 }
  0x8c   : > { %1195 = vmatpush1.bf16.msra.mxu0 %v1974_v41  ;;  %1281 = vmatpush1.bf16.msra.mxu1 %v1977_v42 }
  0x8d   : > { %1196 = vmatprep.subr.bf16.mxu0 %v1982_v43  ;;  %1282 = vmatprep.subr.bf16.mxu1 %v1985_v44 }
  0x90   : > { %1197 = vmatpush1.bf16.msra.mxu0 %v1980_v45  ;;  %1283 = vmatpush1.bf16.msra.mxu1 %v1983_v46 }
  0x91   : > { %1198 = vmatprep.subr.bf16.mxu0 %v1988_v47  ;;  %1284 = vmatprep.subr.bf16.mxu1 %v1991_v48 }
  0x94   : > { %1199 = vmatpush1.bf16.msra.mxu0 %v1986_v49  ;;  %1285 = vmatpush1.bf16.msra.mxu1 %v1989_v50 }
  0x95   : > { %1200 = vmatprep.subr.bf16.mxu0 %v1994_v51  ;;  %1286 = vmatprep.subr.bf16.mxu1 %v1997_v52 }
  0x98   : > { %1201 = vmatpush1.bf16.msra.mxu0 %v1992_v53  ;;  %1287 = vmatpush1.bf16.msra.mxu1 %v1995_v54 }
  0x99   : > { %1202 = vmatprep.subr.bf16.mxu0 %v2000_v55  ;;  %1288 = vmatprep.subr.bf16.mxu1 %v2003_v56 }
  0x9c   : > { %1203 = vmatpush1.bf16.msra.mxu0 %v1998_v57  ;;  %1289 = vmatpush1.bf16.msra.mxu1 %v2001_v58 }
  0x9d   : > { %1204 = vmatprep.subr.bf16.mxu0 %v2006_v59  ;;  %1290 = vmatprep.subr.bf16.mxu1 %v2009_v60 }
  0xa0   : > { %1205 = vmatpush1.bf16.msra.mxu0 %v2004_v61  ;;  %1291 = vmatpush1.bf16.msra.mxu1 %v2007_v62 }
  0xa1   : > { %1206 = vmatprep.subr.bf16.mxu0 %v2012_v63  ;;  %1292 = vmatprep.subr.bf16.mxu1 %v2015_v0 }
  0xa4   : > { %1207 = vmatpush1.bf16.msra.mxu0 %v2010_v1  ;;  %1293 = vmatpush1.bf16.msra.mxu1 %v2013_v2 }
  0xa5   : > { %1208 = vmatprep.subr.bf16.mxu0 %v2018_v3  ;;  %1294 = vmatprep.subr.bf16.mxu1 %v2021_v4 }
  0xa8   : > { %1209 = vmatpush1.bf16.msra.mxu0 %v2016_v5  ;;  %1295 = vmatpush1.bf16.msra.mxu1 %v2019_v6 }
  0xab   : > { %1211 = vmatmul.mubr.bf16.vlgmr.msra.gmra.mrb[0].mxu0 %v2022_v7  ;;  %1297 = vmatmul.mubr.bf16.vlgmr.msra.gmra.mrb[0].mxu1 %v2022_v7 }
 0x17b   : > { %1310 = sbr.rel (%p1747_p12) target bundleno = 387 (0x183), region = 63 }
 0x17e   : > { %v1212_v8 = vpop.f32.mrb[0].mxu0  ;;  %v1298_v9 = vpop.f32.mrb[0].mxu1 }
 0x17f   : > { %v1214_v10 = vpop.f32.mrb[1].mxu0  ;;  %v1300_v11 = vpop.f32.mrb[1].mxu1  ;;  %1311 = vst [vmem:[#allocation2] sm:$0xff] (!%p1747_p12), %v1212_v8  ;;  %1313 = vst [vmem:[#allocation2 + $0x10] sm:$0xff] (!%p1747_p12), %v1298_v9 }
 0x180   : > { %v1216_v12 = vpop.f32.mrb[2].mxu0  ;;  %v1302_v13 = vpop.f32.mrb[2].mxu1  ;;  %1312 = vst [vmem:[#allocation2 + $0x8] sm:$0xff] (!%p1747_p12), %v1214_v10  ;;  %1314 = vst [vmem:[#allocation2 + $0x18] sm:$0xff] (!%p1747_p12), %v1300_v11 }
 0x181   : > { %v1218_v14 = vpop.f32.mrb[3].mxu0  ;;  %v1304_v15 = vpop.f32.mrb[3].mxu1  ;;  %1315 = vst [vmem:[#allocation2 + $0x20] sm:$0xff] (!%p1747_p12), %v1216_v12  ;;  %1317 = vst [vmem:[#allocation2 + $0x30] sm:$0xff] (!%p1747_p12), %v1302_v13 }
 0x182   : > { %1316 = vst [vmem:[#allocation2 + $0x28] sm:$0xff] %v1218_v14  ;;  %1318 = vst [vmem:[#allocation2 + $0x38] sm:$0xff] %v1304_v15 }
 0x183 PF: > { %p1748_p13 = scmp.le.s32.totalorder %s2063_s17, 0 }
 0x185   : > { %1322 = sbr.rel (%p1748_p13) target bundleno = 398 (0x18e), region = 67 }
 0x187   : > { %v1323_v16 = vld [vmem:[#allocation2] sm:$0xff] (!%p1748_p13)  ;;  %v1325_v18 = vld [vmem:[#allocation2 + $0x10] sm:$0xff] (!%p1748_p13) }
 0x188   : > { %v1324_v17 = vld [vmem:[#allocation2 + $0x8] sm:$0xff] (!%p1748_p13)  ;;  %v1331_v19 = vadd.f32 (!%p1748_p13), %v1323_v16, %v1212_v8  ;;  %v1333_v21 = vadd.f32 (!%p1748_p13), %v1325_v18, %v1298_v9  ;;  %v1326_v22 = vld [vmem:[#allocation2 + $0x18] sm:$0xff] (!%p1748_p13) }
 0x189   : > { %v1332_v20 = vadd.f32 (!%p1748_p13), %v1324_v17, %v1214_v10  ;;  %v1327_v23 = vld [vmem:[#allocation2 + $0x20] sm:$0xff] (!%p1748_p13)  ;;  %v1328_v24 = vld [vmem:[#allocation2 + $0x28] sm:$0xff] (!%p1748_p13)  ;;  %v1334_v25 = vadd.f32 (!%p1748_p13), %v1326_v22, %v1300_v11  ;;  %v1329_v28 = vld [vmem:[#allocation2 + $0x30] sm:$0xff] (!%p1748_p13) }
 0x18a   : > { %v1335_v26 = vadd.f32 (!%p1748_p13), %v1327_v23, %v1216_v12  ;;  %v1336_v27 = vadd.f32 (!%p1748_p13), %v1328_v24, %v1218_v14  ;;  %v1330_v29 = vld [vmem:[#allocation2 + $0x38] sm:$0xff] (!%p1748_p13)  ;;  %1339 = vst [vmem:[#allocation2] sm:$0xff] (!%p1748_p13), %v1331_v19  ;;  %1341 = vst [vmem:[#allocation2 + $0x10] sm:$0xff] (!%p1748_p13), %v1333_v21  ;;  %v1337_v30 = vadd.f32 (!%p1748_p13), %v1329_v28, %v1302_v13 }
 0x18b   : > { %1340 = vst [vmem:[#allocation2 + $0x8] sm:$0xff] (!%p1748_p13), %v1332_v20  ;;  %v1338_v31 = vadd.f32 (!%p1748_p13), %v1330_v29, %v1304_v15  ;;  %1342 = vst [vmem:[#allocation2 + $0x18] sm:$0xff] (!%p1748_p13), %v1334_v25 }
 0x18c   : > { %1343 = vst [vmem:[#allocation2 + $0x20] sm:$0xff] %v1335_v26  ;;  %1344 = vst [vmem:[#allocation2 + $0x28] sm:$0xff] %v1336_v27 }
 0x18d   : > { %1345 = vst [vmem:[#allocation2 + $0x30] sm:$0xff] %v1337_v30  ;;  %1346 = vst [vmem:[#allocation2 + $0x38] sm:$0xff] %v1338_v31 }
 0x18e PF: > { %p1749_p0 = scmp.ne.s32.totalorder %s2063_s17, 8 }
 0x18f   : > { %v1361_v32 = vlaneseq (!%p1749_p0)  ;;  %v1359_v34 = vld [vmem:[%s2351_s2] sm:$0xf] (!%p1749_p0) }
 0x190   : > { %1350 = sbr.rel (%p1749_p0) target bundleno = 417 (0x1a1), region = 71  ;;  %v1389_v35 = vld [vmem:[%s2352_s3] sm:$0xf] (!%p1749_p0) }
 0x191   : > { %v1362_v33 = vshrl.u32 (!%p1749_p0), %v1361_v32, 7 }
 0x193   : > { %v1351_v36 = vld [vmem:[#allocation2] sm:$0xff] (!%p1749_p0)  ;;  %v1363_v38 = vsub.s32 (!%p1749_p0), 0, %v1362_v33  ;;  %v1367_v39 = vsub.s32 (!%p1749_p0), 1, %v1362_v33  ;;  %v1371_v40 = vsub.s32 (!%p1749_p0), 2, %v1362_v33  ;;  %v1375_v41 = vsub.s32 (!%p1749_p0), 3, %v1362_v33  ;;  %v1353_v42 = vld [vmem:[#allocation2 + $0x10] sm:$0xff] (!%p1749_p0) }
 0x194   : > { %v1352_v37 = vld [vmem:[#allocation2 + $0x8] sm:$0xff] (!%p1749_p0)  ;;  %v1354_v49 = vld [vmem:[#allocation2 + $0x18] sm:$0xff] (!%p1749_p0)  ;;  %v1357_v50 = vld [vmem:[#allocation2 + $0x30] sm:$0xff] (!%p1749_p0) }
 0x195   : > { %v1355_v43 = vld [vmem:[#allocation2 + $0x20] sm:$0xff] (!%p1749_p0)  ;;  %v1356_v44 = vld [vmem:[#allocation2 + $0x28] sm:$0xff] (!%p1749_p0)  ;;  %v1364_v45 = vrot.slane (!%p1749_p0), %v1359_v34, %v1363_v38  ;;  %v1368_v46 = vrot.slane (!%p1749_p0), %v1359_v34, %v1367_v39  ;;  %v1394_v47 = vrot.slane (!%p1749_p0), %v1389_v35, %v1363_v38  ;;  %v1398_v48 = vrot.slane (!%p1749_p0), %v1389_v35, %v1367_v39  ;;  %v1358_v51 = vld [vmem:[#allocation2 + $0x38] sm:$0xff] (!%p1749_p0) }
 0x196   : > { %v1372_v52 = vrot.slane (!%p1749_p0), %v1359_v34, %v1371_v40  ;;  %v1376_v53 = vrot.slane (!%p1749_p0), %v1359_v34, %v1375_v41  ;;  %v1402_v54 = vrot.slane (!%p1749_p0), %v1389_v35, %v1371_v40  ;;  %v1406_v55 = vrot.slane (!%p1749_p0), %v1389_v35, %v1375_v41 }
 0x197   : > { %v1381_v56 = vmul.f32 %v1364_v45, %v1351_v36  ;;  %v1382_v57 = vmul.f32 %v1368_v46, %v1352_v37  ;;  %v1385_v58 = vmul.f32 %v1364_v45, %v1355_v43  ;;  %v1386_v59 = vmul.f32 %v1368_v46, %v1356_v44 }
 0x198   : > { %v1383_v60 = vmul.f32 %v1372_v52, %v1353_v42  ;;  %v1384_v61 = vmul.f32 %v1376_v53, %v1354_v49  ;;  %v1387_v62 = vmul.f32 %v1372_v52, %v1357_v50  ;;  %v1388_v63 = vmul.f32 %v1376_v53, %v1358_v51 }
 0x199   : > { %v1411_v0 = vadd.f32 %v1394_v47, %v1381_v56  ;;  %v1412_v1 = vadd.f32 %v1398_v48, %v1382_v57  ;;  %v1415_v2 = vadd.f32 %v1394_v47, %v1385_v58  ;;  %v1416_v3 = vadd.f32 %v1398_v48, %v1386_v59 }
 0x19a   : > { %v1413_v4 = vadd.f32 %v1402_v54, %v1383_v60  ;;  %v1414_v5 = vadd.f32 %v1406_v55, %v1384_v61  ;;  %v1417_v6 = vadd.f32 %v1402_v54, %v1387_v62  ;;  %v1418_v7 = vadd.f32 %v1406_v55, %v1388_v63 }
 0x19b   : > { %v1419_v8 = vmax.f32 %v1411_v0, 0.0  ;;  %v1420_v9 = vmax.f32 %v1412_v1, 0.0  ;;  %v1423_v10 = vmax.f32 %v1415_v2, 0.0  ;;  %v1424_v11 = vmax.f32 %v1416_v3, 0.0 }
 0x19c   : > { %v1421_v12 = vmax.f32 %v1413_v4, 0.0  ;;  %v1422_v13 = vmax.f32 %v1414_v5, 0.0  ;;  %v1425_v14 = vmax.f32 %v1417_v6, 0.0  ;;  %v1426_v15 = vmax.f32 %v1418_v7, 0.0 }
 0x19d   : > { %v1758_v16 = vpack.c.bf16 %v1420_v9, %v1419_v8  ;;  %v1760_v17 = vpack.c.bf16 %v1424_v11, %v1423_v10 }
 0x19e   : > { %v1759_v18 = vpack.c.bf16 %v1422_v13, %v1421_v12  ;;  %v1761_v19 = vpack.c.bf16 %v1426_v15, %v1425_v14 }
 0x19f   : > { %1451 = vst [vmem:[%s2178_s5] sm:$0xff] %v1758_v16  ;;  %1453 = vst [vmem:[%s2178_s5 + $0x10] sm:$0xff] %v1760_v17 }
 0x1a0   : > { %1452 = vst [vmem:[%s2178_s5 + $0x8] sm:$0xff] %v1759_v18  ;;  %1454 = vst [vmem:[%s2178_s5 + $0x18] sm:$0xff] %v1761_v19 }
 0x1a1 PF: > { %s14_s21 = sadd.s32 1, %s2079_s21   ;;  %s2354_s15 = smov %s2059_s16 }
 0x1a2   : > { %p11_p1 = scmp.ge.s32.totalorder %s14_s21, 20   ;;  %s2355_s16 = smov %s2157_s28 }
 0x1a3   : > { %s2356_s17 = smov %s2071_s19  ;;  %s2357_s18 = smov %s2075_s20 }
 0x1a4   : > { %s2358_s19 = smov %s2361_s22  ;;  %s2359_s20 = smov %s2365_s23 }
 0x1a5   :  { %13 = sbr.rel (!%p11_p1) target bundleno = 4 (0x4), region = 115 }

// kernel: resnet34_8s_fuse_forward.111
= control target key start
LH: loop header
LB: loop body
LE: loop exit
PB: predicated region body
PF: predicated region fallthrough
CT: control target
= control target key end

     0   :  { %s1050_s15 = smov 0   ;;  %s1052_s16 = smov 0   ;;  %s1196_s0 = inlined_call_operand.vmem [shape: bf16[32,512], index: 0, kind: input, shape index: {}]   ;;  %s1197_s1 = inlined_call_operand.vmem [shape: bf16[512,16], index: 1, kind: input, shape index: {}]   ;;  %s1198_s2 = inlined_call_operand.vmem [shape: f32[1,16], index: 2, kind: input, shape index: {}]   ;;  %s1199_s3 = inlined_call_operand.vmem [shape: f32[1,16], index: 3, kind: input, shape index: {}]   ;;  %s1200_s4 = inlined_call_operand.vmem [shape: f32[32,16], index: 4, kind: output, shape index: {}]  }
   0x1   :  { %s1054_s17 = smov 0  }
   0x2 LB: > { %s33_s18 = sadd.s32 1, %s1019_s16  ;;  %p848_p0 = scmp.ge.s32.totalorder %s1023_s17, 1  ;;  %s1023_s17 = sphi %s1054_s17, %s14_s17   ;;  %s1019_s16 = sphi %s1052_s16, %s1202_s16   ;;  %s1015_s15 = sphi %s1050_s15, %s1201_s15  }
   0x3   : > { %p35_p1 = scmp.ge.s32.totalorder %s33_s18, 2  ;;  %p224_p2 = scmp.lt.s32.totalorder %s1023_s17, 3 }
   0x5   : > { %s1204_s18 = smov (%p35_p1, %s33_s18), 0  ;;  %p225_p3 = pnand %p848_p0, %p224_p2 }
   0x6   : > { %v963_v0 = vld [vmem:[%s1197_s1 + $0x40] sm:$0xff] (!%p225_p3)   ;;  %v967_v4 = vld [vmem:[%s1197_s1 + $0x48] sm:$0xff] (!%p225_p3)   ;;  %v971_v8 = vld [vmem:[%s1197_s1 + $0x50] sm:$0xff] (!%p225_p3)   ;;  %s849_s29 = sshll.u32 (!%p225_p3), %s1015_s15, 1  ;;  %vm675_vm0 = vcmask (!%p225_p3), 130048  }
   0x7   : > { %228 = sbr.rel (%p225_p3) target bundleno = 273 (0x111), region = 36  ;;  %v964_v1 = vld [vmem:[%s1197_s1 + $0xc0] sm:$0xff] (!%p225_p3)   ;;  %895 = vmatprep.subr.bf16.mxu0 (!%p225_p3), %v963_v0  ;;  %v968_v5 = vld [vmem:[%s1197_s1 + $0xc8] sm:$0xff] (!%p225_p3)   ;;  %v972_v9 = vld [vmem:[%s1197_s1 + $0xd0] sm:$0xff] (!%p225_p3)   ;;  %p274_p4 = scmp.lt.s32.totalorder (!%p225_p3), %s849_s29, 3 }
   0x8   : > { %v965_v2 = vld [vmem:[%s1197_s1] sm:$0xff] (!%p225_p3)   ;;  %917 = vmatprep.subr.bf16.mxu1 (!%p225_p3), %v964_v1  ;;  %v969_v6 = vld [vmem:[%s1197_s1 + $0x8] sm:$0xff] (!%p225_p3)   ;;  %v973_v10 = vld [vmem:[%s1197_s1 + $0x10] sm:$0xff] (!%p225_p3)  }
   0x9   : > { %v966_v3 = vld [vmem:[%s1197_s1 + $0x80] sm:$0xff] (!%p225_p3)   ;;  %896 = vmatpush3.bf16.msra.mxu0 (!%p225_p3), %v965_v2  ;;  %v970_v7 = vld [vmem:[%s1197_s1 + $0x88] sm:$0xff] (!%p225_p3)   ;;  %v974_v11 = vld [vmem:[%s1197_s1 + $0x90] sm:$0xff] (!%p225_p3)  }
   0xa   : > { %918 = vmatpush3.bf16.msra.mxu1 (!%p225_p3), %v966_v3  ;;  %897 = vmatprep.subr.bf16.mxu0 (!%p225_p3), %v967_v4  ;;  %v975_v12 = vld [vmem:[%s1197_s1 + $0x58] sm:$0xff] (!%p225_p3)   ;;  %v979_v16 = vld [vmem:[%s1197_s1 + $0x60] sm:$0xff] (!%p225_p3)   ;;  %v983_v20 = vld [vmem:[%s1197_s1 + $0x68] sm:$0xff] (!%p225_p3)  }
   0xb   : > { %919 = vmatprep.subr.bf16.mxu1 (!%p225_p3), %v968_v5  ;;  %v976_v13 = vld [vmem:[%s1197_s1 + $0xd8] sm:$0xff] (!%p225_p3)   ;;  %v980_v17 = vld [vmem:[%s1197_s1 + $0xe0] sm:$0xff] (!%p225_p3)   ;;  %v984_v21 = vld [vmem:[%s1197_s1 + $0xe8] sm:$0xff] (!%p225_p3)  }
   0xc   : > { %v977_v14 = vld [vmem:[%s1197_s1 + $0x18] sm:$0xff] (!%p225_p3)   ;;  %v981_v18 = vld [vmem:[%s1197_s1 + $0x20] sm:$0xff] (!%p225_p3)   ;;  %v985_v22 = vld [vmem:[%s1197_s1 + $0x28] sm:$0xff] (!%p225_p3)  }
   0xd   : > { %898 = vmatpush3.bf16.msra.mxu0 (!%p225_p3), %v969_v6  ;;  %v978_v15 = vld [vmem:[%s1197_s1 + $0x98] sm:$0xff] (!%p225_p3)   ;;  %v982_v19 = vld [vmem:[%s1197_s1 + $0xa0] sm:$0xff] (!%p225_p3)   ;;  %v986_v23 = vld [vmem:[%s1197_s1 + $0xa8] sm:$0xff] (!%p225_p3)  }
   0xe   : > { %920 = vmatpush3.bf16.msra.mxu1 %v970_v7  ;;  %899 = vmatprep.subr.bf16.mxu0 %v971_v8  ;;  %s1206_s29 = smov (!%p274_p4, %s849_s29), 3  ;;  %v987_v24 = vld [vmem:[%s1197_s1 + $0x70] sm:$0xff]   ;;  %v991_v28 = vld [vmem:[%s1197_s1 + $0x78] sm:$0xff]   ;;  %v890_v50 = vld [vmem:[%s1198_s2] ss:$0 sm:$0xff] }
   0xf   : > { %921 = vmatprep.subr.bf16.mxu1 %v972_v9  ;;  %v988_v25 = vld [vmem:[%s1197_s1 + $0xf0] sm:$0xff]   ;;  %s894_s30 = sshll.u32 %s1206_s29, 4  ;;  %v992_v29 = vld [vmem:[%s1197_s1 + $0xf8] sm:$0xff]   ;;  %s853_s23 = sshll.u32 %s1206_s29, 3  ;;  %v891_v52 = vld [vmem:[%s1199_s3] ss:$0 sm:$0xff] }
  0x10   : > { %v989_v26 = vld [vmem:[%s1197_s1 + $0x30] sm:$0xff]   ;;  %s281_s12 = scalar_lea.vmem %s1196_s0, %s894_s30  ;;  %v993_v30 = vld [vmem:[%s1197_s1 + $0x38] sm:$0xff]   ;;  %s306_s28 = scalar_lea.vmem %s1200_s4, %s853_s23 }
  0x11   : > { %900 = vmatpush3.bf16.msra.mxu0 %v973_v10  ;;  %v990_v27 = vld [vmem:[%s1197_s1 + $0xb0] sm:$0xff]   ;;  %v994_v31 = vld [vmem:[%s1197_s1 + $0xb8] sm:$0xff]  }
  0x12   : > { %922 = vmatpush3.bf16.msra.mxu1 %v974_v11  ;;  %901 = vmatprep.subr.bf16.mxu0 %v975_v12  ;;  %v995_v32 = vld [vmem:[%s281_s12] ss:$16 sps:$4 sm:$0xff]   ;;  %v997_v33 = vld [vmem:[%s281_s12 + $0x4] ss:$16 sps:$4 sm:$0xff]   ;;  %v998_v34 = vld [vmem:[%s281_s12 + $0x8] ss:$16 sps:$4 sm:$0xff]  }
  0x13   : > { %923 = vmatprep.subr.bf16.mxu1 %v976_v13  ;;  %v1000_v35 = vld [vmem:[%s281_s12 + $0xc] ss:$16 sps:$4 sm:$0xff]   ;;  %621 = vmatprep.mubr.bf16.mxu0 %v997_v33 }
  0x14   : > { %662 = vmatprep.mubr.bf16.mxu1 %v1000_v35 }
  0x15   : > { %902 = vmatpush3.bf16.msra.mxu0 %v977_v14 }
  0x16   : > { %924 = vmatpush3.bf16.msra.mxu1 %v978_v15  ;;  %903 = vmatprep.subr.bf16.mxu0 %v979_v16 }
  0x17   : > { %925 = vmatprep.subr.bf16.mxu1 %v980_v17 }
  0x19   : > { %904 = vmatpush3.bf16.msra.mxu0 %v981_v18 }
  0x1a   : > { %926 = vmatpush3.bf16.msra.mxu1 %v982_v19  ;;  %905 = vmatprep.subr.bf16.mxu0 %v983_v20 }
  0x1b   : > { %927 = vmatprep.subr.bf16.mxu1 %v984_v21 }
  0x1d   : > { %906 = vmatpush3.bf16.msra.mxu0 %v985_v22 }
  0x1e   : > { %928 = vmatpush3.bf16.msra.mxu1 %v986_v23  ;;  %907 = vmatprep.subr.bf16.mxu0 %v987_v24 }
  0x1f   : > { %929 = vmatprep.subr.bf16.mxu1 %v988_v25 }
  0x21   : > { %908 = vmatpush3.bf16.msra.mxu0 %v989_v26 }
  0x22   : > { %930 = vmatpush3.bf16.msra.mxu1 %v990_v27  ;;  %909 = vmatprep.subr.bf16.mxu0 %v991_v28 }
  0x23   : > { %931 = vmatprep.subr.bf16.mxu1 %v992_v29 }
  0x25   : > { %910 = vmatpush3.bf16.msra.mxu0 %v993_v30 }
  0x26   : > { %932 = vmatpush3.bf16.msra.mxu1 %v994_v31 }
  0x28   : > { %622 = vmatmul.mubr.bf16.vlgmr.msra.gmra.mrb[0].mxu0 %v995_v32 }
  0x29   : > { %663 = vmatmul.mubr.bf16.vlgmr.msra.gmra.mrb[0].mxu1 %v998_v34 }
  0xfb   : > { %v911_v36 = vpop.f32.mrb[0].mxu0 }
  0xfc   : > { %v933_v37 = vpop.f32.mrb[0].mxu1  ;;  %v912_v38 = vpop.f32.mrb[1].mxu0 }
  0xfd   : > { %v913_v39 = vadd.f32 %v912_v38, %v911_v36  ;;  %v934_v40 = vpop.f32.mrb[1].mxu1  ;;  %v914_v41 = vpop.f32.mrb[2].mxu0 }
  0xfe   : > { %v935_v42 = vadd.f32 %v934_v40, %v933_v37  ;;  %v936_v43 = vpop.f32.mrb[2].mxu1  ;;  %v915_v44 = vpop.f32.mrb[3].mxu0 }
  0xff   : > { %v916_v45 = vadd.f32 %v915_v44, %v914_v41  ;;  %v937_v46 = vpop.f32.mrb[3].mxu1 }
 0x100   : > { %v665_v47 = vadd.f32 %v935_v42, %v913_v39  ;;  %v938_v48 = vadd.f32 %v937_v46, %v936_v43 }
 0x102   : > { %676 = vst.msk [vmem:[#allocation2] sm:$0xff] %vm675_vm0, %v665_v47  ;;  %v668_v49 = vadd.f32 %v938_v48, %v916_v45 }
 0x104   : > { %677 = vst.msk [vmem:[#allocation2 + $0x8] sm:$0xff] %vm675_vm0, %v668_v49 }
 0x109   : > { %v692_v51 = vld [vmem:[#allocation2] sm:$0xff] }
 0x10a   : > { %v701_v53 = vmul.f32 %v890_v50, %v692_v51 }
 0x10b   : > { %v693_v54 = vld [vmem:[#allocation2 + $0x8] sm:$0xff] }
 0x10c   : > { %v710_v55 = vadd.f32 %v891_v52, %v701_v53  ;;  %v702_v56 = vmul.f32 %v890_v50, %v693_v54 }
 0x10e   : > { %713 = vst.msk [vmem:[%s306_s28] sm:$0xff] %vm675_vm0, %v710_v55  ;;  %v711_v57 = vadd.f32 %v891_v52, %v702_v56 }
 0x110   : > { %714 = vst.msk [vmem:[%s306_s28 + $0x8] sm:$0xff] %vm675_vm0, %v711_v57 }
 0x111 PF: > { %s14_s17 = sadd.s32 1, %s1023_s17   ;;  %s1201_s15 = smov %s1019_s16 }
 0x112   : > { %p11_p5 = scmp.ge.s32.totalorder %s14_s17, 4   ;;  %s1202_s16 = smov %s1204_s18 }
 0x114   :  { %13 = sbr.rel (!%p11_p5) target bundleno = 2 (0x2), region = 87 }

// kernel: resnet34_8s_fuse_forward.149
= control target key start
LH: loop header
LB: loop body
LE: loop exit
PB: predicated region body
PF: predicated region fallthrough
CT: control target
= control target key end

     0   :  { %s134_s0 = inlined_call_operand.vmem [shape: f32[8,1024], index: 0, kind: input, shape index: {}]   ;;  %s135_s1 = inlined_call_operand.vmem [shape: f32[8,1024], index: 1, kind: input, shape index: {}]   ;;  %s136_s2 = inlined_call_operand.vmem [shape: f32[8,1024], index: 2, kind: output, shape index: {}]  }
   0x1   :  { %v11_v0 = vld [vmem:[%s134_s0] sm:$0xff]  ;;  %v12_v2 = vld [vmem:[%s134_s0 + $0x8] sm:$0xff]  ;;  %v13_v5 = vld [vmem:[%s134_s0 + $0x10] sm:$0xff] }
   0x2   :  { %v19_v1 = vld [vmem:[%s135_s1] sm:$0xff]  ;;  %v20_v4 = vld [vmem:[%s135_s1 + $0x8] sm:$0xff]  ;;  %v21_v6 = vld [vmem:[%s135_s1 + $0x10] sm:$0xff] }
   0x3   :  { %v27_v3 = vadd.f32 %v19_v1, %v11_v0  ;;  %v28_v7 = vadd.f32 %v20_v4, %v12_v2  ;;  %v29_v8 = vadd.f32 %v21_v6, %v13_v5  ;;  %v14_v9 = vld [vmem:[%s134_s0 + $0x18] sm:$0xff]  ;;  %v15_v11 = vld [vmem:[%s134_s0 + $0x20] sm:$0xff]  ;;  %v16_v14 = vld [vmem:[%s134_s0 + $0x28] sm:$0xff] }
   0x4   :  { %v22_v10 = vld [vmem:[%s135_s1 + $0x18] sm:$0xff]  ;;  %v23_v13 = vld [vmem:[%s135_s1 + $0x20] sm:$0xff]  ;;  %v24_v15 = vld [vmem:[%s135_s1 + $0x28] sm:$0xff] }
   0x5   :  { %35 = vst [vmem:[%s136_s2] sm:$0xff] %v27_v3  ;;  %v30_v12 = vadd.f32 %v22_v10, %v14_v9  ;;  %36 = vst [vmem:[%s136_s2 + $0x8] sm:$0xff] %v28_v7  ;;  %v31_v16 = vadd.f32 %v23_v13, %v15_v11  ;;  %v32_v17 = vadd.f32 %v24_v15, %v16_v14  ;;  %v17_v18 = vld [vmem:[%s134_s0 + $0x30] sm:$0xff]  ;;  %v18_v20 = vld [vmem:[%s134_s0 + $0x38] sm:$0xff] }
   0x6   :  { %37 = vst [vmem:[%s136_s2 + $0x10] sm:$0xff] %v29_v8  ;;  %v25_v19 = vld [vmem:[%s135_s1 + $0x30] sm:$0xff]  ;;  %v26_v22 = vld [vmem:[%s135_s1 + $0x38] sm:$0xff] }
   0x7   :  { %38 = vst [vmem:[%s136_s2 + $0x18] sm:$0xff] %v30_v12  ;;  %v33_v21 = vadd.f32 %v25_v19, %v17_v18  ;;  %39 = vst [vmem:[%s136_s2 + $0x20] sm:$0xff] %v31_v16  ;;  %v34_v23 = vadd.f32 %v26_v22, %v18_v20 }
   0x8   :  { %40 = vst [vmem:[%s136_s2 + $0x28] sm:$0xff] %v32_v17 }
   0x9   :  { %41 = vst [vmem:[%s136_s2 + $0x30] sm:$0xff] %v33_v21  ;;  %42 = vst [vmem:[%s136_s2 + $0x38] sm:$0xff] %v34_v23 }

// kernel: resnet34_8s_fuse_forward.112
= control target key start
LH: loop header
LB: loop body
LE: loop exit
PB: predicated region body
PF: predicated region fallthrough
CT: control target
= control target key end

     0   :  { %s1510_s15 = smov 0   ;;  %s1512_s16 = smov 0   ;;  %s1764_s0 = inlined_call_operand.vmem [shape: bf16[512,128], index: 0, kind: input, shape index: {}]   ;;  %s1765_s1 = inlined_call_operand.vmem [shape: bf16[128,64], index: 1, kind: input, shape index: {}]   ;;  %s1766_s2 = inlined_call_operand.vmem [shape: f32[1,64], index: 2, kind: input, shape index: {}]   ;;  %s1767_s3 = inlined_call_operand.vmem [shape: f32[1,64], index: 3, kind: input, shape index: {}]   ;;  %s1768_s4 = inlined_call_operand.vmem [shape: bf16[512,64], index: 4, kind: output, shape index: {}]  }
   0x1   :  { %s1514_s17 = smov 0  }
   0x2 LB: > { %s33_s18 = sadd.s32 1, %s1479_s16  ;;  %p1228_p0 = scmp.ge.s32.totalorder %s1483_s17, 1  ;;  %s1483_s17 = sphi %s1514_s17, %s14_s17   ;;  %s1479_s16 = sphi %s1512_s16, %s1770_s16   ;;  %s1475_s15 = sphi %s1510_s15, %s1769_s15  }
   0x3   : > { %p35_p1 = scmp.ge.s32.totalorder %s33_s18, 2  ;;  %p221_p2 = scmp.lt.s32.totalorder %s1483_s17, 3 }
   0x5   : > { %s1772_s18 = smov (%p35_p1, %s33_s18), 0  ;;  %p222_p3 = pnand %p1228_p0, %p221_p2 }
   0x6   : > { %v1437_v0 = vld [vmem:[%s1765_s1] sm:$0xff] (!%p222_p3)   ;;  %s1229_s21 = sshll.u32 (!%p222_p3), %s1475_s15, 5  ;;  %v1438_v1 = vld [vmem:[%s1765_s1 + $0x8] sm:$0xff] (!%p222_p3)   ;;  %v1439_v2 = vld [vmem:[%s1765_s1 + $0x10] sm:$0xff] (!%p222_p3)   ;;  %vm658_vm0 = vcmask (!%p222_p3), 523264   ;;  %vm1065_vm1 = vcmask (!%p222_p3), 519168  }
   0x7   : > { %225 = sbr.rel (%p222_p3) target bundleno = 302 (0x12e), region = 36  ;;  %p268_p4 = scmp.lt.s32.totalorder (!%p222_p3), %s1229_s21, 63  ;;  %1349 = vmatprep.subr.bf16.mxu0 (!%p222_p3), %v1437_v0  ;;  %1397 = vmatprep.subr.bf16.mxu1 (!%p222_p3), %v1437_v0  ;;  %v1440_v3 = vld [vmem:[%s1765_s1 + $0x18] sm:$0xff] (!%p222_p3)   ;;  %v1441_v6 = vld [vmem:[%s1765_s1 + $0x20] sm:$0xff] (!%p222_p3)   ;;  %v1442_v7 = vld [vmem:[%s1765_s1 + $0x28] sm:$0xff] (!%p222_p3)  }
   0x8   : > { %1350 = vmatpush3.bf16.msra.mxu0 (!%p222_p3), %v1437_v0  ;;  %1405 = vmatpush3.bf16.msra.mxu1 (!%p222_p3), %v1437_v0  ;;  %v1443_v8 = vld [vmem:[%s1765_s1 + $0x30] sm:$0xff] (!%p222_p3)   ;;  %v1444_v9 = vld [vmem:[%s1765_s1 + $0x38] sm:$0xff] (!%p222_p3)   ;;  %v1589_v32 = vld [vmem:[%s1766_s2] ss:$0 sm:$0xff] (!%p222_p3) }
   0x9   : > { %1351 = vmatprep.subr.bf16.mxu0 (!%p222_p3), %v1438_v1  ;;  %1398 = vmatprep.subr.bf16.mxu1 (!%p222_p3), %v1438_v1  ;;  %v1594_v34 = vld [vmem:[%s1767_s3] ss:$0 sm:$0xff] (!%p222_p3) }
   0xc   : > { %1352 = vmatpush3.bf16.msra.mxu0 (!%p222_p3), %v1438_v1  ;;  %1406 = vmatpush3.bf16.msra.mxu1 (!%p222_p3), %v1438_v1 }
   0xd   : > { %1353 = vmatprep.subr.bf16.mxu0 (!%p222_p3), %v1439_v2  ;;  %1399 = vmatprep.subr.bf16.mxu1 (!%p222_p3), %v1439_v2 }
   0xe   : > { %s1774_s21 = smov (!%p268_p4, %s1229_s21), 63 }
   0xf   : > { %s1230_s26 = sshll.u32 %s1774_s21, 2 }
  0x10   : > { %s1545_s29 = scalar_lea.vmem %s1764_s0, %s1230_s26  ;;  %1354 = vmatpush3.bf16.msra.mxu0 %v1439_v2  ;;  %1407 = vmatpush3.bf16.msra.mxu1 %v1439_v2  ;;  %s1623_s24 = scalar_lea.vmem %s1768_s4, %s1230_s26 }
  0x11   : > { %v1445_v4 = vld [vmem:[%s1545_s29] sm:$0xff]   ;;  %1355 = vmatprep.subr.bf16.mxu0 %v1440_v3  ;;  %1400 = vmatprep.subr.bf16.mxu1 %v1440_v3  ;;  %v1447_v10 = vld [vmem:[%s1545_s29 + $0x8] sm:$0xff]   ;;  %v1449_v12 = vld [vmem:[%s1545_s29 + $0x10] sm:$0xff]  }
  0x12   : > { %v1446_v5 = vld [vmem:[%s1545_s29 + $0x40] sm:$0xff]   ;;  %1365 = vmatprep.mubr.bf16.mxu0 %v1445_v4  ;;  %v1448_v11 = vld [vmem:[%s1545_s29 + $0x48] sm:$0xff]   ;;  %v1450_v13 = vld [vmem:[%s1545_s29 + $0x50] sm:$0xff]  }
  0x13   : > { %1381 = vmatprep.mubr.bf16.mxu1 %v1446_v5  ;;  %v1451_v14 = vld [vmem:[%s1545_s29 + $0x18] sm:$0xff]   ;;  %v1453_v16 = vld [vmem:[%s1545_s29 + $0x20] sm:$0xff]   ;;  %v1455_v18 = vld [vmem:[%s1545_s29 + $0x28] sm:$0xff]  }
  0x14   : > { %1356 = vmatpush3.bf16.msra.mxu0 %v1440_v3  ;;  %1408 = vmatpush3.bf16.msra.mxu1 %v1440_v3  ;;  %v1452_v15 = vld [vmem:[%s1545_s29 + $0x58] sm:$0xff]   ;;  %v1454_v17 = vld [vmem:[%s1545_s29 + $0x60] sm:$0xff]   ;;  %v1456_v19 = vld [vmem:[%s1545_s29 + $0x68] sm:$0xff]  }
  0x15   : > { %1357 = vmatprep.subr.bf16.mxu0 %v1441_v6  ;;  %1401 = vmatprep.subr.bf16.mxu1 %v1441_v6  ;;  %v1457_v20 = vld [vmem:[%s1545_s29 + $0x30] sm:$0xff]   ;;  %v1459_v22 = vld [vmem:[%s1545_s29 + $0x38] sm:$0xff]  }
  0x16   : > { %v1458_v21 = vld [vmem:[%s1545_s29 + $0x70] sm:$0xff]   ;;  %v1460_v23 = vld [vmem:[%s1545_s29 + $0x78] sm:$0xff]  }
  0x18   : > { %1358 = vmatpush3.bf16.msra.mxu0 %v1441_v6  ;;  %1409 = vmatpush3.bf16.msra.mxu1 %v1441_v6 }
  0x19   : > { %1359 = vmatprep.subr.bf16.mxu0 %v1442_v7  ;;  %1402 = vmatprep.subr.bf16.mxu1 %v1442_v7 }
  0x1c   : > { %1360 = vmatpush3.bf16.msra.mxu0 %v1442_v7  ;;  %1410 = vmatpush3.bf16.msra.mxu1 %v1442_v7 }
  0x1d   : > { %1361 = vmatprep.subr.bf16.mxu0 %v1443_v8  ;;  %1403 = vmatprep.subr.bf16.mxu1 %v1443_v8 }
  0x20   : > { %1362 = vmatpush3.bf16.msra.mxu0 %v1443_v8  ;;  %1411 = vmatpush3.bf16.msra.mxu1 %v1443_v8 }
  0x21   : > { %1363 = vmatprep.subr.bf16.mxu0 %v1444_v9  ;;  %1404 = vmatprep.subr.bf16.mxu1 %v1444_v9 }
  0x24   : > { %1364 = vmatpush3.bf16.msra.mxu0 %v1444_v9  ;;  %1412 = vmatpush3.bf16.msra.mxu1 %v1444_v9 }
  0x27   : > { %1366 = vmatmul.mubr.bf16.vlgmr.msra.gmra.mrb[0].mxu0 %v1447_v10  ;;  %1382 = vmatmul.mubr.bf16.vlgmr.msra.gmra.mrb[0].mxu1 %v1448_v11 }
  0x28   : > { %1369 = vmatprep.mubr.bf16.mxu0 %v1449_v12  ;;  %1385 = vmatprep.mubr.bf16.mxu1 %v1450_v13 }
  0x2f   : > { %1370 = vmatmul.mubr.bf16.gmra.mrb[4].mxu0 %v1451_v14  ;;  %1386 = vmatmul.mubr.bf16.gmra.mrb[4].mxu1 %v1452_v15 }
  0x30   : > { %1373 = vmatprep.mubr.bf16.mxu0 %v1453_v16  ;;  %1389 = vmatprep.mubr.bf16.mxu1 %v1454_v17 }
  0x37   : > { %1374 = vmatmul.mubr.bf16.gmra.mrb[8].mxu0 %v1455_v18  ;;  %1390 = vmatmul.mubr.bf16.gmra.mrb[8].mxu1 %v1456_v19 }
  0x38   : > { %1377 = vmatprep.mubr.bf16.mxu0 %v1457_v20  ;;  %1393 = vmatprep.mubr.bf16.mxu1 %v1458_v21 }
  0x3f   : > { %1378 = vmatmul.mubr.bf16.gmra.mrb[12].mxu0 %v1459_v22  ;;  %1394 = vmatmul.mubr.bf16.gmra.mrb[12].mxu1 %v1460_v23 }
  0xfa   : > { %v1367_v24 = vpop.f32.mrb[0].mxu0  ;;  %v1383_v25 = vpop.f32.mrb[0].mxu1 }
  0xfb   : > { %661 = vst.msk [vmem:[#allocation2 + $0x10] sm:$0xff] %vm658_vm0, %v1367_v24  ;;  %677 = vst.msk [vmem:[#allocation2 + $0x90] sm:$0xff] %vm658_vm0, %v1383_v25  ;;  %v527_v26 = vpop.f32.mrb[1].mxu0  ;;  %v591_v27 = vpop.f32.mrb[1].mxu1 }
  0xfc   : > { %659 = vst.msk [vmem:[#allocation2] sm:$0xff] %vm658_vm0, %v527_v26  ;;  %675 = vst.msk [vmem:[#allocation2 + $0x80] sm:$0xff] %vm658_vm0, %v591_v27  ;;  %v1368_v28 = vpop.f32.mrb[2].mxu0  ;;  %v1384_v29 = vpop.f32.mrb[2].mxu1 }
  0xfd   : > { %662 = vst.msk [vmem:[#allocation2 + $0x18] sm:$0xff] %vm658_vm0, %v1368_v28  ;;  %678 = vst.msk [vmem:[#allocation2 + $0x98] sm:$0xff] %vm658_vm0, %v1384_v29  ;;  %v530_v30 = vpop.f32.mrb[3].mxu0  ;;  %v594_v31 = vpop.f32.mrb[3].mxu1 }
  0xfe   : > { %660 = vst.msk [vmem:[#allocation2 + $0x8] sm:$0xff] %vm658_vm0, %v530_v30  ;;  %676 = vst.msk [vmem:[#allocation2 + $0x88] sm:$0xff] %vm658_vm0, %v594_v31 }
 0x102   : > { %v797_v33 = vld [vmem:[#allocation2 + $0x10] sm:$0xff]  ;;  %v1371_v36 = vpop.f32.mrb[4].mxu0  ;;  %v1387_v37 = vpop.f32.mrb[4].mxu1 }
 0x103   : > { %v813_v35 = vld [vmem:[#allocation2 + $0x90] sm:$0xff]  ;;  %v836_v38 = vmul.f32 %v1589_v32, %v797_v33  ;;  %v795_v40 = vld [vmem:[#allocation2] sm:$0xff]  ;;  %665 = vst.msk [vmem:[#allocation2 + $0x30] sm:$0xff] %vm658_vm0, %v1371_v36  ;;  %681 = vst.msk [vmem:[#allocation2 + $0xb0] sm:$0xff] %vm658_vm0, %v1387_v37  ;;  %v543_v42 = vpop.f32.mrb[5].mxu0  ;;  %v607_v43 = vpop.f32.mrb[5].mxu1 }
 0x104   : > { %v852_v39 = vmul.f32 %v1589_v32, %v813_v35  ;;  %v811_v41 = vld [vmem:[#allocation2 + $0x80] sm:$0xff]  ;;  %v834_v44 = vmul.f32 %v1589_v32, %v795_v40  ;;  %v798_v46 = vld [vmem:[#allocation2 + $0x18] sm:$0xff]  ;;  %663 = vst.msk [vmem:[#allocation2 + $0x20] sm:$0xff] %vm658_vm0, %v543_v42  ;;  %679 = vst.msk [vmem:[#allocation2 + $0xa0] sm:$0xff] %vm658_vm0, %v607_v43  ;;  %v1372_v48 = vpop.f32.mrb[6].mxu0  ;;  %v1388_v49 = vpop.f32.mrb[6].mxu1 }
 0x105   : > { %v850_v45 = vmul.f32 %v1589_v32, %v811_v41  ;;  %v814_v47 = vld [vmem:[#allocation2 + $0x98] sm:$0xff]  ;;  %v875_v50 = vadd.f32 %v1594_v34, %v836_v38  ;;  %v837_v52 = vmul.f32 %v1589_v32, %v798_v46  ;;  %v796_v54 = vld [vmem:[#allocation2 + $0x8] sm:$0xff]  ;;  %666 = vst.msk [vmem:[#allocation2 + $0x38] sm:$0xff] %vm658_vm0, %v1372_v48  ;;  %682 = vst.msk [vmem:[#allocation2 + $0xb8] sm:$0xff] %vm658_vm0, %v1388_v49  ;;  %v546_v56 = vpop.f32.mrb[7].mxu0  ;;  %v610_v57 = vpop.f32.mrb[7].mxu1 }
 0x106   : > { %v891_v51 = vadd.f32 %v1594_v34, %v852_v39  ;;  %v853_v53 = vmul.f32 %v1589_v32, %v814_v47  ;;  %v812_v55 = vld [vmem:[#allocation2 + $0x88] sm:$0xff]  ;;  %v873_v58 = vadd.f32 %v1594_v34, %v834_v44  ;;  %v835_v60 = vmul.f32 %v1589_v32, %v796_v54  ;;  %664 = vst.msk [vmem:[#allocation2 + $0x28] sm:$0xff] %vm658_vm0, %v546_v56 }
 0x107   : > { %v889_v59 = vadd.f32 %v1594_v34, %v850_v45  ;;  %v851_v61 = vmul.f32 %v1589_v32, %v812_v55  ;;  %680 = vst.msk [vmem:[#allocation2 + $0xa8] sm:$0xff] %vm658_vm0, %v610_v57  ;;  %v907_v62 = vmax.f32 %v875_v50, 0.0  ;;  %v876_v0 = vadd.f32 %v1594_v34, %v837_v52 }
 0x108   : > { %v923_v63 = vmax.f32 %v891_v51, 0.0  ;;  %v892_v1 = vadd.f32 %v1594_v34, %v853_v53  ;;  %v905_v2 = vmax.f32 %v873_v58, 0.0  ;;  %v874_v4 = vadd.f32 %v1594_v34, %v835_v60 }
 0x109   : > { %v921_v3 = vmax.f32 %v889_v59, 0.0  ;;  %v890_v5 = vadd.f32 %v1594_v34, %v851_v61  ;;  %v1295_v6 = vpack.c.bf16 %v907_v62, %v907_v62  ;;  %v908_v8 = vmax.f32 %v876_v0, 0.0 }
 0x10a   : > { %v1311_v7 = vpack.c.bf16 %v923_v63, %v923_v63  ;;  %v924_v9 = vmax.f32 %v892_v1, 0.0  ;;  %v1293_v10 = vpack.c.bf16 %v905_v2, %v905_v2  ;;  %v906_v12 = vmax.f32 %v874_v4, 0.0  ;;  %v801_v14 = vld [vmem:[#allocation2 + $0x30] sm:$0xff]  ;;  %v1375_v16 = vpop.f32.mrb[8].mxu0  ;;  %v1391_v17 = vpop.f32.mrb[8].mxu1 }
 0x10b   : > { %v1309_v11 = vpack.c.bf16 %v921_v3, %v921_v3  ;;  %v922_v13 = vmax.f32 %v890_v5, 0.0  ;;  %v817_v15 = vld [vmem:[#allocation2 + $0xb0] sm:$0xff]  ;;  %1068 = vst.msk [vmem:[%s1623_s24 + $0x8] sm:$0xf] %vm1065_vm1, %v1295_v6  ;;  %v1296_v18 = vpack.c.bf16 %v908_v8, %v908_v8  ;;  %v840_v20 = vmul.f32 %v1589_v32, %v801_v14  ;;  %v799_v22 = vld [vmem:[#allocation2 + $0x20] sm:$0xff]  ;;  %v559_v24 = vpop.f32.mrb[9].mxu0 }
 0x10c   : > { %1084 = vst.msk [vmem:[%s1623_s24 + $0x48] sm:$0xf] %vm1065_vm1, %v1311_v7  ;;  %v1312_v19 = vpack.c.bf16 %v924_v9, %v924_v9  ;;  %v856_v21 = vmul.f32 %v1589_v32, %v817_v15  ;;  %v815_v23 = vld [vmem:[#allocation2 + $0xa0] sm:$0xff]  ;;  %v623_v25 = vpop.f32.mrb[9].mxu1  ;;  %1066 = vst.msk [vmem:[%s1623_s24] sm:$0xf] %vm1065_vm1, %v1293_v10  ;;  %v1294_v26 = vpack.c.bf16 %v906_v12, %v906_v12 }
 0x10d   : > { %669 = vst.msk [vmem:[#allocation2 + $0x50] sm:$0xff] %vm658_vm0, %v1375_v16  ;;  %685 = vst.msk [vmem:[#allocation2 + $0xd0] sm:$0xff] %vm658_vm0, %v1391_v17  ;;  %v1310_v27 = vpack.c.bf16 %v922_v13, %v922_v13  ;;  %v838_v28 = vmul.f32 %v1589_v32, %v799_v22  ;;  %v854_v29 = vmul.f32 %v1589_v32, %v815_v23  ;;  %v802_v30 = vld [vmem:[#allocation2 + $0x38] sm:$0xff]  ;;  %v1376_v33 = vpop.f32.mrb[10].mxu0  ;;  %v1392_v35 = vpop.f32.mrb[10].mxu1  ;;  %v800_v40 = vld [vmem:[#allocation2 + $0x28] sm:$0xff] }
 0x10e   : > { %1082 = vst.msk [vmem:[%s1623_s24 + $0x40] sm:$0xf] %vm1065_vm1, %v1309_v11  ;;  %v818_v31 = vld [vmem:[#allocation2 + $0xb8] sm:$0xff]  ;;  %1069 = vst.msk [vmem:[%s1623_s24 + $0xc] sm:$0xf] %vm1065_vm1, %v1296_v18  ;;  %v879_v36 = vadd.f32 %v1594_v34, %v840_v20  ;;  %v895_v37 = vadd.f32 %v1594_v34, %v856_v21  ;;  %v841_v38 = vmul.f32 %v1589_v32, %v802_v30  ;;  %v816_v41 = vld [vmem:[#allocation2 + $0xa8] sm:$0xff] }
 0x10f   : > { %667 = vst.msk [vmem:[#allocation2 + $0x40] sm:$0xff] %vm658_vm0, %v559_v24  ;;  %683 = vst.msk [vmem:[#allocation2 + $0xc0] sm:$0xff] %vm658_vm0, %v623_v25  ;;  %v857_v39 = vmul.f32 %v1589_v32, %v818_v31  ;;  %v562_v42 = vpop.f32.mrb[11].mxu0  ;;  %v626_v43 = vpop.f32.mrb[11].mxu1  ;;  %v877_v44 = vadd.f32 %v1594_v34, %v838_v28  ;;  %v893_v45 = vadd.f32 %v1594_v34, %v854_v29 }
 0x110   : > { %1085 = vst.msk [vmem:[%s1623_s24 + $0x4c] sm:$0xf] %vm1065_vm1, %v1312_v19  ;;  %1067 = vst.msk [vmem:[%s1623_s24 + $0x4] sm:$0xf] %vm1065_vm1, %v1294_v26  ;;  %v839_v46 = vmul.f32 %v1589_v32, %v800_v40  ;;  %v855_v47 = vmul.f32 %v1589_v32, %v816_v41  ;;  %v911_v48 = vmax.f32 %v879_v36, 0.0  ;;  %v927_v49 = vmax.f32 %v895_v37, 0.0 }
 0x111   : > { %670 = vst.msk [vmem:[#allocation2 + $0x58] sm:$0xff] %vm658_vm0, %v1376_v33  ;;  %686 = vst.msk [vmem:[#allocation2 + $0xd8] sm:$0xff] %vm658_vm0, %v1392_v35  ;;  %v880_v50 = vadd.f32 %v1594_v34, %v841_v38  ;;  %v896_v51 = vadd.f32 %v1594_v34, %v857_v39  ;;  %v909_v52 = vmax.f32 %v877_v44, 0.0  ;;  %v925_v53 = vmax.f32 %v893_v45, 0.0 }
 0x112   : > { %1083 = vst.msk [vmem:[%s1623_s24 + $0x44] sm:$0xf] %vm1065_vm1, %v1310_v27  ;;  %v878_v54 = vadd.f32 %v1594_v34, %v839_v46  ;;  %v894_v55 = vadd.f32 %v1594_v34, %v855_v47  ;;  %v1299_v56 = vpack.c.bf16 %v911_v48, %v911_v48  ;;  %v1315_v57 = vpack.c.bf16 %v927_v49, %v927_v49  ;;  %v1379_v2 = vpop.f32.mrb[12].mxu0  ;;  %v1395_v3 = vpop.f32.mrb[12].mxu1 }
 0x113   : > { %668 = vst.msk [vmem:[#allocation2 + $0x48] sm:$0xff] %vm658_vm0, %v562_v42  ;;  %684 = vst.msk [vmem:[#allocation2 + $0xc8] sm:$0xff] %vm658_vm0, %v626_v43  ;;  %v912_v58 = vmax.f32 %v880_v50, 0.0  ;;  %v928_v59 = vmax.f32 %v896_v51, 0.0  ;;  %v1297_v60 = vpack.c.bf16 %v909_v52, %v909_v52  ;;  %v1313_v61 = vpack.c.bf16 %v925_v53, %v925_v53  ;;  %v575_v10 = vpop.f32.mrb[13].mxu0  ;;  %v639_v11 = vpop.f32.mrb[13].mxu1 }
 0x114   : > { %v910_v62 = vmax.f32 %v878_v54, 0.0  ;;  %v926_v63 = vmax.f32 %v894_v55, 0.0  ;;  %v805_v0 = vld [vmem:[#allocation2 + $0x50] sm:$0xff]  ;;  %1072 = vst.msk [vmem:[%s1623_s24 + $0x18] sm:$0xf] %vm1065_vm1, %v1299_v56  ;;  %v1380_v18 = vpop.f32.mrb[14].mxu0 }
 0x115   : > { %v821_v1 = vld [vmem:[#allocation2 + $0xd0] sm:$0xff]  ;;  %1088 = vst.msk [vmem:[%s1623_s24 + $0x58] sm:$0xf] %vm1065_vm1, %v1315_v57  ;;  %v1300_v4 = vpack.c.bf16 %v912_v58, %v912_v58  ;;  %v1316_v5 = vpack.c.bf16 %v928_v59, %v928_v59  ;;  %v844_v6 = vmul.f32 %v1589_v32, %v805_v0  ;;  %1070 = vst.msk [vmem:[%s1623_s24 + $0x10] sm:$0xf] %vm1065_vm1, %v1297_v60  ;;  %v1396_v19 = vpop.f32.mrb[14].mxu1 }
 0x116   : > { %v860_v7 = vmul.f32 %v1589_v32, %v821_v1  ;;  %v803_v8 = vld [vmem:[#allocation2 + $0x40] sm:$0xff]  ;;  %673 = vst.msk [vmem:[#allocation2 + $0x70] sm:$0xff] %vm658_vm0, %v1379_v2  ;;  %689 = vst.msk [vmem:[#allocation2 + $0xf0] sm:$0xff] %vm658_vm0, %v1395_v3  ;;  %v1298_v12 = vpack.c.bf16 %v910_v62, %v910_v62  ;;  %v1314_v13 = vpack.c.bf16 %v926_v63, %v926_v63  ;;  %v578_v26 = vpop.f32.mrb[15].mxu0  ;;  %v642_v27 = vpop.f32.mrb[15].mxu1 }
 0x117   : > { %v819_v9 = vld [vmem:[#allocation2 + $0xc0] sm:$0xff]  ;;  %1086 = vst.msk [vmem:[%s1623_s24 + $0x50] sm:$0xf] %vm1065_vm1, %v1313_v61  ;;  %v842_v14 = vmul.f32 %v1589_v32, %v803_v8  ;;  %1073 = vst.msk [vmem:[%s1623_s24 + $0x1c] sm:$0xf] %vm1065_vm1, %v1300_v4  ;;  %v883_v20 = vadd.f32 %v1594_v34, %v844_v6 }
 0x118   : > { %v858_v15 = vmul.f32 %v1589_v32, %v819_v9  ;;  %v806_v16 = vld [vmem:[#allocation2 + $0x58] sm:$0xff]  ;;  %671 = vst.msk [vmem:[#allocation2 + $0x60] sm:$0xff] %vm658_vm0, %v575_v10  ;;  %687 = vst.msk [vmem:[#allocation2 + $0xe0] sm:$0xff] %vm658_vm0, %v639_v11  ;;  %v899_v21 = vadd.f32 %v1594_v34, %v860_v7 }
 0x119   : > { %v822_v17 = vld [vmem:[#allocation2 + $0xd8] sm:$0xff]  ;;  %1089 = vst.msk [vmem:[%s1623_s24 + $0x5c] sm:$0xf] %vm1065_vm1, %v1316_v5  ;;  %v845_v22 = vmul.f32 %v1589_v32, %v806_v16  ;;  %1071 = vst.msk [vmem:[%s1623_s24 + $0x14] sm:$0xf] %vm1065_vm1, %v1298_v12  ;;  %v881_v28 = vadd.f32 %v1594_v34, %v842_v14  ;;  %v915_v33 = vmax.f32 %v883_v20, 0.0 }
 0x11a   : > { %v861_v23 = vmul.f32 %v1589_v32, %v822_v17  ;;  %v804_v24 = vld [vmem:[#allocation2 + $0x48] sm:$0xff]  ;;  %674 = vst.msk [vmem:[#allocation2 + $0x78] sm:$0xff] %vm658_vm0, %v1380_v18  ;;  %690 = vst.msk [vmem:[#allocation2 + $0xf8] sm:$0xff] %vm658_vm0, %v1396_v19  ;;  %v897_v29 = vadd.f32 %v1594_v34, %v858_v15  ;;  %v931_v35 = vmax.f32 %v899_v21, 0.0 }
 0x11b   : > { %v820_v25 = vld [vmem:[#allocation2 + $0xc8] sm:$0xff]  ;;  %1087 = vst.msk [vmem:[%s1623_s24 + $0x54] sm:$0xf] %vm1065_vm1, %v1314_v13  ;;  %v843_v30 = vmul.f32 %v1589_v32, %v804_v24  ;;  %v884_v36 = vadd.f32 %v1594_v34, %v845_v22  ;;  %v913_v38 = vmax.f32 %v881_v28, 0.0  ;;  %v1303_v42 = vpack.c.bf16 %v915_v33, %v915_v33 }
 0x11c   : > { %v859_v31 = vmul.f32 %v1589_v32, %v820_v25  ;;  %672 = vst.msk [vmem:[#allocation2 + $0x68] sm:$0xff] %vm658_vm0, %v578_v26  ;;  %688 = vst.msk [vmem:[#allocation2 + $0xe8] sm:$0xff] %vm658_vm0, %v642_v27  ;;  %v900_v37 = vadd.f32 %v1594_v34, %v861_v23  ;;  %v929_v39 = vmax.f32 %v897_v29, 0.0  ;;  %v1319_v43 = vpack.c.bf16 %v931_v35, %v931_v35 }
 0x11d   : > { %v882_v40 = vadd.f32 %v1594_v34, %v843_v30  ;;  %v916_v44 = vmax.f32 %v884_v36, 0.0  ;;  %v1301_v46 = vpack.c.bf16 %v913_v38, %v913_v38  ;;  %v809_v50 = vld [vmem:[#allocation2 + $0x70] sm:$0xff]  ;;  %1076 = vst.msk [vmem:[%s1623_s24 + $0x28] sm:$0xf] %vm1065_vm1, %v1303_v42 }
 0x11e   : > { %v898_v41 = vadd.f32 %v1594_v34, %v859_v31  ;;  %v932_v45 = vmax.f32 %v900_v37, 0.0  ;;  %v1317_v47 = vpack.c.bf16 %v929_v39, %v929_v39  ;;  %v825_v51 = vld [vmem:[#allocation2 + $0xf0] sm:$0xff]  ;;  %1092 = vst.msk [vmem:[%s1623_s24 + $0x68] sm:$0xf] %vm1065_vm1, %v1319_v43  ;;  %v848_v54 = vmul.f32 %v1589_v32, %v809_v50 }
 0x11f   : > { %v914_v48 = vmax.f32 %v882_v40, 0.0  ;;  %v1304_v52 = vpack.c.bf16 %v916_v44, %v916_v44  ;;  %v864_v55 = vmul.f32 %v1589_v32, %v825_v51  ;;  %v807_v56 = vld [vmem:[#allocation2 + $0x60] sm:$0xff]  ;;  %1074 = vst.msk [vmem:[%s1623_s24 + $0x20] sm:$0xf] %vm1065_vm1, %v1301_v46 }
 0x120   : > { %v930_v49 = vmax.f32 %v898_v41, 0.0  ;;  %v1320_v53 = vpack.c.bf16 %v932_v45, %v932_v45  ;;  %v823_v57 = vld [vmem:[#allocation2 + $0xe0] sm:$0xff]  ;;  %1090 = vst.msk [vmem:[%s1623_s24 + $0x60] sm:$0xf] %vm1065_vm1, %v1317_v47  ;;  %v846_v60 = vmul.f32 %v1589_v32, %v807_v56  ;;  %v887_v0 = vadd.f32 %v1594_v34, %v848_v54 }
 0x121   : > { %v1302_v58 = vpack.c.bf16 %v914_v48, %v914_v48  ;;  %v862_v61 = vmul.f32 %v1589_v32, %v823_v57  ;;  %v810_v62 = vld [vmem:[#allocation2 + $0x78] sm:$0xff]  ;;  %1077 = vst.msk [vmem:[%s1623_s24 + $0x2c] sm:$0xf] %vm1065_vm1, %v1304_v52  ;;  %v903_v1 = vadd.f32 %v1594_v34, %v864_v55 }
 0x122   : > { %v1318_v59 = vpack.c.bf16 %v930_v49, %v930_v49  ;;  %v826_v63 = vld [vmem:[#allocation2 + $0xf8] sm:$0xff]  ;;  %1093 = vst.msk [vmem:[%s1623_s24 + $0x6c] sm:$0xf] %vm1065_vm1, %v1320_v53  ;;  %v849_v2 = vmul.f32 %v1589_v32, %v810_v62  ;;  %v885_v6 = vadd.f32 %v1594_v34, %v846_v60  ;;  %v919_v10 = vmax.f32 %v887_v0, 0.0 }
 0x123   : > { %v865_v3 = vmul.f32 %v1589_v32, %v826_v63  ;;  %v808_v4 = vld [vmem:[#allocation2 + $0x68] sm:$0xff]  ;;  %1075 = vst.msk [vmem:[%s1623_s24 + $0x24] sm:$0xf] %vm1065_vm1, %v1302_v58  ;;  %v901_v7 = vadd.f32 %v1594_v34, %v862_v61  ;;  %v935_v11 = vmax.f32 %v903_v1, 0.0 }
 0x124   : > { %v824_v5 = vld [vmem:[#allocation2 + $0xe8] sm:$0xff]  ;;  %1091 = vst.msk [vmem:[%s1623_s24 + $0x64] sm:$0xf] %vm1065_vm1, %v1318_v59  ;;  %v847_v8 = vmul.f32 %v1589_v32, %v808_v4  ;;  %v888_v12 = vadd.f32 %v1594_v34, %v849_v2  ;;  %v917_v14 = vmax.f32 %v885_v6, 0.0  ;;  %v1307_v18 = vpack.c.bf16 %v919_v10, %v919_v10 }
 0x125   : > { %v863_v9 = vmul.f32 %v1589_v32, %v824_v5  ;;  %v904_v13 = vadd.f32 %v1594_v34, %v865_v3  ;;  %v933_v15 = vmax.f32 %v901_v7, 0.0  ;;  %v1323_v19 = vpack.c.bf16 %v935_v11, %v935_v11 }
 0x126   : > { %v886_v16 = vadd.f32 %v1594_v34, %v847_v8  ;;  %v920_v32 = vmax.f32 %v888_v12, 0.0  ;;  %v1305_v21 = vpack.c.bf16 %v917_v14, %v917_v14  ;;  %1080 = vst.msk [vmem:[%s1623_s24 + $0x38] sm:$0xf] %vm1065_vm1, %v1307_v18 }
 0x127   : > { %v902_v17 = vadd.f32 %v1594_v34, %v863_v9  ;;  %v936_v20 = vmax.f32 %v904_v13, 0.0  ;;  %v1321_v22 = vpack.c.bf16 %v933_v15, %v933_v15  ;;  %1096 = vst.msk [vmem:[%s1623_s24 + $0x78] sm:$0xf] %vm1065_vm1, %v1323_v19 }
 0x128   : > { %v918_v23 = vmax.f32 %v886_v16, 0.0  ;;  %v1308_v25 = vpack.c.bf16 %v920_v32, %v920_v32  ;;  %1078 = vst.msk [vmem:[%s1623_s24 + $0x30] sm:$0xf] %vm1065_vm1, %v1305_v21 }
 0x129   : > { %v934_v24 = vmax.f32 %v902_v17, 0.0  ;;  %v1324_v26 = vpack.c.bf16 %v936_v20, %v936_v20  ;;  %1094 = vst.msk [vmem:[%s1623_s24 + $0x70] sm:$0xf] %vm1065_vm1, %v1321_v22 }
 0x12a   : > { %v1306_v34 = vpack.c.bf16 %v918_v23, %v918_v23  ;;  %1081 = vst.msk [vmem:[%s1623_s24 + $0x3c] sm:$0xf] %vm1065_vm1, %v1308_v25 }
 0x12b   : > { %v1322_v27 = vpack.c.bf16 %v934_v24, %v934_v24  ;;  %1097 = vst.msk [vmem:[%s1623_s24 + $0x7c] sm:$0xf] %vm1065_vm1, %v1324_v26 }
 0x12c   : > { %1079 = vst.msk [vmem:[%s1623_s24 + $0x34] sm:$0xf] %vm1065_vm1, %v1306_v34 }
 0x12d   : > { %1095 = vst.msk [vmem:[%s1623_s24 + $0x74] sm:$0xf] %vm1065_vm1, %v1322_v27 }
 0x12e PF: > { %s14_s17 = sadd.s32 1, %s1483_s17   ;;  %s1769_s15 = smov %s1479_s16 }
 0x12f   : > { %p11_p5 = scmp.ge.s32.totalorder %s14_s17, 4   ;;  %s1770_s16 = smov %s1772_s18 }
 0x131   :  { %13 = sbr.rel (!%p11_p5) target bundleno = 2 (0x2), region = 87 }

</bundles_post_ra>
